<compile_context>
chip_gen: v7x
topology: tpu7x:2x2x1
jax: 0.10.0
libtpu: 0.0.40
codegen_flags: <defaults>
</compile_context>

<pallas_src>
import jax
import jax.numpy as jnp
from jax.experimental import pallas as pl
from jax.experimental.pallas import tpu as pltpu

# ----------------------- config (mirrors the module defaults) ---------------
EMBED = 256            # Transformer(dim=256)
DEPTH = 4              # Transformer(depth=4)
NUM_HEADS = 8          # Transformer(heads=8)
DIM_HEAD = 128         # Transformer(dim_head=128)
INNER = NUM_HEADS * DIM_HEAD          # 1024 (attention inner dim)
MLP_DIM = 1024         # Transformer(mlp_dim=head_dim=1024)
FEAT_CH = 1024         # resnet50 features_only out_indices=3 -> 1024 channels
PATCH = 16             # stand-in backbone reduction (stride 16, like layer3)
LN_EPS = 1e-5
ATTN_SCALE = DIM_HEAD ** -0.5
HEAD_PAD = 128         # heads (1 + 7 + 3 outputs) padded to one 128-lane tile


# =============================== kernels ====================================
def _layernorm(x, gamma, beta):
    """f32 LayerNorm over the last axis (stats in f32 for parity)."""
    mu = jnp.mean(x, axis=-1, keepdims=True)
    var = jnp.mean((x - mu) ** 2, axis=-1, keepdims=True)
    return (x - mu) * jax.lax.rsqrt(var + LN_EPS) * gamma + beta


def backbone_linear_kernel(x_ref, w_ref, b_ref, o_ref):
    """(tile_n, K) pooled patch means (bf16) -> fused backbone+linear matmul."""
    o_ref[...] = (
        jnp.dot(x_ref[...], w_ref[...], preferred_element_type=jnp.float32)
        + b_ref[...]
    )


def transformer_kernel(tok_ref,
                       ln1g_ref, ln1b_ref,
                       wqkv_ref, sqkv_ref, wo_ref, so_ref, bo_ref,
                       ln2g_ref, ln2b_ref,
                       w1_ref, s1_ref, b1_ref, w2_ref, s2_ref, b2_ref,
                       out_ref):
    """One grid step == one transformer layer (attn + MLP) over ALL tokens.

    Tokens stay resident in the output block (constant block index) across
    layers; per-layer int8 weights + f32 scales are streamed (double-buffered)
    by the BlockSpec pipeline and dequantized on the fly (scale after dot).
    """
    layer = pl.program_id(0)

    @pl.when(layer == 0)
    def _():
        out_ref[...] = tok_ref[...]

    nb, nd, dim = out_ref.shape
    rows = nb * nd
    x = out_ref[...]                                            # (2B, D, E) f32

    # ---------------- pre-norm multi-head self-attention + residual --------
    xn = _layernorm(x.reshape(rows, dim), ln1g_ref[0], ln1b_ref[0])
    qkv = (jnp.dot(xn.astype(jnp.bfloat16), wqkv_ref[0].astype(jnp.bfloat16),
                   preferred_element_type=jnp.float32)
           * sqkv_ref[0])                                       # (rows, 3*INNER)

    def to_heads(z):
        # (rows, INNER) -> (NUM_HEADS*nb, nd, DIM_HEAD): lane slices stacked on
        # a leading batch axis (no cross-lane transposes inside the kernel).
        parts = [z[:, h * DIM_HEAD:(h + 1) * DIM_HEAD].reshape(nb, nd, DIM_HEAD)
                 for h in range(NUM_HEADS)]
        return jnp.concatenate(parts, axis=0).astype(jnp.bfloat16)

    q = to_heads(qkv[:, 0:INNER])
    k = to_heads(qkv[:, INNER:2 * INNER])
    v = to_heads(qkv[:, 2 * INNER:3 * INNER])

    s = jnp.einsum('bqd,bkd->bqk', q, k,
                   preferred_element_type=jnp.float32) * ATTN_SCALE
    s = s - jnp.max(s, axis=-1, keepdims=True)                  # exact softmax
    p = jnp.exp(s)
    a = p / jnp.sum(p, axis=-1, keepdims=True)
    o = jnp.einsum('bqk,bkd->bqd', a.astype(jnp.bfloat16), v,
                   preferred_element_type=jnp.float32)          # (H*nb, nd, dh)
    attn_out = jnp.concatenate(
        [o[h * nb:(h + 1) * nb].reshape(rows, DIM_HEAD)
         for h in range(NUM_HEADS)], axis=-1)                   # (rows, INNER)

    proj = (jnp.dot(attn_out.astype(jnp.bfloat16), wo_ref[0].astype(jnp.bfloat16),
                    preferred_element_type=jnp.float32)
            * so_ref[0] + bo_ref[0])
    x = x + proj.reshape(nb, nd, dim)

    # ---------------- pre-norm MLP (Linear -> GELU -> Linear) + residual ---
    xn2 = _layernorm(x.reshape(rows, dim), ln2g_ref[0], ln2b_ref[0])
    hmid = (jnp.dot(xn2.astype(jnp.bfloat16), w1_ref[0].astype(jnp.bfloat16),
                    preferred_element_type=jnp.float32)
            * s1_ref[0] + b1_ref[0])
    # tanh-approx GELU keeps the transcendental on the EUP slot.
    hmid = jax.nn.gelu(hmid, approximate=True)
    hout = (jnp.dot(hmid.astype(jnp.bfloat16), w2_ref[0].astype(jnp.bfloat16),
                    preferred_element_type=jnp.float32)
            * s2_ref[0] + b2_ref[0])
    x = x + hout.reshape(nb, nd, dim)

    out_ref[...] = x


def heads_kernel(tok_ref, w_ref, b_ref, o_ref):
    """Temporal mean, ref-dis difference, all three heads in ONE padded matmul."""
    nb = tok_ref.shape[0]
    b = nb // 2
    tok = tok_ref[...]                                          # (2B, D, E) f32
    r = jnp.mean(tok[:b], axis=1)                               # (B, E) ref mean
    d = jnp.mean(tok[b:], axis=1)                               # (B, E) dis mean
    x = jnp.concatenate([r - d, d], axis=-1).astype(jnp.bfloat16)   # (B, 2E)
    o_ref[...] = (
        jnp.dot(x, w_ref[...], preferred_element_type=jnp.float32) + b_ref[...]
    )


# ============================ wrappers (glue) ================================
def _pick_tile(n):
    """Largest 8-aligned divisor of n giving >=2 grid blocks (megacore on v7x)."""
    for cand in (256, 128, 64, 32, 16, 8):
        if cand <= n // 2 and n % cand == 0:
            return cand
    return n


def backbone_linear(pooled, w, b):
    """Fused backbone(stand-in)+linear matmul over the pooled (n, 768) slab."""
    n, k = pooled.shape
    tile_n = _pick_tile(n)
    return pl.pallas_call(
        backbone_linear_kernel,
        grid=(n // tile_n,),
        in_specs=[
            pl.BlockSpec((tile_n, k), lambda i: (i, 0)),
            pl.BlockSpec((k, EMBED), lambda i: (0, 0)),
            pl.BlockSpec((1, EMBED), lambda i: (0, 0)),
        ],
        out_specs=pl.BlockSpec((tile_n, EMBED), lambda i: (i, 0)),
        out_shape=jax.ShapeDtypeStruct((n, EMBED), jnp.float32),
        compiler_params=pltpu.CompilerParams(dimension_semantics=("parallel",)),
    )(pooled, w, b)


def transformer(tok, params):
    """All DEPTH layers in one pallas_call; tokens resident, int8 weights piped."""
    nb, nd, dim = tok.shape
    wmap = lambda l: (l, 0, 0)       # per-layer stacked weights
    cmap = lambda l: (0, 0, 0)       # resident token / output block
    return pl.pallas_call(
        transformer_kernel,
        grid=(DEPTH,),
        in_specs=[
            pl.BlockSpec((nb, nd, dim), cmap),                  # tokens
            pl.BlockSpec((1, 1, dim), wmap),                    # ln1_g
            pl.BlockSpec((1, 1, dim), wmap),                    # ln1_b
            pl.BlockSpec((1, dim, 3 * INNER), wmap),            # w_qkv (int8)
            pl.BlockSpec((1, 1, 3 * INNER), wmap),              # qkv scale
            pl.BlockSpec((1, INNER, dim), wmap),                # w_o (int8)
            pl.BlockSpec((1, 1, dim), wmap),                    # w_o scale
            pl.BlockSpec((1, 1, dim), wmap),                    # b_o
            pl.BlockSpec((1, 1, dim), wmap),                    # ln2_g
            pl.BlockSpec((1, 1, dim), wmap),                    # ln2_b
            pl.BlockSpec((1, dim, MLP_DIM), wmap),              # w_ff1 (int8)
            pl.BlockSpec((1, 1, MLP_DIM), wmap),                # ff1 scale
            pl.BlockSpec((1, 1, MLP_DIM), wmap),                # b_ff1
            pl.BlockSpec((1, MLP_DIM, dim), wmap),              # w_ff2 (int8)
            pl.BlockSpec((1, 1, dim), wmap),                    # ff2 scale
            pl.BlockSpec((1, 1, dim), wmap),                    # b_ff2
        ],
        out_specs=pl.BlockSpec((nb, nd, dim), cmap),
        out_shape=jax.ShapeDtypeStruct((nb, nd, dim), jnp.float32),
        compiler_params=pltpu.CompilerParams(
            dimension_semantics=("arbitrary",)),
    )(tok,
      params["t_ln1_g"], params["t_ln1_b"],
      params["t_wqkv_q"], params["t_wqkv_s"],
      params["t_wo_q"], params["t_wo_s"], params["t_bo"],
      params["t_ln2_g"], params["t_ln2_b"],
      params["t_w1_q"], params["t_w1_s"], params["t_b1"],
      params["t_w2_q"], params["t_w2_s"], params["t_b2"])


def heads_op(tok, params):
    nb = tok.shape[0]
    b = nb // 2
    out = pl.pallas_call(
        heads_kernel,
        out_shape=jax.ShapeDtypeStruct((b, HEAD_PAD), jnp.float32),
    )(tok, params["head_w"], params["head_b"])
    return out[:, 0:1], out[:, 1:8], out[:, 8:11]


# ============================ parameters =====================================
def _quant_stack(mats):
    """Stack per-layer f32 matrices -> (int8 weights, per-out-channel scales)."""
    stacked = jnp.stack(mats)                                   # (DEPTH, in, out)
    scale = jnp.max(jnp.abs(stacked), axis=1, keepdims=True) / 127.0
    scale = jnp.maximum(scale, 1e-8)                            # (DEPTH, 1, out)
    q = jnp.clip(jnp.round(stacked / scale), -127, 127).astype(jnp.int8)
    return q, scale


def init_params(key):
    keys = iter(jax.random.split(key, 64))

    def w(shape, scale=0.02):
        return scale * jax.random.normal(next(keys), shape, jnp.float32)

    k_patch = 3 * PATCH * PATCH
    # Backbone stand-in (linear) and self.linear folded into one matmul.
    bb_w = w((k_patch, FEAT_CH))
    bb_b = jnp.zeros((1, FEAT_CH), jnp.float32)
    lin_w = w((FEAT_CH, EMBED))
    lin_b = jnp.zeros((1, EMBED), jnp.float32)
    bl_w = (bb_w @ lin_w).astype(jnp.bfloat16)                  # (768, 256)
    bl_b = bb_b @ lin_w + lin_b                                 # (1, 256) f32

    # Heads fused into ONE lane-padded (512, 128) matmul:
    #   rows 0:256 multiply (ref-dis)  -> col 0 = bit_rate, cols 1..7 = dis_type
    #   rows 256:512 multiply dis-mean -> cols 8..10 = fps
    bit_w = w((EMBED, 1)); bit_b = jnp.zeros((1,), jnp.float32)
    dis_w = w((EMBED, 7)); dis_b = jnp.zeros((7,), jnp.float32)
    fps_w = w((EMBED, 3)); fps_b = jnp.zeros((3,), jnp.float32)
    w_top = jnp.zeros((EMBED, HEAD_PAD), jnp.float32)
    w_top = w_top.at[:, 0:1].set(bit_w).at[:, 1:8].set(dis_w)
    w_bot = jnp.zeros((EMBED, HEAD_PAD), jnp.float32).at[:, 8:11].set(fps_w)
    head_w = jnp.concatenate([w_top, w_bot], axis=0).astype(jnp.bfloat16)
    head_b = jnp.concatenate(
        [bit_b, dis_b, fps_b, jnp.zeros((HEAD_PAD - 11,), jnp.float32)])[None, :]

    # Transformer weights: big matrices int8 + per-channel scale, rest f32.
    wqkv_q, wqkv_s = _quant_stack([w((EMBED, 3 * INNER)) for _ in range(DEPTH)])
    wo_q, wo_s = _quant_stack([w((INNER, EMBED)) for _ in range(DEPTH)])
    w1_q, w1_s = _quant_stack([w((EMBED, MLP_DIM)) for _ in range(DEPTH)])
    w2_q, w2_s = _quant_stack([w((MLP_DIM, EMBED)) for _ in range(DEPTH)])

    params = {
        "bl_w": bl_w, "bl_b": bl_b,
        "head_w": head_w, "head_b": head_b,
        "t_ln1_g": jnp.ones((DEPTH, 1, EMBED), jnp.float32),
        "t_ln1_b": jnp.zeros((DEPTH, 1, EMBED), jnp.float32),
        "t_wqkv_q": wqkv_q, "t_wqkv_s": wqkv_s,
        "t_wo_q": wo_q, "t_wo_s": wo_s,
        "t_bo": jnp.zeros((DEPTH, 1, EMBED), jnp.float32),
        "t_ln2_g": jnp.ones((DEPTH, 1, EMBED), jnp.float32),
        "t_ln2_b": jnp.zeros((DEPTH, 1, EMBED), jnp.float32),
        "t_w1_q": w1_q, "t_w1_s": w1_s,
        "t_b1": jnp.zeros((DEPTH, 1, MLP_DIM), jnp.float32),
        "t_w2_q": w2_q, "t_w2_s": w2_s,
        "t_b2": jnp.zeros((DEPTH, 1, EMBED), jnp.float32),
    }
    return params


# ============================ forward ========================================
def model_forward(params, ref, dis):
    # ref/dis: (B, C, D, H, W) — NCDHW, exactly the PyTorch convention.
    bsz, c, dfrm, hh, ww = ref.shape
    ph, pw = hh // PATCH, ww // PATCH

    def pool(x):
        # AdaptiveAvgPool2d(1) over the (linear stand-in) backbone features is
        # equivalent to averaging over the (ph, pw) patch grid BEFORE the
        # matmul — a cheap contiguous reduction, no 6-D HBM transpose.
        p = x.reshape(bsz, c, dfrm, ph, PATCH, pw, PATCH).mean(axis=(3, 5))
        p = jnp.transpose(p, (0, 2, 1, 3, 4))                   # (B, D, C, P, P)
        return p.reshape(bsz * dfrm, c * PATCH * PATCH)

    # Fuse ref & dis branches: identical weights -> stream them once.
    pooled = jnp.concatenate([pool(ref), pool(dis)], axis=0).astype(jnp.bfloat16)
    tok = backbone_linear(pooled, params["bl_w"], params["bl_b"])        # (2BD, 256)
    tok = tok.reshape(2 * bsz, dfrm, EMBED)                              # (2B, D, 256)
    tok = transformer(tok, params)                                       # (2B, D, 256)
    bit_rate, dis_type, fps = heads_op(tok, params)
    return bit_rate, dis_type, fps


# ============================ demo ===========================================
if __name__ == "__main__":
    B, C, D, H, W = 2, 3, 8, 32, 32   # small, backbone-stride-compatible shapes
    key = jax.random.PRNGKey(0)
    kp, kr, kd = jax.random.split(key, 3)
    params = init_params(kp)
    ref = jax.random.normal(kr, (B, C, D, H, W), jnp.float32)
    dis = jax.random.normal(kd, (B, C, D, H, W), jnp.float32)

    bit_rate, dis_type, fps = jax.jit(model_forward)(params, ref, dis)
    jax.block_until_ready((bit_rate, dis_type, fps))

    assert bit_rate.shape == (B, 1)
    assert dis_type.shape == (B, 7)
    assert fps.shape == (B, 3)
    print("KERNEL_OK")
</pallas_src>

<mosaic_0001>
module attributes {stable_mosaic.version = 11 : i64} {
  func.func @backbone_linear_kernel(%arg0: i32, %arg1: memref<16x768xbf16, #tpu.memory_space<vmem>>, %arg2: memref<768x256xbf16, #tpu.memory_space<vmem>>, %arg3: memref<1x256xf32, #tpu.memory_space<vmem>>, %arg4: memref<16x256xf32, #tpu.memory_space<vmem>>) attributes {dimension_semantics = [#tpu.dimension_semantics<parallel>], iteration_bounds = array<i64: 2>, scalar_prefetch = 0 : i64, scratch_operands = 0 : i64, tpu.core_type = #tpu.core_type<tc>, window_params = [{transform_indices = @transform_0, window_bounds = array<i64: 16, 768>}, {pipeline_mode = #tpu.pipeline_mode<synchronous>, transform_indices = @transform_1, window_bounds = array<i64: 768, 256>}, {pipeline_mode = #tpu.pipeline_mode<synchronous>, transform_indices = @transform_2, window_bounds = array<i64: 1, 256>}, {transform_indices = @transform_3, window_bounds = array<i64: 16, 256>}]} {
    %c0 = arith.constant 0 : index
    %c0_0 = arith.constant 0 : index
    %0 = vector.load %arg1[%c0, %c0_0] : memref<16x768xbf16, #tpu.memory_space<vmem>>, vector<16x768xbf16>
    %c0_1 = arith.constant 0 : index
    %c0_2 = arith.constant 0 : index
    %1 = vector.load %arg2[%c0_1, %c0_2] : memref<768x256xbf16, #tpu.memory_space<vmem>>, vector<768x256xbf16>
    %cst = arith.constant dense<0.000000e+00> : vector<16x256xf32>
    %2 = tpu.matmul %0, %1, %cst {dimension_numbers = #tpu.dot_dimension_numbers<[1], [0], [0], [1], [0, 0, 1, 1], [], []>} : vector<16x768xbf16>, vector<768x256xbf16>, vector<16x256xf32> -> vector<16x256xf32>
    %c0_3 = arith.constant 0 : index
    %c0_4 = arith.constant 0 : index
    %3 = vector.load %arg3[%c0_3, %c0_4] : memref<1x256xf32, #tpu.memory_space<vmem>>, vector<1x256xf32>
    %4 = vector.broadcast %3 : vector<1x256xf32> to vector<16x256xf32>
    %5 = arith.addf %2, %4 : vector<16x256xf32>
    %c0_5 = arith.constant 0 : index
    %c0_6 = arith.constant 0 : index
    %6 = vector.load %arg4[%c0_5, %c0_6] : memref<16x256xf32, #tpu.memory_space<vmem>>, vector<16x256xf32>
    tpu.vector_store %arg4[%c0_5, %c0_6], %5 {strides = array<i32>} : memref<16x256xf32, #tpu.memory_space<vmem>>, vector<16x256xf32>,
    return
  }
  func.func @transform_0(%arg0: i32) -> (i32, i32) {
    %c0_i32 = arith.constant 0 : i32
    %c0_i32_0 = arith.constant 0 : i32
    return %arg0, %c0_i32 : i32, i32
  }
  func.func @transform_1(%arg0: i32) -> (i32, i32) {
    %c0_i32 = arith.constant 0 : i32
    %c0_i32_0 = arith.constant 0 : i32
    %c0_i32_1 = arith.constant 0 : i32
    return %c0_i32, %c0_i32_0 : i32, i32
  }
  func.func @transform_2(%arg0: i32) -> (i32, i32) {
    %c0_i32 = arith.constant 0 : i32
    %c0_i32_0 = arith.constant 0 : i32
    %c0_i32_1 = arith.constant 0 : i32
    return %c0_i32, %c0_i32_0 : i32, i32
  }
  func.func @transform_3(%arg0: i32) -> (i32, i32) {
    %c0_i32 = arith.constant 0 : i32
    %c0_i32_0 = arith.constant 0 : i32
    return %arg0, %c0_i32 : i32, i32
  }
}

module attributes {stable_mosaic.version = 11 : i64} {
  func.func @transformer_kernel(%arg0: i32, %arg1: memref<4x8x256xf32, #tpu.memory_space<vmem>>, %arg2: memref<1x1x256xf32, #tpu.memory_space<vmem>>, %arg3: memref<1x1x256xf32, #tpu.memory_space<vmem>>, %arg4: memref<1x256x3072xi8, #tpu.memory_space<vmem>>, %arg5: memref<1x1x3072xf32, #tpu.memory_space<vmem>>, %arg6: memref<1x1024x256xi8, #tpu.memory_space<vmem>>, %arg7: memref<1x1x256xf32, #tpu.memory_space<vmem>>, %arg8: memref<1x1x256xf32, #tpu.memory_space<vmem>>, %arg9: memref<1x1x256xf32, #tpu.memory_space<vmem>>, %arg10: memref<1x1x256xf32, #tpu.memory_space<vmem>>, %arg11: memref<1x256x1024xi8, #tpu.memory_space<vmem>>, %arg12: memref<1x1x1024xf32, #tpu.memory_space<vmem>>, %arg13: memref<1x1x1024xf32, #tpu.memory_space<vmem>>, %arg14: memref<1x1024x256xi8, #tpu.memory_space<vmem>>, %arg15: memref<1x1x256xf32, #tpu.memory_space<vmem>>, %arg16: memref<1x1x256xf32, #tpu.memory_space<vmem>>, %arg17: memref<4x8x256xf32, #tpu.memory_space<vmem>>) attributes {dimension_semantics = [#tpu.dimension_semantics<arbitrary>], iteration_bounds = array<i64: 4>, scalar_prefetch = 0 : i64, scratch_operands = 0 : i64, tpu.core_type = #tpu.core_type<tc>, window_params = [{pipeline_mode = #tpu.pipeline_mode<synchronous>, transform_indices = @transform_0, window_bounds = array<i64: 4, 8, 256>}, {transform_indices = @transform_1, window_bounds = array<i64: 1, 1, 256>}, {transform_indices = @transform_2, window_bounds = array<i64: 1, 1, 256>}, {transform_indices = @transform_3, window_bounds = array<i64: 1, 256, 3072>}, {transform_indices = @transform_4, window_bounds = array<i64: 1, 1, 3072>}, {transform_indices = @transform_5, window_bounds = array<i64: 1, 1024, 256>}, {transform_indices = @transform_6, window_bounds = array<i64: 1, 1, 256>}, {transform_indices = @transform_7, window_bounds = array<i64: 1, 1, 256>}, {transform_indices = @transform_8, window_bounds = array<i64: 1, 1, 256>}, {transform_indices = @transform_9, window_bounds = array<i64: 1, 1, 256>}, {transform_indices = @transform_10, window_bounds = array<i64: 1, 256, 1024>}, {transform_indices = @transform_11, window_bounds = array<i64: 1, 1, 1024>}, {transform_indices = @transform_12, window_bounds = array<i64: 1, 1, 1024>}, {transform_indices = @transform_13, window_bounds = array<i64: 1, 1024, 256>}, {transform_indices = @transform_14, window_bounds = array<i64: 1, 1, 256>}, {transform_indices = @transform_15, window_bounds = array<i64: 1, 1, 256>}, {pipeline_mode = #tpu.pipeline_mode<synchronous>, transform_indices = @transform_16, window_bounds = array<i64: 4, 8, 256>}]} {
    %c0_i32 = arith.constant 0 : i32
    %0 = arith.cmpi eq, %arg0, %c0_i32 : i32
    %1 = arith.extui %0 : i1 to i32
    %c0_i32_0 = arith.constant 0 : i32
    %2 = arith.cmpi ne, %1, %c0_i32_0 : i32
    scf.if %2 {
      %c0_73 = arith.constant 0 : index
      %c0_74 = arith.constant 0 : index
      %c0_75 = arith.constant 0 : index
      %212 = vector.load %arg1[%c0_73, %c0_74, %c0_75] : memref<4x8x256xf32, #tpu.memory_space<vmem>>, vector<4x8x256xf32>
      %c0_76 = arith.constant 0 : index
      %c0_77 = arith.constant 0 : index
      %c0_78 = arith.constant 0 : index
      %213 = vector.load %arg17[%c0_76, %c0_77, %c0_78] : memref<4x8x256xf32, #tpu.memory_space<vmem>>, vector<4x8x256xf32>
      tpu.vector_store %arg17[%c0_76, %c0_77, %c0_78], %212 {strides = array<i32>} : memref<4x8x256xf32, #tpu.memory_space<vmem>>, vector<4x8x256xf32>,
    } else {
    }
    %c0 = arith.constant 0 : index
    %c0_1 = arith.constant 0 : index
    %c0_2 = arith.constant 0 : index
    %3 = vector.load %arg17[%c0, %c0_1, %c0_2] : memref<4x8x256xf32, #tpu.memory_space<vmem>>, vector<4x8x256xf32>
    %4 = vector.shape_cast %3 : vector<4x8x256xf32> to vector<32x256xf32>
    %c0_3 = arith.constant 0 : index
    %c0_4 = arith.constant 0 : index
    %c0_5 = arith.constant 0 : index
    %5 = vector.load %arg2[%c0_3, %c0_4, %c0_5] : memref<1x1x256xf32, #tpu.memory_space<vmem>>, vector<1x1x256xf32>
    %6 = vector.shape_cast %5 : vector<1x1x256xf32> to vector<1x256xf32>
    %c0_6 = arith.constant 0 : index
    %c0_7 = arith.constant 0 : index
    %c0_8 = arith.constant 0 : index
    %7 = vector.load %arg3[%c0_6, %c0_7, %c0_8] : memref<1x1x256xf32, #tpu.memory_space<vmem>>, vector<1x1x256xf32>
    %8 = vector.shape_cast %7 : vector<1x1x256xf32> to vector<1x256xf32>
    %cst = arith.constant dense<0.000000e+00> : vector<32xf32>
    %9 = vector.multi_reduction <add>, %4, %cst [1] : vector<32x256xf32> to vector<32xf32>
    %10 = vector.shape_cast %9 : vector<32xf32> to vector<32x1xf32>
    %cst_9 = arith.constant 2.560000e+02 : f32
    %11 = vector.broadcast %cst_9 : f32 to vector<32x1xf32>
    %12 = arith.divf %10, %11 : vector<32x1xf32>
    %13 = vector.broadcast %12 : vector<32x1xf32> to vector<32x256xf32>
    %14 = arith.subf %4, %13 : vector<32x256xf32>
    %15 = arith.mulf %14, %14 : vector<32x256xf32>
    %cst_10 = arith.constant dense<0.000000e+00> : vector<32xf32>
    %16 = vector.multi_reduction <add>, %15, %cst_10 [1] : vector<32x256xf32> to vector<32xf32>
    %17 = vector.shape_cast %16 : vector<32xf32> to vector<32x1xf32>
    %cst_11 = arith.constant 2.560000e+02 : f32
    %18 = vector.broadcast %cst_11 : f32 to vector<32x1xf32>
    %19 = arith.divf %17, %18 : vector<32x1xf32>
    %20 = vector.broadcast %12 : vector<32x1xf32> to vector<32x256xf32>
    %21 = arith.subf %4, %20 : vector<32x256xf32>
    %cst_12 = arith.constant 9.99999974E-6 : f32
    %22 = vector.broadcast %cst_12 : f32 to vector<32x1xf32>
    %23 = arith.addf %19, %22 : vector<32x1xf32>
    %24 = math.rsqrt %23 : vector<32x1xf32>
    %25 = vector.broadcast %24 : vector<32x1xf32> to vector<32x256xf32>
    %26 = arith.mulf %21, %25 : vector<32x256xf32>
    %27 = vector.broadcast %6 : vector<1x256xf32> to vector<32x256xf32>
    %28 = arith.mulf %26, %27 : vector<32x256xf32>
    %29 = vector.broadcast %8 : vector<1x256xf32> to vector<32x256xf32>
    %30 = arith.addf %28, %29 : vector<32x256xf32>
    %31 = arith.truncf %30 : vector<32x256xf32> to vector<32x256xbf16>
    %c0_13 = arith.constant 0 : index
    %c0_14 = arith.constant 0 : index
    %c0_15 = arith.constant 0 : index
    %32 = vector.load %arg4[%c0_13, %c0_14, %c0_15] : memref<1x256x3072xi8, #tpu.memory_space<vmem>>, vector<1x256x3072xi8>
    %33 = vector.shape_cast %32 : vector<1x256x3072xi8> to vector<256x3072xi8>
    %34 = arith.sitofp %33 : vector<256x3072xi8> to vector<256x3072xbf16>
    %cst_16 = arith.constant dense<0.000000e+00> : vector<32x3072xf32>
    %35 = tpu.matmul %31, %34, %cst_16 {dimension_numbers = #tpu.dot_dimension_numbers<[1], [0], [0], [1], [0, 0, 1, 1], [], []>} : vector<32x256xbf16>, vector<256x3072xbf16>, vector<32x3072xf32> -> vector<32x3072xf32>
    %c0_17 = arith.constant 0 : index
    %c0_18 = arith.constant 0 : index
    %c0_19 = arith.constant 0 : index
    %36 = vector.load %arg5[%c0_17, %c0_18, %c0_19] : memref<1x1x3072xf32, #tpu.memory_space<vmem>>, vector<1x1x3072xf32>
    %37 = vector.shape_cast %36 : vector<1x1x3072xf32> to vector<1x3072xf32>
    %38 = vector.broadcast %37 : vector<1x3072xf32> to vector<32x3072xf32>
    %39 = arith.mulf %35, %38 : vector<32x3072xf32>
    %40 = vector.extract_strided_slice %39 {offsets = [0, 0], sizes = [32, 1024], strides = [1, 1]} : vector<32x3072xf32> to vector<32x1024xf32>
    %41 = vector.extract_strided_slice %40 {offsets = [0, 0], sizes = [32, 128], strides = [1, 1]} : vector<32x1024xf32> to vector<32x128xf32>
    %42 = vector.shape_cast %41 : vector<32x128xf32> to vector<4x8x128xf32>
    %43 = vector.extract_strided_slice %40 {offsets = [0, 128], sizes = [32, 128], strides = [1, 1]} : vector<32x1024xf32> to vector<32x128xf32>
    %44 = vector.shape_cast %43 : vector<32x128xf32> to vector<4x8x128xf32>
    %45 = vector.extract_strided_slice %40 {offsets = [0, 256], sizes = [32, 128], strides = [1, 1]} : vector<32x1024xf32> to vector<32x128xf32>
    %46 = vector.shape_cast %45 : vector<32x128xf32> to vector<4x8x128xf32>
    %47 = vector.extract_strided_slice %40 {offsets = [0, 384], sizes = [32, 128], strides = [1, 1]} : vector<32x1024xf32> to vector<32x128xf32>
    %48 = vector.shape_cast %47 : vector<32x128xf32> to vector<4x8x128xf32>
    %49 = vector.extract_strided_slice %40 {offsets = [0, 512], sizes = [32, 128], strides = [1, 1]} : vector<32x1024xf32> to vector<32x128xf32>
    %50 = vector.shape_cast %49 : vector<32x128xf32> to vector<4x8x128xf32>
    %51 = vector.extract_strided_slice %40 {offsets = [0, 640], sizes = [32, 128], strides = [1, 1]} : vector<32x1024xf32> to vector<32x128xf32>
    %52 = vector.shape_cast %51 : vector<32x128xf32> to vector<4x8x128xf32>
    %53 = vector.extract_strided_slice %40 {offsets = [0, 768], sizes = [32, 128], strides = [1, 1]} : vector<32x1024xf32> to vector<32x128xf32>
    %54 = vector.shape_cast %53 : vector<32x128xf32> to vector<4x8x128xf32>
    %55 = vector.extract_strided_slice %40 {offsets = [0, 896], sizes = [32, 128], strides = [1, 1]} : vector<32x1024xf32> to vector<32x128xf32>
    %56 = vector.shape_cast %55 : vector<32x128xf32> to vector<4x8x128xf32>
    %57 = tpu.concatenate %42, %44, %46, %48, %50, %52, %54, %56 in 0 : vector<4x8x128xf32>, vector<4x8x128xf32>, vector<4x8x128xf32>, vector<4x8x128xf32>, vector<4x8x128xf32>, vector<4x8x128xf32>, vector<4x8x128xf32>, vector<4x8x128xf32> -> vector<32x8x128xf32>
    %58 = arith.truncf %57 : vector<32x8x128xf32> to vector<32x8x128xbf16>
    %59 = vector.extract_strided_slice %39 {offsets = [0, 1024], sizes = [32, 1024], strides = [1, 1]} : vector<32x3072xf32> to vector<32x1024xf32>
    %60 = vector.extract_strided_slice %59 {offsets = [0, 0], sizes = [32, 128], strides = [1, 1]} : vector<32x1024xf32> to vector<32x128xf32>
    %61 = vector.shape_cast %60 : vector<32x128xf32> to vector<4x8x128xf32>
    %62 = vector.extract_strided_slice %59 {offsets = [0, 128], sizes = [32, 128], strides = [1, 1]} : vector<32x1024xf32> to vector<32x128xf32>
    %63 = vector.shape_cast %62 : vector<32x128xf32> to vector<4x8x128xf32>
    %64 = vector.extract_strided_slice %59 {offsets = [0, 256], sizes = [32, 128], strides = [1, 1]} : vector<32x1024xf32> to vector<32x128xf32>
    %65 = vector.shape_cast %64 : vector<32x128xf32> to vector<4x8x128xf32>
    %66 = vector.extract_strided_slice %59 {offsets = [0, 384], sizes = [32, 128], strides = [1, 1]} : vector<32x1024xf32> to vector<32x128xf32>
    %67 = vector.shape_cast %66 : vector<32x128xf32> to vector<4x8x128xf32>
    %68 = vector.extract_strided_slice %59 {offsets = [0, 512], sizes = [32, 128], strides = [1, 1]} : vector<32x1024xf32> to vector<32x128xf32>
    %69 = vector.shape_cast %68 : vector<32x128xf32> to vector<4x8x128xf32>
    %70 = vector.extract_strided_slice %59 {offsets = [0, 640], sizes = [32, 128], strides = [1, 1]} : vector<32x1024xf32> to vector<32x128xf32>
    %71 = vector.shape_cast %70 : vector<32x128xf32> to vector<4x8x128xf32>
    %72 = vector.extract_strided_slice %59 {offsets = [0, 768], sizes = [32, 128], strides = [1, 1]} : vector<32x1024xf32> to vector<32x128xf32>
    %73 = vector.shape_cast %72 : vector<32x128xf32> to vector<4x8x128xf32>
    %74 = vector.extract_strided_slice %59 {offsets = [0, 896], sizes = [32, 128], strides = [1, 1]} : vector<32x1024xf32> to vector<32x128xf32>
    %75 = vector.shape_cast %74 : vector<32x128xf32> to vector<4x8x128xf32>
    %76 = tpu.concatenate %61, %63, %65, %67, %69, %71, %73, %75 in 0 : vector<4x8x128xf32>, vector<4x8x128xf32>, vector<4x8x128xf32>, vector<4x8x128xf32>, vector<4x8x128xf32>, vector<4x8x128xf32>, vector<4x8x128xf32>, vector<4x8x128xf32> -> vector<32x8x128xf32>
    %77 = arith.truncf %76 : vector<32x8x128xf32> to vector<32x8x128xbf16>
    %78 = vector.extract_strided_slice %39 {offsets = [0, 2048], sizes = [32, 1024], strides = [1, 1]} : vector<32x3072xf32> to vector<32x1024xf32>
    %79 = vector.extract_strided_slice %78 {offsets = [0, 0], sizes = [32, 128], strides = [1, 1]} : vector<32x1024xf32> to vector<32x128xf32>
    %80 = vector.shape_cast %79 : vector<32x128xf32> to vector<4x8x128xf32>
    %81 = vector.extract_strided_slice %78 {offsets = [0, 128], sizes = [32, 128], strides = [1, 1]} : vector<32x1024xf32> to vector<32x128xf32>
    %82 = vector.shape_cast %81 : vector<32x128xf32> to vector<4x8x128xf32>
    %83 = vector.extract_strided_slice %78 {offsets = [0, 256], sizes = [32, 128], strides = [1, 1]} : vector<32x1024xf32> to vector<32x128xf32>
    %84 = vector.shape_cast %83 : vector<32x128xf32> to vector<4x8x128xf32>
    %85 = vector.extract_strided_slice %78 {offsets = [0, 384], sizes = [32, 128], strides = [1, 1]} : vector<32x1024xf32> to vector<32x128xf32>
    %86 = vector.shape_cast %85 : vector<32x128xf32> to vector<4x8x128xf32>
    %87 = vector.extract_strided_slice %78 {offsets = [0, 512], sizes = [32, 128], strides = [1, 1]} : vector<32x1024xf32> to vector<32x128xf32>
    %88 = vector.shape_cast %87 : vector<32x128xf32> to vector<4x8x128xf32>
    %89 = vector.extract_strided_slice %78 {offsets = [0, 640], sizes = [32, 128], strides = [1, 1]} : vector<32x1024xf32> to vector<32x128xf32>
    %90 = vector.shape_cast %89 : vector<32x128xf32> to vector<4x8x128xf32>
    %91 = vector.extract_strided_slice %78 {offsets = [0, 768], sizes = [32, 128], strides = [1, 1]} : vector<32x1024xf32> to vector<32x128xf32>
    %92 = vector.shape_cast %91 : vector<32x128xf32> to vector<4x8x128xf32>
    %93 = vector.extract_strided_slice %78 {offsets = [0, 896], sizes = [32, 128], strides = [1, 1]} : vector<32x1024xf32> to vector<32x128xf32>
    %94 = vector.shape_cast %93 : vector<32x128xf32> to vector<4x8x128xf32>
    %95 = tpu.concatenate %80, %82, %84, %86, %88, %90, %92, %94 in 0 : vector<4x8x128xf32>, vector<4x8x128xf32>, vector<4x8x128xf32>, vector<4x8x128xf32>, vector<4x8x128xf32>, vector<4x8x128xf32>, vector<4x8x128xf32>, vector<4x8x128xf32> -> vector<32x8x128xf32>
    %96 = arith.truncf %95 : vector<32x8x128xf32> to vector<32x8x128xbf16>
    "tpu.trace_start"() <{level = 10 : i32, message = "bqd,bkd->bqk"}> : () -> ()
    %cst_20 = arith.constant dense<0.000000e+00> : vector<32x8x8xf32>
    %97 = tpu.matmul %58, %77, %cst_20 {dimension_numbers = #tpu.dot_dimension_numbers<[2], [2], [1], [1], [0, 0, 0, 1, 1, 1], [0], [0]>} : vector<32x8x128xbf16>, vector<32x8x128xbf16>, vector<32x8x8xf32> -> vector<32x8x8xf32>
    "tpu.trace_stop"() : () -> ()
    %cst_21 = arith.constant 0.0883883461 : f32
    %98 = vector.broadcast %cst_21 : f32 to vector<32x8x8xf32>
    %99 = arith.mulf %97, %98 : vector<32x8x8xf32>
    %cst_22 = arith.constant dense<0xFF800000> : vector<32x8xf32>
    %100 = vector.multi_reduction <maximumf>, %99, %cst_22 [2] : vector<32x8x8xf32> to vector<32x8xf32>
    %101 = vector.shape_cast %100 : vector<32x8xf32> to vector<32x8x1xf32>
    %102 = vector.broadcast %101 : vector<32x8x1xf32> to vector<32x8x8xf32>
    %103 = arith.subf %99, %102 : vector<32x8x8xf32>
    %104 = math.exp %103 : vector<32x8x8xf32>
    %cst_23 = arith.constant dense<0.000000e+00> : vector<32x8xf32>
    %105 = vector.multi_reduction <add>, %104, %cst_23 [2] : vector<32x8x8xf32> to vector<32x8xf32>
    %106 = vector.shape_cast %105 : vector<32x8xf32> to vector<32x8x1xf32>
    %107 = vector.broadcast %106 : vector<32x8x1xf32> to vector<32x8x8xf32>
    %108 = arith.divf %104, %107 : vector<32x8x8xf32>
    %109 = arith.truncf %108 : vector<32x8x8xf32> to vector<32x8x8xbf16>
    "tpu.trace_start"() <{level = 10 : i32, message = "bqk,bkd->bqd"}> : () -> ()
    %cst_24 = arith.constant dense<0.000000e+00> : vector<32x8x128xf32>
    %110 = tpu.matmul %109, %96, %cst_24 {dimension_numbers = #tpu.dot_dimension_numbers<[2], [1], [1], [2], [0, 0, 0, 1, 1, 2], [0], [0]>} : vector<32x8x8xbf16>, vector<32x8x128xbf16>, vector<32x8x128xf32> -> vector<32x8x128xf32>
    "tpu.trace_stop"() : () -> ()
    %111 = vector.extract_strided_slice %110 {offsets = [0, 0, 0], sizes = [4, 8, 128], strides = [1, 1, 1]} : vector<32x8x128xf32> to vector<4x8x128xf32>
    %112 = vector.shape_cast %111 : vector<4x8x128xf32> to vector<32x128xf32>
    %113 = vector.extract_strided_slice %110 {offsets = [4, 0, 0], sizes = [4, 8, 128], strides = [1, 1, 1]} : vector<32x8x128xf32> to vector<4x8x128xf32>
    %114 = vector.shape_cast %113 : vector<4x8x128xf32> to vector<32x128xf32>
    %115 = vector.extract_strided_slice %110 {offsets = [8, 0, 0], sizes = [4, 8, 128], strides = [1, 1, 1]} : vector<32x8x128xf32> to vector<4x8x128xf32>
    %116 = vector.shape_cast %115 : vector<4x8x128xf32> to vector<32x128xf32>
    %117 = vector.extract_strided_slice %110 {offsets = [12, 0, 0], sizes = [4, 8, 128], strides = [1, 1, 1]} : vector<32x8x128xf32> to vector<4x8x128xf32>
    %118 = vector.shape_cast %117 : vector<4x8x128xf32> to vector<32x128xf32>
    %119 = vector.extract_strided_slice %110 {offsets = [16, 0, 0], sizes = [4, 8, 128], strides = [1, 1, 1]} : vector<32x8x128xf32> to vector<4x8x128xf32>
    %120 = vector.shape_cast %119 : vector<4x8x128xf32> to vector<32x128xf32>
    %121 = vector.extract_strided_slice %110 {offsets = [20, 0, 0], sizes = [4, 8, 128], strides = [1, 1, 1]} : vector<32x8x128xf32> to vector<4x8x128xf32>
    %122 = vector.shape_cast %121 : vector<4x8x128xf32> to vector<32x128xf32>
    %123 = vector.extract_strided_slice %110 {offsets = [24, 0, 0], sizes = [4, 8, 128], strides = [1, 1, 1]} : vector<32x8x128xf32> to vector<4x8x128xf32>
    %124 = vector.shape_cast %123 : vector<4x8x128xf32> to vector<32x128xf32>
    %125 = vector.extract_strided_slice %110 {offsets = [28, 0, 0], sizes = [4, 8, 128], strides = [1, 1, 1]} : vector<32x8x128xf32> to vector<4x8x128xf32>
    %126 = vector.shape_cast %125 : vector<4x8x128xf32> to vector<32x128xf32>
    %127 = tpu.concatenate %112, %114, %116, %118, %120, %122, %124, %126 in 1 : vector<32x128xf32>, vector<32x128xf32>, vector<32x128xf32>, vector<32x128xf32>, vector<32x128xf32>, vector<32x128xf32>, vector<32x128xf32>, vector<32x128xf32> -> vector<32x1024xf32>
    %128 = arith.truncf %127 : vector<32x1024xf32> to vector<32x1024xbf16>
    %c0_25 = arith.constant 0 : index
    %c0_26 = arith.constant 0 : index
    %c0_27 = arith.constant 0 : index
    %129 = vector.load %arg6[%c0_25, %c0_26, %c0_27] : memref<1x1024x256xi8, #tpu.memory_space<vmem>>, vector<1x1024x256xi8>
    %130 = vector.shape_cast %129 : vector<1x1024x256xi8> to vector<1024x256xi8>
    %131 = arith.sitofp %130 : vector<1024x256xi8> to vector<1024x256xbf16>
    %cst_28 = arith.constant dense<0.000000e+00> : vector<32x256xf32>
    %132 = tpu.matmul %128, %131, %cst_28 {dimension_numbers = #tpu.dot_dimension_numbers<[1], [0], [0], [1], [0, 0, 1, 1], [], []>} : vector<32x1024xbf16>, vector<1024x256xbf16>, vector<32x256xf32> -> vector<32x256xf32>
    %c0_29 = arith.constant 0 : index
    %c0_30 = arith.constant 0 : index
    %c0_31 = arith.constant 0 : index
    %133 = vector.load %arg7[%c0_29, %c0_30, %c0_31] : memref<1x1x256xf32, #tpu.memory_space<vmem>>, vector<1x1x256xf32>
    %134 = vector.shape_cast %133 : vector<1x1x256xf32> to vector<1x256xf32>
    %135 = vector.broadcast %134 : vector<1x256xf32> to vector<32x256xf32>
    %136 = arith.mulf %132, %135 : vector<32x256xf32>
    %c0_32 = arith.constant 0 : index
    %c0_33 = arith.constant 0 : index
    %c0_34 = arith.constant 0 : index
    %137 = vector.load %arg8[%c0_32, %c0_33, %c0_34] : memref<1x1x256xf32, #tpu.memory_space<vmem>>, vector<1x1x256xf32>
    %138 = vector.shape_cast %137 : vector<1x1x256xf32> to vector<1x256xf32>
    %139 = vector.broadcast %138 : vector<1x256xf32> to vector<32x256xf32>
    %140 = arith.addf %136, %139 : vector<32x256xf32>
    %141 = vector.shape_cast %140 : vector<32x256xf32> to vector<4x8x256xf32>
    %142 = arith.addf %3, %141 : vector<4x8x256xf32>
    %143 = vector.shape_cast %142 : vector<4x8x256xf32> to vector<32x256xf32>
    %c0_35 = arith.constant 0 : index
    %c0_36 = arith.constant 0 : index
    %c0_37 = arith.constant 0 : index
    %144 = vector.load %arg9[%c0_35, %c0_36, %c0_37] : memref<1x1x256xf32, #tpu.memory_space<vmem>>, vector<1x1x256xf32>
    %145 = vector.shape_cast %144 : vector<1x1x256xf32> to vector<1x256xf32>
    %c0_38 = arith.constant 0 : index
    %c0_39 = arith.constant 0 : index
    %c0_40 = arith.constant 0 : index
    %146 = vector.load %arg10[%c0_38, %c0_39, %c0_40] : memref<1x1x256xf32, #tpu.memory_space<vmem>>, vector<1x1x256xf32>
    %147 = vector.shape_cast %146 : vector<1x1x256xf32> to vector<1x256xf32>
    %cst_41 = arith.constant dense<0.000000e+00> : vector<32xf32>
    %148 = vector.multi_reduction <add>, %143, %cst_41 [1] : vector<32x256xf32> to vector<32xf32>
    %149 = vector.shape_cast %148 : vector<32xf32> to vector<32x1xf32>
    %cst_42 = arith.constant 2.560000e+02 : f32
    %150 = vector.broadcast %cst_42 : f32 to vector<32x1xf32>
    %151 = arith.divf %149, %150 : vector<32x1xf32>
    %152 = vector.broadcast %151 : vector<32x1xf32> to vector<32x256xf32>
    %153 = arith.subf %143, %152 : vector<32x256xf32>
    %154 = arith.mulf %153, %153 : vector<32x256xf32>
    %cst_43 = arith.constant dense<0.000000e+00> : vector<32xf32>
    %155 = vector.multi_reduction <add>, %154, %cst_43 [1] : vector<32x256xf32> to vector<32xf32>
    %156 = vector.shape_cast %155 : vector<32xf32> to vector<32x1xf32>
    %cst_44 = arith.constant 2.560000e+02 : f32
    %157 = vector.broadcast %cst_44 : f32 to vector<32x1xf32>
    %158 = arith.divf %156, %157 : vector<32x1xf32>
    %159 = vector.broadcast %151 : vector<32x1xf32> to vector<32x256xf32>
    %160 = arith.subf %143, %159 : vector<32x256xf32>
    %cst_45 = arith.constant 9.99999974E-6 : f32
    %161 = vector.broadcast %cst_45 : f32 to vector<32x1xf32>
    %162 = arith.addf %158, %161 : vector<32x1xf32>
    %163 = math.rsqrt %162 : vector<32x1xf32>
    %164 = vector.broadcast %163 : vector<32x1xf32> to vector<32x256xf32>
    %165 = arith.mulf %160, %164 : vector<32x256xf32>
    %166 = vector.broadcast %145 : vector<1x256xf32> to vector<32x256xf32>
    %167 = arith.mulf %165, %166 : vector<32x256xf32>
    %168 = vector.broadcast %147 : vector<1x256xf32> to vector<32x256xf32>
    %169 = arith.addf %167, %168 : vector<32x256xf32>
    %170 = arith.truncf %169 : vector<32x256xf32> to vector<32x256xbf16>
    %c0_46 = arith.constant 0 : index
    %c0_47 = arith.constant 0 : index
    %c0_48 = arith.constant 0 : index
    %171 = vector.load %arg11[%c0_46, %c0_47, %c0_48] : memref<1x256x1024xi8, #tpu.memory_space<vmem>>, vector<1x256x1024xi8>
    %172 = vector.shape_cast %171 : vector<1x256x1024xi8> to vector<256x1024xi8>
    %173 = arith.sitofp %172 : vector<256x1024xi8> to vector<256x1024xbf16>
    %cst_49 = arith.constant dense<0.000000e+00> : vector<32x1024xf32>
    %174 = tpu.matmul %170, %173, %cst_49 {dimension_numbers = #tpu.dot_dimension_numbers<[1], [0], [0], [1], [0, 0, 1, 1], [], []>} : vector<32x256xbf16>, vector<256x1024xbf16>, vector<32x1024xf32> -> vector<32x1024xf32>
    %c0_50 = arith.constant 0 : index
    %c0_51 = arith.constant 0 : index
    %c0_52 = arith.constant 0 : index
    %175 = vector.load %arg12[%c0_50, %c0_51, %c0_52] : memref<1x1x1024xf32, #tpu.memory_space<vmem>>, vector<1x1x1024xf32>
    %176 = vector.shape_cast %175 : vector<1x1x1024xf32> to vector<1x1024xf32>
    %177 = vector.broadcast %176 : vector<1x1024xf32> to vector<32x1024xf32>
    %178 = arith.mulf %174, %177 : vector<32x1024xf32>
    %c0_53 = arith.constant 0 : index
    %c0_54 = arith.constant 0 : index
    %c0_55 = arith.constant 0 : index
    %179 = vector.load %arg13[%c0_53, %c0_54, %c0_55] : memref<1x1x1024xf32, #tpu.memory_space<vmem>>, vector<1x1x1024xf32>
    %180 = vector.shape_cast %179 : vector<1x1x1024xf32> to vector<1x1024xf32>
    %181 = vector.broadcast %180 : vector<1x1024xf32> to vector<32x1024xf32>
    %182 = arith.addf %178, %181 : vector<32x1024xf32>
    %183 = arith.mulf %182, %182 : vector<32x1024xf32>
    %184 = arith.mulf %182, %183 : vector<32x1024xf32>
    %cst_56 = arith.constant 4.471500e-02 : f32
    %185 = vector.broadcast %cst_56 : f32 to vector<32x1024xf32>
    %186 = arith.mulf %185, %184 : vector<32x1024xf32>
    %187 = arith.addf %182, %186 : vector<32x1024xf32>
    %cst_57 = arith.constant 0.797884583 : f32
    %188 = vector.broadcast %cst_57 : f32 to vector<32x1024xf32>
    %189 = arith.mulf %188, %187 : vector<32x1024xf32>
    %190 = math.tanh %189 : vector<32x1024xf32>
    %cst_58 = arith.constant 1.000000e+00 : f32
    %191 = vector.broadcast %cst_58 : f32 to vector<32x1024xf32>
    %192 = arith.addf %191, %190 : vector<32x1024xf32>
    %cst_59 = arith.constant 5.000000e-01 : f32
    %193 = vector.broadcast %cst_59 : f32 to vector<32x1024xf32>
    %194 = arith.mulf %193, %192 : vector<32x1024xf32>
    %195 = arith.mulf %182, %194 : vector<32x1024xf32>
    %196 = arith.truncf %195 : vector<32x1024xf32> to vector<32x1024xbf16>
    %c0_60 = arith.constant 0 : index
    %c0_61 = arith.constant 0 : index
    %c0_62 = arith.constant 0 : index
    %197 = vector.load %arg14[%c0_60, %c0_61, %c0_62] : memref<1x1024x256xi8, #tpu.memory_space<vmem>>, vector<1x1024x256xi8>
    %198 = vector.shape_cast %197 : vector<1x1024x256xi8> to vector<1024x256xi8>
    %199 = arith.sitofp %198 : vector<1024x256xi8> to vector<1024x256xbf16>
    %cst_63 = arith.constant dense<0.000000e+00> : vector<32x256xf32>
    %200 = tpu.matmul %196, %199, %cst_63 {dimension_numbers = #tpu.dot_dimension_numbers<[1], [0], [0], [1], [0, 0, 1, 1], [], []>} : vector<32x1024xbf16>, vector<1024x256xbf16>, vector<32x256xf32> -> vector<32x256xf32>
    %c0_64 = arith.constant 0 : index
    %c0_65 = arith.constant 0 : index
    %c0_66 = arith.constant 0 : index
    %201 = vector.load %arg15[%c0_64, %c0_65, %c0_66] : memref<1x1x256xf32, #tpu.memory_space<vmem>>, vector<1x1x256xf32>
    %202 = vector.shape_cast %201 : vector<1x1x256xf32> to vector<1x256xf32>
    %203 = vector.broadcast %202 : vector<1x256xf32> to vector<32x256xf32>
    %204 = arith.mulf %200, %203 : vector<32x256xf32>
    %c0_67 = arith.constant 0 : index
    %c0_68 = arith.constant 0 : index
    %c0_69 = arith.constant 0 : index
    %205 = vector.load %arg16[%c0_67, %c0_68, %c0_69] : memref<1x1x256xf32, #tpu.memory_space<vmem>>, vector<1x1x256xf32>
    %206 = vector.shape_cast %205 : vector<1x1x256xf32> to vector<1x256xf32>
    %207 = vector.broadcast %206 : vector<1x256xf32> to vector<32x256xf32>
    %208 = arith.addf %204, %207 : vector<32x256xf32>
    %209 = vector.shape_cast %208 : vector<32x256xf32> to vector<4x8x256xf32>
    %210 = arith.addf %142, %209 : vector<4x8x256xf32>
    %c0_70 = arith.constant 0 : index
    %c0_71 = arith.constant 0 : index
    %c0_72 = arith.constant 0 : index
    %211 = vector.load %arg17[%c0_70, %c0_71, %c0_72] : memref<4x8x256xf32, #tpu.memory_space<vmem>>, vector<4x8x256xf32>
    tpu.vector_store %arg17[%c0_70, %c0_71, %c0_72], %210 {strides = array<i32>} : memref<4x8x256xf32, #tpu.memory_space<vmem>>, vector<4x8x256xf32>,
    return
  }
  func.func @transform_0(%arg0: i32) -> (i32, i32, i32) {
    %c0_i32 = arith.constant 0 : i32
    %c0_i32_0 = arith.constant 0 : i32
    %c0_i32_1 = arith.constant 0 : i32
    %c0_i32_2 = arith.constant 0 : i32
    return %c0_i32, %c0_i32_0, %c0_i32_1 : i32, i32, i32
  }
  func.func @transform_1(%arg0: i32) -> (i32, i32, i32) {
    %c0_i32 = arith.constant 0 : i32
    %c0_i32_0 = arith.constant 0 : i32
    %c0_i32_1 = arith.constant 0 : i32
    return %arg0, %c0_i32, %c0_i32_0 : i32, i32, i32
  }
  func.func @transform_2(%arg0: i32) -> (i32, i32, i32) {
    %c0_i32 = arith.constant 0 : i32
    %c0_i32_0 = arith.constant 0 : i32
    %c0_i32_1 = arith.constant 0 : i32
    return %arg0, %c0_i32, %c0_i32_0 : i32, i32, i32
  }
  func.func @transform_3(%arg0: i32) -> (i32, i32, i32) {
    %c0_i32 = arith.constant 0 : i32
    %c0_i32_0 = arith.constant 0 : i32
    %c0_i32_1 = arith.constant 0 : i32
    return %arg0, %c0_i32, %c0_i32_0 : i32, i32, i32
  }
  func.func @transform_4(%arg0: i32) -> (i32, i32, i32) {
    %c0_i32 = arith.constant 0 : i32
    %c0_i32_0 = arith.constant 0 : i32
    %c0_i32_1 = arith.constant 0 : i32
    return %arg0, %c0_i32, %c0_i32_0 : i32, i32, i32
  }
  func.func @transform_5(%arg0: i32) -> (i32, i32, i32) {
    %c0_i32 = arith.constant 0 : i32
    %c0_i32_0 = arith.constant 0 : i32
    %c0_i32_1 = arith.constant 0 : i32
    return %arg0, %c0_i32, %c0_i32_0 : i32, i32, i32
  }
  func.func @transform_6(%arg0: i32) -> (i32, i32, i32) {
    %c0_i32 = arith.constant 0 : i32
    %c0_i32_0 = arith.constant 0 : i32
    %c0_i32_1 = arith.constant 0 : i32
    return %arg0, %c0_i32, %c0_i32_0 : i32, i32, i32
  }
  func.func @transform_7(%arg0: i32) -> (i32, i32, i32) {
    %c0_i32 = arith.constant 0 : i32
    %c0_i32_0 = arith.constant 0 : i32
    %c0_i32_1 = arith.constant 0 : i32
    return %arg0, %c0_i32, %c0_i32_0 : i32, i32, i32
  }
  func.func @transform_8(%arg0: i32) -> (i32, i32, i32) {
    %c0_i32 = arith.constant 0 : i32
    %c0_i32_0 = arith.constant 0 : i32
    %c0_i32_1 = arith.constant 0 : i32
    return %arg0, %c0_i32, %c0_i32_0 : i32, i32, i32
  }
  func.func @transform_9(%arg0: i32) -> (i32, i32, i32) {
    %c0_i32 = arith.constant 0 : i32
    %c0_i32_0 = arith.constant 0 : i32
    %c0_i32_1 = arith.constant 0 : i32
    return %arg0, %c0_i32, %c0_i32_0 : i32, i32, i32
  }
  func.func @transform_10(%arg0: i32) -> (i32, i32, i32) {
    %c0_i32 = arith.constant 0 : i32
    %c0_i32_0 = arith.constant 0 : i32
    %c0_i32_1 = arith.constant 0 : i32
    return %arg0, %c0_i32, %c0_i32_0 : i32, i32, i32
  }
  func.func @transform_11(%arg0: i32) -> (i32, i32, i32) {
    %c0_i32 = arith.constant 0 : i32
    %c0_i32_0 = arith.constant 0 : i32
    %c0_i32_1 = arith.constant 0 : i32
    return %arg0, %c0_i32, %c0_i32_0 : i32, i32, i32
  }
  func.func @transform_12(%arg0: i32) -> (i32, i32, i32) {
    %c0_i32 = arith.constant 0 : i32
    %c0_i32_0 = arith.constant 0 : i32
    %c0_i32_1 = arith.constant 0 : i32
    return %arg0, %c0_i32, %c0_i32_0 : i32, i32, i32
  }
  func.func @transform_13(%arg0: i32) -> (i32, i32, i32) {
    %c0_i32 = arith.constant 0 : i32
    %c0_i32_0 = arith.constant 0 : i32
    %c0_i32_1 = arith.constant 0 : i32
    return %arg0, %c0_i32, %c0_i32_0 : i32, i32, i32
  }
  func.func @transform_14(%arg0: i32) -> (i32, i32, i32) {
    %c0_i32 = arith.constant 0 : i32
    %c0_i32_0 = arith.constant 0 : i32
    %c0_i32_1 = arith.constant 0 : i32
    return %arg0, %c0_i32, %c0_i32_0 : i32, i32, i32
  }
  func.func @transform_15(%arg0: i32) -> (i32, i32, i32) {
    %c0_i32 = arith.constant 0 : i32
    %c0_i32_0 = arith.constant 0 : i32
    %c0_i32_1 = arith.constant 0 : i32
    return %arg0, %c0_i32, %c0_i32_0 : i32, i32, i32
  }
  func.func @transform_16(%arg0: i32) -> (i32, i32, i32) {
    %c0_i32 = arith.constant 0 : i32
    %c0_i32_0 = arith.constant 0 : i32
    %c0_i32_1 = arith.constant 0 : i32
    %c0_i32_2 = arith.constant 0 : i32
    return %c0_i32, %c0_i32_0, %c0_i32_1 : i32, i32, i32
  }
}

module attributes {stable_mosaic.version = 11 : i64} {
  func.func @heads_kernel(%arg0: memref<4x8x256xf32, #tpu.memory_space<vmem>>, %arg1: memref<512x128xbf16, #tpu.memory_space<vmem>>, %arg2: memref<1x128xf32, #tpu.memory_space<vmem>>, %arg3: memref<2x128xf32, #tpu.memory_space<vmem>>) attributes {dimension_semantics = [], scalar_prefetch = 0 : i64, scratch_operands = 0 : i64, tpu.core_type = #tpu.core_type<tc>} {
    %c0 = arith.constant 0 : index
    %c0_0 = arith.constant 0 : index
    %c0_1 = arith.constant 0 : index
    %0 = vector.load %arg0[%c0, %c0_0, %c0_1] : memref<4x8x256xf32, #tpu.memory_space<vmem>>, vector<4x8x256xf32>
    %1 = vector.extract_strided_slice %0 {offsets = [0, 0, 0], sizes = [2, 8, 256], strides = [1, 1, 1]} : vector<4x8x256xf32> to vector<2x8x256xf32>
    %cst = arith.constant dense<0.000000e+00> : vector<2x256xf32>
    %2 = vector.multi_reduction <add>, %1, %cst [1] : vector<2x8x256xf32> to vector<2x256xf32>
    %cst_2 = arith.constant 8.000000e+00 : f32
    %3 = vector.broadcast %cst_2 : f32 to vector<2x256xf32>
    %4 = arith.divf %2, %3 : vector<2x256xf32>
    %5 = vector.extract_strided_slice %0 {offsets = [2, 0, 0], sizes = [2, 8, 256], strides = [1, 1, 1]} : vector<4x8x256xf32> to vector<2x8x256xf32>
    %cst_3 = arith.constant dense<0.000000e+00> : vector<2x256xf32>
    %6 = vector.multi_reduction <add>, %5, %cst_3 [1] : vector<2x8x256xf32> to vector<2x256xf32>
    %cst_4 = arith.constant 8.000000e+00 : f32
    %7 = vector.broadcast %cst_4 : f32 to vector<2x256xf32>
    %8 = arith.divf %6, %7 : vector<2x256xf32>
    %9 = arith.subf %4, %8 : vector<2x256xf32>
    %10 = tpu.concatenate %9, %8 in 1 : vector<2x256xf32>, vector<2x256xf32> -> vector<2x512xf32>
    %11 = arith.truncf %10 : vector<2x512xf32> to vector<2x512xbf16>
    %c0_5 = arith.constant 0 : index
    %c0_6 = arith.constant 0 : index
    %12 = vector.load %arg1[%c0_5, %c0_6] : memref<512x128xbf16, #tpu.memory_space<vmem>>, vector<512x128xbf16>
    %cst_7 = arith.constant dense<0.000000e+00> : vector<2x128xf32>
    %13 = tpu.matmul %11, %12, %cst_7 {dimension_numbers = #tpu.dot_dimension_numbers<[1], [0], [0], [1], [0, 0, 1, 1], [], []>} : vector<2x512xbf16>, vector<512x128xbf16>, vector<2x128xf32> -> vector<2x128xf32>
    %c0_8 = arith.constant 0 : index
    %c0_9 = arith.constant 0 : index
    %14 = vector.load %arg2[%c0_8, %c0_9] : memref<1x128xf32, #tpu.memory_space<vmem>>, vector<1x128xf32>
    %15 = vector.broadcast %14 : vector<1x128xf32> to vector<2x128xf32>
    %16 = arith.addf %13, %15 : vector<2x128xf32>
    %c0_10 = arith.constant 0 : index
    %c0_11 = arith.constant 0 : index
    %17 = vector.load %arg3[%c0_10, %c0_11] : memref<2x128xf32, #tpu.memory_space<vmem>>, vector<2x128xf32>
    tpu.vector_store %arg3[%c0_10, %c0_11], %16 {strides = array<i32>} : memref<2x128xf32, #tpu.memory_space<vmem>>, vector<2x128xf32>,
    return
  }
}

</mosaic_0001>

<bundles_post_ra>
// kernel: model_forward.3
= control target key start
LH: loop header
LB: loop body
LE: loop exit
PB: predicated region body
PF: predicated region fallthrough
CT: control target
= control target key end

     0   :  { %s1311_s12 = smov 0   ;;  %s1631_s0 = inlined_call_operand.vmem [shape: bf16[32,768], index: 0, kind: input, shape index: {}]   ;;  %s1632_s1 = inlined_call_operand.vmem [shape: bf16[768,256], index: 1, kind: input, shape index: {}]   ;;  %s1633_s2 = inlined_call_operand.vmem [shape: f32[1,256], index: 2, kind: input, shape index: {}]   ;;  %s1634_s3 = inlined_call_operand.vmem [shape: f32[32,256], index: 3, kind: output, shape index: {}]  }
   0x1 LB: > { %s994_s13 = sadd.s32 4294967295, %s1289_s12   ;;  %p998_p0 = scmp.ge.s32.totalorder %s1289_s12, 1  ;;  %s1289_s12 = sphi %s1311_s12, %s13_s12  }
   0x2   : > { %p139_p1 = scmp.lt.s32.totalorder %s1289_s12, 3 }
   0x4   : > { %p140_p2 = pnand %p998_p0, %p139_p1 }
   0x5   : > { %v1130_v0 = vld [vmem:[%s1632_s1 + $0x104] ss:$8 sps:$4 sm:$0xff] (!%p140_p2)   ;;  %v1132_v1 = vld [vmem:[%s1632_s1 + $0x100] ss:$8 sps:$4 sm:$0xff] (!%p140_p2)   ;;  %v1133_v2 = vld [vmem:[%s1632_s1 + $0x114] ss:$8 sps:$4 sm:$0xff] (!%p140_p2)  }
   0x6   : > { %143 = sbr.rel (%p140_p2) target bundleno = 352 (0x160), region = 32  ;;  %846 = vmatprep.subr.bf16.mxu0 (!%p140_p2), %v1130_v0  ;;  %v1135_v3 = vld [vmem:[%s1632_s1 + $0x110] ss:$8 sps:$4 sm:$0xff] (!%p140_p2)   ;;  %v1136_v4 = vld [vmem:[%s1632_s1 + $0x124] ss:$8 sps:$4 sm:$0xff] (!%p140_p2)   ;;  %s999_s26 = sshll.u32 (!%p140_p2), %s994_s13, 1 }
   0x7   : > { %847 = vmatpush1.bf16.msra.mxu0 (!%p140_p2), %v1132_v1  ;;  %v1138_v5 = vld [vmem:[%s1632_s1 + $0x120] ss:$8 sps:$4 sm:$0xff] (!%p140_p2)   ;;  %v1139_v6 = vld [vmem:[%s1632_s1 + $0x134] ss:$8 sps:$4 sm:$0xff] (!%p140_p2)   ;;  %p166_p3 = scmp.lt.s32.totalorder (!%p140_p2), %s999_s26, 3 }
   0x8   : > { %848 = vmatprep.subr.bf16.mxu0 (!%p140_p2), %v1133_v2  ;;  %v1141_v7 = vld [vmem:[%s1632_s1 + $0x130] ss:$8 sps:$4 sm:$0xff] (!%p140_p2)   ;;  %v1142_v8 = vld [vmem:[%s1632_s1 + $0x144] ss:$8 sps:$4 sm:$0xff] (!%p140_p2)   ;;  %v1144_v9 = vld [vmem:[%s1632_s1 + $0x140] ss:$8 sps:$4 sm:$0xff] (!%p140_p2)  }
   0x9   : > { %v1145_v10 = vld [vmem:[%s1632_s1 + $0x154] ss:$8 sps:$4 sm:$0xff] (!%p140_p2)   ;;  %v1147_v11 = vld [vmem:[%s1632_s1 + $0x150] ss:$8 sps:$4 sm:$0xff] (!%p140_p2)   ;;  %v1148_v12 = vld [vmem:[%s1632_s1 + $0x164] ss:$8 sps:$4 sm:$0xff] (!%p140_p2)  }
   0xa   : > { %v1175_v13 = vld [vmem:[%s1632_s1 + $0x4] ss:$8 sps:$4 sm:$0xff] (!%p140_p2)   ;;  %v1177_v14 = vld [vmem:[%s1632_s1] ss:$8 sps:$4 sm:$0xff] (!%p140_p2)   ;;  %v1181_v16 = vld [vmem:[%s1632_s1 + $0x14] ss:$8 sps:$4 sm:$0xff] (!%p140_p2)  }
   0xb   : > { %849 = vmatpush1.bf16.msra.mxu0 (!%p140_p2), %v1135_v3  ;;  %v1150_v15 = vld [vmem:[%s1632_s1 + $0x160] ss:$8 sps:$4 sm:$0xff] (!%p140_p2)   ;;  %803 = vmatprep.subr.bf16.mxu1 (!%p140_p2), %v1175_v13  ;;  %v1183_v17 = vld [vmem:[%s1632_s1 + $0x10] ss:$8 sps:$4 sm:$0xff] (!%p140_p2)   ;;  %v1151_v18 = vld [vmem:[%s1632_s1 + $0x174] ss:$8 sps:$4 sm:$0xff] (!%p140_p2)  }
   0xc   : > { %850 = vmatprep.subr.bf16.mxu0 (!%p140_p2), %v1136_v4  ;;  %804 = vmatpush1.bf16.msra.mxu1 (!%p140_p2), %v1177_v14  ;;  %v1153_v20 = vld [vmem:[%s1632_s1 + $0x170] ss:$8 sps:$4 sm:$0xff] (!%p140_p2)   ;;  %v1190_v21 = vld [vmem:[%s1632_s1 + $0x24] ss:$8 sps:$4 sm:$0xff] (!%p140_p2)   ;;  %v1192_v22 = vld [vmem:[%s1632_s1 + $0x20] ss:$8 sps:$4 sm:$0xff] (!%p140_p2)  }
   0xd   : > { %s1636_s26 = smov (!%p166_p3, %s999_s26), 3  ;;  %805 = vmatprep.subr.bf16.mxu1 %v1181_v16  ;;  %v1154_v23 = vld [vmem:[%s1632_s1 + $0x184] ss:$8 sps:$4 sm:$0xff]   ;;  %v1156_v24 = vld [vmem:[%s1632_s1 + $0x180] ss:$8 sps:$4 sm:$0xff]  }
   0xe   : > { %s1121_s10 = smul.u32 24, %s1636_s26  ;;  %v1196_v25 = vld [vmem:[%s1632_s1 + $0x34] ss:$8 sps:$4 sm:$0xff]   ;;  %v1198_v27 = vld [vmem:[%s1632_s1 + $0x30] ss:$8 sps:$4 sm:$0xff]   ;;  %s1108_s18 = sshll.u32 %s1636_s26, 4 }
   0xf   : > { %851 = vmatpush1.bf16.msra.mxu0 %v1138_v5  ;;  %v1157_v26 = vld [vmem:[%s1632_s1 + $0x194] ss:$8 sps:$4 sm:$0xff]   ;;  %v1202_v28 = vld [vmem:[%s1632_s1 + $0x44] ss:$8 sps:$4 sm:$0xff]   ;;  %v1159_v29 = vld [vmem:[%s1632_s1 + $0x190] ss:$8 sps:$4 sm:$0xff]   ;;  %s177_s20 = scalar_lea.vmem %s1634_s3, %s1108_s18 }
  0x10   : > { %852 = vmatprep.subr.bf16.mxu0 %v1139_v6  ;;  %s1373_s24 = scalar_lea.vmem %s1631_s0, %s1121_s10  ;;  %806 = vmatpush1.bf16.msra.mxu1 %v1183_v17  ;;  %v1160_v30 = vld [vmem:[%s1632_s1 + $0x1a4] ss:$8 sps:$4 sm:$0xff]   ;;  %v1204_v31 = vld [vmem:[%s1632_s1 + $0x40] ss:$8 sps:$4 sm:$0xff]   ;;  %v1208_v32 = vld [vmem:[%s1632_s1 + $0x54] ss:$8 sps:$4 sm:$0xff]  }
  0x11   : > { %v1186_v19 = vld [vmem:[%s1373_s24 + $0xc] ss:$24 sps:$4 sm:$0xff]   ;;  %807 = vmatprep.subr.bf16.mxu1 %v1190_v21  ;;  %v1162_v33 = vld [vmem:[%s1632_s1 + $0x1a0] ss:$8 sps:$4 sm:$0xff]   ;;  %v1163_v34 = vld [vmem:[%s1632_s1 + $0x1b4] ss:$8 sps:$4 sm:$0xff]  }
  0x12   : > { %878 = vmatprep.mubr.bf16.mxu0 %v1186_v19  ;;  %v1210_v35 = vld [vmem:[%s1632_s1 + $0x50] ss:$8 sps:$4 sm:$0xff]   ;;  %v1214_v36 = vld [vmem:[%s1632_s1 + $0x64] ss:$8 sps:$4 sm:$0xff]   ;;  %v1216_v39 = vld [vmem:[%s1632_s1 + $0x60] ss:$8 sps:$4 sm:$0xff]  }
  0x13   : > { %853 = vmatpush1.bf16.msra.mxu0 %v1141_v7  ;;  %v1165_v37 = vld [vmem:[%s1632_s1 + $0x1b0] ss:$8 sps:$4 sm:$0xff]   ;;  %v1166_v38 = vld [vmem:[%s1632_s1 + $0x1c4] ss:$8 sps:$4 sm:$0xff]   ;;  %v1220_v40 = vld [vmem:[%s1632_s1 + $0x74] ss:$8 sps:$4 sm:$0xff]  }
  0x14   : > { %854 = vmatprep.subr.bf16.mxu0 %v1142_v8  ;;  %808 = vmatpush1.bf16.msra.mxu1 %v1192_v22  ;;  %v1168_v41 = vld [vmem:[%s1632_s1 + $0x1c0] ss:$8 sps:$4 sm:$0xff]   ;;  %v1169_v42 = vld [vmem:[%s1632_s1 + $0x1d4] ss:$8 sps:$4 sm:$0xff]   ;;  %v1222_v43 = vld [vmem:[%s1632_s1 + $0x70] ss:$8 sps:$4 sm:$0xff]  }
  0x15   : > { %809 = vmatprep.subr.bf16.mxu1 %v1196_v25  ;;  %v1226_v44 = vld [vmem:[%s1632_s1 + $0x84] ss:$8 sps:$4 sm:$0xff]   ;;  %v1171_v45 = vld [vmem:[%s1632_s1 + $0x1d0] ss:$8 sps:$4 sm:$0xff]   ;;  %v1228_v47 = vld [vmem:[%s1632_s1 + $0x80] ss:$8 sps:$4 sm:$0xff]  }
  0x16   : > { %v1172_v46 = vld [vmem:[%s1632_s1 + $0x1e4] ss:$8 sps:$4 sm:$0xff]   ;;  %v1232_v48 = vld [vmem:[%s1632_s1 + $0x94] ss:$8 sps:$4 sm:$0xff]   ;;  %v1174_v49 = vld [vmem:[%s1632_s1 + $0x1e0] ss:$8 sps:$4 sm:$0xff]  }
  0x17   : > { %855 = vmatpush1.bf16.msra.mxu0 %v1144_v9  ;;  %v1178_v50 = vld [vmem:[%s1632_s1 + $0x1f4] ss:$8 sps:$4 sm:$0xff]   ;;  %v1234_v51 = vld [vmem:[%s1632_s1 + $0x90] ss:$8 sps:$4 sm:$0xff]   ;;  %v1238_v52 = vld [vmem:[%s1632_s1 + $0xa4] ss:$8 sps:$4 sm:$0xff]  }
  0x18   : > { %856 = vmatprep.subr.bf16.mxu0 %v1145_v10  ;;  %810 = vmatpush1.bf16.msra.mxu1 %v1198_v27  ;;  %v1180_v53 = vld [vmem:[%s1632_s1 + $0x1f0] ss:$8 sps:$4 sm:$0xff]   ;;  %v1189_v54 = vld [vmem:[%s1632_s1 + $0x204] ss:$8 sps:$4 sm:$0xff]   ;;  %v1240_v55 = vld [vmem:[%s1632_s1 + $0xa0] ss:$8 sps:$4 sm:$0xff]  }
  0x19   : > { %811 = vmatprep.subr.bf16.mxu1 %v1202_v28  ;;  %v1244_v56 = vld [vmem:[%s1632_s1 + $0xb4] ss:$8 sps:$4 sm:$0xff]   ;;  %v1184_v57 = vld [vmem:[%s1373_s24 + $0x8] ss:$24 sps:$4 sm:$0xff]   ;;  %v1246_v60 = vld [vmem:[%s1632_s1 + $0xb0] ss:$8 sps:$4 sm:$0xff]  }
  0x1a   : > { %v1187_v58 = vld [vmem:[%s1632_s1 + $0x200] ss:$8 sps:$4 sm:$0xff]   ;;  %v1195_v59 = vld [vmem:[%s1632_s1 + $0x214] ss:$8 sps:$4 sm:$0xff]   ;;  %v1250_v61 = vld [vmem:[%s1632_s1 + $0xc4] ss:$8 sps:$4 sm:$0xff]  }
  0x1b   : > { %857 = vmatpush1.bf16.msra.mxu0 %v1147_v11  ;;  %v1276_v62 = vld [vmem:[%s1373_s24 + $0x4] ss:$24 sps:$4 sm:$0xff]   ;;  %v1193_v63 = vld [vmem:[%s1632_s1 + $0x210] ss:$8 sps:$4 sm:$0xff]   ;;  %v1252_v0 = vld [vmem:[%s1632_s1 + $0xc0] ss:$8 sps:$4 sm:$0xff]  }
  0x1c   : > { %858 = vmatprep.subr.bf16.mxu0 %v1148_v12  ;;  %812 = vmatpush1.bf16.msra.mxu1 %v1204_v31  ;;  %v1282_v1 = vld [vmem:[%s1373_s24 + $0x14] ss:$24 sps:$4 sm:$0xff]   ;;  %v1199_v4 = vld [vmem:[%s1632_s1 + $0x220] ss:$8 sps:$4 sm:$0xff]   ;;  %v1258_v5 = vld [vmem:[%s1632_s1 + $0xd0] ss:$8 sps:$4 sm:$0xff]  }
  0x1d   : > { %813 = vmatprep.subr.bf16.mxu1 %v1208_v32  ;;  %v1201_v2 = vld [vmem:[%s1632_s1 + $0x224] ss:$8 sps:$4 sm:$0xff]   ;;  %v1256_v3 = vld [vmem:[%s1632_s1 + $0xd4] ss:$8 sps:$4 sm:$0xff]   ;;  %835 = vmatprep.mubr.bf16.mxu1 %v1276_v62  ;;  %v1205_v8 = vld [vmem:[%s1632_s1 + $0x230] ss:$8 sps:$4 sm:$0xff]  }
  0x1e   : > { %v1207_v6 = vld [vmem:[%s1632_s1 + $0x234] ss:$8 sps:$4 sm:$0xff]   ;;  %v1262_v7 = vld [vmem:[%s1632_s1 + $0xe4] ss:$8 sps:$4 sm:$0xff]   ;;  %v1264_v9 = vld [vmem:[%s1632_s1 + $0xe0] ss:$8 sps:$4 sm:$0xff]  }
  0x1f   : > { %859 = vmatpush1.bf16.msra.mxu0 %v1150_v15  ;;  %v1213_v10 = vld [vmem:[%s1632_s1 + $0x244] ss:$8 sps:$4 sm:$0xff]   ;;  %v1268_v11 = vld [vmem:[%s1632_s1 + $0xf4] ss:$8 sps:$4 sm:$0xff]   ;;  %v1211_v12 = vld [vmem:[%s1632_s1 + $0x240] ss:$8 sps:$4 sm:$0xff]  }
  0x20   : > { %860 = vmatprep.subr.bf16.mxu0 %v1151_v18  ;;  %814 = vmatpush1.bf16.msra.mxu1 %v1210_v35  ;;  %v1270_v13 = vld [vmem:[%s1632_s1 + $0xf0] ss:$8 sps:$4 sm:$0xff]   ;;  %v1219_v14 = vld [vmem:[%s1632_s1 + $0x254] ss:$8 sps:$4 sm:$0xff]   ;;  %v1225_v17 = vld [vmem:[%s1632_s1 + $0x264] ss:$8 sps:$4 sm:$0xff]  }
  0x21   : > { %815 = vmatprep.subr.bf16.mxu1 %v1214_v36  ;;  %v1274_v15 = vld [vmem:[%s1373_s24] ss:$24 sps:$4 sm:$0xff]   ;;  %v1231_v19 = vld [vmem:[%s1632_s1 + $0x274] ss:$8 sps:$4 sm:$0xff]   ;;  %v1237_v21 = vld [vmem:[%s1632_s1 + $0x284] ss:$8 sps:$4 sm:$0xff]  }
  0x22   : > { %v1217_v16 = vld [vmem:[%s1632_s1 + $0x250] ss:$8 sps:$4 sm:$0xff]   ;;  %v1223_v18 = vld [vmem:[%s1632_s1 + $0x260] ss:$8 sps:$4 sm:$0xff]   ;;  %v1249_v25 = vld [vmem:[%s1632_s1 + $0x2a4] ss:$8 sps:$4 sm:$0xff]  }
  0x23   : > { %861 = vmatpush1.bf16.msra.mxu0 %v1153_v20  ;;  %v1229_v20 = vld [vmem:[%s1632_s1 + $0x270] ss:$8 sps:$4 sm:$0xff]   ;;  %v1235_v22 = vld [vmem:[%s1632_s1 + $0x280] ss:$8 sps:$4 sm:$0xff]   ;;  %v1255_v27 = vld [vmem:[%s1632_s1 + $0x2b4] ss:$8 sps:$4 sm:$0xff]  }
  0x24   : > { %862 = vmatprep.subr.bf16.mxu0 %v1154_v23  ;;  %816 = vmatpush1.bf16.msra.mxu1 %v1216_v39  ;;  %v1243_v23 = vld [vmem:[%s1632_s1 + $0x294] ss:$8 sps:$4 sm:$0xff]   ;;  %v1253_v28 = vld [vmem:[%s1632_s1 + $0x2b0] ss:$8 sps:$4 sm:$0xff]  }
  0x25   : > { %817 = vmatprep.subr.bf16.mxu1 %v1220_v40  ;;  %v1267_v31 = vld [vmem:[%s1632_s1 + $0x2d4] ss:$8 sps:$4 sm:$0xff]   ;;  %v1265_v32 = vld [vmem:[%s1632_s1 + $0x2d0] ss:$8 sps:$4 sm:$0xff]  }
  0x26   : > { %v1279_v35 = vld [vmem:[%s1632_s1 + $0x2f4] ss:$8 sps:$4 sm:$0xff]   ;;  %v1277_v36 = vld [vmem:[%s1632_s1 + $0x2f0] ss:$8 sps:$4 sm:$0xff]  }
  0x27   : > { %863 = vmatpush1.bf16.msra.mxu0 %v1156_v24  ;;  %v1241_v24 = vld [vmem:[%s1632_s1 + $0x290] ss:$8 sps:$4 sm:$0xff]  }
  0x28   : > { %864 = vmatprep.subr.bf16.mxu0 %v1157_v26  ;;  %818 = vmatpush1.bf16.msra.mxu1 %v1222_v43  ;;  %v1247_v26 = vld [vmem:[%s1632_s1 + $0x2a0] ss:$8 sps:$4 sm:$0xff]  }
  0x29   : > { %819 = vmatprep.subr.bf16.mxu1 %v1226_v44 }
  0x2b   : > { %865 = vmatpush1.bf16.msra.mxu0 %v1159_v29  ;;  %v1261_v29 = vld [vmem:[%s1632_s1 + $0x2c4] ss:$8 sps:$4 sm:$0xff]  }
  0x2c   : > { %866 = vmatprep.subr.bf16.mxu0 %v1160_v30  ;;  %820 = vmatpush1.bf16.msra.mxu1 %v1228_v47  ;;  %v1259_v30 = vld [vmem:[%s1632_s1 + $0x2c0] ss:$8 sps:$4 sm:$0xff]  }
  0x2d   : > { %821 = vmatprep.subr.bf16.mxu1 %v1232_v48 }
  0x2f   : > { %867 = vmatpush1.bf16.msra.mxu0 %v1162_v33  ;;  %v1273_v33 = vld [vmem:[%s1632_s1 + $0x2e4] ss:$8 sps:$4 sm:$0xff]  }
  0x30   : > { %868 = vmatprep.subr.bf16.mxu0 %v1163_v34  ;;  %822 = vmatpush1.bf16.msra.mxu1 %v1234_v51  ;;  %v1271_v34 = vld [vmem:[%s1632_s1 + $0x2e0] ss:$8 sps:$4 sm:$0xff]  }
  0x31   : > { %823 = vmatprep.subr.bf16.mxu1 %v1238_v52 }
  0x33   : > { %869 = vmatpush1.bf16.msra.mxu0 %v1165_v37  ;;  %v1280_v37 = vld [vmem:[%s1373_s24 + $0x10] ss:$24 sps:$4 sm:$0xff]  }
  0x34   : > { %870 = vmatprep.subr.bf16.mxu0 %v1166_v38  ;;  %824 = vmatpush1.bf16.msra.mxu1 %v1240_v55 }
  0x35   : > { %825 = vmatprep.subr.bf16.mxu1 %v1244_v56 }
  0x37   : > { %871 = vmatpush1.bf16.msra.mxu0 %v1168_v41 }
  0x38   : > { %872 = vmatprep.subr.bf16.mxu0 %v1169_v42  ;;  %826 = vmatpush1.bf16.msra.mxu1 %v1246_v60  ;;  %v283_v42 = vlaneseq }
  0x39   : > { %827 = vmatprep.subr.bf16.mxu1 %v1250_v61 }
  0x3a   : > { %v284_v43 = vshrl.u32 %v283_v42, 7 }
  0x3b   : > { %873 = vmatpush1.bf16.msra.mxu0 %v1171_v45  ;;  %v281_v45 = vld [vmem:[%s1633_s2] sm:$0x3] }
  0x3c   : > { %874 = vmatprep.subr.bf16.mxu0 %v1172_v46  ;;  %828 = vmatpush1.bf16.msra.mxu1 %v1252_v0  ;;  %v285_v44 = vsub.s32 0, %v284_v43  ;;  %v289_v46 = vsub.s32 1, %v284_v43 }
  0x3d   : > { %829 = vmatprep.subr.bf16.mxu1 %v1256_v3 }
  0x3e   : > { %v286_v47 = vrot.slane %v281_v45, %v285_v44  ;;  %v290_v48 = vrot.slane %v281_v45, %v289_v46 }
  0x3f   : > { %875 = vmatpush1.bf16.msra.mxu0 %v1174_v49 }
  0x40   : > { %876 = vmatprep.subr.bf16.mxu0 %v1178_v50  ;;  %830 = vmatpush1.bf16.msra.mxu1 %v1258_v5 }
  0x41   : > { %831 = vmatprep.subr.bf16.mxu1 %v1262_v7 }
  0x43   : > { %877 = vmatpush1.bf16.msra.mxu0 %v1180_v53 }
  0x44   : > { %889 = vmatprep.subr.bf16.mxu0 %v1189_v54  ;;  %832 = vmatpush1.bf16.msra.mxu1 %v1264_v9 }
  0x45   : > { %833 = vmatprep.subr.bf16.mxu1 %v1268_v11 }
  0x46   : > { %879 = vmatmul.mubr.bf16.vlgmr.msra.gmra.mrb[0].mxu0 %v1184_v57 }
  0x47   : > { %890 = vmatpush1.bf16.msra.mxu0 %v1187_v58  ;;  %921 = vmatprep.mubr.bf16.mxu0 %v1282_v1 }
  0x48   : > { %891 = vmatprep.subr.bf16.mxu0 %v1195_v59  ;;  %834 = vmatpush1.bf16.msra.mxu1 %v1270_v13 }
  0x4b   : > { %892 = vmatpush1.bf16.msra.mxu0 %v1193_v63  ;;  %836 = vmatmul.mubr.bf16.vlgmr.msra.gmra.mrb[0].mxu1 %v1274_v15 }
  0x4c   : > { %893 = vmatprep.subr.bf16.mxu0 %v1201_v2 }
  0x4f   : > { %894 = vmatpush1.bf16.msra.mxu0 %v1199_v4 }
  0x50   : > { %895 = vmatprep.subr.bf16.mxu0 %v1207_v6 }
  0x53   : > { %896 = vmatpush1.bf16.msra.mxu0 %v1205_v8 }
  0x54   : > { %897 = vmatprep.subr.bf16.mxu0 %v1213_v10 }
  0x57   : > { %898 = vmatpush1.bf16.msra.mxu0 %v1211_v12 }
  0x58   : > { %899 = vmatprep.subr.bf16.mxu0 %v1219_v14 }
  0x5b   : > { %900 = vmatpush1.bf16.msra.mxu0 %v1217_v16 }
  0x5c   : > { %901 = vmatprep.subr.bf16.mxu0 %v1225_v17 }
  0x5f   : > { %902 = vmatpush1.bf16.msra.mxu0 %v1223_v18 }
  0x60   : > { %903 = vmatprep.subr.bf16.mxu0 %v1231_v19 }
  0x63   : > { %904 = vmatpush1.bf16.msra.mxu0 %v1229_v20 }
  0x64   : > { %905 = vmatprep.subr.bf16.mxu0 %v1237_v21 }
  0x67   : > { %906 = vmatpush1.bf16.msra.mxu0 %v1235_v22 }
  0x68   : > { %907 = vmatprep.subr.bf16.mxu0 %v1243_v23 }
  0x6b   : > { %908 = vmatpush1.bf16.msra.mxu0 %v1241_v24 }
  0x6c   : > { %909 = vmatprep.subr.bf16.mxu0 %v1249_v25 }
  0x6f   : > { %910 = vmatpush1.bf16.msra.mxu0 %v1247_v26 }
  0x70   : > { %911 = vmatprep.subr.bf16.mxu0 %v1255_v27 }
  0x73   : > { %912 = vmatpush1.bf16.msra.mxu0 %v1253_v28 }
  0x74   : > { %913 = vmatprep.subr.bf16.mxu0 %v1261_v29 }
  0x77   : > { %914 = vmatpush1.bf16.msra.mxu0 %v1259_v30 }
  0x78   : > { %915 = vmatprep.subr.bf16.mxu0 %v1267_v31 }
  0x7b   : > { %916 = vmatpush1.bf16.msra.mxu0 %v1265_v32 }
  0x7c   : > { %917 = vmatprep.subr.bf16.mxu0 %v1273_v33 }
  0x7f   : > { %918 = vmatpush1.bf16.msra.mxu0 %v1271_v34 }
  0x80   : > { %919 = vmatprep.subr.bf16.mxu0 %v1279_v35 }
  0x83   : > { %920 = vmatpush1.bf16.msra.mxu0 %v1277_v36 }
  0x86   : > { %922 = vmatmul.mubr.bf16.vlgmr.msra.gmra.mrb[0].mxu0 %v1280_v37 }
 0x11e   : > { %v837_v38 = vpop.f32.mrb[0].mxu1 }
 0x11f   : > { %v839_v39 = vpop.f32.mrb[1].mxu1  ;;  %v838_v49 = vadd.f32 %v837_v38, %v286_v47 }
 0x120   : > { %v841_v40 = vpop.f32.mrb[2].mxu1  ;;  %v840_v50 = vadd.f32 %v839_v39, %v290_v48 }
 0x121   : > { %v843_v41 = vpop.f32.mrb[3].mxu1  ;;  %v842_v52 = vadd.f32 %v841_v40, %v286_v47 }
 0x122   : > { %v844_v55 = vadd.f32 %v843_v41, %v290_v48 }
 0x159   : > { %v923_v51 = vpop.f32.mrb[0].mxu0 }
 0x15a   : > { %v1110_v53 = vadd.f32 %v923_v51, %v838_v49  ;;  %v925_v54 = vpop.f32.mrb[1].mxu0 }
 0x15b   : > { %v1112_v56 = vadd.f32 %v925_v54, %v840_v50  ;;  %v927_v57 = vpop.f32.mrb[2].mxu0 }
 0x15c   : > { %932 = vst [vmem:[%s177_s20] sm:$0xff] %v1110_v53  ;;  %v1114_v58 = vadd.f32 %v927_v57, %v842_v52  ;;  %v929_v59 = vpop.f32.mrb[3].mxu0 }
 0x15d   : > { %933 = vst [vmem:[%s177_s20 + $0x8] sm:$0xff] %v1112_v56  ;;  %v1116_v60 = vadd.f32 %v929_v59, %v844_v55 }
 0x15e   : > { %934 = vst [vmem:[%s177_s20 + $0x10] sm:$0xff] %v1114_v58 }
 0x15f   : > { %935 = vst [vmem:[%s177_s20 + $0x18] sm:$0xff] %v1116_v60 }
 0x160 PF: > { %s13_s12 = sadd.s32 1, %s1289_s12  }
 0x161   : > { %p10_p4 = scmp.ge.s32.totalorder %s13_s12, 4  }
 0x163   :  { %12 = sbr.rel (!%p10_p4) target bundleno = 1 (0x1), region = 62 }

// kernel: model_forward.5
= control target key start
LH: loop header
LB: loop body
LE: loop exit
PB: predicated region body
PF: predicated region fallthrough
CT: control target
= control target key end

     0   :  { %vm88_vm0 = vcmask 1041409   ;;  %s712_s1 = inlined_call_operand.vmem [shape: bf16[512,128], index: 1, kind: input, shape index: {}]   ;;  %s713_s0 = inlined_call_operand.vmem [shape: f32[4,8,256], index: 0, kind: input, shape index: {}]   ;;  %s714_s2 = inlined_call_operand.vmem [shape: f32[1,128], index: 2, kind: input, shape index: {}]   ;;  %s715_s3 = inlined_call_operand.vmem [shape: f32[2,128], index: 3, kind: output, shape index: {}]  }
   0x1   :  { %v530_v0 = vld [vmem:[%s712_s1 + $0x40] sm:$0xff]   ;;  %v534_v4 = vld [vmem:[%s712_s1 + $0x48] sm:$0xff]   ;;  %v538_v8 = vld [vmem:[%s712_s1 + $0x50] sm:$0xff]  }
   0x2   :  { %v531_v1 = vld [vmem:[%s712_s1 + $0xc0] sm:$0xff]   ;;  %486 = vmatprep.subr.bf16.mxu0 %v530_v0  ;;  %v535_v5 = vld [vmem:[%s712_s1 + $0xc8] sm:$0xff]   ;;  %v539_v9 = vld [vmem:[%s712_s1 + $0xd0] sm:$0xff]  }
   0x3   :  { %v532_v2 = vld [vmem:[%s712_s1] sm:$0xff]   ;;  %508 = vmatprep.subr.bf16.mxu1 %v531_v1  ;;  %v536_v6 = vld [vmem:[%s712_s1 + $0x8] sm:$0xff]   ;;  %v540_v10 = vld [vmem:[%s712_s1 + $0x10] sm:$0xff]  }
   0x4   :  { %v533_v3 = vld [vmem:[%s712_s1 + $0x80] sm:$0xff]   ;;  %487 = vmatpush3.bf16.msra.mxu0 %v532_v2  ;;  %v537_v7 = vld [vmem:[%s712_s1 + $0x88] sm:$0xff]   ;;  %v541_v11 = vld [vmem:[%s712_s1 + $0x90] sm:$0xff]  }
   0x5   :  { %509 = vmatpush3.bf16.msra.mxu1 %v533_v3  ;;  %488 = vmatprep.subr.bf16.mxu0 %v534_v4  ;;  %v542_v12 = vld [vmem:[%s712_s1 + $0x58] sm:$0xff]   ;;  %v546_v16 = vld [vmem:[%s712_s1 + $0x60] sm:$0xff]   ;;  %v550_v20 = vld [vmem:[%s712_s1 + $0x68] sm:$0xff]  }
   0x6   :  { %510 = vmatprep.subr.bf16.mxu1 %v535_v5  ;;  %v543_v13 = vld [vmem:[%s712_s1 + $0xd8] sm:$0xff]   ;;  %v547_v17 = vld [vmem:[%s712_s1 + $0xe0] sm:$0xff]   ;;  %v551_v21 = vld [vmem:[%s712_s1 + $0xe8] sm:$0xff]  }
   0x7   :  { %v544_v14 = vld [vmem:[%s712_s1 + $0x18] sm:$0xff]   ;;  %v548_v18 = vld [vmem:[%s712_s1 + $0x20] sm:$0xff]   ;;  %v552_v22 = vld [vmem:[%s712_s1 + $0x28] sm:$0xff]  }
   0x8   :  { %489 = vmatpush3.bf16.msra.mxu0 %v536_v6  ;;  %v545_v15 = vld [vmem:[%s712_s1 + $0x98] sm:$0xff]   ;;  %v549_v19 = vld [vmem:[%s712_s1 + $0xa0] sm:$0xff]   ;;  %v553_v23 = vld [vmem:[%s712_s1 + $0xa8] sm:$0xff]  }
   0x9   :  { %511 = vmatpush3.bf16.msra.mxu1 %v537_v7  ;;  %490 = vmatprep.subr.bf16.mxu0 %v538_v8  ;;  %v554_v24 = vld [vmem:[%s712_s1 + $0x70] sm:$0xff]   ;;  %v558_v28 = vld [vmem:[%s712_s1 + $0x78] sm:$0xff]   ;;  %v16_v32 = vld [vmem:[%s713_s0 + $0x8] sm:$0xff] }
   0xa   :  { %512 = vmatprep.subr.bf16.mxu1 %v539_v9  ;;  %v555_v25 = vld [vmem:[%s712_s1 + $0xf0] sm:$0xff]   ;;  %v559_v29 = vld [vmem:[%s712_s1 + $0xf8] sm:$0xff]   ;;  %v20_v34 = vld [vmem:[%s713_s0 + $0x28] sm:$0xff]  ;;  %v29_v36 = vrot.slane %v16_v32, 4 }
   0xb   :  { %v556_v26 = vld [vmem:[%s712_s1 + $0x30] sm:$0xff]   ;;  %v560_v30 = vld [vmem:[%s712_s1 + $0x38] sm:$0xff]   ;;  %v58_v38 = vrot.slane %v20_v34, 4  ;;  %v15_v39 = vld [vmem:[%s713_s0] sm:$0xff] }
   0xc   :  { %491 = vmatpush3.bf16.msra.mxu0 %v540_v10  ;;  %v557_v27 = vld [vmem:[%s712_s1 + $0xb0] sm:$0xff]   ;;  %v561_v31 = vld [vmem:[%s712_s1 + $0xb8] sm:$0xff]   ;;  %v19_v42 = vld [vmem:[%s713_s0 + $0x20] sm:$0xff]  ;;  %v23_v44 = vrot.slane %v15_v39, 4  ;;  %v30_v46 = vadd.f32 %v29_v36, %v16_v32 }
   0xd   :  { %513 = vmatpush3.bf16.msra.mxu1 %v541_v11  ;;  %492 = vmatprep.subr.bf16.mxu0 %v542_v12  ;;  %v18_v33 = vld [vmem:[%s713_s0 + $0x18] sm:$0xff]  ;;  %v17_v40 = vld [vmem:[%s713_s0 + $0x10] sm:$0xff]  ;;  %v59_v48 = vadd.f32 %v58_v38, %v20_v34  ;;  %v52_v49 = vrot.slane %v19_v42, 4 }
   0xe   :  { %514 = vmatprep.subr.bf16.mxu1 %v543_v13  ;;  %v22_v35 = vld [vmem:[%s713_s0 + $0x38] sm:$0xff]  ;;  %v41_v37 = vrot.slane %v18_v33, 4  ;;  %v21_v43 = vld [vmem:[%s713_s0 + $0x30] sm:$0xff]  ;;  %v35_v45 = vrot.slane %v17_v40, 4  ;;  %v24_v51 = vadd.f32 %v23_v44, %v15_v39  ;;  %v31_v54 = vrot.slane %v30_v46, 2 }
   0xf   :  { %v70_v41 = vrot.slane %v22_v35, 4  ;;  %v64_v53 = vrot.slane %v21_v43, 4  ;;  %v60_v56 = vrot.slane %v59_v48, 2  ;;  %v53_v57 = vadd.f32 %v52_v49, %v19_v42  ;;  %v453_v49 = vld [vmem:[%s714_s2] ss:$0 sm:$0xff] }
  0x10   :  { %493 = vmatpush3.bf16.msra.mxu0 %v544_v14  ;;  %v42_v47 = vadd.f32 %v41_v37, %v18_v33  ;;  %v36_v52 = vadd.f32 %v35_v45, %v17_v40  ;;  %v25_v59 = vrot.slane %v24_v51, 2  ;;  %v32_v62 = vadd.f32 %v31_v54, %v30_v46 }
  0x11   :  { %515 = vmatpush3.bf16.msra.mxu1 %v545_v15  ;;  %494 = vmatprep.subr.bf16.mxu0 %v546_v16  ;;  %v71_v50 = vadd.f32 %v70_v41, %v22_v35  ;;  %v65_v61 = vadd.f32 %v64_v53, %v21_v43  ;;  %v61_v0 = vadd.f32 %v60_v56, %v59_v48  ;;  %v54_v1 = vrot.slane %v53_v57, 2 }
  0x12   :  { %516 = vmatprep.subr.bf16.mxu1 %v547_v17  ;;  %v43_v55 = vrot.slane %v42_v47, 2  ;;  %v37_v60 = vrot.slane %v36_v52, 2  ;;  %v26_v3 = vadd.f32 %v25_v59, %v24_v51  ;;  %v33_v6 = vrot.slane %v32_v62, 1 }
  0x13   :  { %v72_v58 = vrot.slane %v71_v50, 2  ;;  %v66_v5 = vrot.slane %v65_v61, 2  ;;  %v62_v8 = vrot.slane %v61_v0, 1  ;;  %v55_v9 = vadd.f32 %v54_v1, %v53_v57 }
  0x14   :  { %495 = vmatpush3.bf16.msra.mxu0 %v548_v18  ;;  %v44_v63 = vadd.f32 %v43_v55, %v42_v47  ;;  %v38_v4 = vadd.f32 %v37_v60, %v36_v52  ;;  %v27_v11 = vrot.slane %v26_v3, 1  ;;  %v34_v14 = vadd.f32 %v33_v6, %v32_v62 }
  0x15   :  { %517 = vmatpush3.bf16.msra.mxu1 %v549_v19  ;;  %496 = vmatprep.subr.bf16.mxu0 %v550_v20  ;;  %v73_v2 = vadd.f32 %v72_v58, %v71_v50  ;;  %v67_v13 = vadd.f32 %v66_v5, %v65_v61  ;;  %v63_v16 = vadd.f32 %v62_v8, %v61_v0  ;;  %v56_v17 = vrot.slane %v55_v9, 1 }
  0x16   :  { %518 = vmatprep.subr.bf16.mxu1 %v551_v21  ;;  %v45_v7 = vrot.slane %v44_v63, 1  ;;  %v39_v12 = vrot.slane %v38_v4, 1  ;;  %v28_v19 = vadd.f32 %v27_v11, %v26_v3 }
  0x17   :  { %v74_v10 = vrot.slane %v73_v2, 1  ;;  %v68_v21 = vrot.slane %v67_v13, 1 }
  0x18   :  { %497 = vmatpush3.bf16.msra.mxu0 %v552_v22  ;;  %v46_v15 = vadd.f32 %v45_v7, %v44_v63  ;;  %v40_v20 = vadd.f32 %v39_v12, %v38_v4  ;;  %v49_v22 = vmul.f32 0.125, %v34_v14 }
  0x19   :  { %519 = vmatpush3.bf16.msra.mxu1 %v553_v23  ;;  %498 = vmatprep.subr.bf16.mxu0 %v554_v24  ;;  %v75_v18 = vadd.f32 %v74_v10, %v73_v2  ;;  %v77_v24 = vmul.f32 0.125, %v63_v16 }
  0x1a   :  { %520 = vmatprep.subr.bf16.mxu1 %v555_v25  ;;  %v51_v23 = vmul.f32 0.125, %v46_v15  ;;  %v57_v25 = vadd.f32 %v56_v17, %v55_v9 }
  0x1c   :  { %499 = vmatpush3.bf16.msra.mxu0 %v556_v26  ;;  %v79_v26 = vmul.f32 0.125, %v75_v18 }
  0x1d   :  { %521 = vmatpush3.bf16.msra.mxu1 %v557_v27  ;;  %500 = vmatprep.subr.bf16.mxu0 %v558_v28  ;;  %v48_v27 = vmul.f32 0.125, %v28_v19  ;;  %v50_v28 = vmul.f32 0.125, %v40_v20 }
  0x1e   :  { %522 = vmatprep.subr.bf16.mxu1 %v559_v29  ;;  %v69_v29 = vadd.f32 %v68_v21, %v67_v13  ;;  %v83_v32 = vsub.f32 %v51_v23, %v79_v26  ;;  %v98_v33 = vsel %vm88_vm0, %v79_v26, %v77_v24 }
  0x1f   :  { %v104_v35 = vpack.c.bf16 %v98_v33, %v98_v33 }
  0x20   :  { %501 = vmatpush3.bf16.msra.mxu0 %v560_v30  ;;  %v81_v30 = vsub.f32 %v49_v22, %v77_v24  ;;  %v78_v34 = vmul.f32 0.125, %v69_v29 }
  0x21   :  { %523 = vmatpush3.bf16.msra.mxu1 %v561_v31  ;;  %v76_v31 = vmul.f32 0.125, %v57_v25  ;;  %440 = vmatprep.mubr.bf16.mxu1 %v104_v35 }
  0x22   :  { %v90_v37 = vsel %vm88_vm0, %v83_v32, %v81_v30  ;;  %v82_v38 = vsub.f32 %v50_v28, %v78_v34 }
  0x23   :  { %v80_v36 = vsub.f32 %v48_v27, %v76_v31  ;;  %v97_v39 = vsel %vm88_vm0, %v78_v34, %v76_v31  ;;  %v102_v40 = vpack.c.bf16 %v90_v37, %v90_v37 }
  0x24   :  { %v103_v41 = vpack.c.bf16 %v97_v39, %v97_v39 }
  0x25   :  { %v89_v42 = vsel %vm88_vm0, %v82_v38, %v80_v36  ;;  %400 = vmatprep.mubr.bf16.mxu0 %v102_v40 }
  0x26   :  { %v101_v43 = vpack.c.bf16 %v89_v42, %v89_v42  ;;  %441 = vmatmul.mubr.bf16.vlgmr.msra.gmra.mrb[0].mxu1 %v103_v41 }
  0x28   :  { %401 = vmatmul.mubr.bf16.vlgmr.msra.gmra.mrb[0].mxu0 %v101_v43 }
  0xf9   :  { %v524_v44 = vpop.f32.mrb[0].mxu1 }
  0xfa   :  { %v525_v45 = vpop.f32.mrb[1].mxu1 }
  0xfb   :  { %v502_v46 = vpop.f32.mrb[0].mxu0  ;;  %v526_v47 = vadd.f32 %v525_v45, %v524_v44  ;;  %v527_v48 = vpop.f32.mrb[2].mxu1 }
  0xfc   :  { %v503_v50 = vpop.f32.mrb[1].mxu0  ;;  %v528_v51 = vpop.f32.mrb[3].mxu1 }
  0xfd   :  { %v504_v52 = vadd.f32 %v503_v50, %v502_v46  ;;  %v505_v53 = vpop.f32.mrb[2].mxu0 }
  0xfe   :  { %v506_v54 = vpop.f32.mrb[3].mxu0 }
  0xff   :  { %v403_v55 = vadd.f32 %v504_v52, %v453_v49 }
 0x101   :  { %v443_v56 = vadd.f32 %v526_v47, %v403_v55 }
 0x103   :  { %448 = vst [vmem:[%s715_s3] sm:$0x3] %v443_v56 }

// kernel: model_forward.4
= control target key start
LH: loop header
LB: loop body
LE: loop exit
PB: predicated region body
PF: predicated region fallthrough
CT: control target
= control target key end

     0   :  { %s8627_s21 = smov 0   ;;  %s10973_s0 = inlined_call_operand.vmem [shape: f32[4,8,256], index: 0, kind: input, shape index: {}]   ;;  %s10974_s1 = inlined_call_operand.vmem [shape: f32[4,1,256], index: 1, kind: input, shape index: {}]   ;;  %s10975_s2 = inlined_call_operand.vmem [shape: f32[4,1,256], index: 2, kind: input, shape index: {}]   ;;  %s10976_s3 = inlined_call_operand.vmem [shape: s8[4,256,3072], index: 3, kind: input, shape index: {}]   ;;  %s10977_s4 = inlined_call_operand.vmem [shape: f32[4,1,3072], index: 4, kind: input, shape index: {}]   ;;  %s10978_s5 = inlined_call_operand.vmem [shape: s8[4,1024,256], index: 5, kind: input, shape index: {}]   ;;  %s10979_s6 = inlined_call_operand.vmem [shape: f32[4,1,256], index: 6, kind: input, shape index: {}]   ;;  %s10980_s7 = inlined_call_operand.vmem [shape: f32[4,1,256], index: 7, kind: input, shape index: {}]   ;;  %s10981_s8 = inlined_call_operand.vmem [shape: f32[4,1,256], index: 8, kind: input, shape index: {}]   ;;  %s10982_s9 = inlined_call_operand.vmem [shape: f32[4,1,256], index: 9, kind: input, shape index: {}]   ;;  %s10983_s10 = inlined_call_operand.vmem [shape: s8[4,256,1024], index: 10, kind: input, shape index: {}]   ;;  %s10984_s11 = inlined_call_operand.vmem [shape: f32[4,1,1024], index: 11, kind: input, shape index: {}]   ;;  %s10985_s12 = inlined_call_operand.vmem [shape: f32[4,1,1024], index: 12, kind: input, shape index: {}]   ;;  %s10986_s13 = inlined_call_operand.vmem [shape: s8[4,1024,256], index: 13, kind: input, shape index: {}]   ;;  %s10987_s14 = inlined_call_operand.vmem [shape: f32[4,1,256], index: 14, kind: input, shape index: {}]   ;;  %s10988_s15 = inlined_call_operand.vmem [shape: f32[4,1,256], index: 15, kind: input, shape index: {}]   ;;  %s10989_s16 = inlined_call_operand.vmem [shape: f32[4,8,256], index: 16, kind: output, shape index: {}]  }
   0x1   :  { %11004 = sst [smem:[#allocation27_spill]] %s10973_s0 }
   0x2   :  { %11005 = sst [smem:[#allocation28_spill]] %s10975_s2 }
   0x3   :  { %11006 = sst [smem:[#allocation29_spill]] %s10976_s3 }
   0x4   :  { %11007 = sst [smem:[#allocation30_spill]] %s10977_s4 }
   0x5   :  { %11008 = sst [smem:[#allocation31_spill]] %s10978_s5 }
   0x6   :  { %11009 = sst [smem:[#allocation32_spill]] %s10982_s9 }
   0x7   :  { %11010 = sst [smem:[#allocation33_spill]] %s10983_s10 }
   0x8   :  { %11011 = sst [smem:[#allocation34_spill]] %s10984_s11 }
   0x9   :  { %11012 = sst [smem:[#allocation35_spill]] %s10985_s12 }
   0xa   :  { %11013 = sst [smem:[#allocation36_spill]] %s10987_s14 }
   0xb   :  { %11014 = sst [smem:[#allocation37_spill]] %s10988_s15 }
   0xc   :  { %11015 = sst [smem:[#allocation38_spill]] %s10989_s16 }
   0xd LB: > { %11016 = sst [smem:[#allocation2_spill]] %s8538_s21  ;;  %s7680_s22 = sadd.s32 4294967295, %s8538_s21   ;;  %s8538_s21 = sphi %s8627_s21, %s26_s21  }
   0xe   : > { %p7683_p0 = scmp.ge.s32.totalorder %s8538_s21, 1  ;;  %p586_p1 = scmp.lt.s32.totalorder %s8538_s21, 5 }
  0x10   : > { %p587_p2 = pnand %p7683_p0, %p586_p1 }
  0x12   : > { %590 = sbr.rel (%p587_p2) target bundleno = 3108 (0xc24), region = 84 }
  0x19   : > { %p690_p3 = scmp.lt.s32.totalorder %s7680_s22, 3  ;;  %s11018_s3 = sld [smem:[#allocation29_spill]] }
  0x1a   : > { %s11019_s4 = sld [smem:[#allocation30_spill]]  ;;  %s11020_s5 = sld [smem:[#allocation31_spill]] }
  0x1b   : > { %s691_s23 = scalar_select %p690_p3, %s7680_s22, 3 }
  0x1c   : > { %s11022_s10 = sld [smem:[#allocation33_spill]]  ;;  %s11023_s11 = sld [smem:[#allocation34_spill]] }
  0x1d   : > { %s8635_s24 = sshll.u32 %s691_s23, 1  ;;  %s8299_s25 = smul.u32 1536, %s691_s23 }
  0x1e   : > { %s8300_s20 = smul.u32 24, %s691_s23  ;;  %s7736_s21 = sshll.u32 %s691_s23, 9 }
  0x1f   : > { %s8648_s19 = scalar_lea.vmem %s11018_s3, %s8299_s25  ;;  %s7695_s29 = sshll.u32 %s691_s23, 3 }
  0x20   : > { %s8657_s27 = scalar_lea.vmem %s11019_s4, %s8300_s20  ;;  %s8662_s0 = scalar_lea.vmem %s11020_s5, %s7736_s21 }
  0x21   : > { %s8684_s5 = scalar_lea.vmem %s10986_s13, %s7736_s21  ;;  %s11024_s15 = sld [smem:[#allocation35_spill]] }
  0x22   : > { %s8679_s26 = scalar_lea.vmem %s11022_s10, %s7736_s21  ;;  %s8689_s3 = scalar_lea.vmem %s11023_s11, %s7695_s29 }
  0x23   : > { %s11025_s20 = sld [smem:[#allocation36_spill]]  ;;  %s11026_s9 = sld [smem:[#allocation37_spill]] }
  0x24   : > { %p7701_p4 = scmp.ne.s32.totalorder %s7680_s22, 0 }
  0x25   : > { %s11027_s17 = sld [smem:[#allocation27_spill]] (!%p7701_p4) }
  0x26   : > { %758 = sbr.rel (%p7701_p4) target bundleno = 49 (0x31), region = 88 }
  0x27   : > { %s8694_s16 = scalar_lea.vmem %s11024_s15, %s7695_s29  ;;  %s11028_s15 = sld [smem:[#allocation38_spill]] (!%p7701_p4) }
  0x29   : > { %s749_s25 = scalar_lea.vmem %s11025_s20, %s8635_s24  ;;  %s753_s4 = scalar_lea.vmem %s11026_s9, %s8635_s24 }
  0x2b   : > { %v759_v0 = vld [vmem:[%s11027_s17] sm:$0xff] (!%p7701_p4)  ;;  %v760_v1 = vld [vmem:[%s11027_s17 + $0x8] sm:$0xff] (!%p7701_p4)  ;;  %v761_v2 = vld [vmem:[%s11027_s17 + $0x10] sm:$0xff] (!%p7701_p4) }
  0x2c   : > { %v762_v3 = vld [vmem:[%s11027_s17 + $0x18] sm:$0xff] (!%p7701_p4)  ;;  %v763_v4 = vld [vmem:[%s11027_s17 + $0x20] sm:$0xff] (!%p7701_p4)  ;;  %v764_v5 = vld [vmem:[%s11027_s17 + $0x28] sm:$0xff] (!%p7701_p4) }
  0x2d   : > { %767 = vst [vmem:[%s11028_s15] sm:$0xff] %v759_v0  ;;  %768 = vst [vmem:[%s11028_s15 + $0x8] sm:$0xff] %v760_v1  ;;  %v765_v6 = vld [vmem:[%s11027_s17 + $0x30] sm:$0xff]  ;;  %v766_v7 = vld [vmem:[%s11027_s17 + $0x38] sm:$0xff] }
  0x2e   : > { %769 = vst [vmem:[%s11028_s15 + $0x10] sm:$0xff] %v761_v2  ;;  %770 = vst [vmem:[%s11028_s15 + $0x18] sm:$0xff] %v762_v3 }
  0x2f   : > { %771 = vst [vmem:[%s11028_s15 + $0x20] sm:$0xff] %v763_v4  ;;  %772 = vst [vmem:[%s11028_s15 + $0x28] sm:$0xff] %v764_v5 }
  0x30   : > { %773 = vst [vmem:[%s11028_s15 + $0x30] sm:$0xff] %v765_v6  ;;  %774 = vst [vmem:[%s11028_s15 + $0x38] sm:$0xff] %v766_v7 }
  0x31 PF: > { %s11029_s14 = sld [smem:[#allocation38_spill]]  ;;  %v893_v20 = vld [vmem:[%s8648_s19 + $0x8] sm:$0xff]  ;;  %v892_v22 = vld [vmem:[%s8648_s19] sm:$0xff]  ;;  %s11032_s9 = scalar_lea.vmem %s10974_s1, %s8635_s24  ;;  %vm8541_vm0 = vmmov 0   ;;  %vm3734_vm1 = vcmask 64512   ;;  %vm4122_vm2 = vcmask 1043456  }
  0x32   : > { %v901_v21 = vld [vmem:[%s8648_s19 + $0x48] sm:$0xff]  ;;  %v1085_v23 = vunpack.c.l.s8.bf16 %v893_v20  ;;  %v1109_v24 = vunpack.c.h.s8.bf16 %v893_v20  ;;  %v900_v27 = vld [vmem:[%s8648_s19 + $0x40] sm:$0xff]  ;;  %v1084_v28 = vunpack.c.l.s8.bf16 %v892_v22  ;;  %v1108_v32 = vunpack.c.h.s8.bf16 %v892_v22  ;;  %s11033_s12 = sld [smem:[#allocation28_spill]]  ;;  %s11084_s21 = scalar_lea.vmem %s10980_s7, %s8635_s24 }
  0x33   : > { %v1093_v25 = vunpack.c.l.s8.bf16 %v901_v21  ;;  %v1117_v26 = vunpack.c.h.s8.bf16 %v901_v21  ;;  %v1092_v29 = vunpack.c.l.s8.bf16 %v900_v27  ;;  %v917_v30 = vld [vmem:[%s8648_s19 + $0xc8] sm:$0xff]  ;;  %v1116_v33 = vunpack.c.h.s8.bf16 %v900_v27  ;;  %v916_v36 = vld [vmem:[%s8648_s19 + $0xc0] sm:$0xff]  ;;  %s11087_s18 = scalar_lea.vmem %s10981_s8, %s8635_s24  ;;  %s11088_s28 = sld [smem:[#allocation32_spill]] }
  0x34   : > { %v925_v31 = vld [vmem:[%s8648_s19 + $0x108] sm:$0xff]  ;;  %1468 = vmatprep.subr.bf16.mxu1 %v1085_v23  ;;  %v1133_v34 = vunpack.c.l.s8.bf16 %v917_v30  ;;  %v924_v37 = vld [vmem:[%s8648_s19 + $0x100] sm:$0xff]  ;;  %v1132_v38 = vunpack.c.l.s8.bf16 %v916_v36  ;;  %v1157_v40 = vunpack.c.h.s8.bf16 %v917_v30  ;;  %v1156_v44 = vunpack.c.h.s8.bf16 %v916_v36 }
  0x35   : > { %1680 = vmatprep.subr.bf16.mxu0 %v1093_v25  ;;  %1469 = vmatpush1.bf16.msra.mxu1 %v1084_v28  ;;  %v1141_v35 = vunpack.c.l.s8.bf16 %v925_v31  ;;  %v1140_v39 = vunpack.c.l.s8.bf16 %v924_v37  ;;  %v1165_v41 = vunpack.c.h.s8.bf16 %v925_v31  ;;  %v941_v42 = vld [vmem:[%s8648_s19 + $0x188] sm:$0xff]  ;;  %v1164_v45 = vunpack.c.h.s8.bf16 %v924_v37  ;;  %v940_v48 = vld [vmem:[%s8648_s19 + $0x180] sm:$0xff] }
  0x36   : > { %1681 = vmatpush1.bf16.msra.mxu0 %v1092_v29  ;;  %1470 = vmatprep.subr.bf16.mxu1 %v1109_v24  ;;  %v949_v43 = vld [vmem:[%s8648_s19 + $0x1c8] sm:$0xff]  ;;  %v1181_v46 = vunpack.c.l.s8.bf16 %v941_v42  ;;  %v948_v49 = vld [vmem:[%s8648_s19 + $0x1c0] sm:$0xff]  ;;  %v1180_v50 = vunpack.c.l.s8.bf16 %v940_v48  ;;  %v1205_v52 = vunpack.c.h.s8.bf16 %v941_v42  ;;  %v1204_v56 = vunpack.c.h.s8.bf16 %v940_v48 }
  0x37   : > { %v8755_v8 = vld [vmem:[%s11029_s14] sm:$0xff]  ;;  %v8760_v9 = vld [vmem:[%s11029_s14 + $0x8] sm:$0xff]  ;;  %v8777_v13 = vld [vmem:[%s11029_s14 + $0x10] sm:$0xff]  ;;  %1682 = vmatprep.subr.bf16.mxu0 %v1117_v26  ;;  %v1189_v47 = vunpack.c.l.s8.bf16 %v949_v43  ;;  %v1188_v51 = vunpack.c.l.s8.bf16 %v948_v49  ;;  %v1213_v53 = vunpack.c.h.s8.bf16 %v949_v43  ;;  %v1212_v57 = vunpack.c.h.s8.bf16 %v948_v49 }
  0x38   : > { %v8765_v10 = vld [vmem:[%s11029_s14 + $0x20] sm:$0xff]  ;;  %v785_v11 = vadd.f32 %v8760_v9, %v8755_v8  ;;  %v8772_v12 = vld [vmem:[%s11029_s14 + $0x28] sm:$0xff]  ;;  %v8782_v14 = vld [vmem:[%s11029_s14 + $0x18] sm:$0xff]  ;;  %s11034_s20 = scalar_lea.vmem %s11033_s12, %s8635_s24 }
  0x39   : > { %v791_v15 = vadd.f32 %v8772_v12, %v8765_v10  ;;  %v8789_v16 = vld [vmem:[%s11029_s14 + $0x30] sm:$0xff]  ;;  %v8794_v17 = vld [vmem:[%s11029_s14 + $0x38] sm:$0xff]  ;;  %v788_v18 = vadd.f32 %v8782_v14, %v8777_v13  ;;  %1471 = vmatpush1.bf16.msra.mxu1 %v1108_v32  ;;  %v965_v54 = vld [vmem:[%s8648_s19 + $0x248] sm:$0xff]  ;;  %s11089_s10 = scalar_lea.vmem %s11088_s28, %s8635_s24 }
  0x3a   : > { %786 = vadd.xlane.f32.xlu0 %v785_v11  ;;  %v794_v19 = vadd.f32 %v8794_v17, %v8789_v16  ;;  %1683 = vmatpush1.bf16.msra.mxu0 %v1116_v33  ;;  %v973_v55 = vld [vmem:[%s8648_s19 + $0x288] sm:$0xff]  ;;  %v1229_v58 = vunpack.c.l.s8.bf16 %v965_v54  ;;  %v964_v60 = vld [vmem:[%s8648_s19 + $0x240] sm:$0xff]  ;;  %v1253_v0 = vunpack.c.h.s8.bf16 %v965_v54 }
  0x3b   : > { %792 = vadd.xlane.f32.xlu1 %v791_v15  ;;  %1472 = vmatprep.subr.bf16.mxu1 %v1133_v34  ;;  %v1237_v59 = vunpack.c.l.s8.bf16 %v973_v55  ;;  %v972_v61 = vld [vmem:[%s8648_s19 + $0x280] sm:$0xff]  ;;  %v1228_v62 = vunpack.c.l.s8.bf16 %v964_v60  ;;  %v1261_v1 = vunpack.c.h.s8.bf16 %v973_v55  ;;  %v989_v2 = vld [vmem:[%s8648_s19 + $0x308] sm:$0xff]  ;;  %v1252_v4 = vunpack.c.h.s8.bf16 %v964_v60 }
  0x3c   : > { %1684 = vmatprep.subr.bf16.mxu0 %v1141_v35  ;;  %v1236_v63 = vunpack.c.l.s8.bf16 %v972_v61  ;;  %v997_v3 = vld [vmem:[%s8648_s19 + $0x348] sm:$0xff]  ;;  %v1260_v5 = vunpack.c.h.s8.bf16 %v972_v61  ;;  %v1277_v6 = vunpack.c.l.s8.bf16 %v989_v2  ;;  %v988_v11 = vld [vmem:[%s8648_s19 + $0x300] sm:$0xff]  ;;  %v1301_v20 = vunpack.c.h.s8.bf16 %v989_v2 }
  0x3d   : > { %1473 = vmatpush1.bf16.msra.mxu1 %v1132_v38  ;;  %v1285_v7 = vunpack.c.l.s8.bf16 %v997_v3  ;;  %v996_v15 = vld [vmem:[%s8648_s19 + $0x340] sm:$0xff]  ;;  %v1309_v21 = vunpack.c.h.s8.bf16 %v997_v3  ;;  %v1300_v42 = vunpack.c.h.s8.bf16 %v988_v11 }
  0x3e   : > { %789 = vadd.xlane.f32.xlu0 %v788_v18  ;;  %1685 = vmatpush1.bf16.msra.mxu0 %v1140_v39  ;;  %v1276_v18 = vunpack.c.l.s8.bf16 %v988_v11  ;;  %v1308_v43 = vunpack.c.h.s8.bf16 %v996_v15  ;;  %v1012_v48 = vld [vmem:[%s8648_s19 + $0x3c0] sm:$0xff] }
  0x3f   : > { %795 = vadd.xlane.f32.xlu1 %v794_v19  ;;  %1474 = vmatprep.subr.bf16.mxu1 %v1157_v40  ;;  %v1284_v19 = vunpack.c.l.s8.bf16 %v996_v15  ;;  %v1020_v49 = vld [vmem:[%s8648_s19 + $0x400] sm:$0xff]  ;;  %v1348_v54 = vunpack.c.h.s8.bf16 %v1012_v48 }
  0x40   : > { %1686 = vmatprep.subr.bf16.mxu0 %v1165_v41  ;;  %v1356_v55 = vunpack.c.h.s8.bf16 %v1020_v49  ;;  %v1036_v60 = vld [vmem:[%s8648_s19 + $0x480] sm:$0xff] }
  0x41   : > { %1475 = vmatpush1.bf16.msra.mxu1 %v1156_v44  ;;  %v1013_v44 = vld [vmem:[%s8648_s19 + $0x3c8] sm:$0xff]  ;;  %v1044_v61 = vld [vmem:[%s8648_s19 + $0x4c0] sm:$0xff]  ;;  %v1396_v2 = vunpack.c.h.s8.bf16 %v1036_v60 }
  0x42   : > { %1687 = vmatpush1.bf16.msra.mxu0 %v1164_v45  ;;  %1476 = vmatprep.subr.bf16.mxu1 %v1181_v46  ;;  %v1021_v45 = vld [vmem:[%s8648_s19 + $0x408] sm:$0xff]  ;;  %v1325_v46 = vunpack.c.l.s8.bf16 %v1013_v44  ;;  %v1404_v3 = vunpack.c.h.s8.bf16 %v1044_v61  ;;  %v1060_v11 = vld [vmem:[%s8648_s19 + $0x540] sm:$0xff] }
  0x43   : > { %1688 = vmatprep.subr.bf16.mxu0 %v1189_v47  ;;  %v1333_v47 = vunpack.c.l.s8.bf16 %v1021_v45  ;;  %v1068_v15 = vld [vmem:[%s8648_s19 + $0x580] sm:$0xff] }
  0x45   : > { %1477 = vmatpush1.bf16.msra.mxu1 %v1180_v50  ;;  %v1324_v50 = vunpack.c.l.s8.bf16 %v1012_v48  ;;  %v784_v48 = vld [vmem:[%s11034_s20] sm:$0x3] }
  0x46   : > { %1689 = vmatpush1.bf16.msra.mxu0 %v1188_v51  ;;  %1478 = vmatprep.subr.bf16.mxu1 %v1205_v52  ;;  %v1332_v51 = vunpack.c.l.s8.bf16 %v1020_v49  ;;  %v1349_v52 = vunpack.c.h.s8.bf16 %v1013_v44  ;;  %v783_v44 = vld [vmem:[%s11032_s9] sm:$0x3] }
  0x47   : > { %1690 = vmatprep.subr.bf16.mxu0 %v1213_v53  ;;  %v1357_v53 = vunpack.c.h.s8.bf16 %v1021_v45 }
  0x49   : > { %1479 = vmatpush1.bf16.msra.mxu1 %v1204_v56  ;;  %v1037_v56 = vld [vmem:[%s8648_s19 + $0x488] sm:$0xff] }
  0x4a   : > { %1691 = vmatpush1.bf16.msra.mxu0 %v1212_v57  ;;  %1480 = vmatprep.subr.bf16.mxu1 %v1229_v58  ;;  %v1045_v57 = vld [vmem:[%s8648_s19 + $0x4c8] sm:$0xff]  ;;  %v1373_v58 = vunpack.c.l.s8.bf16 %v1037_v56 }
  0x4b   : > { %1692 = vmatprep.subr.bf16.mxu0 %v1237_v59  ;;  %v1381_v59 = vunpack.c.l.s8.bf16 %v1045_v57 }
  0x4d   : > { %1481 = vmatpush1.bf16.msra.mxu1 %v1228_v62  ;;  %v1372_v62 = vunpack.c.l.s8.bf16 %v1036_v60 }
  0x4e   : > { %1693 = vmatpush1.bf16.msra.mxu0 %v1236_v63  ;;  %1482 = vmatprep.subr.bf16.mxu1 %v1253_v0  ;;  %v1380_v63 = vunpack.c.l.s8.bf16 %v1044_v61  ;;  %v1397_v0 = vunpack.c.h.s8.bf16 %v1037_v56 }
  0x4f   : > { %1694 = vmatprep.subr.bf16.mxu0 %v1261_v1  ;;  %v1405_v1 = vunpack.c.h.s8.bf16 %v1045_v57 }
  0x51   : > { %1483 = vmatpush1.bf16.msra.mxu1 %v1252_v4  ;;  %v1061_v4 = vld [vmem:[%s8648_s19 + $0x548] sm:$0xff] }
  0x52   : > { %1695 = vmatpush1.bf16.msra.mxu0 %v1260_v5  ;;  %1484 = vmatprep.subr.bf16.mxu1 %v1277_v6  ;;  %v1069_v5 = vld [vmem:[%s8648_s19 + $0x588] sm:$0xff]  ;;  %v1421_v6 = vunpack.c.l.s8.bf16 %v1061_v4 }
  0x53   : > { %1696 = vmatprep.subr.bf16.mxu0 %v1285_v7  ;;  %v1429_v7 = vunpack.c.l.s8.bf16 %v1069_v5 }
  0x55   : > { %1485 = vmatpush1.bf16.msra.mxu1 %v1276_v18  ;;  %v1420_v18 = vunpack.c.l.s8.bf16 %v1060_v11 }
  0x56   : > { %1697 = vmatpush1.bf16.msra.mxu0 %v1284_v19  ;;  %1486 = vmatprep.subr.bf16.mxu1 %v1301_v20  ;;  %v1428_v19 = vunpack.c.l.s8.bf16 %v1068_v15  ;;  %v1445_v20 = vunpack.c.h.s8.bf16 %v1061_v4 }
  0x57   : > { %1698 = vmatprep.subr.bf16.mxu0 %v1309_v21  ;;  %v1453_v21 = vunpack.c.h.s8.bf16 %v1069_v5 }
  0x59   : > { %1487 = vmatpush1.bf16.msra.mxu1 %v1300_v42 }
  0x5a   : > { %1699 = vmatpush1.bf16.msra.mxu0 %v1308_v43  ;;  %1488 = vmatprep.subr.bf16.mxu1 %v1325_v46 }
  0x5b   : > { %1700 = vmatprep.subr.bf16.mxu0 %v1333_v47 }
  0x5d   : > { %1489 = vmatpush1.bf16.msra.mxu1 %v1324_v50 }
  0x5e   : > { %1701 = vmatpush1.bf16.msra.mxu0 %v1332_v51  ;;  %1490 = vmatprep.subr.bf16.mxu1 %v1349_v52 }
  0x5f   : > { %1702 = vmatprep.subr.bf16.mxu0 %v1357_v53 }
  0x61   : > { %1491 = vmatpush1.bf16.msra.mxu1 %v1348_v54 }
  0x62   : > { %1703 = vmatpush1.bf16.msra.mxu0 %v1356_v55  ;;  %1492 = vmatprep.subr.bf16.mxu1 %v1373_v58 }
  0x63   : > { %1704 = vmatprep.subr.bf16.mxu0 %v1381_v59 }
  0x65   : > { %1493 = vmatpush1.bf16.msra.mxu1 %v1372_v62 }
  0x66   : > { %1705 = vmatpush1.bf16.msra.mxu0 %v1380_v63  ;;  %1494 = vmatprep.subr.bf16.mxu1 %v1397_v0 }
  0x67   : > { %1706 = vmatprep.subr.bf16.mxu0 %v1405_v1  ;;  %v904_v1 = vld [vmem:[%s8648_s19 + $0x60] sm:$0xff] }
  0x69   : > { %1495 = vmatpush1.bf16.msra.mxu1 %v1396_v2 }
  0x6a   : > { %1707 = vmatpush1.bf16.msra.mxu0 %v1404_v3  ;;  %1496 = vmatprep.subr.bf16.mxu1 %v1421_v6 }
  0x6b   : > { %1708 = vmatprep.subr.bf16.mxu0 %v1429_v7 }
  0x6d   : > { %1497 = vmatpush1.bf16.msra.mxu1 %v1420_v18 }
  0x6e   : > { %1709 = vmatpush1.bf16.msra.mxu0 %v1428_v19  ;;  %1498 = vmatprep.subr.bf16.mxu1 %v1445_v20 }
  0x6f   : > { %1710 = vmatprep.subr.bf16.mxu0 %v1453_v21 }
  0xc7   : > { %v787_v22 = vpop.xlane.xlu0 %786 }
  0xc8   : > { %v798_v23 = vmul.f32 0.00390625, %v787_v22  ;;  %v793_v24 = vpop.xlane.xlu1 %792  ;;  %v1444_v22 = vunpack.c.h.s8.bf16 %v1060_v11  ;;  %v1096_v11 = vunpack.c.l.s8.bf16 %v904_v1 }
  0xc9   : > { %v800_v25 = vmul.f32 0.00390625, %v793_v24  ;;  %v8873_v24 = vld [vmem:[%s8648_s19 + $0x18] sm:$0xff] }
  0xca   : > { %v8821_v26 = vsub.f32 %v8755_v8, %v798_v23  ;;  %v8824_v27 = vsub.f32 %v8760_v9, %v798_v23  ;;  %v1452_v23 = vunpack.c.h.s8.bf16 %v1068_v15  ;;  %1499 = vmatpush1.bf16.msra.mxu1 %v1444_v22  ;;  %v1111_v18 = vunpack.c.h.s8.bf16 %v8873_v24 }
  0xcb   : > { %v8827_v28 = vsub.f32 %v8765_v10, %v800_v25  ;;  %v8830_v29 = vsub.f32 %v8772_v12, %v800_v25  ;;  %v790_v30 = vpop.xlane.xlu0 %789  ;;  %v8876_v25 = vld [vmem:[%s8648_s19 + $0x68] sm:$0xff] }
  0xcc   : > { %v799_v31 = vmul.f32 0.00390625, %v790_v30  ;;  %v796_v32 = vpop.xlane.xlu1 %795  ;;  %v810_v33 = vmul.f32 %v8821_v26, %v8821_v26  ;;  %v811_v34 = vmul.f32 %v8824_v27, %v8824_v27  ;;  %1711 = vmatpush1.bf16.msra.mxu0 %v1452_v23  ;;  %v1087_v30 = vunpack.c.l.s8.bf16 %v8873_v24 }
  0xcd   : > { %v801_v8 = vmul.f32 0.00390625, %v796_v32  ;;  %v814_v9 = vmul.f32 %v8827_v28, %v8827_v28  ;;  %v815_v10 = vmul.f32 %v8830_v29, %v8830_v29  ;;  %v1121_v19 = vunpack.c.h.s8.bf16 %v8876_v25 }
  0xce   : > { %v8841_v35 = vsub.f32 %v8777_v13, %v799_v31  ;;  %v8844_v12 = vsub.f32 %v8782_v14, %v799_v31  ;;  %v818_v36 = vadd.f32 %v811_v34, %v810_v33  ;;  %v1097_v31 = vunpack.c.l.s8.bf16 %v8876_v25  ;;  %1521 = vmatprep.subr.bf16.mxu1 %v1087_v30 }
  0xcf   : > { %v8847_v37 = vsub.f32 %v8789_v16, %v801_v8  ;;  %v8850_v38 = vsub.f32 %v8794_v17, %v801_v8  ;;  %v824_v39 = vadd.f32 %v815_v10, %v814_v9  ;;  %v851_v34 = vlaneseq }
  0xd0   : > { %819 = vadd.xlane.f32.xlu0 %v818_v36  ;;  %v812_v40 = vmul.f32 %v8841_v35, %v8841_v35  ;;  %v813_v13 = vmul.f32 %v8844_v12, %v8844_v12  ;;  %1786 = vmatprep.subr.bf16.mxu0 %v1097_v31  ;;  %v1120_v24 = vunpack.c.h.s8.bf16 %v904_v1 }
  0xd1   : > { %v816_v14 = vmul.f32 %v8847_v37, %v8847_v37  ;;  %v817_v16 = vmul.f32 %v8850_v38, %v8850_v38 }
  0xd2   : > { %v821_v17 = vadd.f32 %v813_v13, %v812_v40  ;;  %v8880_v40 = vshrl.u32 %v851_v34, 7 }
  0xd3   : > { %v827_v41 = vadd.f32 %v817_v16, %v816_v14 }
  0xd4   : > { %825 = vadd.xlane.f32.xlu0 %v824_v39  ;;  %822 = vadd.xlane.f32.xlu1 %v821_v17  ;;  %v8886_v42 = vsub.s32 1, %v8880_v40 }
  0xd6   : > { %11031 = vst [vmem:[#allocation4_spill] sm:$0xff] %v8886_v42  ;;  %v858_v47 = vrot.slane %v783_v44, %v8886_v42  ;;  %v877_v53 = vrot.slane %v784_v48, %v8886_v42 }
  0xd8   : > { %828 = vadd.xlane.f32.xlu1 %v827_v41  ;;  %v8883_v41 = vsub.s32 0, %v8880_v40 }
  0xda   : > { %11030 = vst [vmem:[#allocation3_spill] sm:$0xff] %v8883_v41  ;;  %v854_v46 = vrot.slane %v783_v44, %v8883_v41  ;;  %v873_v52 = vrot.slane %v784_v48, %v8883_v41 }
 0x15d   : > { %v820_v32 = vpop.xlane.xlu0 %819 }
 0x15e   : > { %v830_v33 = vmul.f32 0.00390625, %v820_v32  ;;  %v918_v32 = vld [vmem:[%s8648_s19 + $0xd0] sm:$0xff] }
 0x160   : > { %v834_v8 = vadd.f32 1e-05, %v830_v33  ;;  %v928_v33 = vld [vmem:[%s8648_s19 + $0x120] sm:$0xff] }
 0x161   : > { %v823_v9 = vpop.xlane.xlu1 %822  ;;  %v826_v10 = vpop.xlane.xlu0 %825 }
 0x162   : > { %8311 = vrsqrt.f32 %v834_v8  ;;  %v831_v36 = vmul.f32 0.00390625, %v823_v9  ;;  %v832_v39 = vmul.f32 0.00390625, %v826_v10  ;;  %v1134_v8 = vunpack.c.l.s8.bf16 %v918_v32 }
 0x163   : > { %v1144_v9 = vunpack.c.l.s8.bf16 %v928_v33 }
 0x164   : > { %v835_v13 = vadd.f32 1e-05, %v831_v36  ;;  %v836_v14 = vadd.f32 1e-05, %v832_v39 }
 0x165   : > { %v829_v16 = vpop.xlane.xlu1 %828 }
 0x166   : > { %8313 = vrsqrt.f32 %v835_v13  ;;  %v833_v17 = vmul.f32 0.00390625, %v829_v16  ;;  %v943_v13 = vld [vmem:[%s8648_s19 + $0x198] sm:$0xff]  ;;  %v1158_v16 = vunpack.c.h.s8.bf16 %v918_v32 }
 0x167   : > { %8315 = vrsqrt.f32 %v836_v14  ;;  %v953_v14 = vld [vmem:[%s8648_s19 + $0x1e8] sm:$0xff] }
 0x168   : > { %v837_v43 = vadd.f32 1e-05, %v833_v17  ;;  %v1168_v17 = vunpack.c.h.s8.bf16 %v928_v33  ;;  %v1193_v44 = vunpack.c.l.s8.bf16 %v953_v14 }
 0x16a   : > { %8317 = vrsqrt.f32 %v837_v43  ;;  %v1183_v43 = vunpack.c.l.s8.bf16 %v943_v13 }
 0x16c   : > { %v8312_v45 = vpop.eup %8311 }
 0x16d   : > { %v842_v49 = vmul.f32 %v8312_v45, %v8821_v26  ;;  %v843_v50 = vmul.f32 %v8312_v45, %v8824_v27  ;;  %v894_v26 = vld [vmem:[%s8648_s19 + $0x10] sm:$0xff] }
 0x16e   : > { %v1086_v5 = vunpack.c.l.s8.bf16 %v894_v26  ;;  %v1110_v23 = vunpack.c.h.s8.bf16 %v894_v26  ;;  %v942_v45 = vld [vmem:[%s8648_s19 + $0x190] sm:$0xff] }
 0x16f   : > { %v861_v54 = vmul.f32 %v854_v46, %v842_v49  ;;  %v862_v55 = vmul.f32 %v858_v47, %v843_v50  ;;  %v1207_v49 = vunpack.c.h.s8.bf16 %v943_v13  ;;  %v1217_v50 = vunpack.c.h.s8.bf16 %v953_v14 }
 0x170   : > { %v8314_v51 = vpop.eup %8313 }
 0x171   : > { %v8316_v56 = vpop.eup %8315  ;;  %v844_v57 = vmul.f32 %v8314_v51, %v8841_v35  ;;  %v845_v58 = vmul.f32 %v8314_v51, %v8844_v12  ;;  %v880_v27 = vadd.f32 %v873_v52, %v861_v54  ;;  %v881_v63 = vadd.f32 %v877_v53, %v862_v55  ;;  %v967_v51 = vld [vmem:[%s8648_s19 + $0x258] sm:$0xff] }
 0x172   : > { %v847_v59 = vmul.f32 %v8316_v56, %v8830_v29  ;;  %v846_v12 = vmul.f32 %v8316_v56, %v8827_v28  ;;  %v919_v28 = vld [vmem:[%s8648_s19 + $0xd8] sm:$0xff]  ;;  %v1231_v55 = vunpack.c.l.s8.bf16 %v967_v51 }
 0x173   : > { %v863_v60 = vmul.f32 %v854_v46, %v844_v57  ;;  %v864_v61 = vmul.f32 %v858_v47, %v845_v58  ;;  %v1135_v30 = vunpack.c.l.s8.bf16 %v919_v28  ;;  %v1159_v36 = vunpack.c.h.s8.bf16 %v919_v28  ;;  %v966_v57 = vld [vmem:[%s8648_s19 + $0x250] sm:$0xff]  ;;  %v976_v58 = vld [vmem:[%s8648_s19 + $0x2a0] sm:$0xff] }
 0x174   : > { %v8318_v62 = vpop.eup %8317  ;;  %v866_v0 = vmul.f32 %v858_v47, %v847_v59  ;;  %v1230_v59 = vunpack.c.l.s8.bf16 %v966_v57  ;;  %v1014_v28 = vld [vmem:[%s8648_s19 + $0x3d0] sm:$0xff] }
 0x175   : > { %v882_v2 = vadd.f32 %v873_v52, %v863_v60  ;;  %v883_v3 = vadd.f32 %v877_v53, %v864_v61  ;;  %v848_v4 = vmul.f32 %v8318_v62, %v8847_v37  ;;  %v849_v35 = vmul.f32 %v8318_v62, %v8850_v38  ;;  %v929_v37 = vld [vmem:[%s8648_s19 + $0x128] sm:$0xff]  ;;  %v991_v62 = vld [vmem:[%s8648_s19 + $0x318] sm:$0xff] }
 0x176   : > { %v885_v20 = vadd.f32 %v877_v53, %v866_v0  ;;  %v865_v38 = vmul.f32 %v854_v46, %v846_v12  ;;  %v1145_v31 = vunpack.c.l.s8.bf16 %v929_v37  ;;  %v1169_v39 = vunpack.c.h.s8.bf16 %v929_v37  ;;  %v1024_v37 = vld [vmem:[%s8648_s19 + $0x420] sm:$0xff] }
 0x177   : > { %v8912_v29 = vpack.c.bf16 %v882_v2, %v880_v27  ;;  %v8914_v6 = vpack.c.bf16 %v883_v3, %v881_v63  ;;  %v868_v7 = vmul.f32 %v858_v47, %v849_v35  ;;  %v867_v15 = vmul.f32 %v854_v46, %v848_v4  ;;  %v952_v46 = vld [vmem:[%s8648_s19 + $0x1e0] sm:$0xff]  ;;  %v1001_v27 = vld [vmem:[%s8648_s19 + $0x368] sm:$0xff]  ;;  %v990_v3 = vld [vmem:[%s8648_s19 + $0x310] sm:$0xff] }
 0x178   : > { %v884_v34 = vadd.f32 %v873_v52, %v865_v38  ;;  %v1182_v47 = vunpack.c.l.s8.bf16 %v942_v45  ;;  %v1192_v48 = vunpack.c.l.s8.bf16 %v952_v46  ;;  %v1216_v54 = vunpack.c.h.s8.bf16 %v952_v46  ;;  %v1000_v4 = vld [vmem:[%s8648_s19 + $0x360] sm:$0xff] }
 0x179   : > { %v887_v21 = vadd.f32 %v877_v53, %v868_v7  ;;  %1500 = vmatprep.mubr.bf16.mxu1 %v8914_v6  ;;  %1712 = vmatprep.mubr.bf16.mxu0 %v8914_v6  ;;  %v886_v25 = vadd.f32 %v873_v52, %v867_v15  ;;  %v977_v52 = vld [vmem:[%s8648_s19 + $0x2a8] sm:$0xff]  ;;  %v1206_v53 = vunpack.c.h.s8.bf16 %v942_v45  ;;  %v1240_v60 = vunpack.c.l.s8.bf16 %v976_v58 }
 0x17a   : > { %1501 = vmatmul.mubr.bf16.vlgmr.msra.gmra.mrb[0].mxu1 %v8912_v29  ;;  %1713 = vmatmul.mubr.bf16.vlgmr.msra.gmra.mrb[0].mxu0 %v8912_v29  ;;  %v1241_v56 = vunpack.c.l.s8.bf16 %v977_v52  ;;  %v1255_v61 = vunpack.c.h.s8.bf16 %v967_v51  ;;  %v1265_v26 = vunpack.c.h.s8.bf16 %v977_v52  ;;  %v1254_v63 = vunpack.c.h.s8.bf16 %v966_v57  ;;  %v1025_v15 = vld [vmem:[%s8648_s19 + $0x428] sm:$0xff] }
 0x17b   : > { %v8924_v22 = vpack.c.bf16 %v887_v21, %v885_v20  ;;  %1522 = vmatpush1.bf16.msra.mxu1 %v1086_v5  ;;  %1787 = vmatpush1.bf16.msra.mxu0 %v1096_v11  ;;  %v8930_v10 = vpack.c.bf16 %v886_v25, %v884_v34  ;;  %v1264_v0 = vunpack.c.h.s8.bf16 %v976_v58  ;;  %v1279_v1 = vunpack.c.l.s8.bf16 %v991_v62  ;;  %v1015_v11 = vld [vmem:[%s8648_s19 + $0x3d8] sm:$0xff] }
 0x17c   : > { %1523 = vmatprep.subr.bf16.mxu1 %v1111_v18  ;;  %1788 = vmatprep.subr.bf16.mxu0 %v1121_v19  ;;  %v1289_v2 = vunpack.c.l.s8.bf16 %v1001_v27  ;;  %v1278_v35 = vunpack.c.l.s8.bf16 %v990_v3  ;;  %v1288_v12 = vunpack.c.l.s8.bf16 %v1000_v4  ;;  %v1303_v5 = vunpack.c.h.s8.bf16 %v991_v62 }
 0x17d   : > { %1510 = vmatprep.mubr.bf16.mxu1 %v8924_v22  ;;  %1722 = vmatprep.mubr.bf16.mxu0 %v8924_v22  ;;  %v1313_v7 = vunpack.c.h.s8.bf16 %v1001_v27  ;;  %v1302_v18 = vunpack.c.h.s8.bf16 %v990_v3  ;;  %v1312_v19 = vunpack.c.h.s8.bf16 %v1000_v4  ;;  %v1327_v20 = vunpack.c.l.s8.bf16 %v1015_v11 }
 0x17e   : > { %v1337_v21 = vunpack.c.l.s8.bf16 %v1025_v15  ;;  %v1326_v38 = vunpack.c.l.s8.bf16 %v1014_v28  ;;  %v1361_v25 = vunpack.c.h.s8.bf16 %v1025_v15  ;;  %v1350_v32 = vunpack.c.h.s8.bf16 %v1014_v28 }
 0x17f   : > { %1524 = vmatpush1.bf16.msra.mxu1 %v1110_v23  ;;  %1789 = vmatpush1.bf16.msra.mxu0 %v1120_v24  ;;  %v1336_v23 = vunpack.c.l.s8.bf16 %v1024_v37  ;;  %v1351_v24 = vunpack.c.h.s8.bf16 %v1015_v11  ;;  %v1360_v33 = vunpack.c.h.s8.bf16 %v1024_v37 }
 0x180   : > { %1525 = vmatprep.subr.bf16.mxu1 %v1135_v30  ;;  %1790 = vmatprep.subr.bf16.mxu0 %v1145_v31  ;;  %v1039_v30 = vld [vmem:[%s8648_s19 + $0x498] sm:$0xff]  ;;  %v1049_v31 = vld [vmem:[%s8648_s19 + $0x4e8] sm:$0xff] }
 0x181   : > { %v1375_v34 = vunpack.c.l.s8.bf16 %v1039_v30  ;;  %v1399_v14 = vunpack.c.h.s8.bf16 %v1039_v30 }
 0x182   : > { %1511 = vmatmul.mubr.bf16.gmra.mrb[4].mxu1 %v8930_v10  ;;  %1723 = vmatmul.mubr.bf16.gmra.mrb[4].mxu0 %v8930_v10 }
 0x183   : > { %1526 = vmatpush1.bf16.msra.mxu1 %v1134_v8  ;;  %1791 = vmatpush1.bf16.msra.mxu0 %v1144_v9  ;;  %v1385_v8 = vunpack.c.l.s8.bf16 %v1049_v31  ;;  %v1038_v9 = vld [vmem:[%s8648_s19 + $0x490] sm:$0xff] }
 0x184   : > { %1553 = vmatprep.mubr.bf16.mxu1 %v8914_v6  ;;  %1818 = vmatprep.mubr.bf16.mxu0 %v8914_v6 }
 0x185   : > { %1527 = vmatprep.subr.bf16.mxu1 %v1159_v36  ;;  %1792 = vmatprep.subr.bf16.mxu0 %v1169_v39  ;;  %v1048_v36 = vld [vmem:[%s8648_s19 + $0x4e0] sm:$0xff]  ;;  %v1374_v39 = vunpack.c.l.s8.bf16 %v1038_v9 }
 0x186   : > { %v1384_v13 = vunpack.c.l.s8.bf16 %v1048_v36  ;;  %v1408_v45 = vunpack.c.h.s8.bf16 %v1048_v36 }
 0x187   : > { %1528 = vmatpush1.bf16.msra.mxu1 %v1158_v16  ;;  %1793 = vmatpush1.bf16.msra.mxu0 %v1168_v17  ;;  %v1409_v16 = vunpack.c.h.s8.bf16 %v1049_v31  ;;  %v1063_v17 = vld [vmem:[%s8648_s19 + $0x558] sm:$0xff] }
 0x188   : > { %1529 = vmatprep.subr.bf16.mxu1 %v1183_v43  ;;  %1794 = vmatprep.subr.bf16.mxu0 %v1193_v44  ;;  %v1073_v43 = vld [vmem:[%s8648_s19 + $0x5a8] sm:$0xff]  ;;  %v1398_v44 = vunpack.c.h.s8.bf16 %v1038_v9  ;;  %v1423_v46 = vunpack.c.l.s8.bf16 %v1063_v17  ;;  %v1447_v52 = vunpack.c.h.s8.bf16 %v1063_v17 }
 0x18b   : > { %1530 = vmatpush1.bf16.msra.mxu1 %v1182_v47  ;;  %1795 = vmatpush1.bf16.msra.mxu0 %v1192_v48  ;;  %v1433_v47 = vunpack.c.l.s8.bf16 %v1073_v43  ;;  %v1062_v48 = vld [vmem:[%s8648_s19 + $0x550] sm:$0xff] }
 0x18c   : > { %1531 = vmatprep.subr.bf16.mxu1 %v1207_v49  ;;  %1796 = vmatprep.subr.bf16.mxu0 %v1217_v50  ;;  %v1072_v49 = vld [vmem:[%s8648_s19 + $0x5a0] sm:$0xff]  ;;  %v1422_v50 = vunpack.c.l.s8.bf16 %v1062_v48 }
 0x18d   : > { %v1432_v51 = vunpack.c.l.s8.bf16 %v1072_v49  ;;  %v1456_v57 = vunpack.c.h.s8.bf16 %v1072_v49 }
 0x18f   : > { %1532 = vmatpush1.bf16.msra.mxu1 %v1206_v53  ;;  %1797 = vmatpush1.bf16.msra.mxu0 %v1216_v54  ;;  %v1457_v53 = vunpack.c.h.s8.bf16 %v1073_v43  ;;  %v897_v54 = vld [vmem:[%s8648_s19 + $0x28] sm:$0xff] }
 0x190   : > { %1533 = vmatprep.subr.bf16.mxu1 %v1231_v55  ;;  %1798 = vmatprep.subr.bf16.mxu0 %v1241_v56  ;;  %v909_v55 = vld [vmem:[%s8648_s19 + $0x88] sm:$0xff]  ;;  %v1446_v56 = vunpack.c.h.s8.bf16 %v1062_v48  ;;  %v1089_v58 = vunpack.c.l.s8.bf16 %v897_v54  ;;  %v1113_v27 = vunpack.c.h.s8.bf16 %v897_v54 }
 0x193   : > { %1534 = vmatpush1.bf16.msra.mxu1 %v1230_v59  ;;  %1799 = vmatpush1.bf16.msra.mxu0 %v1240_v60  ;;  %v1101_v59 = vunpack.c.l.s8.bf16 %v909_v55  ;;  %v896_v60 = vld [vmem:[%s8648_s19 + $0x20] sm:$0xff] }
 0x194   : > { %1535 = vmatprep.subr.bf16.mxu1 %v1255_v61  ;;  %1800 = vmatprep.subr.bf16.mxu0 %v1265_v26  ;;  %v908_v61 = vld [vmem:[%s8648_s19 + $0x80] sm:$0xff]  ;;  %v1088_v26 = vunpack.c.l.s8.bf16 %v896_v60 }
 0x195   : > { %v1100_v62 = vunpack.c.l.s8.bf16 %v908_v61  ;;  %v1124_v3 = vunpack.c.h.s8.bf16 %v908_v61 }
 0x197   : > { %1536 = vmatpush1.bf16.msra.mxu1 %v1254_v63  ;;  %1801 = vmatpush1.bf16.msra.mxu0 %v1264_v0  ;;  %v1125_v63 = vunpack.c.h.s8.bf16 %v909_v55  ;;  %v921_v0 = vld [vmem:[%s8648_s19 + $0xe8] sm:$0xff] }
 0x198   : > { %1537 = vmatprep.subr.bf16.mxu1 %v1279_v1  ;;  %1802 = vmatprep.subr.bf16.mxu0 %v1289_v2  ;;  %v933_v1 = vld [vmem:[%s8648_s19 + $0x148] sm:$0xff]  ;;  %v1112_v2 = vunpack.c.h.s8.bf16 %v896_v60  ;;  %v1137_v4 = vunpack.c.l.s8.bf16 %v921_v0  ;;  %v1161_v15 = vunpack.c.h.s8.bf16 %v921_v0 }
 0x19b   : > { %1538 = vmatpush1.bf16.msra.mxu1 %v1278_v35  ;;  %1803 = vmatpush1.bf16.msra.mxu0 %v1288_v12  ;;  %v920_v35 = vld [vmem:[%s8648_s19 + $0xe0] sm:$0xff]  ;;  %v1149_v12 = vunpack.c.l.s8.bf16 %v933_v1 }
 0x19c   : > { %1539 = vmatprep.subr.bf16.mxu1 %v1303_v5  ;;  %1804 = vmatprep.subr.bf16.mxu0 %v1313_v7  ;;  %v932_v5 = vld [vmem:[%s8648_s19 + $0x140] sm:$0xff]  ;;  %v1136_v7 = vunpack.c.l.s8.bf16 %v920_v35 }
 0x19d   : > { %v1148_v11 = vunpack.c.l.s8.bf16 %v932_v5  ;;  %v1172_v28 = vunpack.c.h.s8.bf16 %v932_v5 }
 0x19f   : > { %1540 = vmatpush1.bf16.msra.mxu1 %v1302_v18  ;;  %1805 = vmatpush1.bf16.msra.mxu0 %v1312_v19  ;;  %v1173_v18 = vunpack.c.h.s8.bf16 %v933_v1  ;;  %v945_v19 = vld [vmem:[%s8648_s19 + $0x1a8] sm:$0xff] }
 0x1a0   : > { %1541 = vmatprep.subr.bf16.mxu1 %v1327_v20  ;;  %1806 = vmatprep.subr.bf16.mxu0 %v1337_v21  ;;  %v957_v20 = vld [vmem:[%s8648_s19 + $0x208] sm:$0xff]  ;;  %v1160_v21 = vunpack.c.h.s8.bf16 %v920_v35  ;;  %v1185_v37 = vunpack.c.l.s8.bf16 %v945_v19  ;;  %v1209_v31 = vunpack.c.h.s8.bf16 %v945_v19 }
 0x1a3   : > { %1542 = vmatpush1.bf16.msra.mxu1 %v1326_v38  ;;  %1807 = vmatpush1.bf16.msra.mxu0 %v1336_v23  ;;  %v944_v38 = vld [vmem:[%s8648_s19 + $0x1a0] sm:$0xff]  ;;  %v1197_v23 = vunpack.c.l.s8.bf16 %v957_v20 }
 0x1a4   : > { %1543 = vmatprep.subr.bf16.mxu1 %v1351_v24  ;;  %1808 = vmatprep.subr.bf16.mxu0 %v1361_v25  ;;  %v956_v24 = vld [vmem:[%s8648_s19 + $0x200] sm:$0xff]  ;;  %v1184_v25 = vunpack.c.l.s8.bf16 %v944_v38 }
 0x1a5   : > { %v1196_v30 = vunpack.c.l.s8.bf16 %v956_v24  ;;  %v1220_v9 = vunpack.c.h.s8.bf16 %v956_v24 }
 0x1a7   : > { %1544 = vmatpush1.bf16.msra.mxu1 %v1350_v32  ;;  %1809 = vmatpush1.bf16.msra.mxu0 %v1360_v33  ;;  %v1221_v32 = vunpack.c.h.s8.bf16 %v957_v20  ;;  %v969_v33 = vld [vmem:[%s8648_s19 + $0x268] sm:$0xff] }
 0x1a8   : > { %1545 = vmatprep.subr.bf16.mxu1 %v1375_v34  ;;  %1810 = vmatprep.subr.bf16.mxu0 %v1385_v8  ;;  %v981_v34 = vld [vmem:[%s8648_s19 + $0x2c8] sm:$0xff]  ;;  %v1208_v8 = vunpack.c.h.s8.bf16 %v944_v38  ;;  %v1233_v36 = vunpack.c.l.s8.bf16 %v969_v33  ;;  %v1257_v43 = vunpack.c.h.s8.bf16 %v969_v33 }
 0x1ab   : > { %1546 = vmatpush1.bf16.msra.mxu1 %v1374_v39  ;;  %1811 = vmatpush1.bf16.msra.mxu0 %v1384_v13  ;;  %v968_v39 = vld [vmem:[%s8648_s19 + $0x260] sm:$0xff]  ;;  %v1245_v13 = vunpack.c.l.s8.bf16 %v981_v34 }
 0x1ac   : > { %1547 = vmatprep.subr.bf16.mxu1 %v1399_v14  ;;  %1812 = vmatprep.subr.bf16.mxu0 %v1409_v16  ;;  %v980_v14 = vld [vmem:[%s8648_s19 + $0x2c0] sm:$0xff]  ;;  %v1232_v16 = vunpack.c.l.s8.bf16 %v968_v39 }
 0x1ad   : > { %v1244_v17 = vunpack.c.l.s8.bf16 %v980_v14  ;;  %v1268_v48 = vunpack.c.h.s8.bf16 %v980_v14 }
 0x1af   : > { %1548 = vmatpush1.bf16.msra.mxu1 %v1398_v44  ;;  %1813 = vmatpush1.bf16.msra.mxu0 %v1408_v45  ;;  %v1269_v44 = vunpack.c.h.s8.bf16 %v981_v34  ;;  %v993_v45 = vld [vmem:[%s8648_s19 + $0x328] sm:$0xff] }
 0x1b0   : > { %1549 = vmatprep.subr.bf16.mxu1 %v1423_v46  ;;  %1814 = vmatprep.subr.bf16.mxu0 %v1433_v47  ;;  %v1005_v46 = vld [vmem:[%s8648_s19 + $0x388] sm:$0xff]  ;;  %v1256_v47 = vunpack.c.h.s8.bf16 %v968_v39  ;;  %v1281_v49 = vunpack.c.l.s8.bf16 %v993_v45  ;;  %v1305_v55 = vunpack.c.h.s8.bf16 %v993_v45 }
 0x1b3   : > { %1550 = vmatpush1.bf16.msra.mxu1 %v1422_v50  ;;  %1815 = vmatpush1.bf16.msra.mxu0 %v1432_v51  ;;  %v992_v50 = vld [vmem:[%s8648_s19 + $0x320] sm:$0xff]  ;;  %v1293_v51 = vunpack.c.l.s8.bf16 %v1005_v46 }
 0x1b4   : > { %1551 = vmatprep.subr.bf16.mxu1 %v1447_v52  ;;  %1816 = vmatprep.subr.bf16.mxu0 %v1457_v53  ;;  %v1004_v52 = vld [vmem:[%s8648_s19 + $0x380] sm:$0xff]  ;;  %v1280_v53 = vunpack.c.l.s8.bf16 %v992_v50 }
 0x1b5   : > { %v1292_v54 = vunpack.c.l.s8.bf16 %v1004_v52  ;;  %v1316_v60 = vunpack.c.h.s8.bf16 %v1004_v52 }
 0x1b7   : > { %1552 = vmatpush1.bf16.msra.mxu1 %v1446_v56  ;;  %1817 = vmatpush1.bf16.msra.mxu0 %v1456_v57  ;;  %v1317_v56 = vunpack.c.h.s8.bf16 %v1005_v46  ;;  %v1017_v57 = vld [vmem:[%s8648_s19 + $0x3e8] sm:$0xff] }
 0x1b8   : > { %1574 = vmatprep.subr.bf16.mxu1 %v1089_v58  ;;  %1892 = vmatprep.subr.bf16.mxu0 %v1101_v59  ;;  %v1029_v58 = vld [vmem:[%s8648_s19 + $0x448] sm:$0xff]  ;;  %v1304_v59 = vunpack.c.h.s8.bf16 %v992_v50  ;;  %v1329_v61 = vunpack.c.l.s8.bf16 %v1017_v57  ;;  %v1353_v1 = vunpack.c.h.s8.bf16 %v1017_v57 }
 0x1ba   : > { %1554 = vmatmul.mubr.bf16.vlgmr.msra.gmra.mrb[8].mxu1 %v8912_v29  ;;  %1819 = vmatmul.mubr.bf16.vlgmr.msra.gmra.mrb[8].mxu0 %v8912_v29 }
 0x1bb   : > { %1563 = vmatprep.mubr.bf16.mxu1 %v8924_v22  ;;  %1575 = vmatpush1.bf16.msra.mxu1 %v1088_v26  ;;  %v1016_v26 = vld [vmem:[%s8648_s19 + $0x3e0] sm:$0xff] }
 0x1bc   : > { %1828 = vmatprep.mubr.bf16.mxu0 %v8924_v22  ;;  %1893 = vmatpush1.bf16.msra.mxu0 %v1100_v62  ;;  %v1341_v62 = vunpack.c.l.s8.bf16 %v1029_v58  ;;  %v1352_v35 = vunpack.c.h.s8.bf16 %v1016_v26 }
 0x1bd   : > { %1576 = vmatprep.subr.bf16.mxu1 %v1113_v27  ;;  %1894 = vmatprep.subr.bf16.mxu0 %v1125_v63  ;;  %v1028_v27 = vld [vmem:[%s8648_s19 + $0x440] sm:$0xff]  ;;  %v1328_v63 = vunpack.c.l.s8.bf16 %v1016_v26 }
 0x1be   : > { %v1340_v0 = vunpack.c.l.s8.bf16 %v1028_v27 }
 0x1bf   : > { %1577 = vmatpush1.bf16.msra.mxu1 %v1112_v2  ;;  %v1365_v2 = vunpack.c.h.s8.bf16 %v1029_v58 }
 0x1c0   : > { %1895 = vmatpush1.bf16.msra.mxu0 %v1124_v3  ;;  %1578 = vmatprep.subr.bf16.mxu1 %v1137_v4  ;;  %v1041_v3 = vld [vmem:[%s8648_s19 + $0x4a8] sm:$0xff] }
 0x1c1   : > { %1896 = vmatprep.subr.bf16.mxu0 %v1149_v12  ;;  %v1053_v4 = vld [vmem:[%s8648_s19 + $0x508] sm:$0xff]  ;;  %v1364_v12 = vunpack.c.h.s8.bf16 %v1028_v27  ;;  %v1377_v5 = vunpack.c.l.s8.bf16 %v1041_v3  ;;  %v1401_v20 = vunpack.c.h.s8.bf16 %v1041_v3 }
 0x1c2   : > { %1564 = vmatmul.mubr.bf16.gmra.mrb[12].mxu1 %v8930_v10  ;;  %1829 = vmatmul.mubr.bf16.gmra.mrb[12].mxu0 %v8930_v10 }
 0x1c3   : > { %1579 = vmatpush1.bf16.msra.mxu1 %v1136_v7  ;;  %1606 = vmatprep.mubr.bf16.mxu1 %v8914_v6  ;;  %v1040_v7 = vld [vmem:[%s8648_s19 + $0x4a0] sm:$0xff] }
 0x1c4   : > { %1897 = vmatpush1.bf16.msra.mxu0 %v1148_v11  ;;  %1924 = vmatprep.mubr.bf16.mxu0 %v8914_v6  ;;  %v1389_v11 = vunpack.c.l.s8.bf16 %v1053_v4  ;;  %v1400_v38 = vunpack.c.h.s8.bf16 %v1040_v7 }
 0x1c5   : > { %1580 = vmatprep.subr.bf16.mxu1 %v1161_v15  ;;  %1898 = vmatprep.subr.bf16.mxu0 %v1173_v18  ;;  %v1052_v15 = vld [vmem:[%s8648_s19 + $0x500] sm:$0xff]  ;;  %v1376_v18 = vunpack.c.l.s8.bf16 %v1040_v7 }
 0x1c6   : > { %v1388_v19 = vunpack.c.l.s8.bf16 %v1052_v15 }
 0x1c7   : > { %1581 = vmatpush1.bf16.msra.mxu1 %v1160_v21  ;;  %v1413_v21 = vunpack.c.h.s8.bf16 %v1053_v4 }
 0x1c8   : > { %1899 = vmatpush1.bf16.msra.mxu0 %v1172_v28  ;;  %1582 = vmatprep.subr.bf16.mxu1 %v1185_v37  ;;  %v1065_v28 = vld [vmem:[%s8648_s19 + $0x568] sm:$0xff] }
 0x1c9   : > { %1900 = vmatprep.subr.bf16.mxu0 %v1197_v23  ;;  %v1077_v37 = vld [vmem:[%s8648_s19 + $0x5c8] sm:$0xff]  ;;  %v1412_v23 = vunpack.c.h.s8.bf16 %v1052_v15  ;;  %v1425_v24 = vunpack.c.l.s8.bf16 %v1065_v28  ;;  %v1449_v34 = vunpack.c.h.s8.bf16 %v1065_v28 }
 0x1cb   : > { %1583 = vmatpush1.bf16.msra.mxu1 %v1184_v25  ;;  %v1064_v25 = vld [vmem:[%s8648_s19 + $0x560] sm:$0xff] }
 0x1cc   : > { %1901 = vmatpush1.bf16.msra.mxu0 %v1196_v30  ;;  %1584 = vmatprep.subr.bf16.mxu1 %v1209_v31  ;;  %v1437_v30 = vunpack.c.l.s8.bf16 %v1077_v37  ;;  %v1076_v31 = vld [vmem:[%s8648_s19 + $0x5c0] sm:$0xff]  ;;  %v1448_v39 = vunpack.c.h.s8.bf16 %v1064_v25 }
 0x1cd   : > { %1902 = vmatprep.subr.bf16.mxu0 %v1221_v32  ;;  %v1424_v32 = vunpack.c.l.s8.bf16 %v1064_v25  ;;  %v1436_v33 = vunpack.c.l.s8.bf16 %v1076_v31 }
 0x1cf   : > { %1585 = vmatpush1.bf16.msra.mxu1 %v1208_v8  ;;  %v1461_v8 = vunpack.c.h.s8.bf16 %v1077_v37 }
 0x1d0   : > { %1903 = vmatpush1.bf16.msra.mxu0 %v1220_v9  ;;  %1586 = vmatprep.subr.bf16.mxu1 %v1233_v36  ;;  %v899_v9 = vld [vmem:[%s8648_s19 + $0x38] sm:$0xff]  ;;  %v913_v36 = vld [vmem:[%s8648_s19 + $0xa8] sm:$0xff] }
 0x1d1   : > { %1904 = vmatprep.subr.bf16.mxu0 %v1245_v13  ;;  %v1460_v13 = vunpack.c.h.s8.bf16 %v1076_v31  ;;  %v1091_v14 = vunpack.c.l.s8.bf16 %v899_v9  ;;  %v1115_v46 = vunpack.c.h.s8.bf16 %v899_v9 }
 0x1d3   : > { %1587 = vmatpush1.bf16.msra.mxu1 %v1232_v16  ;;  %v1105_v16 = vunpack.c.l.s8.bf16 %v913_v36 }
 0x1d4   : > { %1905 = vmatpush1.bf16.msra.mxu0 %v1244_v17  ;;  %1588 = vmatprep.subr.bf16.mxu1 %v1257_v43  ;;  %v898_v17 = vld [vmem:[%s8648_s19 + $0x30] sm:$0xff]  ;;  %v912_v43 = vld [vmem:[%s8648_s19 + $0xa0] sm:$0xff] }
 0x1d5   : > { %1906 = vmatprep.subr.bf16.mxu0 %v1269_v44  ;;  %v1090_v44 = vunpack.c.l.s8.bf16 %v898_v17  ;;  %v1104_v45 = vunpack.c.l.s8.bf16 %v912_v43  ;;  %v1114_v50 = vunpack.c.h.s8.bf16 %v898_v17 }
 0x1d7   : > { %1589 = vmatpush1.bf16.msra.mxu1 %v1256_v47  ;;  %v1129_v47 = vunpack.c.h.s8.bf16 %v913_v36 }
 0x1d8   : > { %1907 = vmatpush1.bf16.msra.mxu0 %v1268_v48  ;;  %1590 = vmatprep.subr.bf16.mxu1 %v1281_v49  ;;  %v923_v48 = vld [vmem:[%s8648_s19 + $0xf8] sm:$0xff]  ;;  %v937_v49 = vld [vmem:[%s8648_s19 + $0x168] sm:$0xff] }
 0x1d9   : > { %1908 = vmatprep.subr.bf16.mxu0 %v1293_v51  ;;  %v1128_v51 = vunpack.c.h.s8.bf16 %v912_v43  ;;  %v1139_v52 = vunpack.c.l.s8.bf16 %v923_v48  ;;  %v1163_v58 = vunpack.c.h.s8.bf16 %v923_v48 }
 0x1db   : > { %1591 = vmatpush1.bf16.msra.mxu1 %v1280_v53  ;;  %v922_v53 = vld [vmem:[%s8648_s19 + $0xf0] sm:$0xff] }
 0x1dc   : > { %1909 = vmatpush1.bf16.msra.mxu0 %v1292_v54  ;;  %1592 = vmatprep.subr.bf16.mxu1 %v1305_v55  ;;  %v1153_v54 = vunpack.c.l.s8.bf16 %v937_v49  ;;  %v936_v55 = vld [vmem:[%s8648_s19 + $0x160] sm:$0xff]  ;;  %v1162_v26 = vunpack.c.h.s8.bf16 %v922_v53 }
 0x1dd   : > { %1910 = vmatprep.subr.bf16.mxu0 %v1317_v56  ;;  %v1138_v56 = vunpack.c.l.s8.bf16 %v922_v53  ;;  %v1152_v57 = vunpack.c.l.s8.bf16 %v936_v55 }
 0x1df   : > { %1593 = vmatpush1.bf16.msra.mxu1 %v1304_v59  ;;  %v1177_v59 = vunpack.c.h.s8.bf16 %v937_v49 }
 0x1e0   : > { %1911 = vmatpush1.bf16.msra.mxu0 %v1316_v60  ;;  %1594 = vmatprep.subr.bf16.mxu1 %v1329_v61  ;;  %v947_v60 = vld [vmem:[%s8648_s19 + $0x1b8] sm:$0xff]  ;;  %v961_v61 = vld [vmem:[%s8648_s19 + $0x228] sm:$0xff] }
 0x1e1   : > { %1912 = vmatprep.subr.bf16.mxu0 %v1341_v62  ;;  %v1176_v62 = vunpack.c.h.s8.bf16 %v936_v55  ;;  %v1187_v27 = vunpack.c.l.s8.bf16 %v947_v60  ;;  %v1211_v4 = vunpack.c.h.s8.bf16 %v947_v60 }
 0x1e3   : > { %1595 = vmatpush1.bf16.msra.mxu1 %v1328_v63  ;;  %v946_v63 = vld [vmem:[%s8648_s19 + $0x1b0] sm:$0xff] }
 0x1e4   : > { %1913 = vmatpush1.bf16.msra.mxu0 %v1340_v0  ;;  %1596 = vmatprep.subr.bf16.mxu1 %v1353_v1  ;;  %v1201_v0 = vunpack.c.l.s8.bf16 %v961_v61  ;;  %v960_v1 = vld [vmem:[%s8648_s19 + $0x220] sm:$0xff]  ;;  %v1210_v7 = vunpack.c.h.s8.bf16 %v946_v63 }
 0x1e5   : > { %1914 = vmatprep.subr.bf16.mxu0 %v1365_v2  ;;  %v1186_v2 = vunpack.c.l.s8.bf16 %v946_v63  ;;  %v1200_v3 = vunpack.c.l.s8.bf16 %v960_v1 }
 0x1e7   : > { %1597 = vmatpush1.bf16.msra.mxu1 %v1352_v35  ;;  %v1225_v35 = vunpack.c.h.s8.bf16 %v961_v61 }
 0x1e8   : > { %1915 = vmatpush1.bf16.msra.mxu0 %v1364_v12  ;;  %1598 = vmatprep.subr.bf16.mxu1 %v1377_v5  ;;  %v971_v12 = vld [vmem:[%s8648_s19 + $0x278] sm:$0xff]  ;;  %v985_v5 = vld [vmem:[%s8648_s19 + $0x2e8] sm:$0xff] }
 0x1e9   : > { %1916 = vmatprep.subr.bf16.mxu0 %v1389_v11  ;;  %v1224_v11 = vunpack.c.h.s8.bf16 %v960_v1  ;;  %v1235_v15 = vunpack.c.l.s8.bf16 %v971_v12  ;;  %v1259_v37 = vunpack.c.h.s8.bf16 %v971_v12 }
 0x1eb   : > { %1599 = vmatpush1.bf16.msra.mxu1 %v1376_v18  ;;  %v970_v18 = vld [vmem:[%s8648_s19 + $0x270] sm:$0xff] }
 0x1ec   : > { %1917 = vmatpush1.bf16.msra.mxu0 %v1388_v19  ;;  %1600 = vmatprep.subr.bf16.mxu1 %v1401_v20  ;;  %v1249_v19 = vunpack.c.l.s8.bf16 %v985_v5  ;;  %v984_v20 = vld [vmem:[%s8648_s19 + $0x2e0] sm:$0xff]  ;;  %v1258_v25 = vunpack.c.h.s8.bf16 %v970_v18 }
 0x1ed   : > { %1918 = vmatprep.subr.bf16.mxu0 %v1413_v21  ;;  %v1234_v21 = vunpack.c.l.s8.bf16 %v970_v18  ;;  %v1248_v28 = vunpack.c.l.s8.bf16 %v984_v20 }
 0x1ef   : > { %1601 = vmatpush1.bf16.msra.mxu1 %v1400_v38  ;;  %v1273_v38 = vunpack.c.h.s8.bf16 %v985_v5 }
 0x1f0   : > { %1919 = vmatpush1.bf16.msra.mxu0 %v1412_v23  ;;  %1602 = vmatprep.subr.bf16.mxu1 %v1425_v24  ;;  %v995_v23 = vld [vmem:[%s8648_s19 + $0x338] sm:$0xff]  ;;  %v1009_v24 = vld [vmem:[%s8648_s19 + $0x3a8] sm:$0xff] }
 0x1f1   : > { %1920 = vmatprep.subr.bf16.mxu0 %v1437_v30  ;;  %v1272_v30 = vunpack.c.h.s8.bf16 %v984_v20  ;;  %v1283_v31 = vunpack.c.l.s8.bf16 %v995_v23  ;;  %v1307_v36 = vunpack.c.h.s8.bf16 %v995_v23  ;;  %v902_v20 = vld [vmem:[%s8648_s19 + $0x50] sm:$0xff] }
 0x1f2   : > { %v1118_v23 = vunpack.c.h.s8.bf16 %v902_v20 }
 0x1f3   : > { %1603 = vmatpush1.bf16.msra.mxu1 %v1424_v32  ;;  %v994_v32 = vld [vmem:[%s8648_s19 + $0x330] sm:$0xff] }
 0x1f4   : > { %1921 = vmatpush1.bf16.msra.mxu0 %v1436_v33  ;;  %1604 = vmatprep.subr.bf16.mxu1 %v1449_v34  ;;  %v1297_v33 = vunpack.c.l.s8.bf16 %v1009_v24  ;;  %v1008_v34 = vld [vmem:[%s8648_s19 + $0x3a0] sm:$0xff] }
 0x1f5   : > { %1922 = vmatprep.subr.bf16.mxu0 %v1461_v8  ;;  %v1282_v8 = vunpack.c.l.s8.bf16 %v994_v32  ;;  %v1296_v9 = vunpack.c.l.s8.bf16 %v1008_v34  ;;  %v1320_v17 = vunpack.c.h.s8.bf16 %v1008_v34 }
 0x1f7   : > { %1605 = vmatpush1.bf16.msra.mxu1 %v1448_v39  ;;  %v1321_v39 = vunpack.c.h.s8.bf16 %v1009_v24 }
 0x1f8   : > { %1923 = vmatpush1.bf16.msra.mxu0 %v1460_v13  ;;  %1627 = vmatprep.subr.bf16.mxu1 %v1091_v14  ;;  %v1019_v13 = vld [vmem:[%s8648_s19 + $0x3f8] sm:$0xff]  ;;  %v1033_v14 = vld [vmem:[%s8648_s19 + $0x468] sm:$0xff] }
 0x1f9   : > { %1998 = vmatprep.subr.bf16.mxu0 %v1105_v16  ;;  %v1306_v16 = vunpack.c.h.s8.bf16 %v994_v32  ;;  %v1331_v43 = vunpack.c.l.s8.bf16 %v1019_v13  ;;  %v1355_v49 = vunpack.c.h.s8.bf16 %v1019_v13  ;;  %v951_v32 = vld [vmem:[%s8648_s19 + $0x1d8] sm:$0xff] }
 0x1fa   : > { %1607 = vmatmul.mubr.bf16.vlgmr.msra.gmra.mrb[16].mxu1 %v8912_v29  ;;  %v1191_v34 = vunpack.c.l.s8.bf16 %v951_v32  ;;  %v1215_v13 = vunpack.c.h.s8.bf16 %v951_v32 }
 0x1fb   : > { %1925 = vmatmul.mubr.bf16.vlgmr.msra.gmra.mrb[16].mxu0 %v8912_v29  ;;  %1616 = vmatprep.mubr.bf16.mxu1 %v8924_v22 }
 0x1fc   : > { %1628 = vmatpush1.bf16.msra.mxu1 %v1090_v44  ;;  %1934 = vmatprep.mubr.bf16.mxu0 %v8924_v22  ;;  %v1018_v44 = vld [vmem:[%s8648_s19 + $0x3f0] sm:$0xff] }
 0x1fd   : > { %1999 = vmatpush1.bf16.msra.mxu0 %v1104_v45  ;;  %1629 = vmatprep.subr.bf16.mxu1 %v1115_v46  ;;  %v1345_v45 = vunpack.c.l.s8.bf16 %v1033_v14  ;;  %v1032_v46 = vld [vmem:[%s8648_s19 + $0x460] sm:$0xff]  ;;  %v1354_v53 = vunpack.c.h.s8.bf16 %v1018_v44 }
 0x1fe   : > { %2000 = vmatprep.subr.bf16.mxu0 %v1129_v47  ;;  %v1330_v47 = vunpack.c.l.s8.bf16 %v1018_v44  ;;  %v1344_v48 = vunpack.c.l.s8.bf16 %v1032_v46 }
 0x200   : > { %1630 = vmatpush1.bf16.msra.mxu1 %v1114_v50  ;;  %v1369_v50 = vunpack.c.h.s8.bf16 %v1033_v14  ;;  %v9062_v14 = vld [vmem:[%s8657_s27] sm:$0xff] }
 0x201   : > { %2001 = vmatpush1.bf16.msra.mxu0 %v1128_v51  ;;  %1631 = vmatprep.subr.bf16.mxu1 %v1139_v52  ;;  %v1043_v51 = vld [vmem:[%s8648_s19 + $0x4b8] sm:$0xff]  ;;  %v1057_v52 = vld [vmem:[%s8648_s19 + $0x528] sm:$0xff] }
 0x202   : > { %1617 = vmatmul.mubr.bf16.gmra.mrb[20].mxu1 %v8930_v10  ;;  %2002 = vmatprep.subr.bf16.mxu0 %v1153_v54  ;;  %v1368_v54 = vunpack.c.h.s8.bf16 %v1032_v46  ;;  %v1379_v55 = vunpack.c.l.s8.bf16 %v1043_v51  ;;  %v1403_v61 = vunpack.c.h.s8.bf16 %v1043_v51  ;;  %v9072_v51 = vrot.slane %v9062_v14, %v8886_v42 }
 0x203   : > { %1935 = vmatmul.mubr.bf16.gmra.mrb[20].mxu0 %v8930_v10  ;;  %1659 = vmatprep.mubr.bf16.mxu1 %v8914_v6 }
 0x204   : > { %1632 = vmatpush1.bf16.msra.mxu1 %v1138_v56  ;;  %2030 = vmatprep.mubr.bf16.mxu0 %v8914_v6  ;;  %v1042_v56 = vld [vmem:[%s8648_s19 + $0x4b0] sm:$0xff] }
 0x205   : > { %2003 = vmatpush1.bf16.msra.mxu0 %v1152_v57  ;;  %1633 = vmatprep.subr.bf16.mxu1 %v1163_v58  ;;  %v1393_v57 = vunpack.c.l.s8.bf16 %v1057_v52  ;;  %v1056_v58 = vld [vmem:[%s8648_s19 + $0x520] sm:$0xff]  ;;  %v1402_v63 = vunpack.c.h.s8.bf16 %v1042_v56 }
 0x206   : > { %2004 = vmatprep.subr.bf16.mxu0 %v1177_v59  ;;  %v1378_v59 = vunpack.c.l.s8.bf16 %v1042_v56  ;;  %v1392_v60 = vunpack.c.l.s8.bf16 %v1056_v58 }
 0x208   : > { %1634 = vmatpush1.bf16.msra.mxu1 %v1162_v26  ;;  %v1417_v26 = vunpack.c.h.s8.bf16 %v1057_v52 }
 0x209   : > { %2005 = vmatpush1.bf16.msra.mxu0 %v1176_v62  ;;  %1635 = vmatprep.subr.bf16.mxu1 %v1187_v27  ;;  %v1067_v62 = vld [vmem:[%s8648_s19 + $0x578] sm:$0xff]  ;;  %v1081_v27 = vld [vmem:[%s8648_s19 + $0x5e8] sm:$0xff] }
 0x20a   : > { %2006 = vmatprep.subr.bf16.mxu0 %v1201_v0  ;;  %v1416_v0 = vunpack.c.h.s8.bf16 %v1056_v58  ;;  %v1427_v1 = vunpack.c.l.s8.bf16 %v1067_v62  ;;  %v1451_v5 = vunpack.c.h.s8.bf16 %v1067_v62 }
 0x20c   : > { %1636 = vmatpush1.bf16.msra.mxu1 %v1186_v2  ;;  %v1066_v2 = vld [vmem:[%s8648_s19 + $0x570] sm:$0xff] }
 0x20d   : > { %2007 = vmatpush1.bf16.msra.mxu0 %v1200_v3  ;;  %1637 = vmatprep.subr.bf16.mxu1 %v1211_v4  ;;  %v1441_v3 = vunpack.c.l.s8.bf16 %v1081_v27  ;;  %v1080_v4 = vld [vmem:[%s8648_s19 + $0x5e0] sm:$0xff] }
 0x20e   : > { %2008 = vmatprep.subr.bf16.mxu0 %v1225_v35  ;;  %v1426_v35 = vunpack.c.l.s8.bf16 %v1066_v2  ;;  %v1440_v12 = vunpack.c.l.s8.bf16 %v1080_v4  ;;  %v1464_v18 = vunpack.c.h.s8.bf16 %v1080_v4 }
 0x210   : > { %1638 = vmatpush1.bf16.msra.mxu1 %v1210_v7  ;;  %v1465_v7 = vunpack.c.h.s8.bf16 %v1081_v27  ;;  %v999_v27 = vld [vmem:[%s8648_s19 + $0x358] sm:$0xff] }
 0x211   : > { %2009 = vmatpush1.bf16.msra.mxu0 %v1224_v11  ;;  %1639 = vmatprep.subr.bf16.mxu1 %v1235_v15  ;;  %v903_v11 = vld [vmem:[%s8648_s19 + $0x58] sm:$0xff]  ;;  %v1450_v15 = vunpack.c.h.s8.bf16 %v1066_v2 }
 0x212   : > { %2010 = vmatprep.subr.bf16.mxu0 %v1249_v19  ;;  %v1095_v19 = vunpack.c.l.s8.bf16 %v903_v11 }
 0x214   : > { %1640 = vmatpush1.bf16.msra.mxu1 %v1234_v21  ;;  %v1094_v21 = vunpack.c.l.s8.bf16 %v902_v20 }
 0x215   : > { %2011 = vmatpush1.bf16.msra.mxu0 %v1248_v28  ;;  %1641 = vmatprep.subr.bf16.mxu1 %v1259_v37  ;;  %v1119_v28 = vunpack.c.h.s8.bf16 %v903_v11  ;;  %v10994_v37 = vmov 0.0  }
 0x216   : > { %2012 = vmatprep.subr.bf16.mxu0 %v1273_v38  ;;  %v927_v38 = vld [vmem:[%s8648_s19 + $0x118] sm:$0xff] }
 0x217   : > { %v1143_v24 = vunpack.c.l.s8.bf16 %v927_v38 }
 0x218   : > { %1642 = vmatpush1.bf16.msra.mxu1 %v1258_v25  ;;  %v926_v25 = vld [vmem:[%s8648_s19 + $0x110] sm:$0xff] }
 0x219   : > { %2013 = vmatpush1.bf16.msra.mxu0 %v1272_v30  ;;  %1643 = vmatprep.subr.bf16.mxu1 %v1283_v31  ;;  %v1142_v30 = vunpack.c.l.s8.bf16 %v926_v25  ;;  %v1167_v31 = vunpack.c.h.s8.bf16 %v927_v38 }
 0x21a   : > { %2014 = vmatprep.subr.bf16.mxu0 %v1297_v33  ;;  %v1166_v33 = vunpack.c.h.s8.bf16 %v926_v25  ;;  %v1311_v25 = vunpack.c.h.s8.bf16 %v999_v27 }
 0x21c   : > { %1644 = vmatpush1.bf16.msra.mxu1 %v1282_v8  ;;  %v950_v8 = vld [vmem:[%s8648_s19 + $0x1d0] sm:$0xff] }
 0x21d   : > { %2015 = vmatpush1.bf16.msra.mxu0 %v1296_v9  ;;  %1645 = vmatprep.subr.bf16.mxu1 %v1307_v36  ;;  %v9057_v9 = vld [vmem:[%s8657_s27 + $0x8] sm:$0xff]  ;;  %v1190_v36 = vunpack.c.l.s8.bf16 %v950_v8  ;;  %v1214_v44 = vunpack.c.h.s8.bf16 %v950_v8  ;;  %v1022_v8 = vld [vmem:[%s8648_s19 + $0x410] sm:$0xff] }
 0x21e   : > { %2016 = vmatprep.subr.bf16.mxu0 %v1321_v39  ;;  %v2145_v39 = vrot.slane %v9057_v9, %v8883_v41  ;;  %v9076_v52 = vrot.slane %v9057_v9, %v8886_v42 }
 0x220   : > { %1646 = vmatpush1.bf16.msra.mxu1 %v1306_v16  ;;  %v975_v16 = vld [vmem:[%s8648_s19 + $0x298] sm:$0xff] }
 0x221   : > { %2017 = vmatpush1.bf16.msra.mxu0 %v1320_v17  ;;  %1647 = vmatprep.subr.bf16.mxu1 %v1331_v43  ;;  %v1263_v62 = vunpack.c.h.s8.bf16 %v975_v16 }
 0x222   : > { %2018 = vmatprep.subr.bf16.mxu0 %v1345_v45  ;;  %v2113_v45 = vrot.slane %v9062_v14, %v8883_v41 }
 0x224   : > { %1648 = vmatpush1.bf16.msra.mxu1 %v1330_v47 }
 0x225   : > { %2019 = vmatpush1.bf16.msra.mxu0 %v1344_v48  ;;  %1649 = vmatprep.subr.bf16.mxu1 %v1355_v49  ;;  %v1239_v49 = vunpack.c.l.s8.bf16 %v975_v16 }
 0x226   : > { %2020 = vmatprep.subr.bf16.mxu0 %v1369_v50  ;;  %v974_v50 = vld [vmem:[%s8648_s19 + $0x290] sm:$0xff] }
 0x227   : > { %v1262_v2 = vunpack.c.h.s8.bf16 %v974_v50 }
 0x228   : > { %1650 = vmatpush1.bf16.msra.mxu1 %v1354_v53 }
 0x229   : > { %2021 = vmatpush1.bf16.msra.mxu0 %v1368_v54  ;;  %1651 = vmatprep.subr.bf16.mxu1 %v1379_v55 }
 0x22a   : > { %2022 = vmatprep.subr.bf16.mxu0 %v1393_v57 }
 0x22c   : > { %1652 = vmatpush1.bf16.msra.mxu1 %v1378_v59 }
 0x22d   : > { %2023 = vmatpush1.bf16.msra.mxu0 %v1392_v60  ;;  %1653 = vmatprep.subr.bf16.mxu1 %v1403_v61 }
 0x22e   : > { %2024 = vmatprep.subr.bf16.mxu0 %v1417_v26  ;;  %v1238_v26 = vunpack.c.l.s8.bf16 %v974_v50 }
 0x230   : > { %1654 = vmatpush1.bf16.msra.mxu1 %v1402_v63 }
 0x231   : > { %2025 = vmatpush1.bf16.msra.mxu0 %v1416_v0  ;;  %1655 = vmatprep.subr.bf16.mxu1 %v1427_v1 }
 0x232   : > { %2026 = vmatprep.subr.bf16.mxu0 %v1441_v3 }
 0x234   : > { %1656 = vmatpush1.bf16.msra.mxu1 %v1426_v35 }
 0x235   : > { %2027 = vmatpush1.bf16.msra.mxu0 %v1440_v12  ;;  %1657 = vmatprep.subr.bf16.mxu1 %v1451_v5  ;;  %v1287_v12 = vunpack.c.l.s8.bf16 %v999_v27  ;;  %v998_v5 = vld [vmem:[%s8648_s19 + $0x350] sm:$0xff] }
 0x236   : > { %2028 = vmatprep.subr.bf16.mxu0 %v1465_v7 }
 0x238   : > { %1658 = vmatpush1.bf16.msra.mxu1 %v1450_v15 }
 0x239   : > { %2029 = vmatpush1.bf16.msra.mxu0 %v1464_v18  ;;  %1733 = vmatprep.subr.bf16.mxu1 %v1095_v19 }
 0x23a   : > { %7867 = vmatprep.subr.bf16.mxu0 %v10994_v37 }
 0x23b   : > { %1660 = vmatmul.mubr.bf16.vlgmr.msra.gmra.mrb[24].mxu1 %v8912_v29 }
 0x23c   : > { %2031 = vmatmul.mubr.bf16.vlgmr.msra.gmra.mrb[24].mxu0 %v8912_v29  ;;  %1669 = vmatprep.mubr.bf16.mxu1 %v8924_v22 }
 0x23d   : > { %1734 = vmatpush1.bf16.msra.mxu1 %v1094_v21  ;;  %2040 = vmatprep.mubr.bf16.mxu0 %v8924_v22 }
 0x23e   : > { %1735 = vmatprep.subr.bf16.mxu1 %v1119_v28 }
 0x241   : > { %1736 = vmatpush1.bf16.msra.mxu1 %v1118_v23 }
 0x242   : > { %1737 = vmatprep.subr.bf16.mxu1 %v1143_v24  ;;  %v1286_v24 = vunpack.c.l.s8.bf16 %v998_v5 }
 0x243   : > { %1670 = vmatmul.mubr.bf16.gmra.mrb[28].mxu1 %v8930_v10 }
 0x244   : > { %2041 = vmatmul.mubr.bf16.gmra.mrb[28].mxu0 %v8930_v10  ;;  %1765 = vmatprep.mubr.bf16.mxu1 %v8914_v6 }
 0x245   : > { %1738 = vmatpush1.bf16.msra.mxu1 %v1142_v30  ;;  %7869 = vmatprep.mubr.msk.bf16.mxu0 %vm8541_vm0, %v10994_v37  ;;  %v1023_v30 = vld [vmem:[%s8648_s19 + $0x418] sm:$0xff] }
 0x246   : > { %1739 = vmatprep.subr.bf16.mxu1 %v1167_v31  ;;  %v1359_v16 = vunpack.c.h.s8.bf16 %v1023_v30 }
 0x249   : > { %1740 = vmatpush1.bf16.msra.mxu1 %v1166_v33  ;;  %v1310_v33 = vunpack.c.h.s8.bf16 %v998_v5  ;;  %v930_v5 = vld [vmem:[%s8648_s19 + $0x130] sm:$0xff] }
 0x24a   : > { %1741 = vmatprep.subr.bf16.mxu1 %v1191_v34  ;;  %v1335_v34 = vunpack.c.l.s8.bf16 %v1023_v30  ;;  %v979_v30 = vld [vmem:[%s8648_s19 + $0x2b8] sm:$0xff] }
 0x24d   : > { %1742 = vmatpush1.bf16.msra.mxu1 %v1190_v36  ;;  %v1502_v17 = vpop.f32.mrb[0].mxu1  ;;  %v1714_v43 = vpop.f32.mrb[0].mxu0 }
 0x24e   : > { %v2238_v46 = vmul.f32 %v2145_v39, %v1714_v43  ;;  %1743 = vmatprep.subr.bf16.mxu1 %v1215_v13  ;;  %v9067_v47 = vpop.f32.mrb[1].mxu1  ;;  %v1716_v48 = vpop.f32.mrb[1].mxu0  ;;  %v2230_v63 = vmul.f32 %v2113_v45, %v1502_v17  ;;  %v1334_v13 = vunpack.c.l.s8.bf16 %v1022_v8  ;;  %v1047_v17 = vld [vmem:[%s8648_s19 + $0x4d8] sm:$0xff] }
 0x24f   : > { %v1506_v53 = vpop.f32.mrb[2].mxu1  ;;  %v1718_v54 = vpop.f32.mrb[2].mxu0  ;;  %v2239_v32 = vmul.f32 %v9076_v52, %v1716_v48  ;;  %v2231_v43 = vmul.f32 %v9072_v51, %v9067_v47  ;;  %v1046_v48 = vld [vmem:[%s8648_s19 + $0x4d0] sm:$0xff]  ;;  %v1071_v47 = vld [vmem:[%s8648_s19 + $0x598] sm:$0xff] }
 0x250   : > { %v2358_v55 = vpack.c.bf16 %v2238_v46, %v2238_v46  ;;  %v9078_v56 = vmul.f32 %v2113_v45, %v1506_v53  ;;  %v9080_v57 = vmul.f32 %v2145_v39, %v1718_v54  ;;  %v1508_v58 = vpop.f32.mrb[3].mxu1  ;;  %v1720_v59 = vpop.f32.mrb[3].mxu0  ;;  %v2326_v15 = vpack.c.bf16 %v2230_v63, %v2230_v63  ;;  %v907_v63 = vld [vmem:[%s8648_s19 + $0x78] sm:$0xff] }
 0x251   : > { %1744 = vmatpush1.bf16.msra.mxu1 %v1214_v44  ;;  %v9083_v60 = vmul.f32 %v9072_v51, %v1508_v58  ;;  %v9086_v61 = vmul.f32 %v9076_v52, %v1720_v59  ;;  %v1383_v46 = vunpack.c.l.s8.bf16 %v1047_v17  ;;  %v1382_v53 = vunpack.c.l.s8.bf16 %v1046_v48  ;;  %v1070_v59 = vld [vmem:[%s8648_s19 + $0x590] sm:$0xff] }
 0x252   : > { %1745 = vmatprep.subr.bf16.mxu1 %v1239_v49  ;;  %7868 = vmatpush3.bf16.xpose.msra.mxu0 %v2358_v55  ;;  %v2330_v49 = vpack.c.bf16 %v2231_v43, %v2231_v43  ;;  %v1407_v54 = vunpack.c.h.s8.bf16 %v1047_v17  ;;  %v1406_v55 = vunpack.c.h.s8.bf16 %v1046_v48  ;;  %v1431_v58 = vunpack.c.l.s8.bf16 %v1071_v47 }
 0x253   : > { %7879 = vmatprep.subr.bf16.mxu0 %v10994_v37  ;;  %v1455_v27 = vunpack.c.h.s8.bf16 %v1071_v47 }
 0x255   : > { %1746 = vmatpush1.bf16.msra.mxu1 %v1238_v26  ;;  %v1512_v0 = vpop.f32.mrb[4].mxu1  ;;  %v1724_v1 = vpop.f32.mrb[4].mxu0 }
 0x256   : > { %v2286_v3 = vmul.f32 %v2145_v39, %v1724_v1  ;;  %1747 = vmatprep.subr.bf16.mxu1 %v1263_v62  ;;  %v1514_v4 = vpop.f32.mrb[5].mxu1  ;;  %v1726_v35 = vpop.f32.mrb[5].mxu0  ;;  %v2278_v31 = vmul.f32 %v2113_v45, %v1512_v0  ;;  %v1430_v62 = vunpack.c.l.s8.bf16 %v1070_v59  ;;  %v1099_v0 = vunpack.c.l.s8.bf16 %v907_v63  ;;  %v906_v1 = vld [vmem:[%s8648_s19 + $0x70] sm:$0xff] }
 0x257   : > { %v1516_v7 = vpop.f32.mrb[6].mxu1  ;;  %v1728_v11 = vpop.f32.mrb[6].mxu0  ;;  %v2287_v44 = vmul.f32 %v9076_v52, %v1726_v35  ;;  %v1122_v35 = vunpack.c.h.s8.bf16 %v906_v1 }
 0x258   : > { %v2360_v18 = vpack.c.bf16 %v2286_v3, %v2286_v3  ;;  %v9091_v19 = vmul.f32 %v2113_v45, %v1516_v7  ;;  %v9093_v20 = vmul.f32 %v2145_v39, %v1728_v11  ;;  %v1518_v21 = vpop.f32.mrb[7].mxu1  ;;  %v1730_v28 = vpop.f32.mrb[7].mxu0  ;;  %v2328_v36 = vpack.c.bf16 %v2278_v31, %v2278_v31 }
 0x259   : > { %1748 = vmatpush1.bf16.msra.mxu1 %v1262_v2  ;;  %v9096_v38 = vmul.f32 %v9072_v51, %v1518_v21  ;;  %v9099_v23 = vmul.f32 %v9076_v52, %v1730_v28  ;;  %7870 = vmatmul.mubr.bf16.vlgmr.msra.gmra.mrb[32].mxu0 %v2326_v15  ;;  %v2362_v39 = vpack.c.bf16 %v2239_v32, %v2239_v32  ;;  %v1358_v45 = vunpack.c.h.s8.bf16 %v1022_v8  ;;  %v955_v15 = vld [vmem:[%s8648_s19 + $0x1f8] sm:$0xff]  ;;  %v954_v28 = vld [vmem:[%s8648_s19 + $0x1f0] sm:$0xff] }
 0x25a   : > { %1749 = vmatprep.subr.bf16.mxu1 %v1287_v12  ;;  %7880 = vmatpush3.bf16.xpose.msra.mxu0 %v2360_v18  ;;  %v2364_v50 = vpack.c.bf16 %v2287_v44, %v2287_v44  ;;  %v2279_v52 = vmul.f32 %v9072_v51, %v1514_v4  ;;  %v1454_v51 = vunpack.c.h.s8.bf16 %v1070_v59  ;;  %v1098_v2 = vunpack.c.l.s8.bf16 %v906_v1  ;;  %v931_v4 = vld [vmem:[%s8648_s19 + $0x138] sm:$0xff]  ;;  %v1026_v1 = vld [vmem:[%s8648_s19 + $0x430] sm:$0xff] }
 0x25b   : > { %7881 = vmatprep.mubr.msk.bf16.mxu0 %vm8541_vm0, %v10994_v37  ;;  %7891 = vmatprep.subr.bf16.mxu0 %v10994_v37  ;;  %v1123_v3 = vunpack.c.h.s8.bf16 %v907_v63  ;;  %v1147_v12 = vunpack.c.l.s8.bf16 %v931_v4  ;;  %v1146_v7 = vunpack.c.l.s8.bf16 %v930_v5  ;;  %v1171_v11 = vunpack.c.h.s8.bf16 %v931_v4  ;;  %v1027_v63 = vld [vmem:[%s8648_s19 + $0x438] sm:$0xff] }
 0x25c   : > { %v2332_v26 = vpack.c.bf16 %v2279_v52, %v2279_v52  ;;  %v1170_v18 = vunpack.c.h.s8.bf16 %v930_v5  ;;  %v1195_v21 = vunpack.c.l.s8.bf16 %v955_v15  ;;  %v1002_v52 = vld [vmem:[%s8648_s19 + $0x370] sm:$0xff]  ;;  %v1051_v4 = vld [vmem:[%s8648_s19 + $0x4f8] sm:$0xff] }
 0x25d   : > { %1750 = vmatpush1.bf16.msra.mxu1 %v1286_v24  ;;  %v1194_v24 = vunpack.c.l.s8.bf16 %v954_v28  ;;  %v1050_v5 = vld [vmem:[%s8648_s19 + $0x4f0] sm:$0xff] }
 0x25e   : > { %1751 = vmatprep.subr.bf16.mxu1 %v1311_v25  ;;  %v1219_v25 = vunpack.c.h.s8.bf16 %v955_v15  ;;  %v1075_v15 = vld [vmem:[%s8648_s19 + $0x5b8] sm:$0xff] }
 0x261   : > { %1752 = vmatpush1.bf16.msra.mxu1 %v1310_v33  ;;  %7882 = vmatmul.mubr.bf16.vlgmr.msra.gmra.mrb[36].mxu0 %v2328_v36  ;;  %v1218_v33 = vunpack.c.h.s8.bf16 %v954_v28  ;;  %v1243_v36 = vunpack.c.l.s8.bf16 %v979_v30  ;;  %v1074_v28 = vld [vmem:[%s8648_s19 + $0x5b0] sm:$0xff] }
 0x262   : > { %1753 = vmatprep.subr.bf16.mxu1 %v1335_v34  ;;  %7892 = vmatpush3.bf16.xpose.msra.mxu0 %v2362_v39  ;;  %v978_v39 = vld [vmem:[%s8648_s19 + $0x2b0] sm:$0xff] }
 0x263   : > { %7893 = vmatprep.mubr.msk.bf16.mxu0 %vm8541_vm0, %v10994_v37  ;;  %7903 = vmatprep.subr.bf16.mxu0 %v10994_v37  ;;  %v1242_v44 = vunpack.c.l.s8.bf16 %v978_v39 }
 0x265   : > { %1754 = vmatpush1.bf16.msra.mxu1 %v1334_v13 }
 0x266   : > { %1755 = vmatprep.subr.bf16.mxu1 %v1359_v16 }
 0x269   : > { %1756 = vmatpush1.bf16.msra.mxu1 %v1358_v45  ;;  %7894 = vmatmul.mubr.bf16.vlgmr.msra.gmra.mrb[40].mxu0 %v2330_v49  ;;  %v1267_v45 = vunpack.c.h.s8.bf16 %v979_v30  ;;  %v911_v30 = vld [vmem:[%s8648_s19 + $0x98] sm:$0xff] }
 0x26a   : > { %1757 = vmatprep.subr.bf16.mxu1 %v1383_v46  ;;  %7904 = vmatpush3.bf16.xpose.msra.mxu0 %v2364_v50  ;;  %v1003_v46 = vld [vmem:[%s8648_s19 + $0x378] sm:$0xff]  ;;  %v1266_v50 = vunpack.c.h.s8.bf16 %v978_v39  ;;  %v910_v39 = vld [vmem:[%s8648_s19 + $0x90] sm:$0xff] }
 0x26b   : > { %7905 = vmatprep.mubr.msk.bf16.mxu0 %vm8541_vm0, %v10994_v37  ;;  %7915 = vmatprep.subr.bf16.mxu0 %v10994_v37  ;;  %v1291_v47 = vunpack.c.l.s8.bf16 %v1003_v46 }
 0x26d   : > { %1758 = vmatpush1.bf16.msra.mxu1 %v1382_v53 }
 0x26e   : > { %1759 = vmatprep.subr.bf16.mxu1 %v1407_v54 }
 0x271   : > { %1760 = vmatpush1.bf16.msra.mxu1 %v1406_v55  ;;  %7906 = vmatmul.mubr.bf16.vlgmr.msra.gmra.mrb[44].mxu0 %v2332_v26 }
 0x272   : > { %1761 = vmatprep.subr.bf16.mxu1 %v1431_v58  ;;  %7917 = vmatprep.mubr.msk.bf16.mxu0 %vm8541_vm0, %v10994_v37  ;;  %v1030_v37 = vld [vmem:[%s8648_s19 + $0x450] sm:$0xff] }
 0x275   : > { %1762 = vmatpush1.bf16.msra.mxu1 %v1430_v62  ;;  %v1290_v62 = vunpack.c.l.s8.bf16 %v1002_v52 }
 0x276   : > { %1763 = vmatprep.subr.bf16.mxu1 %v1455_v27  ;;  %v1315_v27 = vunpack.c.h.s8.bf16 %v1003_v46  ;;  %v935_v46 = vld [vmem:[%s8648_s19 + $0x158] sm:$0xff] }
 0x279   : > { %1764 = vmatpush1.bf16.msra.mxu1 %v1454_v51  ;;  %v1314_v51 = vunpack.c.h.s8.bf16 %v1002_v52  ;;  %v934_v52 = vld [vmem:[%s8648_s19 + $0x150] sm:$0xff] }
 0x27a   : > { %1839 = vmatprep.subr.bf16.mxu1 %v1099_v0  ;;  %v1339_v0 = vunpack.c.l.s8.bf16 %v1027_v63 }
 0x27c   : > { %1766 = vmatmul.mubr.bf16.vlgmr.msra.gmra.mrb[32].mxu1 %v8912_v29 }
 0x27d   : > { %1775 = vmatprep.mubr.bf16.mxu1 %v8924_v22  ;;  %1840 = vmatpush1.bf16.msra.mxu1 %v1098_v2  ;;  %v1338_v2 = vunpack.c.l.s8.bf16 %v1026_v1 }
 0x27e   : > { %1841 = vmatprep.subr.bf16.mxu1 %v1123_v3  ;;  %v1363_v3 = vunpack.c.h.s8.bf16 %v1027_v63  ;;  %v959_v63 = vld [vmem:[%s8648_s19 + $0x218] sm:$0xff] }
 0x281   : > { %1842 = vmatpush1.bf16.msra.mxu1 %v1122_v35  ;;  %v1362_v35 = vunpack.c.h.s8.bf16 %v1026_v1  ;;  %v958_v1 = vld [vmem:[%s8648_s19 + $0x210] sm:$0xff] }
 0x282   : > { %1843 = vmatprep.subr.bf16.mxu1 %v1147_v12  ;;  %v1387_v12 = vunpack.c.l.s8.bf16 %v1051_v4 }
 0x284   : > { %1776 = vmatmul.mubr.bf16.gmra.mrb[36].mxu1 %v8930_v10 }
 0x285   : > { %1844 = vmatpush1.bf16.msra.mxu1 %v1146_v7  ;;  %1871 = vmatprep.mubr.bf16.mxu1 %v8914_v6  ;;  %v1386_v7 = vunpack.c.l.s8.bf16 %v1050_v5 }
 0x286   : > { %1845 = vmatprep.subr.bf16.mxu1 %v1171_v11  ;;  %v1411_v11 = vunpack.c.h.s8.bf16 %v1051_v4  ;;  %v983_v4 = vld [vmem:[%s8648_s19 + $0x2d8] sm:$0xff] }
 0x289   : > { %1846 = vmatpush1.bf16.msra.mxu1 %v1170_v18  ;;  %v1410_v18 = vunpack.c.h.s8.bf16 %v1050_v5  ;;  %v1222_v5 = vunpack.c.h.s8.bf16 %v958_v1 }
 0x28a   : > { %1847 = vmatprep.subr.bf16.mxu1 %v1195_v21  ;;  %v1435_v21 = vunpack.c.l.s8.bf16 %v1075_v15 }
 0x28d   : > { %1848 = vmatpush1.bf16.msra.mxu1 %v1194_v24  ;;  %v9134_v31 = vpop.f32.mrb[8].mxu1  ;;  %v9136_v32 = vpop.f32.mrb[8].mxu0  ;;  %v1434_v24 = vunpack.c.l.s8.bf16 %v1074_v28 }
 0x28e   : > { %v9138_v34 = vpop.f32.mrb[9].mxu1  ;;  %v9140_v8 = vpop.f32.mrb[9].mxu0  ;;  %1849 = vmatprep.subr.bf16.mxu1 %v1219_v25  ;;  %v1459_v25 = vunpack.c.h.s8.bf16 %v1075_v15  ;;  %v1247_v15 = vunpack.c.l.s8.bf16 %v983_v4 }
 0x28f   : > { %v9143_v13 = vpop.f32.mrb[10].mxu1  ;;  %v9145_v16 = vpop.f32.mrb[10].mxu0 }
 0x290   : > { %v9147_v17 = vpop.f32.mrb[11].mxu1  ;;  %v9149_v43 = vpop.f32.mrb[11].mxu0 }
 0x291   : > { %1850 = vmatpush1.bf16.msra.mxu1 %v1218_v33  ;;  %v1458_v33 = vunpack.c.h.s8.bf16 %v1074_v28 }
 0x292   : > { %1851 = vmatprep.subr.bf16.mxu1 %v1243_v36  ;;  %v1103_v36 = vunpack.c.l.s8.bf16 %v911_v30 }
 0x295   : > { %1852 = vmatpush1.bf16.msra.mxu1 %v1242_v44  ;;  %v9152_v48 = vpop.f32.mrb[12].mxu1  ;;  %v9154_v49 = vpop.f32.mrb[12].mxu0  ;;  %v1102_v44 = vunpack.c.l.s8.bf16 %v910_v39 }
 0x296   : > { %v9156_v53 = vpop.f32.mrb[13].mxu1  ;;  %v9158_v54 = vpop.f32.mrb[13].mxu0  ;;  %1853 = vmatprep.subr.bf16.mxu1 %v1267_v45  ;;  %v1127_v45 = vunpack.c.h.s8.bf16 %v911_v30 }
 0x297   : > { %v9161_v55 = vpop.f32.mrb[14].mxu1  ;;  %v9163_v58 = vpop.f32.mrb[14].mxu0 }
 0x298   : > { %v9165_v59 = vpop.f32.mrb[15].mxu1  ;;  %v9167_v26 = vpop.f32.mrb[15].mxu0 }
 0x299   : > { %1854 = vmatpush1.bf16.msra.mxu1 %v1266_v50  ;;  %v1126_v50 = vunpack.c.h.s8.bf16 %v910_v39 }
 0x29a   : > { %1855 = vmatprep.subr.bf16.mxu1 %v1291_v47  ;;  %v1151_v47 = vunpack.c.l.s8.bf16 %v935_v46 }
 0x29d   : > { %1856 = vmatpush1.bf16.msra.mxu1 %v1290_v62  ;;  %v1150_v62 = vunpack.c.l.s8.bf16 %v934_v52 }
 0x29e   : > { %1857 = vmatprep.subr.bf16.mxu1 %v1315_v27  ;;  %v1175_v27 = vunpack.c.h.s8.bf16 %v935_v46 }
 0x2a1   : > { %1858 = vmatpush1.bf16.msra.mxu1 %v1314_v51  ;;  %v1174_v51 = vunpack.c.h.s8.bf16 %v934_v52 }
 0x2a2   : > { %1859 = vmatprep.subr.bf16.mxu1 %v1339_v0  ;;  %v1199_v0 = vunpack.c.l.s8.bf16 %v959_v63 }
 0x2a5   : > { %1860 = vmatpush1.bf16.msra.mxu1 %v1338_v2  ;;  %v1198_v2 = vunpack.c.l.s8.bf16 %v958_v1 }
 0x2a6   : > { %1861 = vmatprep.subr.bf16.mxu1 %v1363_v3  ;;  %v1223_v3 = vunpack.c.h.s8.bf16 %v959_v63  ;;  %v1006_v63 = vld [vmem:[%s8648_s19 + $0x390] sm:$0xff] }
 0x2a9   : > { %1862 = vmatpush1.bf16.msra.mxu1 %v1362_v35 }
 0x2aa   : > { %1863 = vmatprep.subr.bf16.mxu1 %v1387_v12  ;;  %v9189_v12 = vld [vmem:[%s8657_s27 + $0x10] sm:$0xff] }
 0x2ab   : > { %v9214_v46 = vrot.slane %v9189_v12, %v8883_v41  ;;  %v1366_v41 = vunpack.c.h.s8.bf16 %v1030_v37 }
 0x2ad   : > { %1864 = vmatpush1.bf16.msra.mxu1 %v1386_v7 }
 0x2ae   : > { %1865 = vmatprep.subr.bf16.mxu1 %v1411_v11 }
 0x2b1   : > { %1866 = vmatpush1.bf16.msra.mxu1 %v1410_v18  ;;  %v982_v18 = vld [vmem:[%s8648_s19 + $0x2d0] sm:$0xff] }
 0x2b2   : > { %1867 = vmatprep.subr.bf16.mxu1 %v1435_v21 }
 0x2b5   : > { %1868 = vmatpush1.bf16.msra.mxu1 %v1434_v24  ;;  %v9202_v24 = vrot.slane %v9189_v12, %v8886_v42  ;;  %v1055_v42 = vld [vmem:[%s8648_s19 + $0x518] sm:$0xff] }
 0x2b6   : > { %1869 = vmatprep.subr.bf16.mxu1 %v1459_v25 }
 0x2b7   : > { %11036 = vst [vmem:[#allocation6_spill] sm:$0xff] %v9202_v24 }
 0x2b9   : > { %1870 = vmatpush1.bf16.msra.mxu1 %v1458_v33 }
 0x2ba   : > { %1945 = vmatprep.subr.bf16.mxu1 %v1103_v36  ;;  %v1246_v36 = vunpack.c.l.s8.bf16 %v982_v18 }
 0x2bc   : > { %1872 = vmatmul.mubr.bf16.vlgmr.msra.gmra.mrb[40].mxu1 %v8912_v29 }
 0x2bd   : > { %1881 = vmatprep.mubr.bf16.mxu1 %v8924_v22  ;;  %1946 = vmatpush1.bf16.msra.mxu1 %v1102_v44  ;;  %v1271_v44 = vunpack.c.h.s8.bf16 %v983_v4 }
 0x2be   : > { %1947 = vmatprep.subr.bf16.mxu1 %v1127_v45  ;;  %v1007_v45 = vld [vmem:[%s8648_s19 + $0x398] sm:$0xff] }
 0x2c1   : > { %1948 = vmatpush1.bf16.msra.mxu1 %v1126_v50 }
 0x2c2   : > { %1949 = vmatprep.subr.bf16.mxu1 %v1151_v47  ;;  %v1270_v47 = vunpack.c.h.s8.bf16 %v982_v18  ;;  %v1294_v18 = vunpack.c.l.s8.bf16 %v1006_v63 }
 0x2c4   : > { %1882 = vmatmul.mubr.bf16.gmra.mrb[44].mxu1 %v8930_v10 }
 0x2c5   : > { %1950 = vmatpush1.bf16.msra.mxu1 %v1150_v62  ;;  %1977 = vmatprep.mubr.bf16.mxu1 %v8914_v6 }
 0x2c6   : > { %1951 = vmatprep.subr.bf16.mxu1 %v1175_v27  ;;  %v1295_v27 = vunpack.c.l.s8.bf16 %v1007_v45 }
 0x2c9   : > { %1952 = vmatpush1.bf16.msra.mxu1 %v1174_v51 }
 0x2ca   : > { %1953 = vmatprep.subr.bf16.mxu1 %v1199_v0 }
 0x2cd   : > { %1954 = vmatpush1.bf16.msra.mxu1 %v1198_v2  ;;  %v9186_v35 = vpop.f32.mrb[16].mxu1 }
 0x2ce   : > { %v9191_v7 = vpop.f32.mrb[16].mxu0  ;;  %v9193_v11 = vpop.f32.mrb[17].mxu1  ;;  %1955 = vmatprep.subr.bf16.mxu1 %v1223_v3 }
 0x2cf   : > { %v9196_v21 = vpop.f32.mrb[17].mxu0  ;;  %v9198_v28 = vpop.f32.mrb[18].mxu1 }
 0x2d0   : > { %11035 = vst [vmem:[#allocation5_spill] sm:$0xff] %v9196_v21  ;;  %v9204_v25 = vpop.f32.mrb[18].mxu0  ;;  %v9206_v30 = vpop.f32.mrb[19].mxu1 }
 0x2d1   : > { %11037 = vst [vmem:[#allocation7_spill] sm:$0xff] %v9204_v25  ;;  %1956 = vmatpush1.bf16.msra.mxu1 %v1222_v5  ;;  %v1932_v33 = vpop.f32.mrb[19].mxu0  ;;  %v1059_v25 = vld [vmem:[%s8648_s19 + $0x538] sm:$0xff] }
 0x2d2   : > { %v9209_v39 = vmul.f32 %v9202_v24, %v1932_v33  ;;  %1957 = vmatprep.subr.bf16.mxu1 %v1247_v15 }
 0x2d4   : > { %11038 = vst [vmem:[#allocation8_spill] sm:$0xff] %v9209_v39 }
 0x2d5   : > { %1958 = vmatpush1.bf16.msra.mxu1 %v1246_v36  ;;  %v9216_v50 = vpop.f32.mrb[20].mxu1  ;;  %v1319_v36 = vunpack.c.h.s8.bf16 %v1007_v45  ;;  %v1054_v45 = vld [vmem:[%s8648_s19 + $0x510] sm:$0xff] }
 0x2d6   : > { %v1936_v52 = vpop.f32.mrb[20].mxu0  ;;  %v9218_v62 = vpop.f32.mrb[21].mxu1  ;;  %1959 = vmatprep.subr.bf16.mxu1 %v1271_v44  ;;  %v1031_v44 = vld [vmem:[%s8648_s19 + $0x458] sm:$0xff] }
 0x2d7   : > { %v9222_v51 = vmul.f32 %v9214_v46, %v1936_v52  ;;  %v1938_v0 = vpop.f32.mrb[21].mxu0  ;;  %v9224_v1 = vpop.f32.mrb[22].mxu1  ;;  %v1318_v52 = vunpack.c.h.s8.bf16 %v1006_v63  ;;  %v1415_v63 = vunpack.c.h.s8.bf16 %v1055_v42 }
 0x2d8   : > { %v9227_v2 = vmul.f32 %v9202_v24, %v1938_v0  ;;  %v1940_v3 = vpop.f32.mrb[22].mxu0  ;;  %v9229_v4 = vpop.f32.mrb[23].mxu1  ;;  %v1343_v0 = vunpack.c.l.s8.bf16 %v1031_v44 }
 0x2d9   : > { %11039 = vst [vmem:[#allocation9_spill] sm:$0xff] %v9222_v51  ;;  %v9232_v5 = vmul.f32 %v9214_v46, %v1940_v3  ;;  %1960 = vmatpush1.bf16.msra.mxu1 %v1270_v47  ;;  %v1942_v15 = vpop.f32.mrb[23].mxu0  ;;  %v1342_v3 = vunpack.c.l.s8.bf16 %v1030_v37  ;;  %v1367_v47 = vunpack.c.h.s8.bf16 %v1031_v44  ;;  %v1078_v44 = vld [vmem:[%s8648_s19 + $0x5d0] sm:$0xff] }
 0x2da   : > { %11040 = vst [vmem:[#allocation10_spill] sm:$0xff] %v9227_v2  ;;  %v9235_v33 = vmul.f32 %v9202_v24, %v1942_v15  ;;  %1961 = vmatprep.subr.bf16.mxu1 %v1295_v27  ;;  %v1391_v15 = vunpack.c.l.s8.bf16 %v1055_v42  ;;  %v1390_v27 = vunpack.c.l.s8.bf16 %v1054_v45  ;;  %v1011_v2 = vld [vmem:[%s8648_s19 + $0x3b8] sm:$0xff]  ;;  %v1034_v51 = vld [vmem:[%s8648_s19 + $0x470] sm:$0xff] }
 0x2db   : > { %11041 = vst [vmem:[#allocation11_spill] sm:$0xff] %v9232_v5  ;;  %v1010_v5 = vld [vmem:[%s8648_s19 + $0x3b0] sm:$0xff] }
 0x2dc   : > { %11042 = vst [vmem:[#allocation12_spill] sm:$0xff] %v9235_v33 }
 0x2dd   : > { %1962 = vmatpush1.bf16.msra.mxu1 %v1294_v18  ;;  %v1079_v18 = vld [vmem:[%s8648_s19 + $0x5d8] sm:$0xff] }
 0x2de   : > { %1963 = vmatprep.subr.bf16.mxu1 %v1319_v36  ;;  %v1414_v36 = vunpack.c.h.s8.bf16 %v1054_v45  ;;  %v1463_v37 = vunpack.c.h.s8.bf16 %v1079_v18 }
 0x2e1   : > { %1964 = vmatpush1.bf16.msra.mxu1 %v1318_v52  ;;  %v1439_v52 = vunpack.c.l.s8.bf16 %v1079_v18 }
 0x2e2   : > { %1965 = vmatprep.subr.bf16.mxu1 %v1343_v0  ;;  %v1438_v0 = vunpack.c.l.s8.bf16 %v1078_v44 }
 0x2e5   : > { %1966 = vmatpush1.bf16.msra.mxu1 %v1342_v3  ;;  %v915_v3 = vld [vmem:[%s8648_s19 + $0xb8] sm:$0xff] }
 0x2e6   : > { %1967 = vmatprep.subr.bf16.mxu1 %v1367_v47  ;;  %v1462_v47 = vunpack.c.h.s8.bf16 %v1078_v44  ;;  %v1131_v45 = vunpack.c.h.s8.bf16 %v915_v3 }
 0x2e9   : > { %1968 = vmatpush1.bf16.msra.mxu1 %v1366_v41  ;;  %v1107_v41 = vunpack.c.l.s8.bf16 %v915_v3 }
 0x2ea   : > { %1969 = vmatprep.subr.bf16.mxu1 %v1391_v15  ;;  %v914_v15 = vld [vmem:[%s8648_s19 + $0xb0] sm:$0xff] }
 0x2eb   : > { %v1106_v42 = vunpack.c.l.s8.bf16 %v914_v15 }
 0x2ed   : > { %1970 = vmatpush1.bf16.msra.mxu1 %v1390_v27  ;;  %v939_v27 = vld [vmem:[%s8648_s19 + $0x178] sm:$0xff] }
 0x2ee   : > { %1971 = vmatprep.subr.bf16.mxu1 %v1415_v63  ;;  %v1130_v63 = vunpack.c.h.s8.bf16 %v914_v15  ;;  %v1155_v18 = vunpack.c.l.s8.bf16 %v939_v27  ;;  %v1179_v44 = vunpack.c.h.s8.bf16 %v939_v27  ;;  %v9255_v27 = vsub.s32 4, %v8880_v40 }
 0x2f0   : > { %11043 = vst [vmem:[#allocation13_spill] sm:$0xff] %v9255_v27 }
 0x2f1   : > { %1972 = vmatpush1.bf16.msra.mxu1 %v1414_v36  ;;  %v938_v36 = vld [vmem:[%s8648_s19 + $0x170] sm:$0xff] }
 0x2f2   : > { %1973 = vmatprep.subr.bf16.mxu1 %v1439_v52  ;;  %v1154_v52 = vunpack.c.l.s8.bf16 %v938_v36 }
 0x2f5   : > { %1974 = vmatpush1.bf16.msra.mxu1 %v1438_v0  ;;  %v963_v0 = vld [vmem:[%s8648_s19 + $0x238] sm:$0xff] }
 0x2f6   : > { %1975 = vmatprep.subr.bf16.mxu1 %v1463_v37  ;;  %v1178_v37 = vunpack.c.h.s8.bf16 %v938_v36  ;;  %v1203_v3 = vunpack.c.l.s8.bf16 %v963_v0  ;;  %v1227_v15 = vunpack.c.h.s8.bf16 %v963_v0 }
 0x2f9   : > { %1976 = vmatpush1.bf16.msra.mxu1 %v1462_v47  ;;  %v962_v47 = vld [vmem:[%s8648_s19 + $0x230] sm:$0xff] }
 0x2fa   : > { %2051 = vmatprep.subr.bf16.mxu1 %v1107_v41  ;;  %v1202_v41 = vunpack.c.l.s8.bf16 %v962_v47 }
 0x2fc   : > { %1978 = vmatmul.mubr.bf16.vlgmr.msra.gmra.mrb[48].mxu1 %v8912_v29 }
 0x2fd   : > { %1987 = vmatprep.mubr.bf16.mxu1 %v8924_v22  ;;  %2052 = vmatpush1.bf16.msra.mxu1 %v1106_v42  ;;  %v987_v42 = vld [vmem:[%s8648_s19 + $0x2f8] sm:$0xff] }
 0x2fe   : > { %2053 = vmatprep.subr.bf16.mxu1 %v1131_v45  ;;  %v1226_v45 = vunpack.c.h.s8.bf16 %v962_v47  ;;  %v1275_v33 = vunpack.c.h.s8.bf16 %v987_v42 }
 0x301   : > { %2054 = vmatpush1.bf16.msra.mxu1 %v1130_v63 }
 0x302   : > { %2055 = vmatprep.subr.bf16.mxu1 %v1155_v18  ;;  %v986_v18 = vld [vmem:[%s8648_s19 + $0x2f0] sm:$0xff] }
 0x304   : > { %1988 = vmatmul.mubr.bf16.gmra.mrb[52].mxu1 %v8930_v10 }
 0x305   : > { %2056 = vmatpush1.bf16.msra.mxu1 %v1154_v52  ;;  %2083 = vmatprep.mubr.bf16.mxu1 %v8914_v6  ;;  %v1251_v6 = vunpack.c.l.s8.bf16 %v987_v42 }
 0x306   : > { %2057 = vmatprep.subr.bf16.mxu1 %v1179_v44  ;;  %v9266_v44 = vrot.slane %v9189_v12, %v9255_v27  ;;  %v1274_v12 = vunpack.c.h.s8.bf16 %v986_v18 }
 0x308   : > { %11045 = vst [vmem:[#allocation15_spill] sm:$0xff] %v9266_v44 }
 0x309   : > { %2058 = vmatpush1.bf16.msra.mxu1 %v1178_v37 }
 0x30a   : > { %2059 = vmatprep.subr.bf16.mxu1 %v1203_v3 }
 0x30d   : > { %2060 = vmatpush1.bf16.msra.mxu1 %v1202_v41  ;;  %v1250_v41 = vunpack.c.l.s8.bf16 %v986_v18 }
 0x30e   : > { %v9257_v63 = vpop.f32.mrb[24].mxu1  ;;  %2061 = vmatprep.subr.bf16.mxu1 %v1227_v15 }
 0x30f   : > { %v9260_v36 = vpop.f32.mrb[24].mxu0  ;;  %v9262_v52 = vpop.f32.mrb[25].mxu1 }
 0x310   : > { %11044 = vst [vmem:[#allocation14_spill] sm:$0xff] %v9260_v36  ;;  %v9268_v0 = vpop.f32.mrb[25].mxu0  ;;  %v9270_v37 = vpop.f32.mrb[26].mxu1 }
 0x311   : > { %11046 = vst [vmem:[#allocation16_spill] sm:$0xff] %v9268_v0  ;;  %v2036_v3 = vpop.f32.mrb[26].mxu0  ;;  %2062 = vmatpush1.bf16.msra.mxu1 %v1226_v45  ;;  %v9272_v47 = vpop.f32.mrb[27].mxu1  ;;  %v1299_v0 = vunpack.c.l.s8.bf16 %v1011_v2 }
 0x312   : > { %v9275_v15 = vmul.f32 %v9266_v44, %v2036_v3  ;;  %v9277_v36 = vpop.f32.mrb[27].mxu0  ;;  %2063 = vmatprep.subr.bf16.mxu1 %v1251_v6 }
 0x313   : > { %11048 = vst [vmem:[#allocation18_spill] sm:$0xff] %v9277_v36 }
 0x314   : > { %11047 = vst [vmem:[#allocation17_spill] sm:$0xff] %v9275_v15  ;;  %v1323_v15 = vunpack.c.h.s8.bf16 %v1011_v2 }
 0x315   : > { %2064 = vmatpush1.bf16.msra.mxu1 %v1250_v41 }
 0x316   : > { %v9280_v39 = vpop.f32.mrb[28].mxu1  ;;  %2065 = vmatprep.subr.bf16.mxu1 %v1275_v33  ;;  %v1298_v33 = vunpack.c.l.s8.bf16 %v1010_v5 }
 0x317   : > { %v2042_v45 = vpop.f32.mrb[28].mxu0  ;;  %v9283_v24 = vpop.f32.mrb[29].mxu1 }
 0x318   : > { %v9286_v21 = vmul.f32 %v9266_v44, %v2042_v45  ;;  %v9288_v3 = vpop.f32.mrb[29].mxu0  ;;  %v9290_v6 = vpop.f32.mrb[30].mxu1  ;;  %v1035_v45 = vld [vmem:[%s8648_s19 + $0x478] sm:$0xff] }
 0x319   : > { %11050 = vst [vmem:[#allocation20_spill] sm:$0xff] %v9288_v3  ;;  %v2046_v42 = vpop.f32.mrb[30].mxu0  ;;  %2066 = vmatpush1.bf16.msra.mxu1 %v1274_v12  ;;  %v9292_v18 = vpop.f32.mrb[31].mxu1  ;;  %v1347_v3 = vunpack.c.l.s8.bf16 %v1035_v45  ;;  %v1346_v12 = vunpack.c.l.s8.bf16 %v1034_v51 }
 0x31a   : > { %11049 = vst [vmem:[#allocation19_spill] sm:$0xff] %v9286_v21  ;;  %11051 = vst [vmem:[#allocation21_spill] sm:$0xff] %v9292_v18  ;;  %v9295_v41 = vmul.f32 %v9266_v44, %v2046_v42  ;;  %v9297_v36 = vpop.f32.mrb[31].mxu0  ;;  %2067 = vmatprep.subr.bf16.mxu1 %v1299_v0  ;;  %v1322_v21 = vunpack.c.h.s8.bf16 %v1010_v5  ;;  %v1371_v18 = vunpack.c.h.s8.bf16 %v1035_v45  ;;  %v1370_v42 = vunpack.c.h.s8.bf16 %v1034_v51  ;;  %v1058_v0 = vld [vmem:[%s8648_s19 + $0x530] sm:$0xff]  ;;  %v1083_v5 = vld [vmem:[%s8648_s19 + $0x5f8] sm:$0xff] }
 0x31b   : > { %11053 = vst [vmem:[#allocation23_spill] sm:$0xff] %v9297_v36  ;;  %v1395_v36 = vunpack.c.l.s8.bf16 %v1059_v25  ;;  %v1394_v2 = vunpack.c.l.s8.bf16 %v1058_v0  ;;  %v1443_v45 = vunpack.c.l.s8.bf16 %v1083_v5 }
 0x31c   : > { %11052 = vst [vmem:[#allocation22_spill] sm:$0xff] %v9295_v41  ;;  %v1418_v41 = vunpack.c.h.s8.bf16 %v1058_v0 }
 0x31d   : > { %2068 = vmatpush1.bf16.msra.mxu1 %v1298_v33  ;;  %v1419_v33 = vunpack.c.h.s8.bf16 %v1059_v25  ;;  %v1467_v25 = vunpack.c.h.s8.bf16 %v1083_v5 }
 0x31e   : > { %2069 = vmatprep.subr.bf16.mxu1 %v1323_v15 }
 0x321   : > { %2070 = vmatpush1.bf16.msra.mxu1 %v1322_v21 }
 0x322   : > { %2071 = vmatprep.subr.bf16.mxu1 %v1347_v3 }
 0x325   : > { %2072 = vmatpush1.bf16.msra.mxu1 %v1346_v12  ;;  %v1082_v12 = vld [vmem:[%s8648_s19 + $0x5f0] sm:$0xff] }
 0x326   : > { %2073 = vmatprep.subr.bf16.mxu1 %v1371_v18  ;;  %v1466_v0 = vunpack.c.h.s8.bf16 %v1082_v12 }
 0x329   : > { %2074 = vmatpush1.bf16.msra.mxu1 %v1370_v42 }
 0x32a   : > { %2075 = vmatprep.subr.bf16.mxu1 %v1395_v36  ;;  %v1442_v36 = vunpack.c.l.s8.bf16 %v1082_v12  ;;  %v2359_v12 = vpack.c.bf16 %v9080_v57, %v9080_v57 }
 0x32c   : > { %v2456_v15 = vpop.f32.mrb[32].mxu0 }
 0x32d   : > { %2076 = vmatpush1.bf16.msra.mxu1 %v1394_v2  ;;  %v9304_v21 = vmul.f32 0.088388346, %v2456_v15  ;;  %v7871_v3 = vpop.f32.mrb[33].mxu0 }
 0x32e   : > { %2077 = vmatprep.subr.bf16.mxu1 %v1419_v33  ;;  %v2459_v51 = vpop.f32.mrb[34].mxu0 }
 0x32f   : > { %v7872_v18 = vpop.f32.mrb[35].mxu0  ;;  %v3735_v44 = vsel %vm3734_vm1, %v9304_v21, -inf }
 0x330   : > { %3736 = vmax.xlane.f32.xlu0 %v3735_v44  ;;  %v11054_v18 = vmov 0.0  }
 0x331   : > { %2078 = vmatpush1.bf16.msra.mxu1 %v1418_v41 }
 0x332   : > { %2079 = vmatprep.subr.bf16.mxu1 %v1443_v45 }
 0x334   : > { %v2536_v42 = vpop.f32.mrb[36].mxu0 }
 0x335   : > { %2080 = vmatpush1.bf16.msra.mxu1 %v1442_v36  ;;  %v9309_v2 = vmul.f32 0.088388346, %v2536_v42  ;;  %v7883_v33 = vpop.f32.mrb[37].mxu0 }
 0x336   : > { %2081 = vmatprep.subr.bf16.mxu1 %v1467_v25  ;;  %v2539_v15 = vpop.f32.mrb[38].mxu0 }
 0x337   : > { %v7884_v3 = vpop.f32.mrb[39].mxu0  ;;  %v3741_v51 = vsel %vm3734_vm1, %v9309_v2, -inf  ;;  %v2327_v15 = vpack.c.bf16 %v9078_v56, %v9078_v56 }
 0x338   : > { %3742 = vmax.xlane.f32.xlu0 %v3741_v51  ;;  %v9333_v3 = vsub.s32 2, %v8880_v40 }
 0x339   : > { %2082 = vmatpush1.bf16.msra.mxu1 %v1466_v0 }
 0x33a   : > { %7873 = vmatprep.subr.bf16.mxu1 %v11054_v18  ;;  %v2153_v51 = vrot.slane %v9057_v9, %v9333_v3  ;;  %v9344_v56 = vrot.slane %v9062_v14, %v9333_v3 }
 0x33c   : > { %2084 = vmatmul.mubr.bf16.vlgmr.msra.gmra.mrb[56].mxu1 %v8912_v29  ;;  %v2616_v44 = vpop.f32.mrb[40].mxu0 }
 0x33d   : > { %2093 = vmatprep.mubr.bf16.mxu1 %v8924_v22  ;;  %v9316_v41 = vmul.f32 0.088388346, %v2616_v44  ;;  %v7895_v5 = vpop.f32.mrb[41].mxu0 }
 0x33e   : > { %v2619_v45 = vpop.f32.mrb[42].mxu0 }
 0x33f   : > { %v7896_v36 = vpop.f32.mrb[43].mxu0  ;;  %v3747_v25 = vsel %vm3734_vm1, %v9316_v41, -inf }
 0x340   : > { %3748 = vmax.xlane.f32.xlu0 %v3747_v25 }
 0x342   : > { %7874 = vmatpush3.bf16.xpose.msra.mxu1 %v2359_v12 }
 0x343   : > { %7885 = vmatprep.subr.bf16.mxu1 %v11054_v18 }
 0x344   : > { %2094 = vmatmul.mubr.bf16.gmra.mrb[60].mxu1 %v8930_v10  ;;  %v2696_v29 = vpop.f32.mrb[44].mxu0  ;;  %v2361_v10 = vpack.c.bf16 %v9093_v20, %v9093_v20  ;;  %v2329_v20 = vpack.c.bf16 %v9091_v19, %v9091_v19 }
 0x345   : > { %7875 = vmatprep.mubr.msk.bf16.mxu1 %vm8541_vm0, %v11054_v18  ;;  %v9326_v22 = vmul.f32 0.088388346, %v2696_v29  ;;  %v7907_v42 = vpop.f32.mrb[45].mxu0  ;;  %v2363_v29 = vpack.c.bf16 %v9086_v61, %v9086_v61 }
 0x346   : > { %v2699_v0 = vpop.f32.mrb[46].mxu0  ;;  %v2232_v42 = vmul.f32 %v9344_v56, %v9134_v31 }
 0x347   : > { %v7908_v33 = vpop.f32.mrb[47].mxu0  ;;  %v3753_v57 = vsel %vm3734_vm1, %v9326_v22, -inf  ;;  %v9359_v0 = vsub.s32 3, %v8880_v40 }
 0x348   : > { %3754 = vmax.xlane.f32.xlu0 %v3753_v57  ;;  %v2334_v61 = vpack.c.bf16 %v2232_v42, %v2232_v42 }
 0x349   : > { %v9365_v31 = vrot.slane %v9057_v9, %v9359_v0 }
 0x34c   : > { %7876 = vmatmul.mubr.bf16.vlgmr.msra.gmra.mrb[64].mxu1 %v2327_v15 }
 0x34d   : > { %7886 = vmatpush3.bf16.xpose.msra.mxu1 %v2361_v10  ;;  %7887 = vmatprep.mubr.msk.bf16.mxu1 %vm8541_vm0, %v11054_v18  ;;  %v2331_v10 = vpack.c.bf16 %v9083_v60, %v9083_v60 }
 0x34e   : > { %7897 = vmatprep.subr.bf16.mxu1 %v11054_v18 }
 0x34f   : > { %v1767_v44 = vpop.f32.mrb[32].mxu1 }
 0x350   : > { %v2240_v5 = vmul.f32 %v2153_v51, %v1767_v44  ;;  %v1769_v45 = vpop.f32.mrb[33].mxu1 }
 0x351   : > { %v1771_v12 = vpop.f32.mrb[34].mxu1  ;;  %v2241_v60 = vmul.f32 %v9365_v31, %v1769_v45 }
 0x352   : > { %v2366_v36 = vpack.c.bf16 %v2240_v5, %v2240_v5  ;;  %v9348_v25 = vpop.f32.mrb[35].mxu1  ;;  %v2264_v9 = vmul.f32 %v2153_v51, %v1771_v12 }
 0x353   : > { %v2370_v42 = vpack.c.bf16 %v2241_v60, %v2241_v60 }
 0x354   : > { %7888 = vmatmul.mubr.bf16.vlgmr.msra.gmra.mrb[68].mxu1 %v2329_v20  ;;  %7916 = vmatpush3.bf16.xpose.msra.mxu0 %v2366_v36  ;;  %v2365_v20 = vpack.c.bf16 %v9099_v23, %v9099_v23  ;;  %v2280_v36 = vmul.f32 %v9344_v56, %v9152_v48  ;;  %v9382_v23 = vrot.slane %v9062_v14, %v9359_v0 }
 0x355   : > { %7898 = vmatpush3.bf16.xpose.msra.mxu1 %v2363_v29  ;;  %7899 = vmatprep.mubr.msk.bf16.mxu1 %vm8541_vm0, %v11054_v18  ;;  %v2333_v48 = vpack.c.bf16 %v9096_v38, %v9096_v38  ;;  %v2256_v14 = vmul.f32 %v9344_v56, %v9143_v13 }
 0x356   : > { %7909 = vmatprep.subr.bf16.mxu1 %v11054_v18  ;;  %7927 = vmatprep.subr.bf16.mxu0 %v11054_v18  ;;  %v2336_v29 = vpack.c.bf16 %v2280_v36, %v2280_v36  ;;  %v2233_v45 = vmul.f32 %v9382_v23, %v9138_v34  ;;  %v9419_v36 = vld [vmem:[%s8657_s27] sm:$0xff] }
 0x357   : > { %v1777_v19 = vpop.f32.mrb[36].mxu1  ;;  %v9423_v60 = vrot.slane %v9419_v36, %v9255_v27 }
 0x358   : > { %v2288_v33 = vmul.f32 %v2153_v51, %v1777_v19  ;;  %v1779_v57 = vpop.f32.mrb[37].mxu1  ;;  %v2367_v19 = vpack.c.bf16 %v2264_v9, %v2264_v9 }
 0x359   : > { %v1781_v15 = vpop.f32.mrb[38].mxu1  ;;  %v2289_v12 = vmul.f32 %v9365_v31, %v1779_v57  ;;  %v2281_v57 = vmul.f32 %v9382_v23, %v9156_v53 }
 0x35a   : > { %v2368_v44 = vpack.c.bf16 %v2288_v33, %v2288_v33  ;;  %v9367_v5 = vpop.f32.mrb[39].mxu1  ;;  %v2312_v38 = vmul.f32 %v2153_v51, %v1781_v15  ;;  %v2338_v33 = vpack.c.bf16 %v2233_v45, %v2233_v45  ;;  %v2304_v15 = vmul.f32 %v9344_v56, %v9161_v55 }
 0x35b   : > { %7918 = vmatmul.mubr.bf16.vlgmr.msra.gmra.mrb[48].mxu0 %v2334_v61  ;;  %v9398_v61 = vld [vmem:[%s8657_s27 + $0x8] sm:$0xff]  ;;  %v2372_v13 = vpack.c.bf16 %v2289_v12, %v2289_v12  ;;  %v2340_v53 = vpack.c.bf16 %v2281_v57, %v2281_v57  ;;  %v2234_v56 = vmul.f32 %v9423_v60, %v9186_v35  ;;  %v2313_v35 = vmul.f32 %v9365_v31, %v9367_v5 }
 0x35c   : > { %7900 = vmatmul.mubr.bf16.vlgmr.msra.gmra.mrb[72].mxu1 %v2331_v10  ;;  %7928 = vmatpush3.bf16.xpose.msra.mxu0 %v2368_v44  ;;  %v9402_v34 = vrot.slane %v9398_v61, %v9255_v27  ;;  %v2335_v10 = vpack.c.bf16 %v2256_v14, %v2256_v14  ;;  %v2369_v44 = vpack.c.bf16 %v2312_v38, %v2312_v38 }
 0x35d   : > { %7910 = vmatpush3.bf16.xpose.msra.mxu1 %v2365_v20  ;;  %7929 = vmatprep.mubr.msk.bf16.mxu0 %vm8541_vm0, %v11054_v18  ;;  %v2265_v20 = vmul.f32 %v9365_v31, %v9348_v25  ;;  %v2337_v9 = vpack.c.bf16 %v2304_v15, %v2304_v15  ;;  %v9430_v25 = vsub.s32 5, %v8880_v40  ;;  %v2373_v14 = vpack.c.bf16 %v2313_v35, %v2313_v35 }
 0x35e   : > { %7911 = vmatprep.mubr.msk.bf16.mxu1 %vm8541_vm0, %v11054_v18  ;;  %7921 = vmatprep.subr.bf16.mxu1 %v11054_v18  ;;  %v2242_v51 = vmul.f32 %v9402_v34, %v9136_v32  ;;  %v2305_v5 = vmul.f32 %v9382_v23, %v9165_v59  ;;  %v2266_v12 = vmul.f32 %v9402_v34, %v9145_v16 }
 0x35f   : > { %7939 = vmatprep.subr.bf16.mxu0 %v11054_v18  ;;  %v2371_v55 = vpack.c.bf16 %v2265_v20, %v2265_v20 }
 0x360   : > { %v2374_v32 = vpack.c.bf16 %v2242_v51, %v2242_v51  ;;  %v9479_v51 = vsub.s32 6, %v8880_v40 }
 0x363   : > { %7930 = vmatmul.mubr.bf16.vlgmr.msra.gmra.mrb[52].mxu0 %v2336_v29  ;;  %v2257_v29 = vmul.f32 %v9382_v23, %v9147_v17  ;;  %v2258_v23 = vmul.f32 %v9423_v60, %v9198_v28  ;;  %v9483_v28 = vrot.slane %v9398_v61, %v9479_v51 }
 0x364   : > { %7912 = vmatmul.mubr.bf16.vlgmr.msra.gmra.mrb[76].mxu1 %v2333_v48  ;;  %7940 = vmatpush3.bf16.xpose.msra.mxu0 %v2370_v42  ;;  %v2290_v48 = vmul.f32 %v9402_v34, %v9154_v49  ;;  %v2342_v42 = vpack.c.bf16 %v2234_v56, %v2234_v56  ;;  %v2282_v49 = vmul.f32 %v9423_v60, %v9216_v50 }
 0x365   : > { %7922 = vmatpush3.bf16.xpose.msra.mxu1 %v2367_v19  ;;  %7941 = vmatprep.mubr.msk.bf16.mxu0 %vm8541_vm0, %v11054_v18  ;;  %v9444_v19 = vrot.slane %v9398_v61, %v9430_v25  ;;  %v2339_v45 = vpack.c.bf16 %v2257_v29, %v2257_v29  ;;  %v9462_v50 = vrot.slane %v9419_v36, %v9430_v25 }
 0x366   : > { %7923 = vmatprep.mubr.msk.bf16.mxu1 %vm8541_vm0, %v11054_v18  ;;  %7933 = vmatprep.subr.bf16.mxu1 %v11054_v18  ;;  %v2376_v17 = vpack.c.bf16 %v2290_v48, %v2290_v48  ;;  %v2344_v38 = vpack.c.bf16 %v2282_v49, %v2282_v49  ;;  %v2343_v57 = vpack.c.bf16 %v2258_v23, %v2258_v23 }
 0x367   : > { %7951 = vmatprep.subr.bf16.mxu0 %v11054_v18  ;;  %v2243_v31 = vmul.f32 %v9444_v19, %v9140_v8  ;;  %v2341_v8 = vpack.c.bf16 %v2305_v5, %v2305_v5  ;;  %v2235_v59 = vmul.f32 %v9462_v50, %v9193_v11  ;;  %v2291_v16 = vmul.f32 %v9444_v19, %v9158_v54 }
 0x368   : > { %v2283_v15 = vmul.f32 %v9462_v50, %v9218_v62  ;;  %v2259_v48 = vmul.f32 %v9462_v50, %v9206_v30  ;;  %v2315_v35 = vmul.f32 %v9444_v19, %v9167_v26  ;;  %v2307_v26 = vmul.f32 %v9462_v50, %v9229_v4 }
 0x369   : > { %v2346_v11 = vpack.c.bf16 %v2235_v59, %v2235_v59 }
 0x36a   : > { %v2347_v30 = vpack.c.bf16 %v2259_v48, %v2259_v48 }
 0x36b   : > { %7942 = vmatmul.mubr.bf16.vlgmr.msra.gmra.mrb[56].mxu0 %v2338_v33  ;;  %v2378_v33 = vpack.c.bf16 %v2243_v31, %v2243_v31 }
 0x36c   : > { %7924 = vmatmul.mubr.bf16.vlgmr.msra.gmra.mrb[80].mxu1 %v2335_v10  ;;  %7952 = vmatpush3.bf16.xpose.msra.mxu0 %v2372_v13  ;;  %v2375_v10 = vpack.c.bf16 %v2266_v12, %v2266_v12  ;;  %v2314_v13 = vmul.f32 %v9402_v34, %v9163_v58  ;;  %v2306_v58 = vmul.f32 %v9423_v60, %v9224_v1 }
 0x36d   : > { %7934 = vmatpush3.bf16.xpose.msra.mxu1 %v2369_v44  ;;  %7953 = vmatprep.mubr.msk.bf16.mxu0 %vm8541_vm0, %v11054_v18  ;;  %v2380_v44 = vpack.c.bf16 %v2291_v16, %v2291_v16  ;;  %v2267_v34 = vmul.f32 %v9444_v19, %v9149_v43 }
 0x36e   : > { %7935 = vmatprep.mubr.msk.bf16.mxu1 %vm8541_vm0, %v11054_v18  ;;  %7945 = vmatprep.subr.bf16.mxu1 %v11054_v18  ;;  %v2377_v54 = vpack.c.bf16 %v2314_v13, %v2314_v13  ;;  %v2345_v60 = vpack.c.bf16 %v2306_v58, %v2306_v58 }
 0x36f   : > { %7963 = vmatprep.subr.bf16.mxu0 %v11054_v18  ;;  %v2379_v29 = vpack.c.bf16 %v2267_v34, %v2267_v34 }
 0x373   : > { %7954 = vmatmul.mubr.bf16.vlgmr.msra.gmra.mrb[60].mxu0 %v2340_v53 }
 0x374   : > { %7936 = vmatmul.mubr.bf16.vlgmr.msra.gmra.mrb[84].mxu1 %v2337_v9  ;;  %7964 = vmatpush3.bf16.xpose.msra.mxu0 %v2374_v32  ;;  %v2348_v32 = vpack.c.bf16 %v2283_v15, %v2283_v15  ;;  %v9500_v9 = vrot.slane %v9419_v36, %v9479_v51 }
 0x375   : > { %7946 = vmatpush3.bf16.xpose.msra.mxu1 %v2371_v55  ;;  %7965 = vmatprep.mubr.msk.bf16.mxu0 %vm8541_vm0, %v11054_v18 }
 0x376   : > { %7947 = vmatprep.mubr.msk.bf16.mxu1 %vm8541_vm0, %v11054_v18  ;;  %7957 = vmatprep.subr.bf16.mxu1 %v11054_v18  ;;  %v2236_v43 = vmul.f32 %v9500_v9, %v9257_v63  ;;  %v9517_v63 = vsub.s32 7, %v8880_v40  ;;  %v2284_v40 = vmul.f32 %v9500_v9, %v9280_v39  ;;  %v2260_v50 = vmul.f32 %v9500_v9, %v9270_v37 }
 0x377   : > { %7975 = vmatprep.subr.bf16.mxu0 %v11054_v18 }
 0x378   : > { %v9522_v31 = vrot.slane %v9398_v61, %v9517_v63  ;;  %v2141_v39 = vrot.slane %v9419_v36, %v9517_v63 }
 0x37a   : > { %v2237_v4 = vmul.f32 %v2141_v39, %v9262_v52  ;;  %v2351_v52 = vpack.c.bf16 %v2260_v50, %v2260_v50  ;;  %v2285_v37 = vmul.f32 %v2141_v39, %v9283_v24 }
 0x37b   : > { %7966 = vmatmul.mubr.bf16.vlgmr.msra.gmra.mrb[64].mxu0 %v2342_v42 }
 0x37c   : > { %7948 = vmatmul.mubr.bf16.vlgmr.msra.gmra.mrb[88].mxu1 %v2339_v45  ;;  %7976 = vmatpush3.bf16.xpose.msra.mxu0 %v2376_v17  ;;  %v2354_v23 = vpack.c.bf16 %v2237_v4, %v2237_v4  ;;  %v2356_v24 = vpack.c.bf16 %v2285_v37, %v2285_v37 }
 0x37d   : > { %7958 = vmatpush3.bf16.xpose.msra.mxu1 %v2373_v14  ;;  %7977 = vmatprep.mubr.msk.bf16.mxu0 %vm8541_vm0, %v11054_v18  ;;  %v2350_v14 = vpack.c.bf16 %v2236_v43, %v2236_v43 }
 0x37e   : > { %7959 = vmatprep.mubr.msk.bf16.mxu1 %vm8541_vm0, %v11054_v18  ;;  %7969 = vmatprep.subr.bf16.mxu1 %v11054_v18 }
 0x37f   : > { %7987 = vmatprep.subr.bf16.mxu0 %v11054_v18 }
 0x383   : > { %7978 = vmatmul.mubr.bf16.vlgmr.msra.gmra.mrb[68].mxu0 %v2344_v38  ;;  %v2381_v38 = vpack.c.bf16 %v2315_v35, %v2315_v35 }
 0x384   : > { %7960 = vmatmul.mubr.bf16.vlgmr.msra.gmra.mrb[92].mxu1 %v2341_v8  ;;  %7988 = vmatpush3.bf16.xpose.msra.mxu0 %v2378_v33  ;;  %v2352_v33 = vpack.c.bf16 %v2284_v40, %v2284_v40  ;;  %v2349_v8 = vpack.c.bf16 %v2307_v26, %v2307_v26 }
 0x385   : > { %7970 = vmatpush3.bf16.xpose.msra.mxu1 %v2375_v10  ;;  %7989 = vmatprep.mubr.msk.bf16.mxu0 %vm8541_vm0, %v11054_v18 }
 0x386   : > { %7971 = vmatprep.mubr.msk.bf16.mxu1 %vm8541_vm0, %v11054_v18  ;;  %7981 = vmatprep.subr.bf16.mxu1 %v11054_v18 }
 0x387   : > { %7999 = vmatprep.subr.bf16.mxu0 %v11054_v18 }
 0x38b   : > { %7990 = vmatmul.mubr.bf16.vlgmr.msra.gmra.mrb[72].mxu0 %v2346_v11  ;;  %v2246_v11 = vmul.f32 %v9214_v46, %v9191_v7 }
 0x38c   : > { %7972 = vmatmul.mubr.bf16.vlgmr.msra.gmra.mrb[96].mxu1 %v2343_v57  ;;  %8000 = vmatpush3.bf16.xpose.msra.mxu0 %v2380_v44  ;;  %v2308_v57 = vmul.f32 %v9500_v9, %v9290_v6  ;;  %v2261_v6 = vmul.f32 %v2141_v39, %v9272_v47  ;;  %v11056_v47 = vld [vmem:[#allocation21_spill] sm:$0xff] }
 0x38d   : > { %7982 = vmatpush3.bf16.xpose.msra.mxu1 %v2377_v54  ;;  %8001 = vmatprep.mubr.msk.bf16.mxu0 %vm8541_vm0, %v11054_v18  ;;  %v2390_v54 = vpack.c.bf16 %v2246_v11, %v2246_v11  ;;  %v2309_v9 = vmul.f32 %v2141_v39, %v11056_v47 }
 0x38e   : > { %7983 = vmatprep.mubr.msk.bf16.mxu1 %vm8541_vm0, %v11054_v18  ;;  %7993 = vmatprep.subr.bf16.mxu1 %v11054_v18 }
 0x38f   : > { %v1873_v20 = vpop.f32.mrb[40].mxu1  ;;  %8011 = vmatprep.subr.bf16.mxu0 %v11054_v18  ;;  %v4124_v15 = vsel %vm4122_vm2, %v2390_v54, 0 }
 0x390   : > { %v2244_v62 = vmul.f32 %v9483_v28, %v1873_v20  ;;  %v1875_v53 = vpop.f32.mrb[41].mxu1  ;;  %v2355_v20 = vpack.c.bf16 %v2261_v6, %v2261_v6 }
 0x391   : > { %v1877_v1 = vpop.f32.mrb[42].mxu1  ;;  %v2245_v19 = vmul.f32 %v9522_v31, %v1875_v53  ;;  %v11055_v53 = vld [vmem:[#allocation7_spill] sm:$0xff] }
 0x392   : > { %v2382_v55 = vpack.c.bf16 %v2244_v62, %v2244_v62  ;;  %v9502_v56 = vpop.f32.mrb[43].mxu1  ;;  %v2268_v61 = vmul.f32 %v9483_v28, %v1877_v1 }
 0x393   : > { %8002 = vmatmul.mubr.bf16.vlgmr.msra.gmra.mrb[76].mxu0 %v2348_v32  ;;  %v2386_v10 = vpack.c.bf16 %v2245_v19, %v2245_v19  ;;  %v2269_v7 = vmul.f32 %v9522_v31, %v9502_v56  ;;  %v2270_v32 = vmul.f32 %v9214_v46, %v11055_v53 }
 0x394   : > { %7984 = vmatmul.mubr.bf16.vlgmr.msra.gmra.mrb[100].mxu1 %v2345_v60  ;;  %8012 = vmatpush3.bf16.xpose.msra.mxu0 %v2382_v55  ;;  %v2383_v59 = vpack.c.bf16 %v2268_v61, %v2268_v61  ;;  %v2357_v60 = vpack.c.bf16 %v2309_v9, %v2309_v9 }
 0x395   : > { %7994 = vmatpush3.bf16.xpose.msra.mxu1 %v2379_v29  ;;  %8013 = vmatprep.mubr.msk.bf16.mxu0 %vm8541_vm0, %v11054_v18  ;;  %v2387_v58 = vpack.c.bf16 %v2269_v7, %v2269_v7  ;;  %v2391_v1 = vpack.c.bf16 %v2270_v32, %v2270_v32 }
 0x396   : > { %7995 = vmatprep.mubr.msk.bf16.mxu1 %vm8541_vm0, %v11054_v18  ;;  %8005 = vmatprep.subr.bf16.mxu1 %v11054_v18 }
 0x397   : > { %v1883_v42 = vpop.f32.mrb[44].mxu1  ;;  %8023 = vmatprep.subr.bf16.mxu0 %v11054_v18  ;;  %v4170_v55 = vsel %vm4122_vm2, %v2391_v1, 0 }
 0x398   : > { %v2292_v45 = vmul.f32 %v9483_v28, %v1883_v42  ;;  %v1885_v17 = vpop.f32.mrb[45].mxu1 }
 0x399   : > { %v1887_v49 = vpop.f32.mrb[46].mxu1  ;;  %v2293_v16 = vmul.f32 %v9522_v31, %v1885_v17 }
 0x39a   : > { %v2384_v5 = vpack.c.bf16 %v2292_v45, %v2292_v45  ;;  %v1889_v12 = vpop.f32.mrb[47].mxu1  ;;  %v2316_v36 = vmul.f32 %v9483_v28, %v1887_v49  ;;  %v2353_v28 = vpack.c.bf16 %v2308_v57, %v2308_v57 }
 0x39b   : > { %8014 = vmatmul.mubr.bf16.vlgmr.msra.gmra.mrb[80].mxu0 %v2350_v14  ;;  %v2388_v13 = vpack.c.bf16 %v2293_v16, %v2293_v16  ;;  %v2317_v34 = vmul.f32 %v9522_v31, %v1889_v12 }
 0x39c   : > { %7996 = vmatmul.mubr.bf16.vlgmr.msra.gmra.mrb[104].mxu1 %v2347_v30  ;;  %8024 = vmatpush3.bf16.xpose.msra.mxu0 %v2384_v5  ;;  %v2385_v44 = vpack.c.bf16 %v2316_v36, %v2316_v36 }
 0x39d   : > { %8006 = vmatpush3.bf16.xpose.msra.mxu1 %v2381_v38  ;;  %8025 = vmatprep.mubr.msk.bf16.mxu0 %vm8541_vm0, %v11054_v18  ;;  %v2389_v62 = vpack.c.bf16 %v2317_v34, %v2317_v34 }
 0x39e   : > { %8007 = vmatprep.mubr.msk.bf16.mxu1 %vm8541_vm0, %v11054_v18  ;;  %8017 = vmatprep.subr.bf16.mxu1 %v11054_v18 }
 0x39f   : > { %8035 = vmatprep.subr.bf16.mxu0 %v11054_v18 }
 0x3a3   : > { %8026 = vmatmul.mubr.bf16.vlgmr.msra.gmra.mrb[84].mxu0 %v2352_v33 }
 0x3a4   : > { %8008 = vmatmul.mubr.bf16.vlgmr.msra.gmra.mrb[108].mxu1 %v2349_v8  ;;  %8036 = vmatpush3.bf16.xpose.msra.mxu0 %v2386_v10 }
 0x3a5   : > { %8018 = vmatpush3.bf16.xpose.msra.mxu1 %v2383_v59  ;;  %8037 = vmatprep.mubr.msk.bf16.mxu0 %vm8541_vm0, %v11054_v18 }
 0x3a6   : > { %8019 = vmatprep.mubr.msk.bf16.mxu1 %vm8541_vm0, %v11054_v18  ;;  %8029 = vmatprep.subr.bf16.mxu1 %v11054_v18 }
 0x3a7   : > { %8047 = vmatprep.subr.bf16.mxu0 %v11054_v18 }
 0x3ab   : > { %8038 = vmatmul.mubr.bf16.vlgmr.msra.gmra.mrb[88].mxu0 %v2354_v23 }
 0x3ac   : > { %8020 = vmatmul.mubr.bf16.vlgmr.msra.gmra.mrb[112].mxu1 %v2351_v52  ;;  %8048 = vmatpush3.bf16.xpose.msra.mxu0 %v2388_v13 }
 0x3ad   : > { %8030 = vmatpush3.bf16.xpose.msra.mxu1 %v2385_v44  ;;  %8049 = vmatprep.mubr.msk.bf16.mxu0 %vm8541_vm0, %v11054_v18 }
 0x3ae   : > { %8031 = vmatprep.mubr.msk.bf16.mxu1 %vm8541_vm0, %v11054_v18  ;;  %8041 = vmatprep.subr.bf16.mxu1 %v11054_v18 }
 0x3af   : > { %8059 = vmatprep.subr.bf16.mxu0 %v11054_v18 }
 0x3b3   : > { %8050 = vmatmul.mubr.bf16.vlgmr.msra.gmra.mrb[92].mxu0 %v2356_v24 }
 0x3b4   : > { %8032 = vmatmul.mubr.bf16.vlgmr.msra.gmra.mrb[116].mxu1 %v2353_v28  ;;  %8060 = vmatpush3.bf16.msra.mxu0 %v4124_v15 }
 0x3b5   : > { %8042 = vmatpush3.bf16.xpose.msra.mxu1 %v2387_v58  ;;  %8043 = vmatprep.mubr.msk.bf16.mxu1 %vm8541_vm0, %v11054_v18 }
 0x3b6   : > { %8053 = vmatprep.subr.bf16.mxu1 %v11054_v18  ;;  %8061 = vmatprep.mubr.msk.bf16.mxu0 %vm8541_vm0, %v11054_v18 }
 0x3b7   : > { %8071 = vmatprep.subr.bf16.mxu0 %v11054_v18 }
 0x3bc   : > { %8044 = vmatmul.mubr.bf16.vlgmr.msra.gmra.mrb[120].mxu1 %v2355_v20 }
 0x3bd   : > { %8054 = vmatpush3.bf16.xpose.msra.mxu1 %v2389_v62  ;;  %8055 = vmatprep.mubr.msk.bf16.mxu1 %vm8541_vm0, %v11054_v18  ;;  %v3737_v50 = vpop.xlane.xlu0 %3736 }
 0x3be   : > { %8065 = vmatprep.subr.bf16.mxu1 %v11054_v18  ;;  %v3831_v37 = vsub.f32 %v9304_v21, %v3737_v50 }
 0x3c0   : > { %v3863_v34 = vmul.f32 1.442695, %v3831_v37 }
 0x3c2   : > { %8319 = vpow2.f32 %v3863_v34 }
 0x3c4   : > { %8056 = vmatmul.mubr.bf16.vlgmr.msra.gmra.mrb[124].mxu1 %v2357_v60 }
 0x3c5   : > { %8066 = vmatpush3.bf16.msra.mxu1 %v4170_v55  ;;  %8067 = vmatprep.mubr.msk.bf16.mxu1 %vm8541_vm0, %v11054_v18  ;;  %v3743_v23 = vpop.xlane.xlu0 %3742 }
 0x3c6   : > { %8077 = vmatprep.subr.bf16.mxu1 %v11054_v18  ;;  %v3833_v20 = vsub.f32 %v9309_v2, %v3743_v23 }
 0x3c8   : > { %v3867_v47 = vmul.f32 1.442695, %v3833_v20 }
 0x3ca   : > { %8321 = vpow2.f32 %v3867_v47 }
 0x3cf   : > { %v9581_v46 = vpop.f32.mrb[48].mxu1 }
 0x3d0   : > { %v9583_v56 = vpop.f32.mrb[49].mxu1 }
 0x3d1   : > { %v9585_v29 = vpop.f32.mrb[50].mxu1 }
 0x3d2   : > { %v9587_v43 = vpop.f32.mrb[51].mxu1 }
 0x3d7   : > { %v9589_v48 = vpop.f32.mrb[52].mxu1 }
 0x3d8   : > { %v9591_v35 = vpop.f32.mrb[53].mxu1 }
 0x3d9   : > { %v9593_v42 = vpop.f32.mrb[54].mxu1 }
 0x3da   : > { %v9595_v45 = vpop.f32.mrb[55].mxu1 }
 0x40f   : > { %v9597_v17 = vpop.f32.mrb[56].mxu1 }
 0x410   : > { %v9599_v14 = vpop.f32.mrb[57].mxu1 }
 0x411   : > { %v9601_v49 = vpop.f32.mrb[58].mxu1 }
 0x412   : > { %11057 = vst [vmem:[#allocation7_spill] sm:$0xff] %v9601_v49  ;;  %v9603_v30 = vpop.f32.mrb[59].mxu1 }
 0x413   : > { %11058 = vst [vmem:[#allocation21_spill] sm:$0xff] %v9603_v30 }
 0x417   : > { %v9605_v31 = vpop.f32.mrb[60].mxu1 }
 0x418   : > { %v9607_v5 = vpop.f32.mrb[61].mxu1 }
 0x419   : > { %11059 = vst [vmem:[#allocation24_spill] sm:$0xff] %v9607_v5  ;;  %v9609_v12 = vpop.f32.mrb[62].mxu1 }
 0x41a   : > { %11060 = vst [vmem:[#allocation25_spill] sm:$0xff] %v9609_v12  ;;  %v9611_v38 = vpop.f32.mrb[63].mxu1 }
 0x41b   : > { %11061 = vst [vmem:[#allocation26_spill] sm:$0xff] %v9611_v38 }
 0x41f   : > { %v2496_v40 = vpop.f32.mrb[64].mxu1 }
 0x420   : > { %v9613_v26 = vmul.f32 0.088388346, %v2496_v40  ;;  %v7877_v19 = vpop.f32.mrb[65].mxu1 }
 0x421   : > { %v2499_v61 = vpop.f32.mrb[66].mxu1 }
 0x422   : > { %v7878_v39 = vpop.f32.mrb[67].mxu1  ;;  %v3738_v33 = vsel %vm3734_vm1, %v9613_v26, -inf }
 0x423   : > { %3739 = vmax.xlane.f32.xlu1 %v3738_v33 }
 0x427   : > { %v2576_v8 = vpop.f32.mrb[68].mxu1 }
 0x428   : > { %v9617_v10 = vmul.f32 0.088388346, %v2576_v8  ;;  %v7889_v59 = vpop.f32.mrb[69].mxu1 }
 0x429   : > { %v2579_v4 = vpop.f32.mrb[70].mxu1 }
 0x42a   : > { %v7890_v16 = vpop.f32.mrb[71].mxu1  ;;  %v3744_v36 = vsel %vm3734_vm1, %v9617_v10, -inf }
 0x42b   : > { %3745 = vmax.xlane.f32.xlu1 %v3744_v36 }
 0x42e   : > { %v2776_v52 = vpop.f32.mrb[48].mxu0 }
 0x42f   : > { %v9621_v13 = vmul.f32 0.088388346, %v2776_v52  ;;  %v2656_v11 = vpop.f32.mrb[72].mxu1  ;;  %v7919_v44 = vpop.f32.mrb[49].mxu0 }
 0x430   : > { %v9624_v57 = vmul.f32 0.088388346, %v2656_v11  ;;  %v7901_v54 = vpop.f32.mrb[73].mxu1  ;;  %v2779_v7 = vpop.f32.mrb[50].mxu0 }
 0x431   : > { %v2659_v24 = vpop.f32.mrb[74].mxu1  ;;  %v7920_v28 = vpop.f32.mrb[51].mxu0  ;;  %v3759_v15 = vsel %vm3734_vm1, %v9621_v13, -inf }
 0x432   : > { %3760 = vmax.xlane.f32.xlu0 %v3759_v15  ;;  %v7902_v58 = vpop.f32.mrb[75].mxu1  ;;  %v3750_v6 = vsel %vm3734_vm1, %v9624_v57, -inf  ;;  %v9645_v11 = vpop.eup %8319 }
 0x433   : > { %3751 = vmax.xlane.f32.xlu1 %v3750_v6  ;;  %v3927_v54 = vsel %vm3734_vm1, %v9645_v11, 0.0  ;;  %v9651_v7 = vpop.eup %8321 }
 0x436   : > { %v2856_v62 = vpop.f32.mrb[52].mxu0 }
 0x437   : > { %v9631_v21 = vmul.f32 0.088388346, %v2856_v62  ;;  %v2736_v53 = vpop.f32.mrb[76].mxu1  ;;  %v7931_v32 = vpop.f32.mrb[53].mxu0 }
 0x438   : > { %v9633_v9 = vmul.f32 0.088388346, %v2736_v53  ;;  %v7913_v1 = vpop.f32.mrb[77].mxu1  ;;  %v2859_v60 = vpop.f32.mrb[54].mxu0  ;;  %v3933_v32 = vsel %vm3734_vm1, %v9651_v7, 0.0 }
 0x439   : > { %v2739_v55 = vpop.f32.mrb[78].mxu1  ;;  %v7932_v40 = vpop.f32.mrb[55].mxu0  ;;  %v3765_v19 = vsel %vm3734_vm1, %v9631_v21, -inf }
 0x43a   : > { %3766 = vmax.xlane.f32.xlu0 %v3765_v19  ;;  %v7914_v61 = vpop.f32.mrb[79].mxu1  ;;  %v3756_v2 = vsel %vm3734_vm1, %v9633_v9, -inf }
 0x43b   : > { %3757 = vmax.xlane.f32.xlu1 %v3756_v2 }
 0x43e   : > { %v2936_v39 = vpop.f32.mrb[56].mxu0 }
 0x43f   : > { %v9639_v33 = vmul.f32 0.088388346, %v2936_v39  ;;  %v2816_v8 = vpop.f32.mrb[80].mxu1  ;;  %v7943_v59 = vpop.f32.mrb[57].mxu0 }
 0x440   : > { %v9641_v4 = vmul.f32 0.088388346, %v2816_v8  ;;  %v7925_v50 = vpop.f32.mrb[81].mxu1  ;;  %v2939_v16 = vpop.f32.mrb[58].mxu0 }
 0x441   : > { %v2819_v36 = vpop.f32.mrb[82].mxu1  ;;  %v7944_v23 = vpop.f32.mrb[59].mxu0  ;;  %v3771_v52 = vsel %vm3734_vm1, %v9639_v33, -inf }
 0x442   : > { %3772 = vmax.xlane.f32.xlu0 %v3771_v52  ;;  %v7926_v44 = vpop.f32.mrb[83].mxu1  ;;  %v3762_v37 = vsel %vm3734_vm1, %v9641_v4, -inf }
 0x443   : > { %3763 = vmax.xlane.f32.xlu1 %v3762_v37 }
 0x446   : > { %3928 = vadd.xlane.f32.xlu0 %v3927_v54  ;;  %v3016_v24 = vpop.f32.mrb[60].mxu0 }
 0x447   : > { %v2896_v28 = vpop.f32.mrb[84].mxu1  ;;  %v7955_v15 = vpop.f32.mrb[61].mxu0  ;;  %v9655_v20 = vmul.f32 0.088388346, %v3016_v24 }
 0x448   : > { %v9653_v58 = vmul.f32 0.088388346, %v2896_v28  ;;  %v7937_v6 = vpop.f32.mrb[85].mxu1  ;;  %v3019_v34 = vpop.f32.mrb[62].mxu0 }
 0x449   : > { %v2899_v62 = vpop.f32.mrb[86].mxu1  ;;  %v7956_v53 = vpop.f32.mrb[63].mxu0  ;;  %v3777_v60 = vsel %vm3734_vm1, %v9655_v20, -inf }
 0x44a   : > { %3934 = vadd.xlane.f32.xlu0 %v3933_v32  ;;  %v7938_v47 = vpop.f32.mrb[87].mxu1  ;;  %v3768_v1 = vsel %vm3734_vm1, %v9653_v58, -inf }
 0x44b   : > { %3769 = vmax.xlane.f32.xlu1 %v3768_v1 }
 0x44e   : > { %3778 = vmax.xlane.f32.xlu0 %v3777_v60  ;;  %v9663_v55 = vpop.f32.mrb[64].mxu0 }
 0x44f   : > { %v2976_v40 = vpop.f32.mrb[88].mxu1  ;;  %v7967_v19 = vpop.f32.mrb[65].mxu0 }
 0x450   : > { %v9665_v61 = vmul.f32 0.088388346, %v2976_v40  ;;  %v7949_v2 = vpop.f32.mrb[89].mxu1  ;;  %v3099_v39 = vpop.f32.mrb[66].mxu0 }
 0x451   : > { %v2979_v8 = vpop.f32.mrb[90].mxu1  ;;  %v7968_v59 = vpop.f32.mrb[67].mxu0 }
 0x452   : > { %v7950_v50 = vpop.f32.mrb[91].mxu1  ;;  %v3774_v16 = vsel %vm3734_vm1, %v9665_v61, -inf }
 0x453   : > { %3775 = vmax.xlane.f32.xlu1 %v3774_v16 }
 0x456   : > { %v9669_v36 = vpop.f32.mrb[68].mxu0 }
 0x457   : > { %v9671_v23 = vpop.f32.mrb[92].mxu1  ;;  %v7979_v52 = vpop.f32.mrb[69].mxu0 }
 0x458   : > { %v7961_v44 = vpop.f32.mrb[93].mxu1  ;;  %v3179_v37 = vpop.f32.mrb[70].mxu0 }
 0x459   : > { %v3059_v54 = vpop.f32.mrb[94].mxu1  ;;  %v7980_v24 = vpop.f32.mrb[71].mxu0 }
 0x45a   : > { %v7962_v28 = vpop.f32.mrb[95].mxu1 }
 0x45e   : > { %v9673_v15 = vpop.f32.mrb[72].mxu0 }
 0x45f   : > { %v9675_v6 = vpop.f32.mrb[96].mxu1  ;;  %v7991_v34 = vpop.f32.mrb[73].mxu0 }
 0x460   : > { %v7973_v62 = vpop.f32.mrb[97].mxu1  ;;  %v3259_v53 = vpop.f32.mrb[74].mxu0 }
 0x461   : > { %v3139_v32 = vpop.f32.mrb[98].mxu1  ;;  %v7992_v47 = vpop.f32.mrb[75].mxu0 }
 0x462   : > { %v7974_v1 = vpop.f32.mrb[99].mxu1 }
 0x466   : > { %v9677_v60 = vpop.f32.mrb[76].mxu0 }
 0x467   : > { %v9679_v40 = vpop.f32.mrb[100].mxu1  ;;  %v8003_v19 = vpop.f32.mrb[77].mxu0 }
 0x468   : > { %v7985_v2 = vpop.f32.mrb[101].mxu1  ;;  %v3339_v39 = vpop.f32.mrb[78].mxu0 }
 0x469   : > { %v3219_v8 = vpop.f32.mrb[102].mxu1  ;;  %v8004_v59 = vpop.f32.mrb[79].mxu0 }
 0x46a   : > { %v7986_v50 = vpop.f32.mrb[103].mxu1 }
 0x46e   : > { %v9681_v16 = vpop.f32.mrb[80].mxu0 }
 0x46f   : > { %v9683_v52 = vpop.f32.mrb[104].mxu1  ;;  %v8015_v44 = vpop.f32.mrb[81].mxu0 }
 0x470   : > { %v7997_v37 = vpop.f32.mrb[105].mxu1  ;;  %v3419_v54 = vpop.f32.mrb[82].mxu0 }
 0x471   : > { %v3299_v24 = vpop.f32.mrb[106].mxu1  ;;  %v8016_v28 = vpop.f32.mrb[83].mxu0 }
 0x472   : > { %v7998_v34 = vpop.f32.mrb[107].mxu1 }
 0x476   : > { %v9685_v62 = vpop.f32.mrb[84].mxu0 }
 0x477   : > { %v9687_v53 = vpop.f32.mrb[108].mxu1  ;;  %v8027_v32 = vpop.f32.mrb[85].mxu0 }
 0x478   : > { %v8009_v47 = vpop.f32.mrb[109].mxu1  ;;  %v3499_v1 = vpop.f32.mrb[86].mxu0 }
 0x479   : > { %v3379_v19 = vpop.f32.mrb[110].mxu1  ;;  %v8028_v2 = vpop.f32.mrb[87].mxu0 }
 0x47a   : > { %v8010_v39 = vpop.f32.mrb[111].mxu1 }
 0x47e   : > { %v9689_v8 = vpop.f32.mrb[88].mxu0 }
 0x47f   : > { %v9691_v59 = vpop.f32.mrb[112].mxu1  ;;  %v8039_v50 = vpop.f32.mrb[89].mxu0 }
 0x480   : > { %v8021_v44 = vpop.f32.mrb[113].mxu1  ;;  %v3579_v37 = vpop.f32.mrb[90].mxu0 }
 0x481   : > { %v3459_v54 = vpop.f32.mrb[114].mxu1  ;;  %v8040_v24 = vpop.f32.mrb[91].mxu0 }
 0x482   : > { %v8022_v28 = vpop.f32.mrb[115].mxu1 }
 0x486   : > { %v9693_v34 = vpop.f32.mrb[92].mxu0 }
 0x487   : > { %v9695_v27 = vpop.f32.mrb[116].mxu1  ;;  %v8051_v32 = vpop.f32.mrb[93].mxu0 }
 0x488   : > { %v8033_v47 = vpop.f32.mrb[117].mxu1  ;;  %v3659_v1 = vpop.f32.mrb[94].mxu0 }
 0x489   : > { %v3539_v19 = vpop.f32.mrb[118].mxu1  ;;  %v8052_v2 = vpop.f32.mrb[95].mxu0 }
 0x48a   : > { %v8034_v39 = vpop.f32.mrb[119].mxu1  ;;  %v3749_v32 = vpop.xlane.xlu0 %3748 }
 0x48b   : > { %v3835_v47 = vsub.f32 %v9316_v41, %v3749_v32 }
 0x48d   : > { %v3871_v2 = vmul.f32 1.442695, %v3835_v47 }
 0x48f   : > { %v9697_v38 = vpop.f32.mrb[120].mxu1 }
 0x490   : > { %v8045_v30 = vpop.f32.mrb[121].mxu1 }
 0x491   : > { %v3619_v12 = vpop.f32.mrb[122].mxu1 }
 0x492   : > { %v8046_v50 = vpop.f32.mrb[123].mxu1 }
 0x497   : > { %v9699_v44 = vpop.f32.mrb[124].mxu1 }
 0x498   : > { %v8057_v37 = vpop.f32.mrb[125].mxu1 }
 0x499   : > { %v3699_v54 = vpop.f32.mrb[126].mxu1 }
 0x49a   : > { %v8058_v24 = vpop.f32.mrb[127].mxu1 }
 0x4b0   : > { %v3740_v28 = vpop.xlane.xlu1 %3739 }
 0x4b1   : > { %v3832_v5 = vsub.f32 %v9613_v26, %v3740_v28  ;;  %v9716_v28 = vmul.f32 0.088388346, %v9663_v55 }
 0x4b3   : > { %v3865_v49 = vmul.f32 1.442695, %v3832_v5  ;;  %v3755_v5 = vpop.xlane.xlu0 %3754 }
 0x4b5   : > { %8323 = vpow2.f32 %v3865_v49 }
 0x4b8   : > { %v3746_v1 = vpop.xlane.xlu1 %3745 }
 0x4b9   : > { %v3834_v19 = vsub.f32 %v9617_v10, %v3746_v1  ;;  %v3837_v1 = vsub.f32 %v9326_v22, %v3755_v5 }
 0x4bb   : > { %v3869_v30 = vmul.f32 1.442695, %v3834_v19  ;;  %v9724_v19 = vmul.f32 0.088388346, %v9669_v36 }
 0x4bd   : > { %8325 = vpow2.f32 %v3869_v30  ;;  %v3789_v22 = vsel %vm3734_vm1, %v9724_v19, -inf }
 0x4be   : > { %8327 = vpow2.f32 %v3871_v2  ;;  %v9727_v2 = vmul.f32 0.088388346, %v9671_v23  ;;  %v9739_v23 = vmul.f32 0.088388346, %v9673_v15 }
 0x4bf   : > { %v9704_v12 = vpop.eup %8323  ;;  %v3761_v37 = vpop.xlane.xlu0 %3760 }
 0x4c0   : > { %v3752_v39 = vpop.xlane.xlu1 %3751  ;;  %v3930_v50 = vsel %vm3734_vm1, %v9704_v12, 0.0  ;;  %v3780_v36 = vsel %vm3734_vm1, %v9727_v2, -inf  ;;  %v3839_v5 = vsub.f32 %v9621_v13, %v3761_v37  ;;  %v3795_v13 = vsel %vm3734_vm1, %v9739_v23, -inf }
 0x4c1   : > { %v3836_v26 = vsub.f32 %v9624_v57, %v3752_v39  ;;  %3931 = vadd.xlane.f32.xlu1 %v3930_v50  ;;  %v3783_v50 = vsel %vm3734_vm1, %v9716_v28, -inf }
 0x4c3   : > { %v3873_v49 = vmul.f32 1.442695, %v3836_v26  ;;  %v3875_v26 = vmul.f32 1.442695, %v3837_v1  ;;  %v9749_v1 = vmul.f32 0.088388346, %v9679_v40 }
 0x4c5   : > { %8329 = vpow2.f32 %v3873_v49 }
 0x4c7   : > { %v9709_v41 = vpop.eup %8325  ;;  %v3767_v24 = vpop.xlane.xlu0 %3766 }
 0x4c8   : > { %v3936_v10 = vsel %vm3734_vm1, %v9709_v41, 0.0  ;;  %v9713_v54 = vpop.eup %8327  ;;  %v3758_v32 = vpop.xlane.xlu1 %3757 }
 0x4c9   : > { %3937 = vadd.xlane.f32.xlu1 %v3936_v10  ;;  %v3939_v57 = vsel %vm3734_vm1, %v9713_v54, 0.0  ;;  %v3838_v39 = vsub.f32 %v9633_v9, %v3758_v32  ;;  %v9742_v9 = vmul.f32 0.088388346, %v9675_v6  ;;  %v9746_v32 = vmul.f32 0.088388346, %v9677_v60 }
 0x4ca   : > { %v3841_v60 = vsub.f32 %v9631_v21, %v3767_v24 }
 0x4cb   : > { %v3877_v10 = vmul.f32 1.442695, %v3838_v39  ;;  %v3786_v6 = vsel %vm3734_vm1, %v9742_v9, -inf  ;;  %v3801_v40 = vsel %vm3734_vm1, %v9746_v32, -inf }
 0x4cd   : > { %3940 = vadd.xlane.f32.xlu1 %v3939_v57 }
 0x4cf   : > { %v9720_v47 = vpop.eup %8329  ;;  %v3773_v30 = vpop.xlane.xlu0 %3772 }
 0x4d0   : > { %v3942_v55 = vsel %vm3734_vm1, %v9720_v47, 0.0  ;;  %v3764_v57 = vpop.xlane.xlu1 %3763  ;;  %v3843_v24 = vsub.f32 %v9639_v33, %v3773_v30 }
 0x4d1   : > { %3943 = vadd.xlane.f32.xlu0 %v3942_v55  ;;  %3784 = vmax.xlane.f32.xlu1 %v3783_v50  ;;  %v3840_v15 = vsub.f32 %v9641_v4, %v3764_v57  ;;  %v3879_v50 = vmul.f32 1.442695, %v3839_v5  ;;  %v3792_v4 = vsel %vm3734_vm1, %v9749_v1, -inf }
 0x4d3   : > { %v3929_v49 = vpop.xlane.xlu0 %3928  ;;  %v3881_v39 = vmul.f32 1.442695, %v3840_v15  ;;  %v11062_v15 = vld [vmem:[#allocation9_spill] sm:$0xff] }
 0x4d4   : > { %8331 = vrcp.f32 %v3929_v49  ;;  %v9765_v49 = vmul.f32 0.088388346, %v9683_v52 }
 0x4d5   : > { %3790 = vmax.xlane.f32.xlu0 %v3789_v22  ;;  %3781 = vmax.xlane.f32.xlu1 %v3780_v36  ;;  %8333 = vpow2.f32 %v3875_v26  ;;  %v9762_v26 = vmul.f32 0.088388346, %v9681_v16  ;;  %v3883_v36 = vmul.f32 1.442695, %v3841_v60 }
 0x4d6   : > { %8335 = vpow2.f32 %v3877_v10  ;;  %v3798_v16 = vsel %vm3734_vm1, %v9765_v49, -inf }
 0x4d7   : > { %v3935_v55 = vpop.xlane.xlu0 %3934  ;;  %v3807_v57 = vsel %vm3734_vm1, %v9762_v26, -inf }
 0x4d8   : > { %v3770_v37 = vpop.xlane.xlu1 %3769  ;;  %8337 = vrcp.f32 %v3935_v55 }
 0x4d9   : > { %3796 = vmax.xlane.f32.xlu0 %v3795_v13  ;;  %3787 = vmax.xlane.f32.xlu1 %v3786_v6  ;;  %8339 = vpow2.f32 %v3879_v50  ;;  %v3842_v22 = vsub.f32 %v9653_v58, %v3770_v37  ;;  %v2392_v58 = vpack.c.bf16 %v11062_v15, %v11062_v15  ;;  %v9782_v6 = vmul.f32 0.088388346, %v9685_v62 }
 0x4da   : > { %8341 = vpow2.f32 %v3881_v39  ;;  %v3887_v37 = vmul.f32 1.442695, %v3843_v24  ;;  %v11063_v39 = vld [vmem:[#allocation5_spill] sm:$0xff] }
 0x4db   : > { %v3885_v5 = vmul.f32 1.442695, %v3842_v22  ;;  %8343 = vpow2.f32 %v3883_v36  ;;  %v3779_v22 = vpop.xlane.xlu0 %3778 }
 0x4dc   : > { %v3845_v24 = vsub.f32 %v9655_v20, %v3779_v22  ;;  %v9840_v22 = vmul.f32 0.088388346, %v9691_v59 }
 0x4dd   : > { %3802 = vmax.xlane.f32.xlu0 %v3801_v40  ;;  %3793 = vmax.xlane.f32.xlu1 %v3792_v4  ;;  %8345 = vpow2.f32 %v3885_v5  ;;  %v11064_v40 = vld [vmem:[#allocation6_spill] sm:$0xff]  ;;  %v4216_v4 = vsel %vm4122_vm2, %v2392_v58, 0  ;;  %v3813_v5 = vsel %vm3734_vm1, %v9782_v6, -inf }
 0x4de   : > { %v8332_v21 = vpop.eup %8331  ;;  %8347 = vpow2.f32 %v3887_v37  ;;  %v3891_v58 = vmul.f32 1.442695, %v3845_v24  ;;  %v3810_v24 = vsel %vm3734_vm1, %v9840_v22, -inf }
 0x4df   : > { %v9773_v52 = vpop.eup %8333  ;;  %v4024_v55 = vmul.f32 %v8332_v21, %v9645_v11  ;;  %v2247_v11 = vmul.f32 %v11064_v40, %v11063_v39 }
 0x4e0   : > { %v3776_v10 = vpop.xlane.xlu1 %3775  ;;  %v9778_v50 = vpop.eup %8335  ;;  %v3945_v60 = vsel %vm3734_vm1, %v9773_v52, 0.0 }
 0x4e1   : > { %3808 = vmax.xlane.f32.xlu0 %v3807_v57  ;;  %3799 = vmax.xlane.f32.xlu1 %v3798_v16  ;;  %v3844_v33 = vsub.f32 %v9665_v61, %v3776_v10  ;;  %v4087_v30 = vpack.c.bf16 %v4024_v55, %v4024_v55  ;;  %v3948_v61 = vsel %vm3734_vm1, %v9778_v50, 0.0  ;;  %v2394_v57 = vpack.c.bf16 %v2247_v11, %v2247_v11 }
 0x4e2   : > { %v8338_v13 = vpop.eup %8337  ;;  %v9804_v16 = vmul.f32 0.088388346, %v9689_v8 }
 0x4e3   : > { %8062 = vmatmul.mubr.msk.bf16.vlgmr.msra.gmra.mrb[96].mxu0 %vm3734_vm1, %v4087_v30  ;;  %v9792_v36 = vpop.eup %8339  ;;  %v4028_v62 = vmul.f32 %v8338_v13, %v9651_v7  ;;  %v3889_v21 = vmul.f32 1.442695, %v3844_v33  ;;  %v4308_v33 = vsel %vm4122_vm2, %v2394_v57, 0  ;;  %v9822_v13 = vmul.f32 0.088388346, %v9693_v34 }
 0x4e4   : > { %8072 = vmatpush3.bf16.msra.mxu0 %v4216_v4  ;;  %8073 = vmatprep.mubr.msk.bf16.mxu0 %vm8541_vm0, %v11054_v18  ;;  %v9801_v10 = vpop.eup %8341  ;;  %v3951_v7 = vsel %vm3734_vm1, %v9792_v36, 0.0  ;;  %v3819_v8 = vsel %vm3734_vm1, %v9804_v16, -inf  ;;  %v9835_v4 = vmul.f32 0.088388346, %v9687_v53  ;;  %v9849_v53 = vmul.f32 0.088388346, %v9695_v27 }
 0x4e5   : > { %3946 = vadd.xlane.f32.xlu0 %v3945_v60  ;;  %3949 = vadd.xlane.f32.xlu1 %v3948_v61  ;;  %8349 = vpow2.f32 %v3889_v21  ;;  %v4089_v15 = vpack.c.bf16 %v4028_v62, %v4028_v62  ;;  %v3954_v20 = vsel %vm3734_vm1, %v9801_v10, 0.0  ;;  %v9810_v55 = vpop.eup %8343  ;;  %v3825_v40 = vsel %vm3734_vm1, %v9822_v13, -inf }
 0x4e6   : > { %8083 = vmatprep.subr.bf16.mxu0 %v11054_v18  ;;  %8351 = vpow2.f32 %v3891_v58  ;;  %v3957_v37 = vsel %vm3734_vm1, %v9810_v55, 0.0  ;;  %v3804_v62 = vsel %vm3734_vm1, %v9835_v4, -inf  ;;  %v3816_v57 = vsel %vm3734_vm1, %v9849_v53, -inf }
 0x4e7   : > { %v9816_v30 = vpop.eup %8345 }
 0x4e8   : > { %v3960_v60 = vsel %vm3734_vm1, %v9816_v30, 0.0  ;;  %v9828_v39 = vpop.eup %8347 }
 0x4e9   : > { %3814 = vmax.xlane.f32.xlu0 %v3813_v5  ;;  %3952 = vadd.xlane.f32.xlu1 %v3951_v7  ;;  %v3963_v34 = vsel %vm3734_vm1, %v9828_v39, 0.0  ;;  %v9856_v5 = vmul.f32 0.088388346, %v9697_v38 }
 0x4eb   : > { %8074 = vmatmul.mubr.msk.bf16.vlgmr.msra.gmra.mrb[100].mxu0 %vm3734_vm1, %v4089_v15  ;;  %v3822_v7 = vsel %vm3734_vm1, %v9856_v5, -inf }
 0x4ec   : > { %8084 = vmatpush3.bf16.msra.mxu0 %v4308_v33  ;;  %8085 = vmatprep.mubr.msk.bf16.mxu0 %vm8541_vm0, %v11054_v18 }
 0x4ed   : > { %3955 = vadd.xlane.f32.xlu0 %v3954_v20  ;;  %3820 = vmax.xlane.f32.xlu1 %v3819_v8  ;;  %v11065_v20 = vld [vmem:[#allocation11_spill] sm:$0xff] }
 0x4ee   : > { %8095 = vmatprep.subr.bf16.mxu0 %v11054_v18  ;;  %v2393_v33 = vpack.c.bf16 %v11065_v20, %v11065_v20 }
 0x4ef   : > { %v9832_v11 = vpop.eup %8349 }
 0x4f0   : > { %v3966_v61 = vsel %vm3734_vm1, %v9832_v11, 0.0  ;;  %v9846_v21 = vpop.eup %8351 }
 0x4f1   : > { %3958 = vadd.xlane.f32.xlu0 %v3957_v37  ;;  %3961 = vadd.xlane.f32.xlu1 %v3960_v60  ;;  %v3969_v59 = vsel %vm3734_vm1, %v9846_v21, 0.0  ;;  %v4262_v60 = vsel %vm4122_vm2, %v2393_v33, 0 }
 0x4f5   : > { %3826 = vmax.xlane.f32.xlu0 %v3825_v40  ;;  %3964 = vadd.xlane.f32.xlu1 %v3963_v34 }
 0x4f9   : > { %3967 = vadd.xlane.f32.xlu0 %v3966_v61  ;;  %3805 = vmax.xlane.f32.xlu1 %v3804_v62 }
 0x4fd   : > { %3811 = vmax.xlane.f32.xlu0 %v3810_v24  ;;  %3970 = vadd.xlane.f32.xlu1 %v3969_v59  ;;  %v11066_v24 = vld [vmem:[#allocation8_spill] sm:$0xff] }
 0x4fe   : > { %v2395_v59 = vpack.c.bf16 %v11066_v24, %v11066_v24 }
 0x501   : > { %3817 = vmax.xlane.f32.xlu0 %v3816_v57 }
 0x505   : > { %3823 = vmax.xlane.f32.xlu0 %v3822_v7 }
 0x54e   : > { %v3932_v27 = vpop.xlane.xlu1 %3931 }
 0x54f   : > { %8353 = vrcp.f32 %v3932_v27 }
 0x556   : > { %v3938_v15 = vpop.xlane.xlu1 %3937 }
 0x557   : > { %8355 = vrcp.f32 %v3938_v15 }
 0x559   : > { %v8354_v58 = vpop.eup %8353 }
 0x55a   : > { %v4026_v8 = vmul.f32 %v8354_v58, %v9704_v12  ;;  %v3941_v38 = vpop.xlane.xlu1 %3940 }
 0x55b   : > { %8357 = vrcp.f32 %v3941_v38  ;;  %v4354_v38 = vsel %vm4122_vm2, %v2395_v59, 0  ;;  %v11068_v59 = vld [vmem:[#allocation12_spill] sm:$0xff] }
 0x55c   : > { %v4088_v37 = vpack.c.bf16 %v4026_v8, %v4026_v8 }
 0x55e   : > { %v3944_v40 = vpop.xlane.xlu0 %3943  ;;  %8068 = vmatmul.mubr.msk.bf16.vlgmr.msra.gmra.mrb[128].mxu1 %vm3734_vm1, %v4088_v37  ;;  %v3785_v34 = vpop.xlane.xlu1 %3784  ;;  %v11067_v37 = vld [vmem:[#allocation10_spill] sm:$0xff] }
 0x55f   : > { %8359 = vrcp.f32 %v3944_v40  ;;  %8078 = vmatpush3.bf16.msra.mxu1 %v4262_v60  ;;  %v3847_v61 = vsub.f32 %v9716_v28, %v3785_v34  ;;  %8079 = vmatprep.mubr.msk.bf16.mxu1 %vm8541_vm0, %v11054_v18  ;;  %v2396_v60 = vpack.c.bf16 %v11067_v37, %v11067_v37 }
 0x560   : > { %8089 = vmatprep.subr.bf16.mxu1 %v11054_v18 }
 0x561   : > { %v8356_v62 = vpop.eup %8355  ;;  %v3895_v12 = vmul.f32 1.442695, %v3847_v61  ;;  %v4400_v24 = vsel %vm4122_vm2, %v2396_v60, 0 }
 0x562   : > { %v4030_v57 = vmul.f32 %v8356_v62, %v9709_v41  ;;  %v3791_v7 = vpop.xlane.xlu0 %3790  ;;  %v3782_v27 = vpop.xlane.xlu1 %3781 }
 0x563   : > { %8361 = vpow2.f32 %v3895_v12  ;;  %v3849_v15 = vsub.f32 %v9724_v19, %v3791_v7  ;;  %v3846_v58 = vsub.f32 %v9727_v2, %v3782_v27 }
 0x564   : > { %v4090_v28 = vpack.c.bf16 %v4030_v57, %v4030_v57  ;;  %v2397_v57 = vpack.c.bf16 %v11068_v59, %v11068_v59 }
 0x565   : > { %v8358_v20 = vpop.eup %8357  ;;  %v3899_v33 = vmul.f32 1.442695, %v3849_v15  ;;  %v3893_v8 = vmul.f32 1.442695, %v3846_v58 }
 0x566   : > { %v4032_v40 = vmul.f32 %v8358_v20, %v9713_v54  ;;  %v3797_v34 = vpop.xlane.xlu0 %3796  ;;  %8080 = vmatmul.mubr.msk.bf16.vlgmr.msra.gmra.mrb[132].mxu1 %vm3734_vm1, %v4090_v28  ;;  %v3788_v41 = vpop.xlane.xlu1 %3787 }
 0x567   : > { %8363 = vpow2.f32 %v3899_v33  ;;  %v3851_v19 = vsub.f32 %v9739_v23, %v3797_v34  ;;  %8090 = vmatpush3.bf16.msra.mxu1 %v4354_v38  ;;  %v3848_v2 = vsub.f32 %v9742_v9, %v3788_v41  ;;  %8091 = vmatprep.mubr.msk.bf16.mxu1 %vm8541_vm0, %v11054_v18  ;;  %v4446_v33 = vsel %vm4122_vm2, %v2397_v57, 0 }
 0x568   : > { %8365 = vpow2.f32 %v3893_v8  ;;  %v4091_v61 = vpack.c.bf16 %v4032_v40, %v4032_v40  ;;  %8101 = vmatprep.subr.bf16.mxu1 %v11054_v18 }
 0x569   : > { %v8360_v62 = vpop.eup %8359  ;;  %v3903_v12 = vmul.f32 1.442695, %v3851_v19  ;;  %v3897_v54 = vmul.f32 1.442695, %v3848_v2 }
 0x56a   : > { %v4034_v23 = vmul.f32 %v8360_v62, %v9720_v47  ;;  %v3803_v7 = vpop.xlane.xlu0 %3802  ;;  %8086 = vmatmul.mubr.msk.bf16.vlgmr.msra.gmra.mrb[104].mxu0 %vm3734_vm1, %v4091_v61  ;;  %v3794_v9 = vpop.xlane.xlu1 %3793 }
 0x56b   : > { %8367 = vpow2.f32 %v3903_v12  ;;  %v3853_v27 = vsub.f32 %v9746_v32, %v3803_v7  ;;  %8096 = vmatpush3.bf16.msra.mxu0 %v4400_v24  ;;  %v3850_v15 = vsub.f32 %v9749_v1, %v3794_v9  ;;  %8097 = vmatprep.mubr.msk.bf16.mxu0 %vm8541_vm0, %v11054_v18 }
 0x56c   : > { %8369 = vpow2.f32 %v3897_v54  ;;  %v4092_v58 = vpack.c.bf16 %v4034_v23, %v4034_v23  ;;  %8107 = vmatprep.subr.bf16.mxu0 %v11054_v18  ;;  %v9925_v23 = vld [vmem:[%s8657_s27 + $0x10] sm:$0xff]  ;;  %s11083_s27 = scalar_lea.vmem %s10979_s6, %s8635_s24 }
 0x56d   : > { %v9896_v28 = vpop.eup %8361  ;;  %v3907_v47 = vmul.f32 1.442695, %v3853_v27  ;;  %v3901_v20 = vmul.f32 1.442695, %v3850_v15  ;;  %v2185_v7 = vrot.slane %v9925_v23, %v9333_v3 }
 0x56e   : > { %v3809_v8 = vpop.xlane.xlu0 %3808  ;;  %8092 = vmatmul.mubr.msk.bf16.vlgmr.msra.gmra.mrb[136].mxu1 %vm3734_vm1, %v4092_v58  ;;  %v3800_v32 = vpop.xlane.xlu1 %3799  ;;  %v3975_v1 = vsel %vm3734_vm1, %v9896_v28, 0.0 }
 0x56f   : > { %8371 = vpow2.f32 %v3907_v47  ;;  %v3855_v38 = vsub.f32 %v9762_v26, %v3809_v8  ;;  %8102 = vmatpush3.bf16.msra.mxu1 %v4446_v33  ;;  %v3852_v37 = vsub.f32 %v9765_v49, %v3800_v32  ;;  %3976 = vadd.xlane.f32.xlu1 %v3975_v1  ;;  %v2248_v33 = vmul.f32 %v2185_v7, %v9581_v46 }
 0x570   : > { %8373 = vpow2.f32 %v3901_v20  ;;  %8103 = vmatprep.mubr.msk.bf16.mxu1 %vm8541_vm0, %v11054_v18  ;;  %8113 = vmatprep.subr.bf16.mxu1 %v11054_v18  ;;  %v2272_v1 = vmul.f32 %v2185_v7, %v9585_v29 }
 0x571   : > { %v9907_v60 = vpop.eup %8363  ;;  %v3911_v40 = vmul.f32 1.442695, %v3855_v38  ;;  %v3905_v34 = vmul.f32 1.442695, %v3852_v37 }
 0x572   : > { %v9909_v41 = vpop.eup %8365  ;;  %v3947_v19 = vpop.xlane.xlu0 %3946  ;;  %v3981_v26 = vsel %vm3734_vm1, %v9907_v60, 0.0  ;;  %v2399_v29 = vpack.c.bf16 %v2272_v1, %v2272_v1 }
 0x573   : > { %8375 = vpow2.f32 %v3911_v40  ;;  %v3950_v49 = vpop.xlane.xlu1 %3949  ;;  %3982 = vadd.xlane.f32.xlu1 %v3981_v26  ;;  %v3972_v2 = vsel %vm3734_vm1, %v9909_v41, 0.0 }
 0x574   : > { %8377 = vpow2.f32 %v3905_v34  ;;  %3973 = vadd.xlane.f32.xlu0 %v3972_v2 }
 0x575   : > { %v9915_v61 = vpop.eup %8367  ;;  %8379 = vrcp.f32 %v3947_v19 }
 0x576   : > { %v9917_v62 = vpop.eup %8369  ;;  %8381 = vrcp.f32 %v3950_v49  ;;  %v3815_v12 = vpop.xlane.xlu0 %3814  ;;  %v3987_v54 = vsel %vm3734_vm1, %v9915_v61, 0.0 }
 0x577   : > { %v3857_v24 = vsub.f32 %v9782_v6, %v3815_v12  ;;  %v3953_v59 = vpop.xlane.xlu1 %3952  ;;  %3988 = vadd.xlane.f32.xlu1 %v3987_v54  ;;  %v3978_v57 = vsel %vm3734_vm1, %v9917_v62, 0.0 }
 0x578   : > { %3979 = vadd.xlane.f32.xlu0 %v3978_v57  ;;  %8383 = vrcp.f32 %v3953_v59 }
 0x579   : > { %v9929_v9 = vpop.eup %8371  ;;  %v3915_v27 = vmul.f32 1.442695, %v3857_v24 }
 0x57a   : > { %v9931_v15 = vpop.eup %8373  ;;  %v3956_v58 = vpop.xlane.xlu0 %3955  ;;  %v3993_v6 = vsel %vm3734_vm1, %v9929_v9, 0.0 }
 0x57b   : > { %8385 = vpow2.f32 %v3915_v27  ;;  %v3821_v47 = vpop.xlane.xlu1 %3820  ;;  %3994 = vadd.xlane.f32.xlu1 %v3993_v6  ;;  %v3984_v20 = vsel %vm3734_vm1, %v9931_v15, 0.0 }
 0x57c   : > { %8387 = vrcp.f32 %v3956_v58  ;;  %v3859_v8 = vsub.f32 %v9804_v16, %v3821_v47  ;;  %3985 = vadd.xlane.f32.xlu0 %v3984_v20  ;;  %v2398_v16 = vpack.c.bf16 %v2248_v33, %v2248_v33  ;;  %v2296_v47 = vmul.f32 %v2185_v7, %v9589_v48 }
 0x57d   : > { %v9939_v32 = vpop.eup %8375  ;;  %v4538_v20 = vsel %vm4122_vm2, %v2399_v29, 0 }
 0x57e   : > { %v9942_v38 = vpop.eup %8377  ;;  %v3919_v37 = vmul.f32 1.442695, %v3859_v8  ;;  %v3959_v40 = vpop.xlane.xlu0 %3958  ;;  %v3999_v34 = vsel %vm3734_vm1, %v9939_v32, 0.0  ;;  %v4492_v6 = vsel %vm4122_vm2, %v2398_v16, 0 }
 0x57f   : > { %v8380_v19 = vpop.eup %8379  ;;  %v3962_v26 = vpop.xlane.xlu1 %3961  ;;  %4000 = vadd.xlane.f32.xlu1 %v3999_v34  ;;  %v3990_v46 = vsel %vm3734_vm1, %v9942_v38, 0.0 }
 0x580   : > { %v8382_v49 = vpop.eup %8381  ;;  %v4036_v2 = vmul.f32 %v8380_v19, %v9773_v52  ;;  %8389 = vpow2.f32 %v3919_v37  ;;  %3991 = vadd.xlane.f32.xlu0 %v3990_v46 }
 0x581   : > { %v4038_v12 = vmul.f32 %v8382_v49, %v9778_v50  ;;  %8391 = vrcp.f32 %v3959_v40  ;;  %v2320_v50 = vmul.f32 %v2185_v7, %v9593_v42  ;;  %v2189_v42 = vrot.slane %v9925_v23, %v9359_v0 }
 0x582   : > { %8393 = vrcp.f32 %v3962_v26  ;;  %v3827_v54 = vpop.xlane.xlu0 %3826  ;;  %v4093_v24 = vpack.c.bf16 %v4036_v2, %v4036_v2  ;;  %v8384_v59 = vpop.eup %8383  ;;  %v9975_v2 = vmul.f32 0.088388346, %v9699_v44 }
 0x583   : > { %v3861_v57 = vsub.f32 %v9822_v13, %v3827_v54  ;;  %v4094_v27 = vpack.c.bf16 %v4038_v12, %v4038_v12  ;;  %v3965_v58 = vpop.xlane.xlu1 %3964  ;;  %v4040_v13 = vmul.f32 %v8384_v59, %v9792_v36  ;;  %v2400_v36 = vpack.c.bf16 %v2296_v47, %v2296_v47 }
 0x584   : > { %8098 = vmatmul.mubr.msk.bf16.vlgmr.msra.gmra.mrb[108].mxu0 %vm3734_vm1, %v4093_v24  ;;  %v2401_v34 = vpack.c.bf16 %v2320_v50, %v2320_v50  ;;  %v2249_v54 = vmul.f32 %v2189_v42, %v9583_v56  ;;  %v2273_v59 = vmul.f32 %v2189_v42, %v9587_v43  ;;  %v3828_v43 = vsel %vm3734_vm1, %v9975_v2, -inf }
 0x585   : > { %v9954_v52 = vpop.eup %8385  ;;  %v3923_v33 = vmul.f32 1.442695, %v3861_v57  ;;  %8104 = vmatmul.mubr.msk.bf16.vlgmr.msra.gmra.mrb[140].mxu1 %vm3734_vm1, %v4094_v27  ;;  %8108 = vmatpush3.bf16.msra.mxu0 %v4492_v6  ;;  %v4095_v46 = vpack.c.bf16 %v4040_v13, %v4040_v13  ;;  %v4584_v24 = vsel %vm4122_vm2, %v2400_v36, 0 }
 0x586   : > { %v8388_v8 = vpop.eup %8387  ;;  %8114 = vmatpush3.bf16.msra.mxu1 %v4538_v20  ;;  %v3968_v1 = vpop.xlane.xlu0 %3967  ;;  %v4005_v48 = vsel %vm3734_vm1, %v9954_v52, 0.0  ;;  %8109 = vmatprep.mubr.msk.bf16.mxu0 %vm8541_vm0, %v11054_v18  ;;  %v4630_v57 = vsel %vm4122_vm2, %v2401_v34, 0  ;;  %v2403_v20 = vpack.c.bf16 %v2273_v59, %v2273_v59 }
 0x587   : > { %v4042_v37 = vmul.f32 %v8388_v8, %v9801_v10  ;;  %8395 = vpow2.f32 %v3923_v33  ;;  %v3806_v40 = vpop.xlane.xlu1 %3805  ;;  %4006 = vadd.xlane.f32.xlu1 %v4005_v48  ;;  %8115 = vmatprep.mubr.msk.bf16.mxu1 %vm8541_vm0, %v11054_v18 }
 0x588   : > { %v3854_v7 = vsub.f32 %v9835_v4, %v3806_v40  ;;  %8119 = vmatprep.subr.bf16.mxu0 %v11054_v18  ;;  %8125 = vmatprep.subr.bf16.mxu1 %v11054_v18  ;;  %8397 = vrcp.f32 %v3965_v58  ;;  %v2297_v40 = vmul.f32 %v2189_v42, %v9591_v35  ;;  %v4722_v36 = vsel %vm4122_vm2, %v2403_v20, 0 }
 0x589   : > { %v4096_v19 = vpack.c.bf16 %v4042_v37, %v4042_v37  ;;  %8399 = vrcp.f32 %v3968_v1 }
 0x58a   : > { %v9972_v10 = vpop.eup %8389  ;;  %v3909_v26 = vmul.f32 1.442695, %v3854_v7  ;;  %v3812_v49 = vpop.xlane.xlu0 %3811  ;;  %v2321_v7 = vmul.f32 %v2189_v42, %v9595_v45  ;;  %v2404_v45 = vpack.c.bf16 %v2297_v40, %v2297_v40 }
 0x58b   : > { %v8392_v16 = vpop.eup %8391  ;;  %v3856_v29 = vsub.f32 %v9840_v22, %v3812_v49  ;;  %v4011_v4 = vsel %vm3734_vm1, %v9972_v10, 0.0  ;;  %v3971_v27 = vpop.xlane.xlu1 %3970 }
 0x58c   : > { %v8394_v12 = vpop.eup %8393  ;;  %8401 = vpow2.f32 %v3909_v26  ;;  %8110 = vmatmul.mubr.msk.bf16.vlgmr.msra.gmra.mrb[112].mxu0 %vm3734_vm1, %v4095_v46  ;;  %4012 = vadd.xlane.f32.xlu0 %v4011_v4  ;;  %v4044_v22 = vmul.f32 %v8392_v16, %v9810_v55  ;;  %v2402_v55 = vpack.c.bf16 %v2249_v54, %v2249_v54  ;;  %v2405_v42 = vpack.c.bf16 %v2321_v7, %v2321_v7  ;;  %v11070_v4 = vld [vmem:[#allocation15_spill] sm:$0xff] }
 0x58d   : > { %8116 = vmatmul.mubr.msk.bf16.vlgmr.msra.gmra.mrb[144].mxu1 %vm3734_vm1, %v4096_v19  ;;  %8120 = vmatpush3.bf16.msra.mxu0 %v4584_v24  ;;  %v3913_v44 = vmul.f32 1.442695, %v3856_v29  ;;  %v4046_v56 = vmul.f32 %v8394_v12, %v9816_v30  ;;  %v11069_v29 = vld [vmem:[#allocation14_spill] sm:$0xff]  ;;  %v4768_v54 = vsel %vm4122_vm2, %v2404_v45, 0  ;;  %v11071_v7 = vld [vmem:[#allocation19_spill] sm:$0xff] }
 0x58e   : > { %8126 = vmatpush3.bf16.msra.mxu1 %v4630_v57  ;;  %v3818_v58 = vpop.xlane.xlu0 %3817  ;;  %8121 = vmatprep.mubr.msk.bf16.mxu0 %vm8541_vm0, %v11054_v18  ;;  %v4097_v50 = vpack.c.bf16 %v4044_v22, %v4044_v22  ;;  %v4676_v37 = vsel %vm4122_vm2, %v2402_v55, 0  ;;  %v2250_v12 = vmul.f32 %v11070_v4, %v11069_v29  ;;  %v4814_v59 = vsel %vm4122_vm2, %v2405_v42, 0 }
 0x58f   : > { %8403 = vpow2.f32 %v3913_v44  ;;  %v3858_v6 = vsub.f32 %v9849_v53, %v3818_v58  ;;  %8127 = vmatprep.mubr.msk.bf16.mxu1 %vm8541_vm0, %v11054_v18  ;;  %8131 = vmatprep.subr.bf16.mxu0 %v11054_v18  ;;  %v4098_v13 = vpack.c.bf16 %v4046_v56, %v4046_v56 }
 0x590   : > { %3829 = vmax.xlane.f32.xlu0 %v3828_v43  ;;  %8137 = vmatprep.subr.bf16.mxu1 %v11054_v18  ;;  %8405 = vrcp.f32 %v3971_v27  ;;  %v2406_v22 = vpack.c.bf16 %v2250_v12, %v2250_v12 }
 0x591   : > { %v9997_v47 = vpop.eup %8395  ;;  %v3917_v30 = vmul.f32 1.442695, %v3858_v6 }
 0x592   : > { %v3824_v33 = vpop.xlane.xlu0 %3823  ;;  %v4017_v53 = vsel %vm3734_vm1, %v9997_v47, 0.0  ;;  %v8398_v8 = vpop.eup %8397  ;;  %v4860_v56 = vsel %vm4122_vm2, %v2406_v22, 0 }
 0x593   : > { %8407 = vpow2.f32 %v3917_v30  ;;  %v3860_v1 = vsub.f32 %v9856_v5, %v3824_v33  ;;  %4018 = vadd.xlane.f32.xlu1 %v4017_v53  ;;  %v8400_v48 = vpop.eup %8399  ;;  %v4048_v5 = vmul.f32 %v8398_v8, %v9828_v39 }
 0x594   : > { %8122 = vmatmul.mubr.msk.bf16.vlgmr.msra.gmra.mrb[116].mxu0 %vm3734_vm1, %v4097_v50  ;;  %v4050_v35 = vmul.f32 %v8400_v48, %v9832_v11 }
 0x595   : > { %8128 = vmatmul.mubr.msk.bf16.vlgmr.msra.gmra.mrb[148].mxu1 %vm3734_vm1, %v4098_v13  ;;  %8132 = vmatpush3.bf16.msra.mxu0 %v4676_v37  ;;  %v3921_v34 = vmul.f32 1.442695, %v3860_v1  ;;  %v4099_v46 = vpack.c.bf16 %v4048_v5, %v4048_v5 }
 0x596   : > { %v10008_v19 = vpop.eup %8401  ;;  %8138 = vmatpush3.bf16.msra.mxu1 %v4722_v36  ;;  %8133 = vmatprep.mubr.msk.bf16.mxu0 %vm8541_vm0, %v11054_v18  ;;  %v4100_v16 = vpack.c.bf16 %v4050_v35, %v4050_v35  ;;  %v10056_v36 = vrot.slane %v9925_v23, %v9430_v25 }
 0x597   : > { %8409 = vpow2.f32 %v3921_v34  ;;  %v3996_v26 = vsel %vm3734_vm1, %v10008_v19, 0.0  ;;  %8139 = vmatprep.mubr.msk.bf16.mxu1 %vm8541_vm0, %v11054_v18  ;;  %8143 = vmatprep.subr.bf16.mxu0 %v11054_v18  ;;  %v2408_v34 = vpack.c.bf16 %v11071_v7, %v11071_v7 }
 0x598   : > { %3997 = vadd.xlane.f32.xlu1 %v3996_v26  ;;  %8149 = vmatprep.subr.bf16.mxu1 %v11054_v18 }
 0x599   : > { %v10020_v39 = vpop.eup %8403 }
 0x59a   : > { %v4002_v11 = vsel %vm3734_vm1, %v10020_v39, 0.0  ;;  %v8406_v49 = vpop.eup %8405 }
 0x59b   : > { %4003 = vadd.xlane.f32.xlu0 %v4002_v11  ;;  %v4052_v57 = vmul.f32 %v8406_v49, %v9846_v21  ;;  %v4952_v49 = vsel %vm4122_vm2, %v2408_v34, 0 }
 0x59c   : > { %8134 = vmatmul.mubr.msk.bf16.vlgmr.msra.gmra.mrb[120].mxu0 %vm3734_vm1, %v4099_v46  ;;  %v11072_v46 = vld [vmem:[#allocation16_spill] sm:$0xff] }
 0x59d   : > { %v10028_v24 = vpop.eup %8407  ;;  %8140 = vmatmul.mubr.msk.bf16.vlgmr.msra.gmra.mrb[152].mxu1 %vm3734_vm1, %v4100_v16  ;;  %8144 = vmatpush3.bf16.msra.mxu0 %v4768_v54  ;;  %v4101_v58 = vpack.c.bf16 %v4052_v57, %v4052_v57  ;;  %v2251_v11 = vmul.f32 %v10056_v36, %v11072_v46  ;;  %v11073_v16 = vld [vmem:[#allocation17_spill] sm:$0xff] }
 0x59e   : > { %8150 = vmatpush3.bf16.msra.mxu1 %v4814_v59  ;;  %v4008_v44 = vsel %vm3734_vm1, %v10028_v24, 0.0  ;;  %8145 = vmatprep.mubr.msk.bf16.mxu0 %vm8541_vm0, %v11054_v18  ;;  %v2407_v29 = vpack.c.bf16 %v11073_v16, %v11073_v16 }
 0x59f   : > { %4009 = vadd.xlane.f32.xlu1 %v4008_v44  ;;  %8155 = vmatprep.subr.bf16.mxu0 %v11054_v18  ;;  %v2410_v57 = vpack.c.bf16 %v2251_v11, %v2251_v11 }
 0x5a0   : > { %8151 = vmatprep.mubr.msk.bf16.mxu1 %vm8541_vm0, %v11054_v18  ;;  %8161 = vmatprep.subr.bf16.mxu1 %v11054_v18  ;;  %v4906_v44 = vsel %vm4122_vm2, %v2407_v29, 0 }
 0x5a1   : > { %v10041_v27 = vpop.eup %8409 }
 0x5a2   : > { %v4014_v21 = vsel %vm3734_vm1, %v10041_v27, 0.0 }
 0x5a3   : > { %4015 = vadd.xlane.f32.xlu0 %v4014_v21  ;;  %v5044_v21 = vsel %vm4122_vm2, %v2410_v57, 0 }
 0x5a4   : > { %8146 = vmatmul.mubr.msk.bf16.vlgmr.msra.gmra.mrb[124].mxu0 %vm3734_vm1, %v4101_v58 }
 0x5a5   : > { %8156 = vmatpush3.bf16.msra.mxu0 %v4860_v56  ;;  %8157 = vmatprep.mubr.msk.bf16.mxu0 %vm8541_vm0, %v11054_v18  ;;  %v11074_v56 = vld [vmem:[#allocation20_spill] sm:$0xff] }
 0x5a6   : > { %8167 = vmatprep.subr.bf16.mxu0 %v11054_v18 }
 0x5b6   : > { %v10050_v6 = vpop.f32.mrb[96].mxu0 }
 0x5b7   : > { %v8063_v43 = vpop.f32.mrb[97].mxu0 }
 0x5b8   : > { %v4163_v55 = vpop.f32.mrb[98].mxu0  ;;  %v2299_v43 = vmul.f32 %v10056_v36, %v11074_v56 }
 0x5b9   : > { %v8064_v20 = vpop.f32.mrb[99].mxu0  ;;  %v11075_v55 = vld [vmem:[#allocation22_spill] sm:$0xff] }
 0x5ba   : > { %v2409_v20 = vpack.c.bf16 %v11075_v55, %v11075_v55  ;;  %v11078_v55 = vld [vmem:[#allocation7_spill] sm:$0xff] }
 0x5be   : > { %v10052_v30 = vpop.f32.mrb[100].mxu0 }
 0x5bf   : > { %v8075_v50 = vpop.f32.mrb[101].mxu0 }
 0x5c0   : > { %v4255_v33 = vpop.f32.mrb[102].mxu0 }
 0x5c1   : > { %v8076_v53 = vpop.f32.mrb[103].mxu0 }
 0x5fc   : > { %v3977_v8 = vpop.xlane.xlu1 %3976 }
 0x5fd   : > { %8411 = vrcp.f32 %v3977_v8  ;;  %v2412_v8 = vpack.c.bf16 %v2299_v43, %v2299_v43 }
 0x600   : > { %v3983_v13 = vpop.xlane.xlu1 %3982 }
 0x601   : > { %8413 = vrcp.f32 %v3983_v13  ;;  %v3974_v1 = vpop.xlane.xlu0 %3973  ;;  %v10090_v13 = vrot.slane %v9925_v23, %v9479_v51 }
 0x602   : > { %8415 = vrcp.f32 %v3974_v1  ;;  %v11076_v1 = vld [vmem:[#allocation18_spill] sm:$0xff] }
 0x603   : > { %v2300_v57 = vmul.f32 %v10090_v13, %v9605_v31 }
 0x604   : > { %v3989_v37 = vpop.xlane.xlu1 %3988 }
 0x605   : > { %v3980_v48 = vpop.xlane.xlu0 %3979 }
 0x606   : > { %8417 = vrcp.f32 %v3980_v48  ;;  %v2275_v48 = vmul.f32 %v10056_v36, %v11076_v1 }
 0x607   : > { %v8412_v40 = vpop.eup %8411  ;;  %8419 = vrcp.f32 %v3989_v37  ;;  %v4998_v37 = vsel %vm4122_vm2, %v2409_v20, 0  ;;  %v2276_v20 = vmul.f32 %v10090_v13, %v11078_v55 }
 0x608   : > { %v4056_v5 = vmul.f32 %v8412_v40, %v9896_v28  ;;  %v3995_v12 = vpop.xlane.xlu1 %3994 }
 0x609   : > { %v3986_v45 = vpop.xlane.xlu0 %3985 }
 0x60a   : > { %v4103_v35 = vpack.c.bf16 %v4056_v5, %v4056_v5  ;;  %8421 = vrcp.f32 %v3986_v45  ;;  %v5136_v5 = vsel %vm4122_vm2, %v2412_v8, 0  ;;  %v2411_v45 = vpack.c.bf16 %v2275_v48, %v2275_v48 }
 0x60b   : > { %v8414_v26 = vpop.eup %8413  ;;  %8423 = vrcp.f32 %v3995_v12  ;;  %v2415_v8 = vpack.c.bf16 %v2276_v20, %v2276_v20 }
 0x60c   : > { %v8416_v42 = vpop.eup %8415  ;;  %8158 = vmatmul.mubr.msk.bf16.vlgmr.msra.gmra.mrb[128].mxu0 %vm3734_vm1, %v4103_v35  ;;  %v4060_v28 = vmul.f32 %v8414_v26, %v9907_v60  ;;  %v2252_v35 = vmul.f32 %v10090_v13, %v9597_v17 }
 0x60d   : > { %v4054_v4 = vmul.f32 %v8416_v42, %v9909_v41  ;;  %8168 = vmatpush3.bf16.msra.mxu0 %v4952_v49  ;;  %8169 = vmatprep.mubr.msk.bf16.mxu0 %vm8541_vm0, %v11054_v18  ;;  %v3992_v58 = vpop.xlane.xlu0 %3991 }
 0x60e   : > { %8179 = vmatprep.subr.bf16.mxu0 %v11054_v18  ;;  %v4105_v41 = vpack.c.bf16 %v4060_v28, %v4060_v28  ;;  %8425 = vrcp.f32 %v3992_v58  ;;  %v2414_v16 = vpack.c.bf16 %v2252_v35, %v2252_v35  ;;  %v11077_v28 = vld [vmem:[#allocation23_spill] sm:$0xff] }
 0x60f   : > { %v4102_v54 = vpack.c.bf16 %v4054_v4, %v4054_v4  ;;  %v5090_v4 = vsel %vm4122_vm2, %v2411_v45, 0  ;;  %v2323_v12 = vmul.f32 %v10056_v36, %v11077_v28 }
 0x610   : > { %v8418_v59 = vpop.eup %8417 }
 0x611   : > { %8152 = vmatmul.mubr.msk.bf16.vlgmr.msra.gmra.mrb[156].mxu1 %vm3734_vm1, %v4102_v54  ;;  %v8420_v22 = vpop.eup %8419  ;;  %v4058_v60 = vmul.f32 %v8418_v59, %v9917_v62  ;;  %v4001_v62 = vpop.xlane.xlu1 %4000  ;;  %v5228_v59 = vsel %vm4122_vm2, %v2414_v16, 0  ;;  %v2413_v36 = vpack.c.bf16 %v2323_v12, %v2323_v12 }
 0x612   : > { %8162 = vmatpush3.bf16.msra.mxu1 %v4906_v44  ;;  %8163 = vmatprep.mubr.msk.bf16.mxu1 %vm8541_vm0, %v11054_v18  ;;  %v4064_v50 = vmul.f32 %v8420_v22, %v9915_v61  ;;  %8427 = vrcp.f32 %v4001_v62  ;;  %v10127_v22 = vrot.slane %v9925_v23, %v9517_v63 }
 0x613   : > { %8173 = vmatprep.subr.bf16.mxu1 %v11054_v18  ;;  %v4104_v33 = vpack.c.bf16 %v4058_v60, %v4058_v60  ;;  %v2416_v60 = vpack.c.bf16 %v2300_v57, %v2300_v57  ;;  %v5182_v58 = vsel %vm4122_vm2, %v2413_v36, 0 }
 0x614   : > { %8170 = vmatmul.mubr.msk.bf16.vlgmr.msra.gmra.mrb[132].mxu0 %vm3734_vm1, %v4105_v41  ;;  %v8422_v53 = vpop.eup %8421  ;;  %v4107_v40 = vpack.c.bf16 %v4064_v50, %v4064_v50  ;;  %v2253_v23 = vmul.f32 %v10127_v22, %v9599_v14 }
 0x615   : > { %8180 = vmatpush3.bf16.msra.mxu0 %v5044_v21  ;;  %8181 = vmatprep.mubr.msk.bf16.mxu0 %vm8541_vm0, %v11054_v18  ;;  %v8424_v7 = vpop.eup %8423  ;;  %v4062_v34 = vmul.f32 %v8422_v53, %v9931_v15  ;;  %v4007_v26 = vpop.xlane.xlu1 %4006  ;;  %v5320_v43 = vsel %vm4122_vm2, %v2416_v60, 0 }
 0x616   : > { %8191 = vmatprep.subr.bf16.mxu0 %v11054_v18  ;;  %v4068_v46 = vmul.f32 %v8424_v7, %v9929_v9  ;;  %8429 = vrcp.f32 %v4007_v26  ;;  %v2418_v53 = vpack.c.bf16 %v2253_v23, %v2253_v23  ;;  %v11079_v26 = vld [vmem:[#allocation24_spill] sm:$0xff] }
 0x617   : > { %v4106_v11 = vpack.c.bf16 %v4062_v34, %v4062_v34  ;;  %v2301_v45 = vmul.f32 %v10127_v22, %v11079_v26 }
 0x618   : > { %v8426_v49 = vpop.eup %8425  ;;  %v4109_v9 = vpack.c.bf16 %v4068_v46, %v4068_v46  ;;  %v5412_v35 = vsel %vm4122_vm2, %v2418_v53, 0  ;;  %v11080_v46 = vld [vmem:[#allocation25_spill] sm:$0xff] }
 0x619   : > { %8164 = vmatmul.mubr.msk.bf16.vlgmr.msra.gmra.mrb[160].mxu1 %vm3734_vm1, %v4104_v33  ;;  %v4013_v61 = vpop.xlane.xlu0 %4012  ;;  %v4066_v54 = vmul.f32 %v8426_v49, %v9942_v38 }
 0x61a   : > { %8174 = vmatpush3.bf16.msra.mxu1 %v4998_v37  ;;  %8175 = vmatprep.mubr.msk.bf16.mxu1 %vm8541_vm0, %v11054_v18 }
 0x61b   : > { %8185 = vmatprep.subr.bf16.mxu1 %v11054_v18  ;;  %v4108_v38 = vpack.c.bf16 %v4066_v54, %v4066_v54 }
 0x61c   : > { %8182 = vmatmul.mubr.msk.bf16.vlgmr.msra.gmra.mrb[136].mxu0 %vm3734_vm1, %v4107_v40 }
 0x61d   : > { %8192 = vmatpush3.bf16.msra.mxu0 %v5136_v5  ;;  %v3830_v42 = vpop.xlane.xlu0 %3829  ;;  %8193 = vmatprep.mubr.msk.bf16.mxu0 %vm8541_vm0, %v11054_v18 }
 0x61e   : > { %v3862_v15 = vsub.f32 %v9975_v2, %v3830_v42  ;;  %8203 = vmatprep.subr.bf16.mxu0 %v11054_v18  ;;  %v8428_v2 = vpop.eup %8427 }
 0x61f   : > { %v4072_v41 = vmul.f32 %v8428_v2, %v9939_v32 }
 0x620   : > { %v3925_v29 = vmul.f32 1.442695, %v3862_v15  ;;  %v4019_v17 = vpop.xlane.xlu1 %4018  ;;  %v8430_v32 = vpop.eup %8429  ;;  %v2324_v15 = vmul.f32 %v10090_v13, %v11080_v46  ;;  %v5613_v46 = vld [vmem:[%s8662_s0 + $0x28] sm:$0xff] }
 0x621   : > { %8176 = vmatmul.mubr.msk.bf16.vlgmr.msra.gmra.mrb[164].mxu1 %vm3734_vm1, %v4106_v11  ;;  %v4111_v21 = vpack.c.bf16 %v4072_v41, %v4072_v41  ;;  %v4076_v62 = vmul.f32 %v8430_v32, %v9954_v52 }
 0x622   : > { %8431 = vpow2.f32 %v3925_v29  ;;  %8186 = vmatpush3.bf16.msra.mxu1 %v5090_v4  ;;  %8187 = vmatprep.mubr.msk.bf16.mxu1 %vm8541_vm0, %v11054_v18  ;;  %v2420_v29 = vpack.c.bf16 %v2301_v45, %v2301_v45  ;;  %v2417_v13 = vpack.c.bf16 %v2324_v15, %v2324_v15  ;;  %v5609_v4 = vld [vmem:[%s8662_s0 + $0x8] sm:$0xff] }
 0x623   : > { %8197 = vmatprep.subr.bf16.mxu1 %v11054_v18  ;;  %v4113_v40 = vpack.c.bf16 %v4076_v62, %v4076_v62  ;;  %v5673_v36 = vunpack.c.l.s8.bf16 %v5609_v4 }
 0x624   : > { %8194 = vmatmul.mubr.msk.bf16.vlgmr.msra.gmra.mrb[140].mxu0 %vm3734_vm1, %v4109_v9 }
 0x625   : > { %8204 = vmatpush3.bf16.msra.mxu0 %v5228_v59  ;;  %v3998_v44 = vpop.xlane.xlu1 %3997  ;;  %8205 = vmatprep.mubr.msk.bf16.mxu0 %vm8541_vm0, %v11054_v18  ;;  %v5504_v59 = vsel %vm4122_vm2, %v2420_v29, 0  ;;  %v5683_v29 = vunpack.c.h.s8.bf16 %v5613_v46 }
 0x626   : > { %8433 = vrcp.f32 %v3998_v44  ;;  %8215 = vmatprep.subr.bf16.mxu0 %v11054_v18  ;;  %v11081_v44 = vld [vmem:[#allocation21_spill] sm:$0xff] }
 0x627   : > { %8435 = vrcp.f32 %v4013_v61  ;;  %v2277_v41 = vmul.f32 %v10127_v22, %v11081_v44 }
 0x628   : > { %v4004_v31 = vpop.xlane.xlu0 %4003 }
 0x629   : > { %8188 = vmatmul.mubr.msk.bf16.vlgmr.msra.gmra.mrb[168].mxu1 %vm3734_vm1, %v4108_v38  ;;  %8437 = vrcp.f32 %v4004_v31  ;;  %v5366_v38 = vsel %vm4122_vm2, %v2417_v13, 0  ;;  %v2419_v55 = vpack.c.bf16 %v2277_v41, %v2277_v41  ;;  %v5615_v13 = vld [vmem:[%s8662_s0 + $0x38] sm:$0xff] }
 0x62a   : > { %8198 = vmatpush3.bf16.msra.mxu1 %v5182_v58  ;;  %8199 = vmatprep.mubr.msk.bf16.mxu1 %vm8541_vm0, %v11054_v18  ;;  %8439 = vrcp.f32 %v4019_v17  ;;  %v5687_v41 = vunpack.c.h.s8.bf16 %v5615_v13 }
 0x62b   : > { %8209 = vmatprep.subr.bf16.mxu1 %v11054_v18 }
 0x62c   : > { %v10134_v56 = vpop.eup %8431  ;;  %8206 = vmatmul.mubr.msk.bf16.vlgmr.msra.gmra.mrb[144].mxu0 %vm3734_vm1, %v4111_v21  ;;  %v4010_v14 = vpop.xlane.xlu1 %4009  ;;  %v5608_v21 = vld [vmem:[%s8662_s0] sm:$0xff] }
 0x62d   : > { %8216 = vmatpush3.bf16.msra.mxu0 %v5320_v43  ;;  %v4020_v50 = vsel %vm3734_vm1, %v10134_v56, 0.0  ;;  %8217 = vmatprep.mubr.msk.bf16.mxu0 %vm8541_vm0, %v11054_v18  ;;  %8441 = vrcp.f32 %v4010_v14 }
 0x62e   : > { %4021 = vadd.xlane.f32.xlu1 %v4020_v50  ;;  %8227 = vmatprep.subr.bf16.mxu0 %v11054_v18 }
 0x630   : > { %v8434_v33 = vpop.eup %8433  ;;  %v4016_v16 = vpop.xlane.xlu0 %4015 }
 0x631   : > { %v4070_v1 = vmul.f32 %v8434_v33, %v10008_v19  ;;  %v10149_v48 = vpop.f32.mrb[128].mxu1  ;;  %v8436_v7 = vpop.eup %8435  ;;  %v5274_v19 = vsel %vm4122_vm2, %v2415_v8, 0  ;;  %8443 = vrcp.f32 %v4016_v16  ;;  %v5675_v8 = vunpack.c.h.s8.bf16 %v5609_v4 }
 0x632   : > { %v5592_v37 = vpack.c.bf16 %v10149_v48, %v10050_v6  ;;  %v8069_v61 = vpop.f32.mrb[129].mxu1  ;;  %v4080_v11 = vmul.f32 %v8436_v7, %v9972_v10  ;;  %v11082_v7 = vld [vmem:[#allocation26_spill] sm:$0xff] }
 0x633   : > { %v4209_v52 = vpop.f32.mrb[130].mxu1  ;;  %v4110_v34 = vpack.c.bf16 %v4070_v1, %v4070_v1  ;;  %v8438_v5 = vpop.eup %8437  ;;  %v5611_v1 = vld [vmem:[%s8662_s0 + $0x18] sm:$0xff] }
 0x634   : > { %v8070_v42 = vpop.f32.mrb[131].mxu1  ;;  %8218 = vmatmul.mubr.msk.bf16.vlgmr.msra.gmra.mrb[148].mxu0 %vm3734_vm1, %v4113_v40  ;;  %v4074_v49 = vmul.f32 %v8438_v5, %v10020_v39  ;;  %v4115_v12 = vpack.c.bf16 %v4080_v11, %v4080_v11  ;;  %v8440_v39 = vpop.eup %8439  ;;  %v5458_v40 = vsel %vm4122_vm2, %v2419_v55, 0  ;;  %v2325_v52 = vmul.f32 %v10127_v22, %v11082_v7 }
 0x635   : > { %8200 = vmatmul.mubr.msk.bf16.vlgmr.msra.gmra.mrb[172].mxu1 %vm3734_vm1, %v4110_v34  ;;  %8228 = vmatpush3.bf16.msra.mxu0 %v5412_v35  ;;  %v4084_v31 = vmul.f32 %v8440_v39, %v9997_v47  ;;  %v5672_v47 = vunpack.c.l.s8.bf16 %v5608_v21  ;;  %v5674_v34 = vunpack.c.h.s8.bf16 %v5608_v21  ;;  %v5677_v5 = vunpack.c.l.s8.bf16 %v5611_v1  ;;  %v5610_v35 = vld [vmem:[%s8662_s0 + $0x10] sm:$0xff]  ;;  %v5616_v21 = vld [vmem:[%s8662_s0 + $0x40] sm:$0xff] }
 0x636   : > { %8210 = vmatpush3.bf16.msra.mxu1 %v5274_v19  ;;  %8211 = vmatprep.mubr.msk.bf16.mxu1 %vm8541_vm0, %v11054_v18  ;;  %v4112_v2 = vpack.c.bf16 %v4074_v49, %v4074_v49  ;;  %v2421_v45 = vpack.c.bf16 %v2325_v52, %v2325_v52  ;;  %v5676_v22 = vunpack.c.l.s8.bf16 %v5610_v35  ;;  %v5679_v42 = vunpack.c.h.s8.bf16 %v5611_v1  ;;  %v5612_v49 = vld [vmem:[%s8662_s0 + $0x20] sm:$0xff] }
 0x637   : > { %8221 = vmatprep.subr.bf16.mxu1 %v11054_v18  ;;  %8229 = vmatprep.mubr.msk.bf16.mxu0 %vm8541_vm0, %v11054_v18  ;;  %v8442_v54 = vpop.eup %8441  ;;  %v4117_v14 = vpack.c.bf16 %v4084_v31, %v4084_v31  ;;  %v5681_v11 = vunpack.c.l.s8.bf16 %v5613_v46  ;;  %v5680_v16 = vunpack.c.l.s8.bf16 %v5612_v49  ;;  %v5682_v4 = vunpack.c.h.s8.bf16 %v5612_v49  ;;  %v5621_v46 = vld [vmem:[%s8662_s0 + $0x68] sm:$0xff] }
 0x638   : > { %8239 = vmatprep.subr.bf16.mxu0 %v11054_v18  ;;  %v4078_v32 = vmul.f32 %v8442_v54, %v10028_v24  ;;  %v5550_v15 = vsel %vm4122_vm2, %v2421_v45, 0  ;;  %v5690_v1 = vunpack.c.h.s8.bf16 %v5616_v21 }
 0x639   : > { %v10169_v17 = vpop.f32.mrb[132].mxu1 }
 0x63a   : > { %v5600_v10 = vpack.c.bf16 %v10169_v17, %v10052_v30  ;;  %v8081_v28 = vpop.f32.mrb[133].mxu1  ;;  %v4114_v53 = vpack.c.bf16 %v4078_v32, %v4078_v32  ;;  %v5630_v30 = vld [vmem:[%s8662_s0 + $0xb0] sm:$0xff] }
 0x63b   : > { %v4301_v9 = vpop.f32.mrb[134].mxu1  ;;  %v8444_v24 = vpop.eup %8443  ;;  %v5685_v28 = vunpack.c.l.s8.bf16 %v5615_v13  ;;  %v5716_v17 = vunpack.c.l.s8.bf16 %v5630_v30 }
 0x63c   : > { %v8082_v57 = vpop.f32.mrb[135].mxu1  ;;  %8230 = vmatmul.mubr.msk.bf16.vlgmr.msra.gmra.mrb[152].mxu0 %vm3734_vm1, %v4115_v12  ;;  %v4082_v26 = vmul.f32 %v8444_v24, %v10041_v27  ;;  %v5678_v27 = vunpack.c.h.s8.bf16 %v5610_v35  ;;  %v5614_v12 = vld [vmem:[%s8662_s0 + $0x30] sm:$0xff] }
 0x63d   : > { %8212 = vmatmul.mubr.msk.bf16.vlgmr.msra.gmra.mrb[176].mxu1 %vm3734_vm1, %v4112_v2  ;;  %8240 = vmatpush3.bf16.msra.mxu0 %v5504_v59  ;;  %v4344_v60 = vpop.f32.mrb[104].mxu0  ;;  %v5684_v57 = vunpack.c.l.s8.bf16 %v5614_v12  ;;  %v5686_v31 = vunpack.c.h.s8.bf16 %v5614_v12 }
 0x63e   : > { %8222 = vmatpush3.bf16.msra.mxu1 %v5366_v38  ;;  %v8087_v58 = vpop.f32.mrb[105].mxu0  ;;  %8223 = vmatprep.mubr.msk.bf16.mxu1 %vm8541_vm0, %v11054_v18  ;;  %v4116_v19 = vpack.c.bf16 %v4082_v26, %v4082_v26 }
 0x63f   : > { %v4347_v23 = vpop.f32.mrb[106].mxu0  ;;  %8233 = vmatprep.subr.bf16.mxu1 %v11054_v18  ;;  %8241 = vmatprep.mubr.msk.bf16.mxu0 %vm8541_vm0, %v11054_v18 }
 0x640   : > { %v8088_v43 = vpop.f32.mrb[107].mxu0  ;;  %5800 = vmatprep.subr.bf16.mxu0 %v5673_v36 }
 0x641   : > { %v4390_v20 = vpop.f32.mrb[136].mxu1 }
 0x642   : > { %v5593_v50 = vpack.c.bf16 %v4390_v20, %v4344_v60  ;;  %v8093_v62 = vpop.f32.mrb[137].mxu1  ;;  %v5617_v60 = vld [vmem:[%s8662_s0 + $0x48] sm:$0xff] }
 0x643   : > { %v4393_v33 = vpop.f32.mrb[138].mxu1  ;;  %v5689_v58 = vunpack.c.l.s8.bf16 %v5617_v60 }
 0x644   : > { %v8094_v61 = vpop.f32.mrb[139].mxu1  ;;  %8242 = vmatmul.mubr.msk.bf16.vlgmr.msra.gmra.mrb[156].mxu0 %vm3734_vm1, %v4117_v14  ;;  %v5691_v33 = vunpack.c.h.s8.bf16 %v5617_v60 }
 0x645   : > { %8224 = vmatmul.mubr.msk.bf16.vlgmr.msra.gmra.mrb[180].mxu1 %vm3734_vm1, %v4114_v53  ;;  %5801 = vmatpush1.bf16.msra.mxu0 %v5672_v47  ;;  %v5618_v61 = vld [vmem:[%s8662_s0 + $0x50] sm:$0xff] }
 0x646   : > { %8234 = vmatpush3.bf16.msra.mxu1 %v5458_v40  ;;  %5832 = vmatprep.mubr.bf16.mxu0 %v5593_v50  ;;  %v5688_v50 = vunpack.c.l.s8.bf16 %v5616_v21  ;;  %v5692_v26 = vunpack.c.l.s8.bf16 %v5618_v61 }
 0x647   : > { %5802 = vmatprep.subr.bf16.mxu0 %v5675_v8  ;;  %8235 = vmatprep.mubr.msk.bf16.mxu1 %vm8541_vm0, %v11054_v18  ;;  %v5619_v8 = vld [vmem:[%s8662_s0 + $0x58] sm:$0xff] }
 0x648   : > { %8245 = vmatprep.subr.bf16.mxu1 %v11054_v18  ;;  %v5693_v24 = vunpack.c.l.s8.bf16 %v5619_v8 }
 0x649   : > { %5803 = vmatpush1.bf16.msra.mxu0 %v5674_v34 }
 0x64a   : > { %5804 = vmatprep.subr.bf16.mxu0 %v5677_v5 }
 0x64d   : > { %8236 = vmatmul.mubr.msk.bf16.vlgmr.msra.gmra.mrb[184].mxu1 %vm3734_vm1, %v4116_v19  ;;  %5805 = vmatpush1.bf16.msra.mxu0 %v5676_v22 }
 0x64e   : > { %8246 = vmatpush3.bf16.msra.mxu1 %v5550_v15  ;;  %5806 = vmatprep.subr.bf16.mxu0 %v5679_v42  ;;  %v5695_v42 = vunpack.c.h.s8.bf16 %v5619_v8  ;;  %v5694_v15 = vunpack.c.h.s8.bf16 %v5618_v61  ;;  %v5627_v8 = vld [vmem:[%s8662_s0 + $0x98] sm:$0xff]  ;;  %v5626_v61 = vld [vmem:[%s8662_s0 + $0x90] sm:$0xff] }
 0x64f   : > { %8247 = vmatprep.mubr.msk.bf16.mxu1 %vm8541_vm0, %v11054_v18  ;;  %v5710_v6 = vunpack.c.h.s8.bf16 %v5626_v61 }
 0x651   : > { %5807 = vmatpush1.bf16.msra.mxu0 %v5678_v27  ;;  %v5697_v27 = vunpack.c.l.s8.bf16 %v5621_v46 }
 0x652   : > { %5808 = vmatprep.subr.bf16.mxu0 %v5681_v11  ;;  %v5620_v11 = vld [vmem:[%s8662_s0 + $0x60] sm:$0xff] }
 0x653   : > { %v5696_v12 = vunpack.c.l.s8.bf16 %v5620_v11 }
 0x655   : > { %5809 = vmatpush1.bf16.msra.mxu0 %v5680_v16 }
 0x656   : > { %5810 = vmatprep.subr.bf16.mxu0 %v5683_v29 }
 0x657   : > { %v10207_v39 = vpop.f32.mrb[108].mxu0 }
 0x658   : > { %v10209_v9 = vpop.f32.mrb[140].mxu1  ;;  %v8099_v2 = vpop.f32.mrb[109].mxu0 }
 0x659   : > { %v5601_v18 = vpack.c.bf16 %v10209_v9, %v10207_v39  ;;  %v8105_v54 = vpop.f32.mrb[141].mxu1  ;;  %v4439_v59 = vpop.f32.mrb[110].mxu0  ;;  %5811 = vmatpush1.bf16.msra.mxu0 %v5682_v4 }
 0x65a   : > { %v4485_v36 = vpop.f32.mrb[142].mxu1  ;;  %v8100_v44 = vpop.f32.mrb[111].mxu0  ;;  %5812 = vmatprep.subr.bf16.mxu0 %v5685_v28  ;;  %v5699_v59 = vunpack.c.h.s8.bf16 %v5621_v46  ;;  %v5632_v46 = vld [vmem:[%s8662_s0 + $0xc0] sm:$0xff] }
 0x65b   : > { %v8106_v38 = vpop.f32.mrb[143].mxu1  ;;  %v5623_v36 = vld [vmem:[%s8662_s0 + $0x78] sm:$0xff]  ;;  %v5698_v44 = vunpack.c.h.s8.bf16 %v5620_v11 }
 0x65c   : > { %v5622_v38 = vld [vmem:[%s8662_s0 + $0x70] sm:$0xff]  ;;  %v5635_v11 = vld [vmem:[%s8662_s0 + $0xd8] sm:$0xff] }
 0x65d   : > { %5813 = vmatpush1.bf16.msra.mxu0 %v5684_v57  ;;  %v5700_v21 = vunpack.c.l.s8.bf16 %v5622_v38 }
 0x65e   : > { %5814 = vmatprep.subr.bf16.mxu0 %v5687_v41  ;;  %v5701_v41 = vunpack.c.l.s8.bf16 %v5623_v36 }
 0x65f   : > { %v10215_v32 = vpop.f32.mrb[112].mxu0 }
 0x660   : > { %v10217_v23 = vpop.f32.mrb[144].mxu1  ;;  %v8111_v43 = vpop.f32.mrb[113].mxu0 }
 0x661   : > { %v5594_v55 = vpack.c.bf16 %v10217_v23, %v10215_v32  ;;  %v8117_v20 = vpop.f32.mrb[145].mxu1  ;;  %v4531_v47 = vpop.f32.mrb[114].mxu0  ;;  %5815 = vmatpush1.bf16.msra.mxu0 %v5686_v31  ;;  %v5645_v32 = vld [vmem:[%s8662_s0 + $0x128] sm:$0xff] }
 0x662   : > { %v4577_v62 = vpop.f32.mrb[146].mxu1  ;;  %v8112_v14 = vpop.f32.mrb[115].mxu0  ;;  %5816 = vmatprep.subr.bf16.mxu0 %v5689_v58  ;;  %v5703_v20 = vunpack.c.h.s8.bf16 %v5623_v36  ;;  %v5625_v47 = vld [vmem:[%s8662_s0 + $0x88] sm:$0xff]  ;;  %v5639_v36 = vld [vmem:[%s8662_s0 + $0xf8] sm:$0xff] }
 0x663   : > { %v8118_v53 = vpop.f32.mrb[147].mxu1  ;;  %v5705_v62 = vunpack.c.l.s8.bf16 %v5625_v47  ;;  %v5624_v14 = vld [vmem:[%s8662_s0 + $0x80] sm:$0xff] }
 0x664   : > { %v5707_v53 = vunpack.c.h.s8.bf16 %v5625_v47 }
 0x665   : > { %5817 = vmatpush1.bf16.msra.mxu0 %v5688_v50  ;;  %v5702_v50 = vunpack.c.h.s8.bf16 %v5622_v38  ;;  %v5638_v38 = vld [vmem:[%s8662_s0 + $0xf0] sm:$0xff] }
 0x666   : > { %5818 = vmatprep.subr.bf16.mxu0 %v5691_v33  ;;  %v5704_v33 = vunpack.c.l.s8.bf16 %v5624_v14 }
 0x667   : > { %v10223_v40 = vpop.f32.mrb[116].mxu0 }
 0x668   : > { %v10225_v7 = vpop.f32.mrb[148].mxu1  ;;  %v8123_v52 = vpop.f32.mrb[117].mxu0 }
 0x669   : > { %v5602_v34 = vpack.c.bf16 %v10225_v7, %v10223_v40  ;;  %v8129_v5 = vpop.f32.mrb[149].mxu1  ;;  %v4623_v35 = vpop.f32.mrb[118].mxu0  ;;  %5819 = vmatpush1.bf16.msra.mxu0 %v5690_v1  ;;  %v5706_v1 = vunpack.c.h.s8.bf16 %v5624_v14  ;;  %v5708_v52 = vunpack.c.l.s8.bf16 %v5626_v61  ;;  %v5652_v7 = vld [vmem:[%s8662_s0 + $0x160] sm:$0xff] }
 0x66a   : > { %v4669_v45 = vpop.f32.mrb[150].mxu1  ;;  %v8124_v22 = vpop.f32.mrb[119].mxu0  ;;  %5820 = vmatprep.subr.bf16.mxu0 %v5693_v24  ;;  %v5709_v24 = vunpack.c.l.s8.bf16 %v5627_v8  ;;  %v5711_v5 = vunpack.c.h.s8.bf16 %v5627_v8  ;;  %v5629_v35 = vld [vmem:[%s8662_s0 + $0xa8] sm:$0xff] }
 0x66b   : > { %v8130_v19 = vpop.f32.mrb[151].mxu1  ;;  %v5713_v48 = vunpack.c.l.s8.bf16 %v5629_v35  ;;  %v5715_v9 = vunpack.c.h.s8.bf16 %v5629_v35  ;;  %v5633_v22 = vld [vmem:[%s8662_s0 + $0xc8] sm:$0xff] }
 0x66c   : > { %v5721_v19 = vunpack.c.l.s8.bf16 %v5633_v22 }
 0x66d   : > { %5821 = vmatpush1.bf16.msra.mxu0 %v5692_v26 }
 0x66e   : > { %5822 = vmatprep.subr.bf16.mxu0 %v5695_v42  ;;  %v5718_v42 = vunpack.c.h.s8.bf16 %v5630_v30  ;;  %v5649_v30 = vld [vmem:[%s8662_s0 + $0x148] sm:$0xff] }
 0x66f   : > { %v4712_v49 = vpop.f32.mrb[120].mxu0 }
 0x670   : > { %v4758_v16 = vpop.f32.mrb[152].mxu1  ;;  %v8135_v29 = vpop.f32.mrb[121].mxu0 }
 0x671   : > { %v5595_v13 = vpack.c.bf16 %v4758_v16, %v4712_v49  ;;  %v8141_v4 = vpop.f32.mrb[153].mxu1  ;;  %v4715_v28 = vpop.f32.mrb[122].mxu0  ;;  %5823 = vmatpush1.bf16.msra.mxu0 %v5694_v15  ;;  %v5720_v15 = vunpack.c.l.s8.bf16 %v5632_v46  ;;  %v5722_v49 = vunpack.c.h.s8.bf16 %v5632_v46  ;;  %v5725_v16 = vunpack.c.l.s8.bf16 %v5635_v11  ;;  %v5634_v29 = vld [vmem:[%s8662_s0 + $0xd0] sm:$0xff] }
 0x672   : > { %v4761_v2 = vpop.f32.mrb[154].mxu1  ;;  %v8136_v54 = vpop.f32.mrb[123].mxu0  ;;  %5824 = vmatprep.subr.bf16.mxu0 %v5697_v27  ;;  %v5723_v27 = vunpack.c.h.s8.bf16 %v5633_v22  ;;  %v5727_v4 = vunpack.c.h.s8.bf16 %v5635_v11  ;;  %v5637_v28 = vld [vmem:[%s8662_s0 + $0xe8] sm:$0xff]  ;;  %v5648_v22 = vld [vmem:[%s8662_s0 + $0x140] sm:$0xff]  ;;  %v5755_v11 = vunpack.c.h.s8.bf16 %v5649_v30 }
 0x673   : > { %v8142_v57 = vpop.f32.mrb[155].mxu1  ;;  %v5729_v2 = vunpack.c.l.s8.bf16 %v5637_v28  ;;  %v5636_v54 = vld [vmem:[%s8662_s0 + $0xe0] sm:$0xff] }
 0x674   : > { %v5731_v57 = vunpack.c.h.s8.bf16 %v5637_v28 }
 0x675   : > { %5825 = vmatpush1.bf16.msra.mxu0 %v5696_v12  ;;  %v5726_v12 = vunpack.c.h.s8.bf16 %v5634_v29 }
 0x676   : > { %5826 = vmatprep.subr.bf16.mxu0 %v5699_v59  ;;  %v5728_v59 = vunpack.c.l.s8.bf16 %v5636_v54 }
 0x677   : > { %v10233_v60 = vpop.f32.mrb[124].mxu0 }
 0x678   : > { %v8147_v31 = vpop.f32.mrb[125].mxu0 }
 0x679   : > { %v4807_v58 = vpop.f32.mrb[126].mxu0  ;;  %5827 = vmatpush1.bf16.msra.mxu0 %v5698_v44  ;;  %v5730_v44 = vunpack.c.h.s8.bf16 %v5636_v54  ;;  %v5732_v31 = vunpack.c.l.s8.bf16 %v5638_v38 }
 0x67a   : > { %v8148_v43 = vpop.f32.mrb[127].mxu0  ;;  %5828 = vmatprep.subr.bf16.mxu0 %v5701_v41  ;;  %v5733_v41 = vunpack.c.l.s8.bf16 %v5639_v36  ;;  %v5735_v58 = vunpack.c.h.s8.bf16 %v5639_v36 }
 0x67b   : > { %v5641_v43 = vld [vmem:[%s8662_s0 + $0x108] sm:$0xff] }
 0x67c   : > { %v5737_v47 = vunpack.c.l.s8.bf16 %v5641_v43  ;;  %v5739_v14 = vunpack.c.h.s8.bf16 %v5641_v43 }
 0x67d   : > { %5829 = vmatpush1.bf16.msra.mxu0 %v5700_v21 }
 0x67e   : > { %5830 = vmatprep.subr.bf16.mxu0 %v5703_v20  ;;  %v5734_v20 = vunpack.c.h.s8.bf16 %v5638_v38  ;;  %v5653_v38 = vld [vmem:[%s8662_s0 + $0x168] sm:$0xff] }
 0x67f   : > { %v5761_v40 = vunpack.c.l.s8.bf16 %v5653_v38 }
 0x681   : > { %5831 = vmatpush1.bf16.msra.mxu0 %v5702_v50  ;;  %v5640_v50 = vld [vmem:[%s8662_s0 + $0x100] sm:$0xff] }
 0x682   : > { %5853 = vmatprep.subr.bf16.mxu0 %v5705_v62  ;;  %v5736_v62 = vunpack.c.l.s8.bf16 %v5640_v50 }
 0x684   : > { %5833 = vmatmul.mubr.bf16.vlgmr.msra.gmra.mrb[160].mxu0 %v5592_v37  ;;  %v5628_v37 = vld [vmem:[%s8662_s0 + $0xa0] sm:$0xff] }
 0x685   : > { %5842 = vmatprep.mubr.bf16.mxu0 %v5601_v18  ;;  %5854 = vmatpush1.bf16.msra.mxu0 %v5704_v33  ;;  %v5712_v39 = vunpack.c.l.s8.bf16 %v5628_v37  ;;  %v5631_v18 = vld [vmem:[%s8662_s0 + $0xb8] sm:$0xff]  ;;  %v5714_v26 = vunpack.c.h.s8.bf16 %v5628_v37 }
 0x686   : > { %5855 = vmatprep.subr.bf16.mxu0 %v5707_v53  ;;  %v5717_v45 = vunpack.c.l.s8.bf16 %v5631_v18  ;;  %v5643_v33 = vld [vmem:[%s8662_s0 + $0x118] sm:$0xff]  ;;  %v5738_v53 = vunpack.c.h.s8.bf16 %v5640_v50 }
 0x687   : > { %v5743_v35 = vunpack.c.h.s8.bf16 %v5643_v33  ;;  %v5647_v37 = vld [vmem:[%s8662_s0 + $0x138] sm:$0xff] }
 0x689   : > { %5856 = vmatpush1.bf16.msra.mxu0 %v5706_v1  ;;  %v5741_v1 = vunpack.c.l.s8.bf16 %v5643_v33 }
 0x68a   : > { %5857 = vmatprep.subr.bf16.mxu0 %v5709_v24  ;;  %v5642_v24 = vld [vmem:[%s8662_s0 + $0x110] sm:$0xff] }
 0x68b   : > { %v5742_v23 = vunpack.c.h.s8.bf16 %v5642_v24 }
 0x68c   : > { %5843 = vmatmul.mubr.bf16.gmra.mrb[164].mxu0 %v5600_v10  ;;  %v5719_v10 = vunpack.c.h.s8.bf16 %v5631_v18  ;;  %v5646_v18 = vld [vmem:[%s8662_s0 + $0x130] sm:$0xff] }
 0x68d   : > { %5858 = vmatpush1.bf16.msra.mxu0 %v5708_v52  ;;  %5885 = vmatprep.mubr.bf16.mxu0 %v5595_v13  ;;  %v5724_v13 = vunpack.c.l.s8.bf16 %v5634_v29 }
 0x68e   : > { %5859 = vmatprep.subr.bf16.mxu0 %v5711_v5  ;;  %v5740_v5 = vunpack.c.l.s8.bf16 %v5642_v24 }
 0x691   : > { %5860 = vmatpush1.bf16.msra.mxu0 %v5710_v6  ;;  %v5644_v6 = vld [vmem:[%s8662_s0 + $0x120] sm:$0xff] }
 0x692   : > { %5861 = vmatprep.subr.bf16.mxu0 %v5713_v48  ;;  %v5744_v48 = vunpack.c.l.s8.bf16 %v5644_v6 }
 0x695   : > { %5862 = vmatpush1.bf16.msra.mxu0 %v5712_v39  ;;  %v5746_v39 = vunpack.c.h.s8.bf16 %v5644_v6 }
 0x696   : > { %5863 = vmatprep.subr.bf16.mxu0 %v5715_v9  ;;  %v5749_v9 = vunpack.c.l.s8.bf16 %v5647_v37 }
 0x699   : > { %5864 = vmatpush1.bf16.msra.mxu0 %v5714_v26  ;;  %v5748_v26 = vunpack.c.l.s8.bf16 %v5646_v18 }
 0x69a   : > { %5865 = vmatprep.subr.bf16.mxu0 %v5717_v45  ;;  %v5751_v45 = vunpack.c.h.s8.bf16 %v5647_v37 }
 0x69d   : > { %5866 = vmatpush1.bf16.msra.mxu0 %v5716_v17  ;;  %v5750_v17 = vunpack.c.h.s8.bf16 %v5646_v18 }
 0x69e   : > { %5867 = vmatprep.subr.bf16.mxu0 %v5719_v10  ;;  %v5753_v10 = vunpack.c.l.s8.bf16 %v5649_v30 }
 0x6a1   : > { %5868 = vmatpush1.bf16.msra.mxu0 %v5718_v42 }
 0x6a2   : > { %5869 = vmatprep.subr.bf16.mxu0 %v5721_v19 }
 0x6a5   : > { %5870 = vmatpush1.bf16.msra.mxu0 %v5720_v15  ;;  %v5752_v15 = vunpack.c.l.s8.bf16 %v5648_v22 }
 0x6a6   : > { %5871 = vmatprep.subr.bf16.mxu0 %v5723_v27 }
 0x6a9   : > { %5872 = vmatpush1.bf16.msra.mxu0 %v5722_v49  ;;  %v5651_v49 = vld [vmem:[%s8662_s0 + $0x158] sm:$0xff] }
 0x6aa   : > { %5873 = vmatprep.subr.bf16.mxu0 %v5725_v16 }
 0x6ad   : > { %5874 = vmatpush1.bf16.msra.mxu0 %v5724_v13 }
 0x6ae   : > { %5875 = vmatprep.subr.bf16.mxu0 %v5727_v4  ;;  %v5754_v4 = vunpack.c.h.s8.bf16 %v5648_v22  ;;  %v5656_v22 = vld [vmem:[%s8662_s0 + $0x180] sm:$0xff] }
 0x6b1   : > { %5876 = vmatpush1.bf16.msra.mxu0 %v5726_v12  ;;  %v5757_v12 = vunpack.c.l.s8.bf16 %v5651_v49 }
 0x6b2   : > { %5877 = vmatprep.subr.bf16.mxu0 %v5729_v2  ;;  %v5650_v2 = vld [vmem:[%s8662_s0 + $0x150] sm:$0xff] }
 0x6b3   : > { %v5756_v36 = vunpack.c.l.s8.bf16 %v5650_v2  ;;  %v5758_v43 = vunpack.c.h.s8.bf16 %v5650_v2 }
 0x6b5   : > { %5878 = vmatpush1.bf16.msra.mxu0 %v5728_v59 }
 0x6b6   : > { %5879 = vmatprep.subr.bf16.mxu0 %v5731_v57 }
 0x6b9   : > { %5880 = vmatpush1.bf16.msra.mxu0 %v5730_v44 }
 0x6ba   : > { %5881 = vmatprep.subr.bf16.mxu0 %v5733_v41  ;;  %v5759_v41 = vunpack.c.h.s8.bf16 %v5651_v49 }
 0x6bb   : > { %v4022_v21 = vpop.xlane.xlu1 %4021 }
 0x6bc   : > { %8445 = vrcp.f32 %v4022_v21 }
 0x6bd   : > { %5882 = vmatpush1.bf16.msra.mxu0 %v5732_v31 }
 0x6be   : > { %5883 = vmatprep.subr.bf16.mxu0 %v5735_v58 }
 0x6c1   : > { %5884 = vmatpush1.bf16.msra.mxu0 %v5734_v20 }
 0x6c2   : > { %5906 = vmatprep.subr.bf16.mxu0 %v5737_v47 }
 0x6c4   : > { %5886 = vmatmul.mubr.bf16.vlgmr.msra.gmra.mrb[160].mxu0 %v5594_v55  ;;  %v5745_v55 = vunpack.c.l.s8.bf16 %v5645_v32 }
 0x6c5   : > { %5907 = vmatpush1.bf16.msra.mxu0 %v5736_v62 }
 0x6c6   : > { %v8446_v8 = vpop.eup %8445  ;;  %5908 = vmatprep.subr.bf16.mxu0 %v5739_v14  ;;  %v5760_v14 = vunpack.c.l.s8.bf16 %v5652_v7 }
 0x6c7   : > { %v4086_v61 = vmul.f32 %v8446_v8, %v10134_v56  ;;  %v5747_v56 = vunpack.c.h.s8.bf16 %v5645_v32  ;;  %v5655_v8 = vld [vmem:[%s8662_s0 + $0x178] sm:$0xff]  ;;  %v5654_v32 = vld [vmem:[%s8662_s0 + $0x170] sm:$0xff] }
 0x6c8   : > { %v5766_v30 = vunpack.c.h.s8.bf16 %v5654_v32 }
 0x6c9   : > { %5909 = vmatpush1.bf16.msra.mxu0 %v5738_v53  ;;  %v4118_v52 = vpack.c.bf16 %v4086_v61, %v4086_v61  ;;  %v5763_v53 = vunpack.c.h.s8.bf16 %v5653_v38 }
 0x6ca   : > { %5910 = vmatprep.subr.bf16.mxu0 %v5741_v1 }
 0x6cb   : > { %8248 = vmatmul.mubr.msk.bf16.vlgmr.msra.gmra.mrb[188].mxu1 %vm3734_vm1, %v4118_v52  ;;  %v5762_v52 = vunpack.c.h.s8.bf16 %v5652_v7 }
 0x6cd   : > { %5911 = vmatpush1.bf16.msra.mxu0 %v5740_v5 }
 0x6ce   : > { %5912 = vmatprep.subr.bf16.mxu0 %v5743_v35  ;;  %v5765_v35 = vunpack.c.l.s8.bf16 %v5655_v8 }
 0x6d1   : > { %5913 = vmatpush1.bf16.msra.mxu0 %v5742_v23 }
 0x6d2   : > { %5914 = vmatprep.subr.bf16.mxu0 %v5745_v55 }
 0x6d5   : > { %5915 = vmatpush1.bf16.msra.mxu0 %v5744_v48 }
 0x6d6   : > { %5916 = vmatprep.subr.bf16.mxu0 %v5747_v56  ;;  %v5764_v56 = vunpack.c.l.s8.bf16 %v5654_v32 }
 0x6d9   : > { %5917 = vmatpush1.bf16.msra.mxu0 %v5746_v39  ;;  %v5767_v39 = vunpack.c.h.s8.bf16 %v5655_v8 }
 0x6da   : > { %5918 = vmatprep.subr.bf16.mxu0 %v5749_v9  ;;  %v5657_v9 = vld [vmem:[%s8662_s0 + $0x188] sm:$0xff] }
 0x6db   : > { %v5771_v49 = vunpack.c.h.s8.bf16 %v5657_v9 }
 0x6dd   : > { %5919 = vmatpush1.bf16.msra.mxu0 %v5748_v26 }
 0x6de   : > { %5920 = vmatprep.subr.bf16.mxu0 %v5751_v45 }
 0x6df   : > { %v10275_v42 = vpop.f32.mrb[128].mxu0 }
 0x6e0   : > { %v8159_v19 = vpop.f32.mrb[129].mxu0 }
 0x6e1   : > { %5921 = vmatpush1.bf16.msra.mxu0 %v5750_v17  ;;  %v4899_v46 = vpop.f32.mrb[130].mxu0 }
 0x6e2   : > { %v8160_v27 = vpop.f32.mrb[131].mxu0  ;;  %5922 = vmatprep.subr.bf16.mxu0 %v5753_v10  ;;  %v5769_v10 = vunpack.c.l.s8.bf16 %v5657_v9 }
 0x6e3   : > { %v5768_v27 = vunpack.c.l.s8.bf16 %v5656_v22 }
 0x6e4   : > { %v4850_v16 = vpop.f32.mrb[156].mxu1 }
 0x6e5   : > { %v5603_v29 = vpack.c.bf16 %v4850_v16, %v10233_v60  ;;  %v8153_v13 = vpop.f32.mrb[157].mxu1  ;;  %5923 = vmatpush1.bf16.msra.mxu0 %v5752_v15  ;;  %v5659_v16 = vld [vmem:[%s8662_s0 + $0x198] sm:$0xff] }
 0x6e6   : > { %v4853_v28 = vpop.f32.mrb[158].mxu1  ;;  %5924 = vmatprep.subr.bf16.mxu0 %v5755_v11  ;;  %v5773_v13 = vunpack.c.l.s8.bf16 %v5659_v16 }
 0x6e7   : > { %v8154_v54 = vpop.f32.mrb[159].mxu1  ;;  %5895 = vmatprep.mubr.bf16.mxu0 %v5603_v29  ;;  %v10280_v59 = vpop.f32.mrb[132].mxu0  ;;  %v5770_v29 = vunpack.c.h.s8.bf16 %v5656_v22 }
 0x6e8   : > { %5896 = vmatmul.mubr.bf16.gmra.mrb[164].mxu0 %v5602_v34  ;;  %v8171_v57 = vpop.f32.mrb[133].mxu0 }
 0x6e9   : > { %5925 = vmatpush1.bf16.msra.mxu0 %v5754_v4  ;;  %v4991_v60 = vpop.f32.mrb[134].mxu0  ;;  %v5658_v4 = vld [vmem:[%s8662_s0 + $0x190] sm:$0xff] }
 0x6ea   : > { %v8172_v44 = vpop.f32.mrb[135].mxu0  ;;  %5926 = vmatprep.subr.bf16.mxu0 %v5757_v12  ;;  %v5772_v60 = vunpack.c.l.s8.bf16 %v5658_v4 }
 0x6ec   : > { %v4942_v31 = vpop.f32.mrb[160].mxu1 }
 0x6ed   : > { %v5596_v58 = vpack.c.bf16 %v4942_v31, %v10275_v42  ;;  %v8165_v21 = vpop.f32.mrb[161].mxu1  ;;  %5927 = vmatpush1.bf16.msra.mxu0 %v5756_v36  ;;  %v5661_v31 = vld [vmem:[%s8662_s0 + $0x1a8] sm:$0xff] }
 0x6ee   : > { %v4945_v20 = vpop.f32.mrb[162].mxu1  ;;  %5928 = vmatprep.subr.bf16.mxu0 %v5759_v41  ;;  %v5775_v41 = vunpack.c.h.s8.bf16 %v5659_v16  ;;  %v5777_v21 = vunpack.c.l.s8.bf16 %v5661_v31 }
 0x6ef   : > { %v8166_v34 = vpop.f32.mrb[163].mxu1  ;;  %v5080_v47 = vpop.f32.mrb[136].mxu0 }
 0x6f0   : > { %v8183_v50 = vpop.f32.mrb[137].mxu0 }
 0x6f1   : > { %5929 = vmatpush1.bf16.msra.mxu0 %v5758_v43  ;;  %v5083_v62 = vpop.f32.mrb[138].mxu0  ;;  %v5660_v43 = vld [vmem:[%s8662_s0 + $0x1a0] sm:$0xff] }
 0x6f2   : > { %v8184_v33 = vpop.f32.mrb[139].mxu0  ;;  %5930 = vmatprep.subr.bf16.mxu0 %v5761_v40  ;;  %v5776_v62 = vunpack.c.l.s8.bf16 %v5660_v43 }
 0x6f4   : > { %v5034_v1 = vpop.f32.mrb[164].mxu1 }
 0x6f5   : > { %v5604_v24 = vpack.c.bf16 %v5034_v1, %v10280_v59  ;;  %v8177_v61 = vpop.f32.mrb[165].mxu1  ;;  %5931 = vmatpush1.bf16.msra.mxu0 %v5760_v14  ;;  %v5663_v1 = vld [vmem:[%s8662_s0 + $0x1b8] sm:$0xff] }
 0x6f6   : > { %v5037_v5 = vpop.f32.mrb[166].mxu1  ;;  %5932 = vmatprep.subr.bf16.mxu0 %v5763_v53  ;;  %v5779_v53 = vunpack.c.h.s8.bf16 %v5661_v31  ;;  %v5781_v61 = vunpack.c.l.s8.bf16 %v5663_v1 }
 0x6f7   : > { %v8178_v23 = vpop.f32.mrb[167].mxu1  ;;  %v5172_v55 = vpop.f32.mrb[140].mxu0 }
 0x6f8   : > { %v8195_v6 = vpop.f32.mrb[141].mxu0 }
 0x6f9   : > { %5933 = vmatpush1.bf16.msra.mxu0 %v5762_v52  ;;  %v5175_v48 = vpop.f32.mrb[142].mxu0  ;;  %v5662_v52 = vld [vmem:[%s8662_s0 + $0x1b0] sm:$0xff] }
 0x6fa   : > { %v8196_v37 = vpop.f32.mrb[143].mxu0  ;;  %5934 = vmatprep.subr.bf16.mxu0 %v5765_v35  ;;  %v5780_v48 = vunpack.c.l.s8.bf16 %v5662_v52 }
 0x6fc   : > { %v5126_v18 = vpop.f32.mrb[168].mxu1 }
 0x6fd   : > { %v5597_v26 = vpack.c.bf16 %v5126_v18, %v5080_v47  ;;  %v8189_v45 = vpop.f32.mrb[169].mxu1  ;;  %5935 = vmatpush1.bf16.msra.mxu0 %v5764_v56  ;;  %v5665_v18 = vld [vmem:[%s8662_s0 + $0x1c8] sm:$0xff] }
 0x6fe   : > { %v5129_v17 = vpop.f32.mrb[170].mxu1  ;;  %5936 = vmatprep.subr.bf16.mxu0 %v5767_v39  ;;  %v5783_v39 = vunpack.c.h.s8.bf16 %v5663_v1  ;;  %v5785_v45 = vunpack.c.l.s8.bf16 %v5665_v18 }
 0x6ff   : > { %v8190_v42 = vpop.f32.mrb[171].mxu1  ;;  %5938 = vmatprep.mubr.bf16.mxu0 %v5597_v26  ;;  %v10293_v19 = vpop.f32.mrb[144].mxu0  ;;  %v5782_v26 = vunpack.c.h.s8.bf16 %v5662_v52 }
 0x700   : > { %v8207_v46 = vpop.f32.mrb[145].mxu0 }
 0x701   : > { %5937 = vmatpush1.bf16.msra.mxu0 %v5766_v30  ;;  %v5267_v15 = vpop.f32.mrb[146].mxu0  ;;  %v5664_v30 = vld [vmem:[%s8662_s0 + $0x1c0] sm:$0xff] }
 0x702   : > { %v8208_v11 = vpop.f32.mrb[147].mxu0  ;;  %5959 = vmatprep.subr.bf16.mxu0 %v5769_v10  ;;  %v5784_v42 = vunpack.c.l.s8.bf16 %v5664_v30  ;;  %v5787_v15 = vunpack.c.h.s8.bf16 %v5665_v18  ;;  %v8524_v18 = vld [vmem:[%s11029_s14 + $0x10] sm:$0xff] }
 0x703   : > { %v5667_v11 = vld [vmem:[%s8662_s0 + $0x1d8] sm:$0xff] }
 0x704   : > { %5939 = vmatmul.mubr.bf16.vlgmr.msra.gmra.mrb[160].mxu0 %v5596_v58  ;;  %v5774_v58 = vunpack.c.h.s8.bf16 %v5658_v4  ;;  %v5789_v16 = vunpack.c.l.s8.bf16 %v5667_v11  ;;  %v5791_v4 = vunpack.c.h.s8.bf16 %v5667_v11 }
 0x705   : > { %5960 = vmatpush1.bf16.msra.mxu0 %v5768_v27 }
 0x706   : > { %5961 = vmatprep.subr.bf16.mxu0 %v5771_v49  ;;  %v5786_v49 = vunpack.c.h.s8.bf16 %v5664_v30 }
 0x707   : > { %v10297_v28 = vpop.f32.mrb[148].mxu0 }
 0x708   : > { %v5218_v12 = vpop.f32.mrb[172].mxu1  ;;  %v8219_v2 = vpop.f32.mrb[149].mxu0 }
 0x709   : > { %v5605_v54 = vpack.c.bf16 %v5218_v12, %v5172_v55  ;;  %v8201_v59 = vpop.f32.mrb[173].mxu1  ;;  %5962 = vmatpush1.bf16.msra.mxu0 %v5770_v29  ;;  %v5359_v57 = vpop.f32.mrb[150].mxu0  ;;  %v5666_v29 = vld [vmem:[%s8662_s0 + $0x1d0] sm:$0xff]  ;;  %v5669_v12 = vld [vmem:[%s8662_s0 + $0x1e8] sm:$0xff] }
 0x70a   : > { %v5221_v36 = vpop.f32.mrb[174].mxu1  ;;  %v8220_v44 = vpop.f32.mrb[151].mxu0  ;;  %5963 = vmatprep.subr.bf16.mxu0 %v5773_v13  ;;  %v5788_v13 = vunpack.c.l.s8.bf16 %v5666_v29  ;;  %v5790_v2 = vunpack.c.h.s8.bf16 %v5666_v29  ;;  %v5668_v59 = vld [vmem:[%s8662_s0 + $0x1e0] sm:$0xff] }
 0x70b   : > { %v8202_v38 = vpop.f32.mrb[175].mxu1  ;;  %5948 = vmatprep.mubr.bf16.mxu0 %v5605_v54  ;;  %v5793_v54 = vunpack.c.l.s8.bf16 %v5669_v12  ;;  %v5792_v57 = vunpack.c.l.s8.bf16 %v5668_v59  ;;  %v5671_v36 = vld [vmem:[%s8662_s0 + $0x1f8] sm:$0xff]  ;;  %v5794_v44 = vunpack.c.h.s8.bf16 %v5668_v59 }
 0x70c   : > { %5949 = vmatmul.mubr.bf16.gmra.mrb[164].mxu0 %v5604_v24  ;;  %v5778_v24 = vunpack.c.h.s8.bf16 %v5660_v43  ;;  %v5670_v38 = vld [vmem:[%s8662_s0 + $0x1f0] sm:$0xff] }
 0x70d   : > { %5964 = vmatpush1.bf16.msra.mxu0 %v5772_v60  ;;  %v5795_v60 = vunpack.c.h.s8.bf16 %v5669_v12  ;;  %v5796_v31 = vunpack.c.l.s8.bf16 %v5670_v38 }
 0x70e   : > { %5965 = vmatprep.subr.bf16.mxu0 %v5775_v41  ;;  %v5797_v41 = vunpack.c.l.s8.bf16 %v5671_v36 }
 0x70f   : > { %v5448_v20 = vpop.f32.mrb[152].mxu0 }
 0x710   : > { %v10301_v40 = vpop.f32.mrb[176].mxu1  ;;  %v8231_v7 = vpop.f32.mrb[153].mxu0 }
 0x711   : > { %v5598_v34 = vpack.c.bf16 %v10301_v40, %v10293_v19  ;;  %v8213_v47 = vpop.f32.mrb[177].mxu1  ;;  %5966 = vmatpush1.bf16.msra.mxu0 %v5774_v58  ;;  %v5451_v50 = vpop.f32.mrb[154].mxu0  ;;  %v5799_v58 = vunpack.c.h.s8.bf16 %v5671_v36  ;;  %v6032_v19 = vld [vmem:[%s11084_s21] sm:$0x3] }
 0x712   : > { %v5313_v14 = vpop.f32.mrb[178].mxu1  ;;  %v8232_v33 = vpop.f32.mrb[155].mxu0  ;;  %5967 = vmatprep.subr.bf16.mxu0 %v5777_v21  ;;  %v5798_v21 = vunpack.c.h.s8.bf16 %v5670_v38  ;;  %v11085_v40 = vld [vmem:[#allocation3_spill] sm:$0xff] }
 0x713   : > { %v8214_v8 = vpop.f32.mrb[179].mxu1  ;;  %v11086_v14 = vld [vmem:[#allocation4_spill] sm:$0xff] }
 0x715   : > { %5968 = vmatpush1.bf16.msra.mxu0 %v5776_v62  ;;  %v6012_v62 = vld [vmem:[%s11083_s27] sm:$0x3] }
 0x716   : > { %5969 = vmatprep.subr.bf16.mxu0 %v5779_v53  ;;  %v6021_v33 = vrot.slane %v6012_v62, %v11086_v14  ;;  %v6037_v53 = vrot.slane %v6032_v19, %v11085_v40 }
 0x717   : > { %v10307_v5 = vpop.f32.mrb[156].mxu0 }
 0x718   : > { %v10309_v35 = vpop.f32.mrb[180].mxu1  ;;  %v8243_v32 = vpop.f32.mrb[157].mxu0 }
 0x719   : > { %v5606_v23 = vpack.c.bf16 %v10309_v35, %v10297_v28  ;;  %v8225_v55 = vpop.f32.mrb[181].mxu1  ;;  %5970 = vmatpush1.bf16.msra.mxu0 %v5778_v24  ;;  %v5543_v6 = vpop.f32.mrb[158].mxu0  ;;  %v6041_v28 = vrot.slane %v6032_v19, %v11086_v14  ;;  %v6176_v19 = vld [vmem:[%s8679_s26 + $0x40] sm:$0xff] }
 0x71a   : > { %v5405_v56 = vpop.f32.mrb[182].mxu1  ;;  %v8244_v37 = vpop.f32.mrb[159].mxu0  ;;  %5971 = vmatprep.subr.bf16.mxu0 %v5781_v61  ;;  %v8522_v6 = vld [vmem:[%s11029_s14] sm:$0xff] }
 0x71b   : > { %v8226_v9 = vpop.f32.mrb[183].mxu1  ;;  %v8523_v37 = vld [vmem:[%s11029_s14 + $0x8] sm:$0xff] }
 0x71d   : > { %5972 = vmatpush1.bf16.msra.mxu0 %v5780_v48 }
 0x71e   : > { %5973 = vmatprep.subr.bf16.mxu0 %v5783_v39 }
 0x720   : > { %v5494_v17 = vpop.f32.mrb[184].mxu1 }
 0x721   : > { %v5599_v10 = vpack.c.bf16 %v5494_v17, %v5448_v20  ;;  %v8237_v22 = vpop.f32.mrb[185].mxu1  ;;  %5974 = vmatpush1.bf16.msra.mxu0 %v5782_v26 }
 0x722   : > { %v5497_v46 = vpop.f32.mrb[186].mxu1  ;;  %5975 = vmatprep.subr.bf16.mxu0 %v5785_v45  ;;  %v8525_v45 = vld [vmem:[%s11029_s14 + $0x18] sm:$0xff] }
 0x723   : > { %v8238_v27 = vpop.f32.mrb[187].mxu1  ;;  %5991 = vmatprep.mubr.bf16.mxu0 %v5599_v10 }
 0x725   : > { %5976 = vmatpush1.bf16.msra.mxu0 %v5784_v42 }
 0x726   : > { %5977 = vmatprep.subr.bf16.mxu0 %v5787_v15 }
 0x729   : > { %5978 = vmatpush1.bf16.msra.mxu0 %v5786_v49 }
 0x72a   : > { %5979 = vmatprep.subr.bf16.mxu0 %v5789_v16 }
 0x72d   : > { %5980 = vmatpush1.bf16.msra.mxu0 %v5788_v13 }
 0x72e   : > { %5981 = vmatprep.subr.bf16.mxu0 %v5791_v4  ;;  %v8526_v4 = vld [vmem:[%s11029_s14 + $0x20] sm:$0xff] }
 0x731   : > { %5982 = vmatpush1.bf16.msra.mxu0 %v5790_v2 }
 0x732   : > { %5983 = vmatprep.subr.bf16.mxu0 %v5793_v54  ;;  %v8527_v54 = vld [vmem:[%s11029_s14 + $0x28] sm:$0xff] }
 0x735   : > { %5984 = vmatpush1.bf16.msra.mxu0 %v5792_v57 }
 0x736   : > { %5985 = vmatprep.subr.bf16.mxu0 %v5795_v60  ;;  %v8528_v60 = vld [vmem:[%s11029_s14 + $0x30] sm:$0xff] }
 0x739   : > { %5986 = vmatpush1.bf16.msra.mxu0 %v5794_v44  ;;  %v8529_v44 = vld [vmem:[%s11029_s14 + $0x38] sm:$0xff] }
 0x73a   : > { %5987 = vmatprep.subr.bf16.mxu0 %v5797_v41 }
 0x73d   : > { %5988 = vmatpush1.bf16.msra.mxu0 %v5796_v31 }
 0x73e   : > { %5989 = vmatprep.subr.bf16.mxu0 %v5799_v58  ;;  %v6169_v58 = vld [vmem:[%s8679_s26 + $0x8] sm:$0xff] }
 0x741   : > { %5990 = vmatpush1.bf16.msra.mxu0 %v5798_v21  ;;  %v6168_v21 = vld [vmem:[%s8679_s26] sm:$0xff] }
 0x744   : > { %5992 = vmatmul.mubr.bf16.vlgmr.msra.gmra.mrb[160].mxu0 %v5598_v34  ;;  %v6017_v34 = vrot.slane %v6012_v62, %v11085_v40 }
 0x79e   : > { %v5586_v43 = vpop.f32.mrb[188].mxu1 }
 0x79f   : > { %v5607_v20 = vpack.c.bf16 %v5586_v43, %v10307_v5  ;;  %v8249_v7 = vpop.f32.mrb[189].mxu1  ;;  %v6233_v43 = vunpack.c.l.s8.bf16 %v6169_v58 }
 0x7a0   : > { %v5589_v47 = vpop.f32.mrb[190].mxu1  ;;  %v6241_v7 = vunpack.c.h.s8.bf16 %v6169_v58 }
 0x7a1   : > { %v8250_v50 = vpop.f32.mrb[191].mxu1  ;;  %6001 = vmatprep.mubr.bf16.mxu0 %v5607_v20  ;;  %v6232_v20 = vunpack.c.l.s8.bf16 %v6168_v21  ;;  %v6177_v47 = vld [vmem:[%s8679_s26 + $0x48] sm:$0xff]  ;;  %6360 = vmatprep.subr.bf16.mxu1 %v6233_v43 }
 0x7a2   : > { %6002 = vmatmul.mubr.bf16.gmra.mrb[164].mxu0 %v5606_v23  ;;  %v6240_v50 = vunpack.c.h.s8.bf16 %v6168_v21  ;;  %v6249_v62 = vunpack.c.l.s8.bf16 %v6177_v47  ;;  %v6217_v21 = vld [vmem:[%s8679_s26 + $0x188] sm:$0xff] }
 0x7a3   : > { %6361 = vmatpush1.bf16.msra.mxu1 %v6232_v20  ;;  %v6329_v43 = vunpack.c.l.s8.bf16 %v6217_v21  ;;  %v6216_v20 = vld [vmem:[%s8679_s26 + $0x180] sm:$0xff] }
 0x7a4   : > { %6362 = vmatprep.subr.bf16.mxu1 %v6241_v7  ;;  %v6328_v7 = vunpack.c.l.s8.bf16 %v6216_v20 }
 0x7a7   : > { %6363 = vmatpush1.bf16.msra.mxu1 %v6240_v50  ;;  %v6336_v50 = vunpack.c.h.s8.bf16 %v6216_v20 }
 0x7a8   : > { %6364 = vmatprep.subr.bf16.mxu1 %v6249_v62  ;;  %v6225_v62 = vld [vmem:[%s8679_s26 + $0x1c8] sm:$0xff] }
 0x817   : > { %v5993_v8 = vpop.f32.mrb[160].mxu0 }
 0x818   : > { %v6024_v1 = vmul.f32 %v6017_v34, %v5993_v8  ;;  %v5995_v24 = vpop.f32.mrb[161].mxu0  ;;  %v6256_v8 = vunpack.c.h.s8.bf16 %v6176_v19 }
 0x819   : > { %v6025_v61 = vmul.f32 %v6021_v33, %v5995_v24  ;;  %v5997_v52 = vpop.f32.mrb[162].mxu0 }
 0x81a   : > { %v6044_v5 = vadd.f32 %v6037_v53, %v6024_v1  ;;  %v6026_v35 = vmul.f32 %v6017_v34, %v5997_v52  ;;  %v5999_v32 = vpop.f32.mrb[163].mxu0  ;;  %v6184_v1 = vld [vmem:[%s8679_s26 + $0x80] sm:$0xff]  ;;  %v6193_v52 = vld [vmem:[%s8679_s26 + $0xc8] sm:$0xff] }
 0x81b   : > { %v6045_v23 = vadd.f32 %v6041_v28, %v6025_v61  ;;  %v6027_v55 = vmul.f32 %v6021_v33, %v5999_v32  ;;  %v6264_v24 = vunpack.c.l.s8.bf16 %v6184_v1  ;;  %v6192_v32 = vld [vmem:[%s8679_s26 + $0xc0] sm:$0xff] }
 0x81c   : > { %v10345_v48 = vadd.f32 %v8522_v6, %v6044_v5  ;;  %v6046_v56 = vadd.f32 %v6037_v53, %v6026_v35  ;;  %v6272_v5 = vunpack.c.h.s8.bf16 %v6184_v1  ;;  %v6281_v35 = vunpack.c.l.s8.bf16 %v6193_v52 }
 0x81d   : > { %v10350_v39 = vadd.f32 %v8523_v37, %v6045_v23  ;;  %v6047_v9 = vadd.f32 %v6041_v28, %v6027_v55  ;;  %v6280_v6 = vunpack.c.l.s8.bf16 %v6192_v32  ;;  %v6289_v37 = vunpack.c.h.s8.bf16 %v6193_v52 }
 0x81e   : > { %v10355_v26 = vadd.f32 %v8524_v18, %v6046_v56 }
 0x81f   : > { %v10360_v30 = vadd.f32 %v8525_v45, %v6047_v9  ;;  %v6062_v17 = vadd.f32 %v10350_v39, %v10345_v48 }
 0x821   : > { %6063 = vadd.xlane.f32.xlu0 %v6062_v17  ;;  %v6065_v10 = vadd.f32 %v10360_v30, %v10355_v26  ;;  %v6201_v17 = vld [vmem:[%s8679_s26 + $0x108] sm:$0xff] }
 0x823   : > { %6066 = vadd.xlane.f32.xlu1 %v6065_v10  ;;  %v6288_v10 = vunpack.c.h.s8.bf16 %v6192_v32 }
 0x875   : > { %v6003_v22 = vpop.f32.mrb[164].mxu0 }
 0x876   : > { %v6028_v42 = vmul.f32 %v6017_v34, %v6003_v22  ;;  %v6005_v46 = vpop.f32.mrb[165].mxu0 }
 0x877   : > { %v6029_v15 = vmul.f32 %v6021_v33, %v6005_v46  ;;  %v6007_v27 = vpop.f32.mrb[166].mxu0 }
 0x878   : > { %v6048_v11 = vadd.f32 %v6037_v53, %v6028_v42  ;;  %v6030_v49 = vmul.f32 %v6017_v34, %v6007_v27  ;;  %v6009_v16 = vpop.f32.mrb[167].mxu0  ;;  %v6248_v34 = vunpack.c.l.s8.bf16 %v6176_v19  ;;  %v6297_v27 = vunpack.c.l.s8.bf16 %v6201_v17  ;;  %v6224_v19 = vld [vmem:[%s8679_s26 + $0x1c0] sm:$0xff] }
 0x879   : > { %v6049_v29 = vadd.f32 %v6041_v28, %v6029_v15  ;;  %v6031_v13 = vmul.f32 %v6021_v33, %v6009_v16  ;;  %v6257_v33 = vunpack.c.h.s8.bf16 %v6177_v47  ;;  %v6337_v47 = vunpack.c.h.s8.bf16 %v6217_v21 }
 0x87a   : > { %v10369_v12 = vadd.f32 %v8526_v4, %v6048_v11  ;;  %v6050_v2 = vadd.f32 %v6037_v53, %v6030_v49  ;;  %v6185_v53 = vld [vmem:[%s8679_s26 + $0x88] sm:$0xff]  ;;  %6365 = vmatpush1.bf16.msra.mxu1 %v6248_v34  ;;  %v6200_v11 = vld [vmem:[%s8679_s26 + $0x100] sm:$0xff]  ;;  %v6345_v34 = vunpack.c.l.s8.bf16 %v6225_v62 }
 0x87b   : > { %v10374_v59 = vadd.f32 %v8527_v54, %v6049_v29  ;;  %v6051_v57 = vadd.f32 %v6041_v28, %v6031_v13  ;;  %6366 = vmatprep.subr.bf16.mxu1 %v6257_v33  ;;  %v6265_v28 = vunpack.c.l.s8.bf16 %v6185_v53  ;;  %v6273_v61 = vunpack.c.h.s8.bf16 %v6185_v53 }
 0x87c   : > { %v10379_v36 = vadd.f32 %v8528_v60, %v6050_v2  ;;  %v6296_v4 = vunpack.c.l.s8.bf16 %v6200_v11  ;;  %v6305_v2 = vunpack.c.h.s8.bf16 %v6201_v17  ;;  %v6304_v54 = vunpack.c.h.s8.bf16 %v6200_v11 }
 0x87d   : > { %v10384_v41 = vadd.f32 %v8529_v44, %v6051_v57  ;;  %v6068_v38 = vadd.f32 %v10374_v59, %v10369_v12  ;;  %v6209_v57 = vld [vmem:[%s8679_s26 + $0x148] sm:$0xff]  ;;  %v6208_v44 = vld [vmem:[%s8679_s26 + $0x140] sm:$0xff]  ;;  %v6344_v33 = vunpack.c.l.s8.bf16 %v6224_v19  ;;  %v6353_v53 = vunpack.c.h.s8.bf16 %v6225_v62 }
 0x87e   : > { %6367 = vmatpush1.bf16.msra.mxu1 %v6256_v8  ;;  %v6313_v60 = vunpack.c.l.s8.bf16 %v6209_v57  ;;  %v6320_v58 = vunpack.c.h.s8.bf16 %v6208_v44  ;;  %v6352_v8 = vunpack.c.h.s8.bf16 %v6224_v19 }
 0x87f   : > { %6069 = vadd.xlane.f32.xlu0 %v6068_v38  ;;  %v6071_v31 = vadd.f32 %v10384_v41, %v10379_v36  ;;  %6368 = vmatprep.subr.bf16.mxu1 %v6265_v28  ;;  %v6312_v38 = vunpack.c.l.s8.bf16 %v6208_v44  ;;  %v6171_v28 = vld [vmem:[%s8679_s26 + $0x18] sm:$0xff] }
 0x880   : > { %v6235_v1 = vunpack.c.l.s8.bf16 %v6171_v28 }
 0x881   : > { %6072 = vadd.xlane.f32.xlu1 %v6071_v31  ;;  %v6321_v31 = vunpack.c.h.s8.bf16 %v6209_v57 }
 0x882   : > { %6369 = vmatpush1.bf16.msra.mxu1 %v6264_v24 }
 0x883   : > { %6370 = vmatprep.subr.bf16.mxu1 %v6273_v61 }
 0x886   : > { %6371 = vmatpush1.bf16.msra.mxu1 %v6272_v5 }
 0x887   : > { %6372 = vmatprep.subr.bf16.mxu1 %v6281_v35 }
 0x88a   : > { %6373 = vmatpush1.bf16.msra.mxu1 %v6280_v6 }
 0x88b   : > { %6374 = vmatprep.subr.bf16.mxu1 %v6289_v37 }
 0x88e   : > { %6375 = vmatpush1.bf16.msra.mxu1 %v6288_v10 }
 0x88f   : > { %6376 = vmatprep.subr.bf16.mxu1 %v6297_v27 }
 0x892   : > { %6377 = vmatpush1.bf16.msra.mxu1 %v6296_v4 }
 0x893   : > { %6378 = vmatprep.subr.bf16.mxu1 %v6305_v2 }
 0x896   : > { %6379 = vmatpush1.bf16.msra.mxu1 %v6304_v54 }
 0x897   : > { %6380 = vmatprep.subr.bf16.mxu1 %v6313_v60 }
 0x89a   : > { %6381 = vmatpush1.bf16.msra.mxu1 %v6312_v38 }
 0x89b   : > { %6382 = vmatprep.subr.bf16.mxu1 %v6321_v31 }
 0x89e   : > { %6383 = vmatpush1.bf16.msra.mxu1 %v6320_v58 }
 0x89f   : > { %6384 = vmatprep.subr.bf16.mxu1 %v6329_v43 }
 0x8a2   : > { %6385 = vmatpush1.bf16.msra.mxu1 %v6328_v7  ;;  %v6170_v7 = vld [vmem:[%s8679_s26 + $0x10] sm:$0xff] }
 0x8a3   : > { %6386 = vmatprep.subr.bf16.mxu1 %v6337_v47 }
 0x8a6   : > { %6387 = vmatpush1.bf16.msra.mxu1 %v6336_v50 }
 0x8a7   : > { %6388 = vmatprep.subr.bf16.mxu1 %v6345_v34  ;;  %v6234_v34 = vunpack.c.l.s8.bf16 %v6170_v7 }
 0x8aa   : > { %6389 = vmatpush1.bf16.msra.mxu1 %v6344_v33  ;;  %v6243_v33 = vunpack.c.h.s8.bf16 %v6171_v28 }
 0x8ab   : > { %6390 = vmatprep.subr.bf16.mxu1 %v6353_v53  ;;  %v6179_v53 = vld [vmem:[%s8679_s26 + $0x58] sm:$0xff] }
 0x8ae   : > { %v6064_v23 = vpop.xlane.xlu0 %6063  ;;  %6391 = vmatpush1.bf16.msra.mxu1 %v6352_v8  ;;  %v6242_v8 = vunpack.c.h.s8.bf16 %v6170_v7 }
 0x8af   : > { %v6074_v55 = vmul.f32 0.00390625, %v6064_v23  ;;  %6413 = vmatprep.subr.bf16.mxu1 %v6235_v1  ;;  %v6251_v1 = vunpack.c.l.s8.bf16 %v6179_v53 }
 0x8b0   : > { %v6067_v56 = vpop.xlane.xlu1 %6066 }
 0x8b1   : > { %v10399_v9 = vsub.f32 %v10345_v48, %v6074_v55  ;;  %v10402_v18 = vsub.f32 %v10350_v39, %v6074_v55  ;;  %v6075_v45 = vmul.f32 0.00390625, %v6067_v56 }
 0x8b3   : > { %v10406_v22 = vsub.f32 %v10355_v26, %v6075_v45  ;;  %v10409_v42 = vsub.f32 %v10360_v30, %v6075_v45  ;;  %v6086_v46 = vmul.f32 %v10399_v9, %v10399_v9  ;;  %v6087_v15 = vmul.f32 %v10402_v18, %v10402_v18 }
 0x8b5   : > { %v6094_v49 = vadd.f32 %v6087_v15, %v6086_v46  ;;  %v6088_v16 = vmul.f32 %v10406_v22, %v10406_v22  ;;  %v6089_v29 = vmul.f32 %v10409_v42, %v10409_v42 }
 0x8b7   : > { %6095 = vadd.xlane.f32.xlu0 %v6094_v49  ;;  %v6097_v13 = vadd.f32 %v6089_v29, %v6088_v16  ;;  %v6060_v29 = vld [vmem:[%s11087_s18] sm:$0x3] }
 0x8b8   : > { %v10458_v4 = vrot.slane %v6060_v29, %v11086_v14  ;;  %v10461_v2 = vrot.slane %v6060_v29, %v11085_v40 }
 0x8b9   : > { %6098 = vadd.xlane.f32.xlu1 %v6097_v13  ;;  %v6061_v13 = vld [vmem:[%s11089_s10] sm:$0x3] }
 0x8ba   : > { %v10466_v38 = vrot.slane %v6061_v13, %v11086_v14  ;;  %v10469_v31 = vrot.slane %v6061_v13, %v11085_v40  ;;  %v6202_v13 = vld [vmem:[%s8679_s26 + $0x110] sm:$0xff] }
 0x90c   : > { %v6070_v24 = vpop.xlane.xlu0 %6069 }
 0x90d   : > { %v6076_v61 = vmul.f32 0.00390625, %v6070_v24  ;;  %v6178_v24 = vld [vmem:[%s8679_s26 + $0x50] sm:$0xff] }
 0x90e   : > { %v6073_v52 = vpop.xlane.xlu1 %6072  ;;  %v6258_v28 = vunpack.c.h.s8.bf16 %v6178_v24 }
 0x90f   : > { %v10428_v5 = vsub.f32 %v10369_v12, %v6076_v61  ;;  %v10431_v35 = vsub.f32 %v10374_v59, %v6076_v61  ;;  %v6077_v32 = vmul.f32 0.00390625, %v6073_v52  ;;  %v6250_v61 = vunpack.c.l.s8.bf16 %v6178_v24  ;;  %v10503_v24 = vld [vmem:[%s8679_s26 + $0x28] sm:$0xff] }
 0x910   : > { %v6259_v52 = vunpack.c.h.s8.bf16 %v6179_v53  ;;  %v6226_v53 = vld [vmem:[%s8679_s26 + $0x1d0] sm:$0xff] }
 0x911   : > { %v10434_v23 = vsub.f32 %v10379_v36, %v6077_v32  ;;  %v10437_v55 = vsub.f32 %v10384_v41, %v6077_v32  ;;  %v6090_v6 = vmul.f32 %v10428_v5, %v10428_v5  ;;  %v6091_v56 = vmul.f32 %v10431_v35, %v10431_v35  ;;  %v6187_v32 = vld [vmem:[%s8679_s26 + $0x98] sm:$0xff] }
 0x913   : > { %v6100_v37 = vadd.f32 %v6091_v56, %v6090_v6  ;;  %v6092_v45 = vmul.f32 %v10434_v23, %v10434_v23  ;;  %v6093_v17 = vmul.f32 %v10437_v55, %v10437_v55  ;;  %v6267_v6 = vunpack.c.l.s8.bf16 %v6187_v32  ;;  %v6186_v56 = vld [vmem:[%s8679_s26 + $0x90] sm:$0xff] }
 0x915   : > { %6101 = vadd.xlane.f32.xlu0 %v6100_v37  ;;  %v6103_v10 = vadd.f32 %v6093_v17, %v6092_v45  ;;  %v6266_v37 = vunpack.c.l.s8.bf16 %v6186_v56  ;;  %v6275_v45 = vunpack.c.h.s8.bf16 %v6187_v32  ;;  %v6195_v17 = vld [vmem:[%s8679_s26 + $0xd8] sm:$0xff] }
 0x917   : > { %6104 = vadd.xlane.f32.xlu1 %v6103_v10  ;;  %v6274_v10 = vunpack.c.h.s8.bf16 %v6186_v56 }
 0x944   : > { %v6096_v46 = vpop.xlane.xlu0 %6095 }
 0x945   : > { %v6106_v15 = vmul.f32 0.00390625, %v6096_v46  ;;  %v6283_v46 = vunpack.c.l.s8.bf16 %v6195_v17 }
 0x946   : > { %v6099_v27 = vpop.xlane.xlu1 %6098 }
 0x947   : > { %v6110_v11 = vadd.f32 1e-05, %v6106_v15  ;;  %v6107_v49 = vmul.f32 0.00390625, %v6099_v27  ;;  %v6194_v15 = vld [vmem:[%s8679_s26 + $0xd0] sm:$0xff] }
 0x948   : > { %v6282_v27 = vunpack.c.l.s8.bf16 %v6194_v15 }
 0x949   : > { %8447 = vrsqrt.f32 %v6110_v11  ;;  %v6111_v16 = vadd.f32 1e-05, %v6107_v49  ;;  %v6291_v11 = vunpack.c.h.s8.bf16 %v6195_v17  ;;  %v6203_v49 = vld [vmem:[%s8679_s26 + $0x118] sm:$0xff] }
 0x94a   : > { %v6299_v29 = vunpack.c.l.s8.bf16 %v6203_v49  ;;  %v7027_v17 = vld [vmem:[%s8684_s5 + $0x18] sm:$0xff] }
 0x94b   : > { %8449 = vrsqrt.f32 %v6111_v16  ;;  %v6290_v16 = vunpack.c.h.s8.bf16 %v6194_v15 }
 0x953   : > { %v8448_v54 = vpop.eup %8447 }
 0x954   : > { %v6118_v57 = vmul.f32 %v8448_v54, %v10399_v9  ;;  %v6119_v60 = vmul.f32 %v8448_v54, %v10402_v18  ;;  %v6298_v54 = vunpack.c.l.s8.bf16 %v6202_v13 }
 0x955   : > { %v8450_v44 = vpop.eup %8449 }
 0x956   : > { %v6120_v58 = vmul.f32 %v8450_v44, %v10406_v22  ;;  %v6121_v21 = vmul.f32 %v8450_v44, %v10409_v42  ;;  %v6138_v43 = vmul.f32 %v10458_v4, %v6119_v60  ;;  %v6137_v20 = vmul.f32 %v10461_v2, %v6118_v57  ;;  %v6211_v60 = vld [vmem:[%s8679_s26 + $0x158] sm:$0xff] }
 0x957   : > { %v6307_v57 = vunpack.c.h.s8.bf16 %v6203_v49  ;;  %v6306_v44 = vunpack.c.h.s8.bf16 %v6202_v13  ;;  %v7095_v49 = vunpack.c.h.s8.bf16 %v7027_v17 }
 0x958   : > { %v6140_v9 = vmul.f32 %v10458_v4, %v6121_v21  ;;  %v6139_v18 = vmul.f32 %v10461_v2, %v6120_v58  ;;  %v6157_v47 = vadd.f32 %v10466_v38, %v6138_v43  ;;  %v6156_v62 = vadd.f32 %v10469_v31, %v6137_v20  ;;  %v6210_v21 = vld [vmem:[%s8679_s26 + $0x150] sm:$0xff] }
 0x959   : > { %v6315_v58 = vunpack.c.l.s8.bf16 %v6211_v60  ;;  %v6314_v43 = vunpack.c.l.s8.bf16 %v6210_v21  ;;  %v6323_v20 = vunpack.c.h.s8.bf16 %v6211_v60  ;;  %v7029_v60 = vld [vmem:[%s8684_s5 + $0x28] sm:$0xff] }
 0x95a   : > { %v6159_v50 = vadd.f32 %v10466_v38, %v6140_v9  ;;  %v6158_v22 = vadd.f32 %v10469_v31, %v6139_v18  ;;  %v6219_v9 = vld [vmem:[%s8679_s26 + $0x198] sm:$0xff]  ;;  %v6322_v18 = vunpack.c.h.s8.bf16 %v6210_v21 }
 0x95b   : > { %v6331_v7 = vunpack.c.l.s8.bf16 %v6219_v9 }
 0x95c   : > { %v10482_v19 = vpack.c.bf16 %v6159_v50, %v6157_v47  ;;  %v10484_v42 = vpack.c.bf16 %v6158_v22, %v6156_v62  ;;  %v6218_v47 = vld [vmem:[%s8679_s26 + $0x190] sm:$0xff]  ;;  %v6339_v62 = vunpack.c.h.s8.bf16 %v6219_v9  ;;  %v6227_v22 = vld [vmem:[%s8679_s26 + $0x1d8] sm:$0xff] }
 0x95d   : > { %v6330_v50 = vunpack.c.l.s8.bf16 %v6218_v47  ;;  %v7031_v9 = vld [vmem:[%s8684_s5 + $0x38] sm:$0xff] }
 0x95e   : > { %6392 = vmatprep.mubr.bf16.mxu1 %v10482_v19 }
 0x95f   : > { %6393 = vmatmul.mubr.bf16.vlgmr.msra.gmra.mrb[192].mxu1 %v10484_v42 }
 0x960   : > { %6414 = vmatpush1.bf16.msra.mxu1 %v6234_v34  ;;  %v6338_v34 = vunpack.c.h.s8.bf16 %v6218_v47  ;;  %v7030_v47 = vld [vmem:[%s8684_s5 + $0x30] sm:$0xff] }
 0x961   : > { %6415 = vmatprep.subr.bf16.mxu1 %v6243_v33  ;;  %v6347_v33 = vunpack.c.l.s8.bf16 %v6227_v22 }
 0x964   : > { %6416 = vmatpush1.bf16.msra.mxu1 %v6242_v8  ;;  %v6346_v8 = vunpack.c.l.s8.bf16 %v6226_v53 }
 0x965   : > { %6417 = vmatprep.subr.bf16.mxu1 %v6251_v1  ;;  %v6355_v1 = vunpack.c.h.s8.bf16 %v6227_v22  ;;  %v7100_v22 = vunpack.c.l.s8.bf16 %v7030_v47 }
 0x968   : > { %6418 = vmatpush1.bf16.msra.mxu1 %v6250_v61  ;;  %v7025_v61 = vld [vmem:[%s8684_s5 + $0x8] sm:$0xff] }
 0x969   : > { %6419 = vmatprep.subr.bf16.mxu1 %v6259_v52  ;;  %v6354_v52 = vunpack.c.h.s8.bf16 %v6226_v53  ;;  %v7089_v32 = vunpack.c.l.s8.bf16 %v7025_v61 }
 0x96b   : > { %7216 = vmatprep.subr.bf16.mxu0 %v7089_v32 }
 0x96c   : > { %6420 = vmatpush1.bf16.msra.mxu1 %v6258_v28  ;;  %v6237_v28 = vunpack.c.l.s8.bf16 %v10503_v24 }
 0x96d   : > { %6421 = vmatprep.subr.bf16.mxu1 %v6267_v6  ;;  %v7024_v6 = vld [vmem:[%s8684_s5] sm:$0xff] }
 0x96e   : > { %v7088_v56 = vunpack.c.l.s8.bf16 %v7024_v6 }
 0x970   : > { %6422 = vmatpush1.bf16.msra.mxu1 %v6266_v37  ;;  %v7091_v37 = vunpack.c.h.s8.bf16 %v7025_v61  ;;  %7217 = vmatpush1.bf16.msra.mxu0 %v7088_v56  ;;  %v7103_v61 = vunpack.c.h.s8.bf16 %v7031_v9 }
 0x971   : > { %6423 = vmatprep.subr.bf16.mxu1 %v6275_v45  ;;  %v7090_v45 = vunpack.c.h.s8.bf16 %v7024_v6  ;;  %v7033_v6 = vld [vmem:[%s8684_s5 + $0x48] sm:$0xff] }
 0x972   : > { %7218 = vmatprep.subr.bf16.mxu0 %v7091_v37  ;;  %v7105_v56 = vunpack.c.l.s8.bf16 %v7033_v6  ;;  %v7032_v37 = vld [vmem:[%s8684_s5 + $0x40] sm:$0xff] }
 0x974   : > { %6424 = vmatpush1.bf16.msra.mxu1 %v6274_v10  ;;  %7219 = vmatpush1.bf16.msra.mxu0 %v7090_v45  ;;  %v7093_v10 = vunpack.c.l.s8.bf16 %v7027_v17  ;;  %v7104_v45 = vunpack.c.l.s8.bf16 %v7032_v37  ;;  %v6172_v17 = vld [vmem:[%s8679_s26 + $0x20] sm:$0xff] }
 0x975   : > { %6425 = vmatprep.subr.bf16.mxu1 %v6283_v46  ;;  %v7026_v46 = vld [vmem:[%s8684_s5 + $0x10] sm:$0xff] }
 0x976   : > { %7220 = vmatprep.subr.bf16.mxu0 %v7093_v10  ;;  %v7035_v10 = vld [vmem:[%s8684_s5 + $0x58] sm:$0xff] }
 0x978   : > { %6426 = vmatpush1.bf16.msra.mxu1 %v6282_v27  ;;  %v7092_v27 = vunpack.c.l.s8.bf16 %v7026_v46 }
 0x979   : > { %6427 = vmatprep.subr.bf16.mxu1 %v6291_v11 }
 0x97a   : > { %7221 = vmatpush1.bf16.msra.mxu0 %v7092_v27  ;;  %v6236_v27 = vunpack.c.l.s8.bf16 %v6172_v17 }
 0x97b   : > { %7222 = vmatprep.subr.bf16.mxu0 %v7095_v49  ;;  %v6245_v49 = vunpack.c.h.s8.bf16 %v10503_v24 }
 0x97c   : > { %6428 = vmatpush1.bf16.msra.mxu1 %v6290_v16 }
 0x97d   : > { %6429 = vmatprep.subr.bf16.mxu1 %v6299_v29 }
 0x980   : > { %6430 = vmatpush1.bf16.msra.mxu1 %v6298_v54  ;;  %v7094_v54 = vunpack.c.h.s8.bf16 %v7026_v46  ;;  %v7109_v46 = vunpack.c.l.s8.bf16 %v7035_v10 }
 0x981   : > { %6431 = vmatprep.subr.bf16.mxu1 %v6307_v57 }
 0x982   : > { %7223 = vmatpush1.bf16.msra.mxu0 %v7094_v54 }
 0x984   : > { %6432 = vmatpush1.bf16.msra.mxu1 %v6306_v44  ;;  %v7097_v44 = vunpack.c.l.s8.bf16 %v7029_v60 }
 0x985   : > { %6433 = vmatprep.subr.bf16.mxu1 %v6315_v58  ;;  %v7028_v58 = vld [vmem:[%s8684_s5 + $0x20] sm:$0xff] }
 0x986   : > { %7224 = vmatprep.subr.bf16.mxu0 %v7097_v44  ;;  %v7096_v21 = vunpack.c.l.s8.bf16 %v7028_v58  ;;  %v7037_v44 = vld [vmem:[%s8684_s5 + $0x68] sm:$0xff] }
 0x987   : > { %v7113_v24 = vunpack.c.l.s8.bf16 %v7037_v44 }
 0x988   : > { %6434 = vmatpush1.bf16.msra.mxu1 %v6314_v43  ;;  %v7099_v43 = vunpack.c.h.s8.bf16 %v7029_v60  ;;  %7225 = vmatpush1.bf16.msra.mxu0 %v7096_v21  ;;  %v6180_v60 = vld [vmem:[%s8679_s26 + $0x60] sm:$0xff] }
 0x989   : > { %6435 = vmatprep.subr.bf16.mxu1 %v6323_v20  ;;  %v7098_v20 = vunpack.c.h.s8.bf16 %v7028_v58  ;;  %v7036_v58 = vld [vmem:[%s8684_s5 + $0x60] sm:$0xff]  ;;  %v6252_v21 = vunpack.c.l.s8.bf16 %v6180_v60 }
 0x98a   : > { %7226 = vmatprep.subr.bf16.mxu0 %v7099_v43  ;;  %v7112_v43 = vunpack.c.l.s8.bf16 %v7036_v58 }
 0x98c   : > { %6436 = vmatpush1.bf16.msra.mxu1 %v6322_v18  ;;  %7227 = vmatpush1.bf16.msra.mxu0 %v7098_v20  ;;  %v7101_v18 = vunpack.c.l.s8.bf16 %v7031_v9  ;;  %v6189_v9 = vld [vmem:[%s8679_s26 + $0xa8] sm:$0xff] }
 0x98d   : > { %6437 = vmatprep.subr.bf16.mxu1 %v6331_v7 }
 0x98e   : > { %7228 = vmatprep.subr.bf16.mxu0 %v7101_v18  ;;  %v7115_v18 = vunpack.c.h.s8.bf16 %v7037_v44 }
 0x990   : > { %6438 = vmatpush1.bf16.msra.mxu1 %v6330_v50  ;;  %7229 = vmatpush1.bf16.msra.mxu0 %v7100_v22  ;;  %v7039_v22 = vld [vmem:[%s8684_s5 + $0x78] sm:$0xff] }
 0x991   : > { %6439 = vmatprep.subr.bf16.mxu1 %v6339_v62  ;;  %7230 = vmatprep.subr.bf16.mxu0 %v7103_v61  ;;  %v6277_v61 = vunpack.c.h.s8.bf16 %v6189_v9 }
 0x994   : > { %6440 = vmatpush1.bf16.msra.mxu1 %v6338_v34 }
 0x995   : > { %6441 = vmatprep.subr.bf16.mxu1 %v6347_v33 }
 0x998   : > { %6442 = vmatpush1.bf16.msra.mxu1 %v6346_v8 }
 0x999   : > { %6443 = vmatprep.subr.bf16.mxu1 %v6355_v1 }
 0x99c   : > { %6444 = vmatpush1.bf16.msra.mxu1 %v6354_v52 }
 0x99d   : > { %6466 = vmatprep.subr.bf16.mxu1 %v6237_v28 }
 0x9a2   : > { %v6102_v15 = vpop.xlane.xlu0 %6101 }
 0x9a3   : > { %v6108_v11 = vmul.f32 0.00390625, %v6102_v15  ;;  %v7034_v15 = vld [vmem:[%s8684_s5 + $0x50] sm:$0xff] }
 0x9a4   : > { %v6105_v16 = vpop.xlane.xlu1 %6104  ;;  %v7110_v54 = vunpack.c.h.s8.bf16 %v7034_v15 }
 0x9a5   : > { %v6112_v29 = vadd.f32 1e-05, %v6108_v11  ;;  %v6109_v13 = vmul.f32 0.00390625, %v6105_v16  ;;  %v7108_v11 = vunpack.c.l.s8.bf16 %v7034_v15  ;;  %v6181_v16 = vld [vmem:[%s8679_s26 + $0x68] sm:$0xff] }
 0x9a6   : > { %v6261_v20 = vunpack.c.h.s8.bf16 %v6181_v16 }
 0x9a7   : > { %8451 = vrsqrt.f32 %v6112_v29  ;;  %v6113_v57 = vadd.f32 1e-05, %v6109_v13  ;;  %v7111_v29 = vunpack.c.h.s8.bf16 %v7035_v10  ;;  %v6244_v13 = vunpack.c.h.s8.bf16 %v6172_v17 }
 0x9a9   : > { %8453 = vrsqrt.f32 %v6113_v57  ;;  %v6253_v57 = vunpack.c.l.s8.bf16 %v6181_v16 }
 0x9b1   : > { %v8452_v7 = vpop.eup %8451 }
 0x9b2   : > { %v6122_v50 = vmul.f32 %v8452_v7, %v10428_v5  ;;  %v6123_v62 = vmul.f32 %v8452_v7, %v10431_v35  ;;  %v7102_v35 = vunpack.c.h.s8.bf16 %v7030_v47  ;;  %v6260_v7 = vunpack.c.h.s8.bf16 %v6180_v60 }
 0x9b3   : > { %v8454_v34 = vpop.eup %8453  ;;  %v7114_v47 = vunpack.c.h.s8.bf16 %v7036_v58 }
 0x9b4   : > { %v6124_v33 = vmul.f32 %v8454_v34, %v10434_v23  ;;  %v6125_v53 = vmul.f32 %v8454_v34, %v10437_v55  ;;  %v6142_v8 = vmul.f32 %v10458_v4, %v6123_v62  ;;  %v6141_v1 = vmul.f32 %v10461_v2, %v6122_v50  ;;  %7231 = vmatpush1.bf16.msra.mxu0 %v7102_v35  ;;  %v6188_v62 = vld [vmem:[%s8679_s26 + $0xa0] sm:$0xff] }
 0x9b5   : > { %7232 = vmatprep.subr.bf16.mxu0 %v7105_v56  ;;  %v6269_v50 = vunpack.c.l.s8.bf16 %v6189_v9  ;;  %v7117_v34 = vunpack.c.l.s8.bf16 %v7039_v22  ;;  %v6276_v35 = vunpack.c.h.s8.bf16 %v6188_v62 }
 0x9b6   : > { %v6144_v52 = vmul.f32 %v10458_v4, %v6125_v53  ;;  %v6143_v5 = vmul.f32 %v10461_v2, %v6124_v33  ;;  %v6161_v32 = vadd.f32 %v10466_v38, %v6142_v8  ;;  %v6160_v23 = vadd.f32 %v10469_v31, %v6141_v1  ;;  %v7038_v33 = vld [vmem:[%s8684_s5 + $0x70] sm:$0xff] }
 0x9b7   : > { %v6268_v53 = vunpack.c.l.s8.bf16 %v6188_v62  ;;  %v7116_v8 = vunpack.c.l.s8.bf16 %v7038_v33  ;;  %v7119_v1 = vunpack.c.h.s8.bf16 %v7039_v22 }
 0x9b8   : > { %v6163_v28 = vadd.f32 %v10466_v38, %v6144_v52  ;;  %v6162_v55 = vadd.f32 %v10469_v31, %v6143_v5  ;;  %7233 = vmatpush1.bf16.msra.mxu0 %v7104_v45  ;;  %v7107_v38 = vunpack.c.h.s8.bf16 %v7033_v6  ;;  %v7106_v31 = vunpack.c.h.s8.bf16 %v7032_v37  ;;  %v6197_v52 = vld [vmem:[%s8679_s26 + $0xe8] sm:$0xff] }
 0x9b9   : > { %v7118_v5 = vunpack.c.h.s8.bf16 %v7038_v33  ;;  %v6293_v56 = vunpack.c.h.s8.bf16 %v6197_v52  ;;  %v6205_v37 = vld [vmem:[%s8679_s26 + $0x128] sm:$0xff] }
 0x9ba   : > { %v10528_v4 = vpack.c.bf16 %v6163_v28, %v6161_v32  ;;  %v10530_v2 = vpack.c.bf16 %v6162_v55, %v6160_v23  ;;  %7234 = vmatprep.subr.bf16.mxu0 %v7107_v38  ;;  %v6285_v32 = vunpack.c.l.s8.bf16 %v6197_v52  ;;  %v6196_v28 = vld [vmem:[%s8679_s26 + $0xe0] sm:$0xff]  ;;  %v10554_v23 = vld [vmem:[%s8684_s5 + $0x88] sm:$0xff]  ;;  %v6301_v38 = vunpack.c.l.s8.bf16 %v6205_v37  ;;  %v6191_v52 = vld [vmem:[%s8679_s26 + $0xb8] sm:$0xff] }
 0x9bb   : > { %v7121_v55 = vunpack.c.l.s8.bf16 %v10554_v23  ;;  %v6284_v6 = vunpack.c.l.s8.bf16 %v6196_v28  ;;  %v6292_v45 = vunpack.c.h.s8.bf16 %v6196_v28  ;;  %v6309_v10 = vunpack.c.h.s8.bf16 %v6205_v37 }
 0x9bc   : > { %6402 = vmatprep.mubr.bf16.mxu1 %v10528_v4  ;;  %7235 = vmatpush1.bf16.msra.mxu0 %v7106_v31  ;;  %v6204_v31 = vld [vmem:[%s8679_s26 + $0x120] sm:$0xff] }
 0x9bd   : > { %6403 = vmatmul.mubr.bf16.gmra.mrb[196].mxu1 %v10530_v2  ;;  %7236 = vmatprep.subr.bf16.mxu0 %v7109_v46  ;;  %v6300_v17 = vunpack.c.l.s8.bf16 %v6204_v31  ;;  %v6213_v46 = vld [vmem:[%s8679_s26 + $0x168] sm:$0xff]  ;;  %v6308_v15 = vunpack.c.h.s8.bf16 %v6204_v31  ;;  %v6207_v31 = vld [vmem:[%s8679_s26 + $0x138] sm:$0xff] }
 0x9be   : > { %6445 = vmatprep.mubr.bf16.mxu1 %v10482_v19  ;;  %v6325_v16 = vunpack.c.h.s8.bf16 %v6213_v46 }
 0x9c0   : > { %7237 = vmatpush1.bf16.msra.mxu0 %v7108_v11  ;;  %v6212_v11 = vld [vmem:[%s8679_s26 + $0x160] sm:$0xff] }
 0x9c1   : > { %7238 = vmatprep.subr.bf16.mxu0 %v7111_v29  ;;  %v6221_v29 = vld [vmem:[%s8679_s26 + $0x1a8] sm:$0xff] }
 0x9c2   : > { %v6341_v44 = vunpack.c.h.s8.bf16 %v6221_v29 }
 0x9c4   : > { %7239 = vmatpush1.bf16.msra.mxu0 %v7110_v54  ;;  %v6333_v54 = vunpack.c.l.s8.bf16 %v6221_v29  ;;  %v6214_v29 = vld [vmem:[%s8679_s26 + $0x170] sm:$0xff] }
 0x9c5   : > { %6446 = vmatmul.mubr.bf16.vlgmr.msra.gmra.mrb[200].mxu1 %v10484_v42  ;;  %7240 = vmatprep.subr.bf16.mxu0 %v7113_v24  ;;  %v6229_v24 = vld [vmem:[%s8679_s26 + $0x1e8] sm:$0xff] }
 0x9c6   : > { %6467 = vmatpush1.bf16.msra.mxu1 %v6236_v27  ;;  %6455 = vmatprep.mubr.bf16.mxu1 %v10528_v4  ;;  %v6317_v27 = vunpack.c.l.s8.bf16 %v6213_v46  ;;  %v6357_v9 = vunpack.c.h.s8.bf16 %v6229_v24  ;;  %v6206_v46 = vld [vmem:[%s8679_s26 + $0x130] sm:$0xff] }
 0x9c7   : > { %6468 = vmatprep.subr.bf16.mxu1 %v6245_v49  ;;  %v6316_v49 = vunpack.c.l.s8.bf16 %v6212_v11 }
 0x9c8   : > { %7241 = vmatpush1.bf16.msra.mxu0 %v7112_v43  ;;  %v6228_v43 = vld [vmem:[%s8679_s26 + $0x1e0] sm:$0xff] }
 0x9c9   : > { %7242 = vmatprep.subr.bf16.mxu0 %v7115_v18  ;;  %v6175_v18 = vld [vmem:[%s8679_s26 + $0x38] sm:$0xff] }
 0x9ca   : > { %6469 = vmatpush1.bf16.msra.mxu1 %v6244_v13  ;;  %v6324_v13 = vunpack.c.h.s8.bf16 %v6212_v11  ;;  %v6247_v22 = vunpack.c.h.s8.bf16 %v6175_v18  ;;  %v6215_v11 = vld [vmem:[%s8679_s26 + $0x178] sm:$0xff] }
 0x9cb   : > { %6470 = vmatprep.subr.bf16.mxu1 %v6253_v57  ;;  %v6220_v57 = vld [vmem:[%s8679_s26 + $0x1a0] sm:$0xff] }
 0x9cc   : > { %7243 = vmatpush1.bf16.msra.mxu0 %v7114_v47  ;;  %v6332_v60 = vunpack.c.l.s8.bf16 %v6220_v57  ;;  %v6340_v58 = vunpack.c.h.s8.bf16 %v6220_v57  ;;  %v6239_v47 = vunpack.c.l.s8.bf16 %v6175_v18  ;;  %v10582_v57 = vld [vmem:[%s8689_s3] sm:$0xff] }
 0x9cd   : > { %6456 = vmatmul.mubr.bf16.gmra.mrb[204].mxu1 %v10530_v2  ;;  %7244 = vmatprep.subr.bf16.mxu0 %v7117_v34  ;;  %v6183_v34 = vld [vmem:[%s8679_s26 + $0x78] sm:$0xff] }
 0x9ce   : > { %6471 = vmatpush1.bf16.msra.mxu1 %v6252_v21  ;;  %6498 = vmatprep.mubr.bf16.mxu1 %v10482_v19  ;;  %v6349_v21 = vunpack.c.l.s8.bf16 %v6229_v24  ;;  %v10586_v24 = vld [vmem:[%s8694_s16] sm:$0xff] }
 0x9cf   : > { %6472 = vmatprep.subr.bf16.mxu1 %v6261_v20  ;;  %v6348_v20 = vunpack.c.l.s8.bf16 %v6228_v43 }
 0x9d0   : > { %7245 = vmatpush1.bf16.msra.mxu0 %v7116_v8  ;;  %v6182_v8 = vld [vmem:[%s8679_s26 + $0x70] sm:$0xff] }
 0x9d1   : > { %7246 = vmatprep.subr.bf16.mxu0 %v7119_v1  ;;  %v6254_v1 = vunpack.c.l.s8.bf16 %v6182_v8 }
 0x9d2   : > { %6473 = vmatpush1.bf16.msra.mxu1 %v6260_v7  ;;  %v6356_v7 = vunpack.c.h.s8.bf16 %v6228_v43  ;;  %v6222_v43 = vld [vmem:[%s8679_s26 + $0x1b0] sm:$0xff] }
 0x9d3   : > { %6474 = vmatprep.subr.bf16.mxu1 %v6269_v50  ;;  %v6174_v50 = vld [vmem:[%s8679_s26 + $0x30] sm:$0xff] }
 0x9d4   : > { %7247 = vmatpush1.bf16.msra.mxu0 %v7118_v5  ;;  %v6238_v62 = vunpack.c.l.s8.bf16 %v6174_v50  ;;  %v6246_v33 = vunpack.c.h.s8.bf16 %v6174_v50  ;;  %v6262_v5 = vunpack.c.h.s8.bf16 %v6182_v8 }
 0x9d5   : > { %7269 = vmatprep.subr.bf16.mxu0 %v7121_v55  ;;  %v6279_v55 = vunpack.c.h.s8.bf16 %v6191_v52 }
 0x9d6   : > { %6475 = vmatpush1.bf16.msra.mxu1 %v6268_v53  ;;  %v6255_v53 = vunpack.c.l.s8.bf16 %v6183_v34 }
 0x9d7   : > { %6476 = vmatprep.subr.bf16.mxu1 %v6277_v61  ;;  %v6263_v61 = vunpack.c.h.s8.bf16 %v6183_v34 }
 0x9da   : > { %6477 = vmatpush1.bf16.msra.mxu1 %v6276_v35  ;;  %v6271_v35 = vunpack.c.l.s8.bf16 %v6191_v52 }
 0x9db   : > { %6478 = vmatprep.subr.bf16.mxu1 %v6285_v32  ;;  %v6190_v32 = vld [vmem:[%s8679_s26 + $0xb0] sm:$0xff] }
 0x9dc   : > { %v6270_v28 = vunpack.c.l.s8.bf16 %v6190_v32 }
 0x9de   : > { %6479 = vmatpush1.bf16.msra.mxu1 %v6284_v6  ;;  %v6199_v6 = vld [vmem:[%s8679_s26 + $0xf8] sm:$0xff] }
 0x9df   : > { %6480 = vmatprep.subr.bf16.mxu1 %v6293_v56  ;;  %v6278_v56 = vunpack.c.h.s8.bf16 %v6190_v32  ;;  %v6287_v37 = vunpack.c.l.s8.bf16 %v6199_v6 }
 0x9e2   : > { %6481 = vmatpush1.bf16.msra.mxu1 %v6292_v45  ;;  %v6198_v45 = vld [vmem:[%s8679_s26 + $0xf0] sm:$0xff] }
 0x9e3   : > { %6482 = vmatprep.subr.bf16.mxu1 %v6301_v38  ;;  %v6286_v38 = vunpack.c.l.s8.bf16 %v6198_v45 }
 0x9e6   : > { %6483 = vmatpush1.bf16.msra.mxu1 %v6300_v17  ;;  %v6294_v17 = vunpack.c.h.s8.bf16 %v6198_v45 }
 0x9e7   : > { %6484 = vmatprep.subr.bf16.mxu1 %v6309_v10  ;;  %v6303_v10 = vunpack.c.l.s8.bf16 %v6207_v31 }
 0x9ea   : > { %6485 = vmatpush1.bf16.msra.mxu1 %v6308_v15  ;;  %v6302_v15 = vunpack.c.l.s8.bf16 %v6206_v46 }
 0x9eb   : > { %6486 = vmatprep.subr.bf16.mxu1 %v6317_v27  ;;  %v6311_v27 = vunpack.c.h.s8.bf16 %v6207_v31 }
 0x9ee   : > { %6487 = vmatpush1.bf16.msra.mxu1 %v6316_v49  ;;  %v6310_v49 = vunpack.c.h.s8.bf16 %v6206_v46 }
 0x9ef   : > { %6488 = vmatprep.subr.bf16.mxu1 %v6325_v16  ;;  %v6319_v16 = vunpack.c.l.s8.bf16 %v6215_v11 }
 0x9f2   : > { %6489 = vmatpush1.bf16.msra.mxu1 %v6324_v13  ;;  %v6318_v13 = vunpack.c.l.s8.bf16 %v6214_v29 }
 0x9f3   : > { %6490 = vmatprep.subr.bf16.mxu1 %v6333_v54  ;;  %v6327_v54 = vunpack.c.h.s8.bf16 %v6215_v11 }
 0x9f6   : > { %6491 = vmatpush1.bf16.msra.mxu1 %v6332_v60  ;;  %v6223_v60 = vld [vmem:[%s8679_s26 + $0x1b8] sm:$0xff] }
 0x9f7   : > { %6492 = vmatprep.subr.bf16.mxu1 %v6341_v44  ;;  %v6326_v44 = vunpack.c.h.s8.bf16 %v6214_v29 }
 0x9fa   : > { %6493 = vmatpush1.bf16.msra.mxu1 %v6340_v58  ;;  %v10590_v58 = vrot.slane %v10582_v57, %v11085_v40 }
 0x9fb   : > { %6494 = vmatprep.subr.bf16.mxu1 %v6349_v21  ;;  %v6335_v21 = vunpack.c.l.s8.bf16 %v6223_v60 }
 0x9fe   : > { %6495 = vmatpush1.bf16.msra.mxu1 %v6348_v20  ;;  %v10595_v20 = vrot.slane %v10582_v57, %v11086_v14 }
 0x9ff   : > { %6496 = vmatprep.subr.bf16.mxu1 %v6357_v9  ;;  %v10599_v9 = vrot.slane %v10586_v24, %v11085_v40 }
 0xa02   : > { %6497 = vmatpush1.bf16.msra.mxu1 %v6356_v7  ;;  %v10603_v7 = vrot.slane %v10586_v24, %v11086_v14 }
 0xa03   : > { %6519 = vmatprep.subr.bf16.mxu1 %v6239_v47  ;;  %v6334_v47 = vunpack.c.l.s8.bf16 %v6222_v43 }
 0xa05   : > { %6499 = vmatmul.mubr.bf16.vlgmr.msra.gmra.mrb[208].mxu1 %v10484_v42 }
 0xa06   : > { %6508 = vmatprep.mubr.bf16.mxu1 %v10528_v4  ;;  %6520 = vmatpush1.bf16.msra.mxu1 %v6238_v62 }
 0xa07   : > { %6521 = vmatprep.subr.bf16.mxu1 %v6247_v22  ;;  %v6343_v22 = vunpack.c.h.s8.bf16 %v6223_v60 }
 0xa0a   : > { %6522 = vmatpush1.bf16.msra.mxu1 %v6246_v33 }
 0xa0b   : > { %6523 = vmatprep.subr.bf16.mxu1 %v6255_v53  ;;  %v6231_v53 = vld [vmem:[%s8679_s26 + $0x1f8] sm:$0xff] }
 0xa0d   : > { %6509 = vmatmul.mubr.bf16.gmra.mrb[212].mxu1 %v10530_v2 }
 0xa0e   : > { %6524 = vmatpush1.bf16.msra.mxu1 %v6254_v1  ;;  %6551 = vmatprep.mubr.bf16.mxu1 %v10482_v19  ;;  %v6295_v19 = vunpack.c.h.s8.bf16 %v6199_v6  ;;  %v6230_v6 = vld [vmem:[%s8679_s26 + $0x1f0] sm:$0xff] }
 0xa0f   : > { %6525 = vmatprep.subr.bf16.mxu1 %v6263_v61 }
 0xa12   : > { %6526 = vmatpush1.bf16.msra.mxu1 %v6262_v5 }
 0xa13   : > { %6527 = vmatprep.subr.bf16.mxu1 %v6271_v35  ;;  %v6342_v35 = vunpack.c.h.s8.bf16 %v6222_v43 }
 0xa16   : > { %6528 = vmatpush1.bf16.msra.mxu1 %v6270_v28 }
 0xa17   : > { %6529 = vmatprep.subr.bf16.mxu1 %v6279_v55  ;;  %v6351_v55 = vunpack.c.l.s8.bf16 %v6231_v53 }
 0xa1a   : > { %6530 = vmatpush1.bf16.msra.mxu1 %v6278_v56 }
 0xa1b   : > { %6531 = vmatprep.subr.bf16.mxu1 %v6287_v37 }
 0xa1e   : > { %6532 = vmatpush1.bf16.msra.mxu1 %v6286_v38 }
 0xa1f   : > { %6533 = vmatprep.subr.bf16.mxu1 %v6295_v19 }
 0xa22   : > { %6534 = vmatpush1.bf16.msra.mxu1 %v6294_v17  ;;  %v6350_v17 = vunpack.c.l.s8.bf16 %v6230_v6 }
 0xa23   : > { %6535 = vmatprep.subr.bf16.mxu1 %v6303_v10 }
 0xa26   : > { %6536 = vmatpush1.bf16.msra.mxu1 %v6302_v15  ;;  %v6359_v15 = vunpack.c.h.s8.bf16 %v6231_v53 }
 0xa27   : > { %6537 = vmatprep.subr.bf16.mxu1 %v6311_v27 }
 0xa2a   : > { %6538 = vmatpush1.bf16.msra.mxu1 %v6310_v49 }
 0xa2b   : > { %6539 = vmatprep.subr.bf16.mxu1 %v6319_v16 }
 0xa2e   : > { %6540 = vmatpush1.bf16.msra.mxu1 %v6318_v13 }
 0xa2f   : > { %6541 = vmatprep.subr.bf16.mxu1 %v6327_v54  ;;  %v6358_v54 = vunpack.c.h.s8.bf16 %v6230_v6 }
 0xa32   : > { %6542 = vmatpush1.bf16.msra.mxu1 %v6326_v44  ;;  %v6394_v18 = vpop.f32.mrb[192].mxu1 }
 0xa33   : > { %v6614_v50 = vmul.f32 %v10590_v58, %v6394_v18  ;;  %v6396_v62 = vpop.f32.mrb[193].mxu1  ;;  %6543 = vmatprep.subr.bf16.mxu1 %v6335_v21 }
 0xa34   : > { %v6615_v34 = vmul.f32 %v10595_v20, %v6396_v62  ;;  %v6398_v33 = vpop.f32.mrb[194].mxu1 }
 0xa35   : > { %v6688_v8 = vadd.f32 %v10599_v9, %v6614_v50  ;;  %v6622_v1 = vmul.f32 %v10590_v58, %v6398_v33  ;;  %v6400_v61 = vpop.f32.mrb[195].mxu1 }
 0xa36   : > { %v6689_v52 = vadd.f32 %v10603_v7, %v6615_v34  ;;  %v6623_v5 = vmul.f32 %v10595_v20, %v6400_v61  ;;  %6544 = vmatpush1.bf16.msra.mxu1 %v6334_v47 }
 0xa37   : > { %v6720_v32 = vmul.f32 %v6688_v8, %v6688_v8  ;;  %v6696_v28 = vadd.f32 %v10599_v9, %v6622_v1  ;;  %6545 = vmatprep.subr.bf16.mxu1 %v6343_v22 }
 0xa38   : > { %v6721_v56 = vmul.f32 %v6689_v52, %v6689_v52  ;;  %v6697_v37 = vadd.f32 %v10603_v7, %v6623_v5 }
 0xa39   : > { %v6752_v45 = vmul.f32 %v6720_v32, %v6688_v8  ;;  %v6728_v38 = vmul.f32 %v6696_v28, %v6696_v28 }
 0xa3a   : > { %v6753_v19 = vmul.f32 %v6721_v56, %v6689_v52  ;;  %v6729_v31 = vmul.f32 %v6697_v37, %v6697_v37  ;;  %6546 = vmatpush1.bf16.msra.mxu1 %v6342_v35 }
 0xa3b   : > { %v6784_v10 = vmul.f32 0.044715, %v6752_v45  ;;  %v6760_v46 = vmul.f32 %v6728_v38, %v6696_v28  ;;  %6547 = vmatprep.subr.bf16.mxu1 %v6351_v55 }
 0xa3c   : > { %v6785_v27 = vmul.f32 0.044715, %v6753_v19  ;;  %v6761_v11 = vmul.f32 %v6729_v31, %v6697_v37 }
 0xa3d   : > { %v6816_v49 = vadd.f32 %v6784_v10, %v6688_v8  ;;  %v6792_v16 = vmul.f32 0.044715, %v6760_v46 }
 0xa3e   : > { %v6817_v29 = vadd.f32 %v6785_v27, %v6689_v52  ;;  %v6793_v13 = vmul.f32 0.044715, %v6761_v11  ;;  %6548 = vmatpush1.bf16.msra.mxu1 %v6350_v17  ;;  %v7043_v17 = vld [vmem:[%s8684_s5 + $0x98] sm:$0xff]  ;;  %v7044_v27 = vld [vmem:[%s8684_s5 + $0xa0] sm:$0xff] }
 0xa3f   : > { %v6848_v60 = vmul.f32 0.7978846, %v6816_v49  ;;  %v6824_v44 = vadd.f32 %v6792_v16, %v6696_v28  ;;  %6549 = vmatprep.subr.bf16.mxu1 %v6359_v15  ;;  %v7125_v46 = vunpack.c.l.s8.bf16 %v7043_v17  ;;  %v7128_v11 = vunpack.c.l.s8.bf16 %v7044_v27  ;;  %v7047_v16 = vld [vmem:[%s8684_s5 + $0xb8] sm:$0xff] }
 0xa40   : > { %v6849_v21 = vmul.f32 0.7978846, %v6817_v29  ;;  %v6825_v43 = vadd.f32 %v6793_v13, %v6697_v37  ;;  %v7130_v29 = vunpack.c.h.s8.bf16 %v7044_v27  ;;  %v7133_v13 = vunpack.c.l.s8.bf16 %v7047_v16 }
 0xa41   : > { %8455 = vtanh.f32 %v6848_v60  ;;  %v6856_v18 = vmul.f32 0.7978846, %v6824_v44  ;;  %v7135_v44 = vunpack.c.h.s8.bf16 %v7047_v16 }
 0xa42   : > { %v6857_v47 = vmul.f32 0.7978846, %v6825_v43  ;;  %6550 = vmatpush1.bf16.msra.mxu1 %v6358_v54  ;;  %8457 = vtanh.f32 %v6849_v21  ;;  %v7046_v54 = vld [vmem:[%s8684_s5 + $0xb0] sm:$0xff]  ;;  %v7049_v21 = vld [vmem:[%s8684_s5 + $0xc8] sm:$0xff] }
 0xa43   : > { %8459 = vtanh.f32 %v6856_v18  ;;  %v7132_v60 = vunpack.c.l.s8.bf16 %v7046_v54  ;;  %v7134_v43 = vunpack.c.h.s8.bf16 %v7046_v54  ;;  %v7137_v18 = vunpack.c.l.s8.bf16 %v7049_v21 }
 0xa44   : > { %8461 = vtanh.f32 %v6857_v47  ;;  %v7048_v47 = vld [vmem:[%s8684_s5 + $0xc0] sm:$0xff] }
 0xa45   : > { %6552 = vmatmul.mubr.bf16.vlgmr.msra.gmra.mrb[216].mxu1 %v10484_v42 }
 0xa46   : > { %6561 = vmatprep.mubr.bf16.mxu1 %v10528_v4  ;;  %v7040_v4 = vld [vmem:[%s8684_s5 + $0x80] sm:$0xff] }
 0xa47   : > { %v7120_v31 = vunpack.c.l.s8.bf16 %v7040_v4  ;;  %v7122_v10 = vunpack.c.h.s8.bf16 %v7040_v4  ;;  %v7055_v4 = vld [vmem:[%s8684_s5 + $0xf8] sm:$0xff] }
 0xa4b   : > { %v8456_v50 = vpop.eup %8455 }
 0xa4c   : > { %v8458_v62 = vpop.eup %8457  ;;  %v6912_v22 = vadd.f32 1.0, %v8456_v50  ;;  %v7136_v50 = vunpack.c.l.s8.bf16 %v7048_v47 }
 0xa4d   : > { %v8460_v34 = vpop.eup %8459  ;;  %6562 = vmatmul.mubr.bf16.gmra.mrb[220].mxu1 %v10530_v2  ;;  %v6913_v33 = vadd.f32 1.0, %v8458_v62  ;;  %v7123_v2 = vunpack.c.h.s8.bf16 %v10554_v23  ;;  %v7139_v62 = vunpack.c.h.s8.bf16 %v7049_v21 }
 0xa4e   : > { %v8462_v53 = vpop.eup %8461  ;;  %v6944_v1 = vmul.f32 0.5, %v6912_v22  ;;  %v6920_v61 = vadd.f32 1.0, %v8460_v34  ;;  %v7051_v22 = vld [vmem:[%s8684_s5 + $0xd8] sm:$0xff]  ;;  %v7138_v34 = vunpack.c.h.s8.bf16 %v7048_v47 }
 0xa4f   : > { %v6921_v5 = vadd.f32 1.0, %v8462_v53  ;;  %v6945_v35 = vmul.f32 0.5, %v6913_v33  ;;  %v7141_v33 = vunpack.c.l.s8.bf16 %v7051_v22  ;;  %v7050_v53 = vld [vmem:[%s8684_s5 + $0xd0] sm:$0xff] }
 0xa50   : > { %v6952_v32 = vmul.f32 0.5, %v6920_v61  ;;  %v6976_v6 = vmul.f32 %v6944_v1, %v6688_v8  ;;  %v7042_v8 = vld [vmem:[%s8684_s5 + $0x90] sm:$0xff]  ;;  %v7140_v1 = vunpack.c.l.s8.bf16 %v7050_v53  ;;  %v7143_v61 = vunpack.c.h.s8.bf16 %v7051_v22 }
 0xa51   : > { %v6953_v55 = vmul.f32 0.5, %v6921_v5  ;;  %v6977_v56 = vmul.f32 %v6945_v35, %v6689_v52  ;;  %v7127_v52 = vunpack.c.h.s8.bf16 %v7043_v17  ;;  %v7126_v15 = vunpack.c.h.s8.bf16 %v7042_v8  ;;  %v7053_v5 = vld [vmem:[%s8684_s5 + $0xe8] sm:$0xff] }
 0xa52   : > { %v6984_v42 = vmul.f32 %v6952_v32, %v6696_v28  ;;  %v7124_v28 = vunpack.c.l.s8.bf16 %v7042_v8  ;;  %v7142_v35 = vunpack.c.h.s8.bf16 %v7050_v53  ;;  %v7145_v32 = vunpack.c.l.s8.bf16 %v7053_v5 }
 0xa53   : > { %v6985_v45 = vmul.f32 %v6953_v55, %v6697_v37  ;;  %v7045_v37 = vld [vmem:[%s8684_s5 + $0xa8] sm:$0xff]  ;;  %v7052_v55 = vld [vmem:[%s8684_s5 + $0xe0] sm:$0xff] }
 0xa54   : > { %v7008_v38 = vpack.c.bf16 %v6984_v42, %v6976_v6  ;;  %v7129_v23 = vunpack.c.l.s8.bf16 %v7045_v37  ;;  %v7131_v49 = vunpack.c.h.s8.bf16 %v7045_v37  ;;  %v7144_v6 = vunpack.c.l.s8.bf16 %v7052_v55 }
 0xa55   : > { %v7009_v19 = vpack.c.bf16 %v6985_v45, %v6977_v56  ;;  %v7147_v42 = vunpack.c.h.s8.bf16 %v7053_v5  ;;  %v7146_v56 = vunpack.c.h.s8.bf16 %v7052_v55  ;;  %v7149_v45 = vunpack.c.l.s8.bf16 %v7055_v4 }
 0xa57   : > { %7248 = vmatprep.mubr.bf16.mxu0 %v7009_v19 }
 0xa58   : > { %7249 = vmatmul.mubr.bf16.vlgmr.msra.gmra.mrb[168].mxu0 %v7008_v38  ;;  %v7054_v38 = vld [vmem:[%s8684_s5 + $0xf0] sm:$0xff] }
 0xa59   : > { %7270 = vmatpush1.bf16.msra.mxu0 %v7120_v31  ;;  %v7148_v19 = vunpack.c.l.s8.bf16 %v7054_v38  ;;  %v7151_v31 = vunpack.c.h.s8.bf16 %v7055_v4  ;;  %v7150_v8 = vunpack.c.h.s8.bf16 %v7054_v38 }
 0xa5a   : > { %7271 = vmatprep.subr.bf16.mxu0 %v7123_v2  ;;  %v10635_v2 = vld [vmem:[%s8684_s5 + $0x108] sm:$0xff] }
 0xa5b   : > { %v7153_v37 = vunpack.c.l.s8.bf16 %v10635_v2 }
 0xa5d   : > { %7272 = vmatpush1.bf16.msra.mxu0 %v7122_v10 }
 0xa5e   : > { %7273 = vmatprep.subr.bf16.mxu0 %v7125_v46 }
 0xa61   : > { %7274 = vmatpush1.bf16.msra.mxu0 %v7124_v28 }
 0xa62   : > { %7275 = vmatprep.subr.bf16.mxu0 %v7127_v52 }
 0xa65   : > { %7276 = vmatpush1.bf16.msra.mxu0 %v7126_v15 }
 0xa66   : > { %7277 = vmatprep.subr.bf16.mxu0 %v7129_v23 }
 0xa69   : > { %7278 = vmatpush1.bf16.msra.mxu0 %v7128_v11 }
 0xa6a   : > { %7279 = vmatprep.subr.bf16.mxu0 %v7131_v49 }
 0xa6d   : > { %7280 = vmatpush1.bf16.msra.mxu0 %v7130_v29 }
 0xa6e   : > { %7281 = vmatprep.subr.bf16.mxu0 %v7133_v13  ;;  %v6585_v13 = vrot.slane %v10582_v57, %v9333_v3 }
 0xa71   : > { %7282 = vmatpush1.bf16.msra.mxu0 %v7132_v60  ;;  %v6589_v60 = vrot.slane %v10582_v57, %v9359_v0 }
 0xa72   : > { %7283 = vmatprep.subr.bf16.mxu0 %v7135_v44  ;;  %v6659_v44 = vrot.slane %v10586_v24, %v9333_v3 }
 0xa75   : > { %7284 = vmatpush1.bf16.msra.mxu0 %v7134_v43 }
 0xa76   : > { %7285 = vmatprep.subr.bf16.mxu0 %v7137_v18 }
 0xa79   : > { %7286 = vmatpush1.bf16.msra.mxu0 %v7136_v50 }
 0xa7a   : > { %7287 = vmatprep.subr.bf16.mxu0 %v7139_v62 }
 0xa7d   : > { %7288 = vmatpush1.bf16.msra.mxu0 %v7138_v34 }
 0xa7e   : > { %7289 = vmatprep.subr.bf16.mxu0 %v7141_v33 }
 0xa81   : > { %7290 = vmatpush1.bf16.msra.mxu0 %v7140_v1 }
 0xa82   : > { %7291 = vmatprep.subr.bf16.mxu0 %v7143_v61 }
 0xa85   : > { %7292 = vmatpush1.bf16.msra.mxu0 %v7142_v35 }
 0xa86   : > { %7293 = vmatprep.subr.bf16.mxu0 %v7145_v32 }
 0xa89   : > { %7294 = vmatpush1.bf16.msra.mxu0 %v7144_v6 }
 0xa8a   : > { %7295 = vmatprep.subr.bf16.mxu0 %v7147_v42 }
 0xa8d   : > { %7296 = vmatpush1.bf16.msra.mxu0 %v7146_v56 }
 0xa8e   : > { %7297 = vmatprep.subr.bf16.mxu0 %v7149_v45 }
 0xa90   : > { %v6404_v17 = vpop.f32.mrb[196].mxu1 }
 0xa91   : > { %v6630_v10 = vmul.f32 %v10590_v58, %v6404_v17  ;;  %v6406_v46 = vpop.f32.mrb[197].mxu1  ;;  %7298 = vmatpush1.bf16.msra.mxu0 %v7148_v19 }
 0xa92   : > { %v6631_v28 = vmul.f32 %v10595_v20, %v6406_v46  ;;  %v6408_v52 = vpop.f32.mrb[198].mxu1  ;;  %7299 = vmatprep.subr.bf16.mxu0 %v7151_v31 }
 0xa93   : > { %v10641_v15 = vadd.f32 %v10599_v9, %v6630_v10  ;;  %v6638_v23 = vmul.f32 %v10590_v58, %v6408_v52  ;;  %v6410_v27 = vpop.f32.mrb[199].mxu1 }
 0xa94   : > { %v10645_v11 = vadd.f32 %v10603_v7, %v6631_v28  ;;  %v6639_v49 = vmul.f32 %v10595_v20, %v6410_v27 }
 0xa95   : > { %v6736_v16 = vmul.f32 %v10641_v15, %v10641_v15  ;;  %v10651_v29 = vadd.f32 %v10599_v9, %v6638_v23  ;;  %7300 = vmatpush1.bf16.msra.mxu0 %v7150_v8 }
 0xa96   : > { %v6737_v54 = vmul.f32 %v10645_v11, %v10645_v11  ;;  %v10658_v58 = vadd.f32 %v10603_v7, %v6639_v49  ;;  %7322 = vmatprep.subr.bf16.mxu0 %v7153_v37  ;;  %v6663_v7 = vrot.slane %v10586_v24, %v9359_v0 }
 0xa97   : > { %v6768_v20 = vmul.f32 %v6736_v16, %v10641_v15  ;;  %v6744_v9 = vmul.f32 %v10651_v29, %v10651_v29 }
 0xa98   : > { %v6769_v21 = vmul.f32 %v6737_v54, %v10645_v11  ;;  %v6745_v43 = vmul.f32 %v10658_v58, %v10658_v58  ;;  %v6447_v18 = vpop.f32.mrb[200].mxu1 }
 0xa99   : > { %v6800_v47 = vmul.f32 0.044715, %v6768_v20  ;;  %v6776_v50 = vmul.f32 %v6744_v9, %v10651_v29  ;;  %v6616_v62 = vmul.f32 %v6585_v13, %v6447_v18  ;;  %v6449_v22 = vpop.f32.mrb[201].mxu1 }
 0xa9a   : > { %v6801_v34 = vmul.f32 0.044715, %v6769_v21  ;;  %v6777_v33 = vmul.f32 %v6745_v43, %v10658_v58  ;;  %v6617_v53 = vmul.f32 %v6589_v60, %v6449_v22  ;;  %v6451_v1 = vpop.f32.mrb[202].mxu1 }
 0xa9b   : > { %v6832_v3 = vadd.f32 %v6800_v47, %v10641_v15  ;;  %v6808_v61 = vmul.f32 0.044715, %v6776_v50  ;;  %v10675_v5 = vadd.f32 %v6659_v44, %v6616_v62  ;;  %v6624_v35 = vmul.f32 %v6585_v13, %v6451_v1  ;;  %v6453_v32 = vpop.f32.mrb[203].mxu1 }
 0xa9c   : > { %v6833_v55 = vadd.f32 %v6801_v34, %v10645_v11  ;;  %v6809_v0 = vmul.f32 0.044715, %v6777_v33  ;;  %v10678_v6 = vadd.f32 %v6663_v7, %v6617_v53  ;;  %v6625_v42 = vmul.f32 %v6589_v60, %v6453_v32 }
 0xa9d   : > { %v6864_v4 = vmul.f32 0.7978846, %v6832_v3  ;;  %v6840_v56 = vadd.f32 %v6808_v61, %v10651_v29  ;;  %v6722_v45 = vmul.f32 %v10675_v5, %v10675_v5  ;;  %v10683_v38 = vadd.f32 %v6659_v44, %v6624_v35 }
 0xa9e   : > { %v6865_v19 = vmul.f32 0.7978846, %v6833_v55  ;;  %v6841_v31 = vadd.f32 %v6809_v0, %v10658_v58  ;;  %v6723_v17 = vmul.f32 %v10678_v6, %v10678_v6  ;;  %v10688_v10 = vadd.f32 %v6663_v7, %v6625_v42 }
 0xa9f   : > { %v6872_v46 = vmul.f32 0.7978846, %v6840_v56  ;;  %v6754_v8 = vmul.f32 %v6722_v45, %v10675_v5  ;;  %v6730_v28 = vmul.f32 %v10683_v38, %v10683_v38  ;;  %8463 = vtanh.f32 %v6864_v4 }
 0xaa0   : > { %v6873_v52 = vmul.f32 0.7978846, %v6841_v31  ;;  %v6755_v37 = vmul.f32 %v6723_v17, %v10678_v6  ;;  %v6731_v23 = vmul.f32 %v10688_v10, %v10688_v10  ;;  %v6457_v27 = vpop.f32.mrb[204].mxu1  ;;  %8465 = vtanh.f32 %v6865_v19 }
 0xaa1   : > { %v6786_v49 = vmul.f32 0.044715, %v6754_v8  ;;  %v6762_v16 = vmul.f32 %v6730_v28, %v10683_v38  ;;  %v6632_v54 = vmul.f32 %v6585_v13, %v6457_v27  ;;  %v6459_v20 = vpop.f32.mrb[205].mxu1  ;;  %8467 = vtanh.f32 %v6872_v46 }
 0xaa2   : > { %v6787_v9 = vmul.f32 0.044715, %v6755_v37  ;;  %v6763_v21 = vmul.f32 %v6731_v23, %v10688_v10  ;;  %v6633_v43 = vmul.f32 %v6589_v60, %v6459_v20  ;;  %v6461_v18 = vpop.f32.mrb[206].mxu1  ;;  %8469 = vtanh.f32 %v6873_v52 }
 0xaa3   : > { %v6818_v47 = vadd.f32 %v6786_v49, %v10675_v5  ;;  %v6794_v50 = vmul.f32 0.044715, %v6762_v16  ;;  %v10699_v62 = vadd.f32 %v6659_v44, %v6632_v54  ;;  %v6640_v22 = vmul.f32 %v6585_v13, %v6461_v18  ;;  %v6463_v34 = vpop.f32.mrb[207].mxu1 }
 0xaa4   : > { %v6819_v33 = vadd.f32 %v6787_v9, %v10678_v6  ;;  %v6795_v53 = vmul.f32 0.044715, %v6763_v21  ;;  %v10702_v1 = vadd.f32 %v6663_v7, %v6633_v43  ;;  %v6641_v3 = vmul.f32 %v6589_v60, %v6463_v34 }
 0xaa5   : > { %v6850_v61 = vmul.f32 0.7978846, %v6818_v47  ;;  %v6826_v35 = vadd.f32 %v6794_v50, %v10683_v38  ;;  %v6738_v32 = vmul.f32 %v10699_v62, %v10699_v62  ;;  %v10707_v55 = vadd.f32 %v6659_v44, %v6640_v22 }
 0xaa6   : > { %v6851_v0 = vmul.f32 0.7978846, %v6819_v33  ;;  %v6827_v42 = vadd.f32 %v6795_v53, %v10688_v10  ;;  %v6739_v13 = vmul.f32 %v10702_v1, %v10702_v1  ;;  %v10712_v4 = vadd.f32 %v6663_v7, %v6641_v3 }
 0xaa7   : > { %8471 = vtanh.f32 %v6850_v61  ;;  %v6858_v56 = vmul.f32 0.7978846, %v6826_v35  ;;  %v6770_v60 = vmul.f32 %v6738_v32, %v10699_v62  ;;  %v6746_v45 = vmul.f32 %v10707_v55, %v10707_v55 }
 0xaa8   : > { %v6859_v19 = vmul.f32 0.7978846, %v6827_v42  ;;  %v6771_v31 = vmul.f32 %v6739_v13, %v10702_v1  ;;  %v6747_v44 = vmul.f32 %v10712_v4, %v10712_v4  ;;  %8473 = vtanh.f32 %v6851_v0 }
 0xaa9   : > { %v8464_v17 = vpop.eup %8463  ;;  %8475 = vtanh.f32 %v6858_v56  ;;  %v6802_v46 = vmul.f32 0.044715, %v6770_v60  ;;  %v6778_v7 = vmul.f32 %v6746_v45, %v10707_v55 }
 0xaaa   : > { %v8466_v8 = vpop.eup %8465  ;;  %v6803_v28 = vmul.f32 0.044715, %v6771_v31  ;;  %v6779_v52 = vmul.f32 %v6747_v44, %v10712_v4  ;;  %v6928_v37 = vadd.f32 1.0, %v8464_v17  ;;  %8477 = vtanh.f32 %v6859_v19 }
 0xaab   : > { %v8468_v23 = vpop.eup %8467  ;;  %v6834_v27 = vadd.f32 %v6802_v46, %v10699_v62  ;;  %v6810_v49 = vmul.f32 0.044715, %v6778_v7  ;;  %v6929_v16 = vadd.f32 1.0, %v8466_v8 }
 0xaac   : > { %v8470_v54 = vpop.eup %8469  ;;  %v6835_v20 = vadd.f32 %v6803_v28, %v10702_v1  ;;  %v6811_v9 = vmul.f32 0.044715, %v6779_v52  ;;  %v6936_v21 = vadd.f32 1.0, %v8468_v23  ;;  %v6960_v43 = vmul.f32 0.5, %v6928_v37  ;;  %v7056_v37 = vld [vmem:[%s8684_s5 + $0x100] sm:$0xff] }
 0xaad   : > { %v6866_v18 = vmul.f32 0.7978846, %v6834_v27  ;;  %v6842_v47 = vadd.f32 %v6810_v49, %v10707_v55  ;;  %v6937_v50 = vadd.f32 1.0, %v8470_v54  ;;  %v6961_v22 = vmul.f32 0.5, %v6929_v16 }
 0xaae   : > { %v6867_v34 = vmul.f32 0.7978846, %v6835_v20  ;;  %v6843_v33 = vadd.f32 %v6811_v9, %v10712_v4  ;;  %v6968_v53 = vmul.f32 0.5, %v6936_v21  ;;  %v6992_v32 = vmul.f32 %v6960_v43, %v10641_v15 }
 0xaaf   : > { %v6874_v3 = vmul.f32 0.7978846, %v6842_v47  ;;  %v6969_v61 = vmul.f32 0.5, %v6937_v50  ;;  %8479 = vtanh.f32 %v6866_v18  ;;  %v6993_v13 = vmul.f32 %v6961_v22, %v10645_v11 }
 0xab0   : > { %v6875_v35 = vmul.f32 0.7978846, %v6843_v33  ;;  %v7000_v0 = vmul.f32 %v6968_v53, %v10651_v29  ;;  %8481 = vtanh.f32 %v6867_v34  ;;  %v7152_v43 = vunpack.c.l.s8.bf16 %v7056_v37 }
 0xab1   : > { %v8472_v42 = vpop.eup %8471  ;;  %v7001_v56 = vmul.f32 %v6969_v61, %v10658_v58  ;;  %8483 = vtanh.f32 %v6874_v3  ;;  %v7155_v50 = vunpack.c.h.s8.bf16 %v10635_v2  ;;  %v7058_v2 = vld [vmem:[%s8684_s5 + $0x110] sm:$0xff] }
 0xab2   : > { %v8474_v60 = vpop.eup %8473  ;;  %v6914_v45 = vadd.f32 1.0, %v8472_v42  ;;  %v7016_v19 = vpack.c.bf16 %v7000_v0, %v6992_v32  ;;  %8485 = vtanh.f32 %v6875_v35 }
 0xab3   : > { %v8476_v31 = vpop.eup %8475  ;;  %v7017_v44 = vpack.c.bf16 %v7001_v56, %v6993_v13  ;;  %v6915_v17 = vadd.f32 1.0, %v8474_v60  ;;  %v7156_v56 = vunpack.c.l.s8.bf16 %v7058_v2 }
 0xab4   : > { %v8478_v46 = vpop.eup %8477  ;;  %v6946_v7 = vmul.f32 0.5, %v6914_v45  ;;  %v6922_v15 = vadd.f32 1.0, %v8476_v31  ;;  %v7061_v45 = vld [vmem:[%s8684_s5 + $0x128] sm:$0xff]  ;;  %v7063_v31 = vld [vmem:[%s8684_s5 + $0x138] sm:$0xff] }
 0xab5   : > { %7258 = vmatprep.mubr.bf16.mxu0 %v7017_v44  ;;  %v6923_v29 = vadd.f32 1.0, %v8478_v46  ;;  %v6947_v8 = vmul.f32 0.5, %v6915_v17  ;;  %v7165_v17 = vunpack.c.l.s8.bf16 %v7063_v31  ;;  %v7062_v46 = vld [vmem:[%s8684_s5 + $0x130] sm:$0xff] }
 0xab6   : > { %v6954_v28 = vmul.f32 0.5, %v6922_v15  ;;  %7259 = vmatmul.mubr.bf16.gmra.mrb[172].mxu0 %v7016_v19  ;;  %v6978_v58 = vmul.f32 %v6946_v7, %v10675_v5  ;;  %v7060_v19 = vld [vmem:[%s8684_s5 + $0x120] sm:$0xff]  ;;  %v7164_v7 = vunpack.c.l.s8.bf16 %v7062_v46  ;;  %v7167_v15 = vunpack.c.h.s8.bf16 %v7063_v31 }
 0xab7   : > { %v6955_v11 = vmul.f32 0.5, %v6923_v29  ;;  %v6979_v27 = vmul.f32 %v6947_v8, %v10678_v6  ;;  %v7059_v6 = vld [vmem:[%s8684_s5 + $0x118] sm:$0xff]  ;;  %v7162_v44 = vunpack.c.h.s8.bf16 %v7060_v19  ;;  %v11090_v29 = vld [vmem:[#allocation13_spill] sm:$0xff] }
 0xab8   : > { %v6986_v52 = vmul.f32 %v6954_v28, %v10683_v38  ;;  %v7157_v3 = vunpack.c.l.s8.bf16 %v7059_v6  ;;  %v7159_v60 = vunpack.c.h.s8.bf16 %v7059_v6  ;;  %v6593_v8 = vrot.slane %v10582_v57, %v11090_v29  ;;  %v7065_v28 = vld [vmem:[%s8684_s5 + $0x148] sm:$0xff] }
 0xab9   : > { %v8480_v23 = vpop.eup %8479  ;;  %v6987_v49 = vmul.f32 %v6955_v11, %v10688_v10  ;;  %v7154_v10 = vunpack.c.h.s8.bf16 %v7056_v37  ;;  %v6597_v11 = vrot.slane %v10582_v57, %v9430_v25 }
 0xaba   : > { %v8482_v16 = vpop.eup %8481  ;;  %v7010_v54 = vpack.c.bf16 %v6986_v52, %v6978_v58  ;;  %v6930_v20 = vadd.f32 1.0, %v8480_v23  ;;  %v6667_v58 = vrot.slane %v10586_v24, %v11090_v29  ;;  %v7166_v52 = vunpack.c.h.s8.bf16 %v7062_v46 }
 0xabb   : > { %v8484_v9 = vpop.eup %8483  ;;  %v7011_v21 = vpack.c.bf16 %v6987_v49, %v6979_v27  ;;  %v6931_v18 = vadd.f32 1.0, %v8482_v16  ;;  %v10755_v23 = vrot.slane %v10586_v24, %v9430_v25  ;;  %v7169_v27 = vunpack.c.l.s8.bf16 %v7065_v28  ;;  %v7064_v49 = vld [vmem:[%s8684_s5 + $0x140] sm:$0xff] }
 0xabc   : > { %v8486_v47 = vpop.eup %8485  ;;  %v6938_v5 = vadd.f32 1.0, %v8484_v9  ;;  %v6962_v38 = vmul.f32 0.5, %v6930_v20  ;;  %v7171_v24 = vunpack.c.h.s8.bf16 %v7065_v28 }
 0xabd   : > { %7301 = vmatprep.mubr.bf16.mxu0 %v7011_v21  ;;  %v6939_v22 = vadd.f32 1.0, %v8486_v47  ;;  %v6963_v34 = vmul.f32 0.5, %v6931_v18  ;;  %v7168_v18 = vunpack.c.l.s8.bf16 %v7064_v49 }
 0xabe   : > { %7302 = vmatmul.mubr.bf16.vlgmr.msra.gmra.mrb[168].mxu0 %v7010_v54  ;;  %v6970_v33 = vmul.f32 0.5, %v6938_v5  ;;  %v6994_v61 = vmul.f32 %v6962_v38, %v10699_v62  ;;  %v7158_v62 = vunpack.c.h.s8.bf16 %v7058_v2 }
 0xabf   : > { %7323 = vmatpush1.bf16.msra.mxu0 %v7152_v43  ;;  %v6971_v53 = vmul.f32 0.5, %v6939_v22  ;;  %v6995_v32 = vmul.f32 %v6963_v34, %v10702_v1  ;;  %v7160_v1 = vunpack.c.l.s8.bf16 %v7060_v19  ;;  %v10769_v22 = vld [vmem:[%s8684_s5 + $0x150] sm:$0xff] }
 0xac0   : > { %7324 = vmatprep.subr.bf16.mxu0 %v7155_v50  ;;  %v7002_v35 = vmul.f32 %v6970_v33, %v10707_v55  ;;  %v7161_v55 = vunpack.c.l.s8.bf16 %v7061_v45  ;;  %v7067_v50 = vld [vmem:[%s8684_s5 + $0x158] sm:$0xff] }
 0xac1   : > { %v7003_v0 = vmul.f32 %v6971_v53, %v10712_v4  ;;  %v7163_v4 = vunpack.c.h.s8.bf16 %v7061_v45  ;;  %v7170_v53 = vunpack.c.h.s8.bf16 %v7064_v49 }
 0xac2   : > { %v7018_v42 = vpack.c.bf16 %v7002_v35, %v6994_v61  ;;  %v10780_v61 = vld [vmem:[%s8684_s5 + $0x168] sm:$0xff] }
 0xac3   : > { %7325 = vmatpush1.bf16.msra.mxu0 %v7154_v10  ;;  %v7019_v13 = vpack.c.bf16 %v7003_v0, %v6995_v32  ;;  %v7172_v0 = vunpack.c.l.s8.bf16 %v10769_v22  ;;  %v7177_v31 = vunpack.c.l.s8.bf16 %v10780_v61 }
 0xac4   : > { %7326 = vmatprep.subr.bf16.mxu0 %v7157_v3  ;;  %v7173_v3 = vunpack.c.l.s8.bf16 %v7067_v50 }
 0xac5   : > { %7311 = vmatprep.mubr.bf16.mxu0 %v7019_v13 }
 0xac6   : > { %7312 = vmatmul.mubr.bf16.gmra.mrb[172].mxu0 %v7018_v42  ;;  %v7175_v42 = vunpack.c.h.s8.bf16 %v7067_v50  ;;  %v7068_v50 = vld [vmem:[%s8684_s5 + $0x160] sm:$0xff] }
 0xac7   : > { %7327 = vmatpush1.bf16.msra.mxu0 %v7156_v56 }
 0xac8   : > { %7328 = vmatprep.subr.bf16.mxu0 %v7159_v60 }
 0xacb   : > { %7329 = vmatpush1.bf16.msra.mxu0 %v7158_v62  ;;  %v7174_v62 = vunpack.c.h.s8.bf16 %v10769_v22 }
 0xacc   : > { %7330 = vmatprep.subr.bf16.mxu0 %v7161_v55 }
 0xacf   : > { %7331 = vmatpush1.bf16.msra.mxu0 %v7160_v1 }
 0xad0   : > { %7332 = vmatprep.subr.bf16.mxu0 %v7163_v4 }
 0xad3   : > { %7333 = vmatpush1.bf16.msra.mxu0 %v7162_v44 }
 0xad4   : > { %7334 = vmatprep.subr.bf16.mxu0 %v7165_v17 }
 0xad7   : > { %7335 = vmatpush1.bf16.msra.mxu0 %v7164_v7 }
 0xad8   : > { %v6500_v37 = vpop.f32.mrb[208].mxu1  ;;  %7336 = vmatprep.subr.bf16.mxu0 %v7167_v15 }
 0xad9   : > { %v6618_v16 = vmul.f32 %v6593_v8, %v6500_v37  ;;  %v6502_v54 = vpop.f32.mrb[209].mxu1 }
 0xada   : > { %v6619_v20 = vmul.f32 %v6597_v11, %v6502_v54  ;;  %v6504_v9 = vpop.f32.mrb[210].mxu1 }
 0xadb   : > { %v10758_v57 = vadd.f32 %v6667_v58, %v6618_v16  ;;  %v6626_v21 = vmul.f32 %v6593_v8, %v6504_v9  ;;  %v6506_v43 = vpop.f32.mrb[211].mxu1  ;;  %7337 = vmatpush1.bf16.msra.mxu0 %v7166_v52 }
 0xadc   : > { %v10761_v47 = vadd.f32 %v10755_v23, %v6619_v20  ;;  %v6627_v25 = vmul.f32 %v6597_v11, %v6506_v43  ;;  %7338 = vmatprep.subr.bf16.mxu0 %v7169_v27 }
 0xadd   : > { %v6724_v5 = vmul.f32 %v10758_v57, %v10758_v57  ;;  %v10766_v38 = vadd.f32 %v6667_v58, %v6626_v21 }
 0xade   : > { %v6725_v34 = vmul.f32 %v10761_v47, %v10761_v47  ;;  %v10774_v6 = vadd.f32 %v10755_v23, %v6627_v25 }
 0xadf   : > { %v6756_v33 = vmul.f32 %v6724_v5, %v10758_v57  ;;  %v6732_v10 = vmul.f32 %v10766_v38, %v10766_v38  ;;  %7339 = vmatpush1.bf16.msra.mxu0 %v7168_v18 }
 0xae0   : > { %v6757_v35 = vmul.f32 %v6725_v34, %v10761_v47  ;;  %v6733_v2 = vmul.f32 %v10774_v6, %v10774_v6  ;;  %v6510_v32 = vpop.f32.mrb[212].mxu1  ;;  %7340 = vmatprep.subr.bf16.mxu0 %v7171_v24 }
 0xae1   : > { %v6788_v13 = vmul.f32 0.044715, %v6756_v33  ;;  %v6764_v56 = vmul.f32 %v6732_v10, %v10766_v38  ;;  %v6634_v60 = vmul.f32 %v6593_v8, %v6510_v32  ;;  %v6512_v45 = vpop.f32.mrb[213].mxu1 }
 0xae2   : > { %v6789_v55 = vmul.f32 0.044715, %v6757_v35  ;;  %v6765_v19 = vmul.f32 %v6733_v2, %v10774_v6  ;;  %v6635_v1 = vmul.f32 %v6597_v11, %v6512_v45  ;;  %v6514_v4 = vpop.f32.mrb[214].mxu1  ;;  %v7179_v2 = vunpack.c.h.s8.bf16 %v10780_v61 }
 0xae3   : > { %v6820_v44 = vadd.f32 %v6788_v13, %v10758_v57  ;;  %v6796_v17 = vmul.f32 0.044715, %v6764_v56  ;;  %v10791_v46 = vadd.f32 %v6667_v58, %v6634_v60  ;;  %v6642_v7 = vmul.f32 %v6593_v8, %v6514_v4  ;;  %v6516_v15 = vpop.f32.mrb[215].mxu1  ;;  %7341 = vmatpush1.bf16.msra.mxu0 %v7170_v53 }
 0xae4   : > { %v6821_v29 = vadd.f32 %v6789_v55, %v10761_v47  ;;  %v6797_v28 = vmul.f32 0.044715, %v6765_v19  ;;  %v10795_v52 = vadd.f32 %v10755_v23, %v6635_v1  ;;  %v6643_v37 = vmul.f32 %v6597_v11, %v6516_v15  ;;  %7342 = vmatprep.subr.bf16.mxu0 %v7173_v3  ;;  %v7070_v19 = vld [vmem:[%s8684_s5 + $0x170] sm:$0xff] }
 0xae5   : > { %v6852_v27 = vmul.f32 0.7978846, %v6820_v44  ;;  %v6828_v49 = vadd.f32 %v6796_v17, %v10766_v38  ;;  %v6740_v16 = vmul.f32 %v10791_v46, %v10791_v46  ;;  %v10800_v54 = vadd.f32 %v6667_v58, %v6642_v7 }
 0xae6   : > { %v6853_v8 = vmul.f32 0.7978846, %v6821_v29  ;;  %v6829_v20 = vadd.f32 %v6797_v28, %v10774_v6  ;;  %v6741_v9 = vmul.f32 %v10795_v52, %v10795_v52  ;;  %v10806_v21 = vadd.f32 %v10755_v23, %v6643_v37 }
 0xae7   : > { %8487 = vtanh.f32 %v6852_v27  ;;  %v6860_v11 = vmul.f32 0.7978846, %v6828_v49  ;;  %v6772_v43 = vmul.f32 %v6740_v16, %v10791_v46  ;;  %v6748_v18 = vmul.f32 %v10800_v54, %v10800_v54  ;;  %7343 = vmatpush1.bf16.msra.mxu0 %v7172_v0  ;;  %v7073_v49 = vld [vmem:[%s8684_s5 + $0x188] sm:$0xff] }
 0xae8   : > { %v6861_v25 = vmul.f32 0.7978846, %v6829_v20  ;;  %v6773_v58 = vmul.f32 %v6741_v9, %v10795_v52  ;;  %v6749_v24 = vmul.f32 %v10806_v21, %v10806_v21  ;;  %7344 = vmatprep.subr.bf16.mxu0 %v7175_v42  ;;  %8489 = vtanh.f32 %v6853_v8  ;;  %v7071_v42 = vld [vmem:[%s8684_s5 + $0x178] sm:$0xff] }
 0xae9   : > { %8491 = vtanh.f32 %v6860_v11  ;;  %v6804_v23 = vmul.f32 0.044715, %v6772_v43  ;;  %v6780_v5 = vmul.f32 %v6748_v18, %v10800_v54  ;;  %v7176_v53 = vunpack.c.l.s8.bf16 %v7068_v50  ;;  %v7072_v18 = vld [vmem:[%s8684_s5 + $0x180] sm:$0xff] }
 0xaea   : > { %v6805_v22 = vmul.f32 0.044715, %v6773_v58  ;;  %v6781_v34 = vmul.f32 %v6749_v24, %v10806_v21  ;;  %8493 = vtanh.f32 %v6861_v25  ;;  %v7178_v45 = vunpack.c.h.s8.bf16 %v7068_v50 }
 0xaeb   : > { %v6836_v33 = vadd.f32 %v6804_v23, %v10791_v46  ;;  %v6812_v10 = vmul.f32 0.044715, %v6780_v5  ;;  %7345 = vmatpush1.bf16.msra.mxu0 %v7174_v62  ;;  %v7181_v55 = vunpack.c.l.s8.bf16 %v7071_v42  ;;  %v7180_v44 = vunpack.c.l.s8.bf16 %v7070_v19 }
 0xaec   : > { %v6837_v3 = vadd.f32 %v6805_v22, %v10795_v52  ;;  %v6813_v35 = vmul.f32 0.044715, %v6781_v34  ;;  %7346 = vmatprep.subr.bf16.mxu0 %v7177_v31  ;;  %v7183_v28 = vunpack.c.h.s8.bf16 %v7071_v42  ;;  %v7182_v8 = vunpack.c.h.s8.bf16 %v7070_v19 }
 0xaed   : > { %v6868_v32 = vmul.f32 0.7978846, %v6836_v33  ;;  %v6844_v0 = vadd.f32 %v6812_v10, %v10800_v54  ;;  %v7185_v43 = vunpack.c.l.s8.bf16 %v7073_v49  ;;  %v7184_v33 = vunpack.c.l.s8.bf16 %v7072_v18 }
 0xaee   : > { %v6869_v13 = vmul.f32 0.7978846, %v6837_v3  ;;  %v6845_v56 = vadd.f32 %v6813_v35, %v10806_v21 }
 0xaef   : > { %v6876_v60 = vmul.f32 0.7978846, %v6844_v0  ;;  %7347 = vmatpush1.bf16.msra.mxu0 %v7176_v53  ;;  %8495 = vtanh.f32 %v6868_v32  ;;  %v7186_v32 = vunpack.c.h.s8.bf16 %v7072_v18 }
 0xaf0   : > { %v6877_v62 = vmul.f32 0.7978846, %v6845_v56  ;;  %7348 = vmatprep.subr.bf16.mxu0 %v7179_v2  ;;  %8497 = vtanh.f32 %v6869_v13  ;;  %v7075_v2 = vld [vmem:[%s8684_s5 + $0x198] sm:$0xff] }
 0xaf1   : > { %v8488_v1 = vpop.eup %8487  ;;  %8499 = vtanh.f32 %v6876_v60  ;;  %v7189_v56 = vunpack.c.l.s8.bf16 %v7075_v2  ;;  %v7074_v60 = vld [vmem:[%s8684_s5 + $0x190] sm:$0xff] }
 0xaf2   : > { %v8490_v61 = vpop.eup %8489  ;;  %v6916_v4 = vadd.f32 1.0, %v8488_v1  ;;  %8501 = vtanh.f32 %v6877_v62  ;;  %v7188_v1 = vunpack.c.l.s8.bf16 %v7074_v60 }
 0xaf3   : > { %v8492_v31 = vpop.eup %8491  ;;  %7349 = vmatpush1.bf16.msra.mxu0 %v7178_v45  ;;  %v6917_v17 = vadd.f32 1.0, %v8490_v61  ;;  %v7191_v61 = vunpack.c.h.s8.bf16 %v7075_v2 }
 0xaf4   : > { %v8494_v7 = vpop.eup %8493  ;;  %v6948_v15 = vmul.f32 0.5, %v6916_v4  ;;  %v6924_v29 = vadd.f32 1.0, %v8492_v31  ;;  %7350 = vmatprep.subr.bf16.mxu0 %v7181_v55  ;;  %v7077_v4 = vld [vmem:[%s8684_s5 + $0x1a8] sm:$0xff]  ;;  %v7076_v31 = vld [vmem:[%s8684_s5 + $0x1a0] sm:$0xff] }
 0xaf5   : > { %v6925_v37 = vadd.f32 1.0, %v8494_v7  ;;  %v6949_v27 = vmul.f32 0.5, %v6917_v17  ;;  %v7194_v17 = vunpack.c.h.s8.bf16 %v7076_v31 }
 0xaf6   : > { %v6956_v16 = vmul.f32 0.5, %v6924_v29  ;;  %v6980_v9 = vmul.f32 %v6948_v15, %v10758_v57  ;;  %v7078_v15 = vld [vmem:[%s8684_s5 + $0x1b0] sm:$0xff] }
 0xaf7   : > { %7351 = vmatpush1.bf16.msra.mxu0 %v7180_v44  ;;  %v6957_v20 = vmul.f32 0.5, %v6925_v37  ;;  %v6981_v58 = vmul.f32 %v6949_v27, %v10761_v47  ;;  %v7079_v44 = vld [vmem:[%s8684_s5 + $0x1b8] sm:$0xff]  ;;  %v7196_v29 = vunpack.c.l.s8.bf16 %v7078_v15  ;;  %v8530_v37 = vld [vmem:[%s8689_s3] sm:$0xff] }
 0xaf8   : > { %v6988_v11 = vmul.f32 %v6956_v16, %v10766_v38  ;;  %7352 = vmatprep.subr.bf16.mxu0 %v7183_v28  ;;  %v7187_v38 = vunpack.c.h.s8.bf16 %v7073_v49  ;;  %v7197_v7 = vunpack.c.l.s8.bf16 %v7079_v44  ;;  %v7199_v28 = vunpack.c.h.s8.bf16 %v7079_v44  ;;  %v7081_v49 = vld [vmem:[%s8684_s5 + $0x1c8] sm:$0xff] }
 0xaf9   : > { %v8496_v25 = vpop.eup %8495  ;;  %v6989_v24 = vmul.f32 %v6957_v20, %v10774_v6  ;;  %v6601_v27 = vrot.slane %v8530_v37, %v9479_v51  ;;  %v6605_v16 = vrot.slane %v8530_v37, %v9517_v63  ;;  %v7201_v18 = vunpack.c.l.s8.bf16 %v7081_v49 }
 0xafa   : > { %v8498_v50 = vpop.eup %8497  ;;  %v7012_v23 = vpack.c.bf16 %v6988_v11, %v6980_v9  ;;  %v6932_v5 = vadd.f32 1.0, %v8496_v25  ;;  %v7198_v9 = vunpack.c.h.s8.bf16 %v7078_v15  ;;  %v7080_v25 = vld [vmem:[%s8684_s5 + $0x1c0] sm:$0xff] }
 0xafb   : > { %v8500_v22 = vpop.eup %8499  ;;  %7353 = vmatpush1.bf16.msra.mxu0 %v7182_v8  ;;  %v7013_v34 = vpack.c.bf16 %v6989_v24, %v6981_v58  ;;  %v6933_v10 = vadd.f32 1.0, %v8498_v50  ;;  %v8531_v8 = vld [vmem:[%s8694_s16] sm:$0xff] }
 0xafc   : > { %v8502_v57 = vpop.eup %8501  ;;  %7375 = vmatprep.subr.bf16.mxu0 %v7185_v43  ;;  %v6940_v53 = vadd.f32 1.0, %v8500_v22  ;;  %v6964_v3 = vmul.f32 0.5, %v6932_v5  ;;  %v6675_v20 = vrot.slane %v8531_v8, %v9479_v51  ;;  %v10847_v43 = vrot.slane %v8531_v8, %v9517_v63 }
 0xafd   : > { %7354 = vmatprep.mubr.bf16.mxu0 %v7013_v34  ;;  %v6941_v35 = vadd.f32 1.0, %v8502_v57  ;;  %v6965_v47 = vmul.f32 0.5, %v6933_v10  ;;  %v7200_v51 = vunpack.c.l.s8.bf16 %v7080_v25  ;;  %v7203_v10 = vunpack.c.h.s8.bf16 %v7081_v49  ;;  %v7083_v57 = vld [vmem:[%s8684_s5 + $0x1d8] sm:$0xff] }
 0xafe   : > { %7355 = vmatmul.mubr.bf16.vlgmr.msra.gmra.mrb[168].mxu0 %v7012_v23  ;;  %v6972_v6 = vmul.f32 0.5, %v6940_v53  ;;  %v6996_v42 = vmul.f32 %v6964_v3, %v10791_v46  ;;  %v7190_v46 = vunpack.c.h.s8.bf16 %v7074_v60  ;;  %v10861_v3 = vld [vmem:[%s8684_s5 + $0x1d0] sm:$0xff] }
 0xaff   : > { %7376 = vmatpush1.bf16.msra.mxu0 %v7184_v33  ;;  %v6973_v0 = vmul.f32 0.5, %v6941_v35  ;;  %v6997_v45 = vmul.f32 %v6965_v47, %v10795_v52  ;;  %v7192_v52 = vunpack.c.l.s8.bf16 %v7076_v31 }
 0xb00   : > { %7377 = vmatprep.subr.bf16.mxu0 %v7187_v38  ;;  %v7004_v13 = vmul.f32 %v6972_v6, %v10800_v54  ;;  %v7193_v54 = vunpack.c.l.s8.bf16 %v7077_v4 }
 0xb01   : > { %v7005_v62 = vmul.f32 %v6973_v0, %v10806_v21  ;;  %v7195_v21 = vunpack.c.h.s8.bf16 %v7077_v4  ;;  %v7205_v0 = vunpack.c.l.s8.bf16 %v7083_v57  ;;  %v7206_v4 = vunpack.c.h.s8.bf16 %v10861_v3 }
 0xb02   : > { %v7020_v55 = vpack.c.bf16 %v7004_v13, %v6996_v42  ;;  %v10872_v42 = vld [vmem:[%s8684_s5 + $0x1e8] sm:$0xff] }
 0xb03   : > { %7378 = vmatpush1.bf16.msra.mxu0 %v7186_v32  ;;  %v7021_v19 = vpack.c.bf16 %v7005_v62, %v6997_v45  ;;  %v7202_v32 = vunpack.c.h.s8.bf16 %v7080_v25  ;;  %v7204_v45 = vunpack.c.l.s8.bf16 %v10861_v3  ;;  %v7207_v62 = vunpack.c.h.s8.bf16 %v7083_v57 }
 0xb04   : > { %7379 = vmatprep.subr.bf16.mxu0 %v7189_v56 }
 0xb05   : > { %7364 = vmatprep.mubr.bf16.mxu0 %v7021_v19 }
 0xb06   : > { %7365 = vmatmul.mubr.bf16.gmra.mrb[172].mxu0 %v7020_v55 }
 0xb07   : > { %7380 = vmatpush1.bf16.msra.mxu0 %v7188_v1 }
 0xb08   : > { %7381 = vmatprep.subr.bf16.mxu0 %v7191_v61 }
 0xb0b   : > { %7382 = vmatpush1.bf16.msra.mxu0 %v7190_v46 }
 0xb0c   : > { %7383 = vmatprep.subr.bf16.mxu0 %v7193_v54 }
 0xb0f   : > { %7384 = vmatpush1.bf16.msra.mxu0 %v7192_v52 }
 0xb10   : > { %7385 = vmatprep.subr.bf16.mxu0 %v7195_v21  ;;  %v7209_v21 = vunpack.c.l.s8.bf16 %v10872_v42 }
 0xb13   : > { %7386 = vmatpush1.bf16.msra.mxu0 %v7194_v17 }
 0xb14   : > { %7387 = vmatprep.subr.bf16.mxu0 %v7197_v7 }
 0xb17   : > { %7388 = vmatpush1.bf16.msra.mxu0 %v7196_v29 }
 0xb18   : > { %v6553_v11 = vpop.f32.mrb[216].mxu1  ;;  %7389 = vmatprep.subr.bf16.mxu0 %v7199_v28 }
 0xb19   : > { %v6620_v58 = vmul.f32 %v6601_v27, %v6553_v11  ;;  %v6555_v24 = vpop.f32.mrb[217].mxu1 }
 0xb1a   : > { %v6621_v50 = vmul.f32 %v6605_v16, %v6555_v24  ;;  %v6557_v23 = vpop.f32.mrb[218].mxu1 }
 0xb1b   : > { %v10850_v5 = vadd.f32 %v6675_v20, %v6620_v58  ;;  %v6628_v22 = vmul.f32 %v6601_v27, %v6557_v23  ;;  %v6559_v34 = vpop.f32.mrb[219].mxu1  ;;  %7390 = vmatpush1.bf16.msra.mxu0 %v7198_v9 }
 0xb1c   : > { %v10853_v33 = vadd.f32 %v10847_v43, %v6621_v50  ;;  %v6629_v63 = vmul.f32 %v6605_v16, %v6559_v34  ;;  %7391 = vmatprep.subr.bf16.mxu0 %v7201_v18 }
 0xb1d   : > { %v6726_v38 = vmul.f32 %v10850_v5, %v10850_v5  ;;  %v10858_v53 = vadd.f32 %v6675_v20, %v6628_v22 }
 0xb1e   : > { %v6727_v35 = vmul.f32 %v10853_v33, %v10853_v33  ;;  %v10866_v47 = vadd.f32 %v10847_v43, %v6629_v63  ;;  %v7084_v63 = vld [vmem:[%s8684_s5 + $0x1e0] sm:$0xff] }
 0xb1f   : > { %v6758_v2 = vmul.f32 %v6726_v38, %v10850_v5  ;;  %v6734_v6 = vmul.f32 %v10858_v53, %v10858_v53  ;;  %7392 = vmatpush1.bf16.msra.mxu0 %v7200_v51 }
 0xb20   : > { %v6759_v13 = vmul.f32 %v6727_v35, %v10853_v33  ;;  %v6735_v56 = vmul.f32 %v10866_v47, %v10866_v47  ;;  %v6563_v60 = vpop.f32.mrb[220].mxu1  ;;  %7393 = vmatprep.subr.bf16.mxu0 %v7203_v10 }
 0xb21   : > { %v6790_v55 = vmul.f32 0.044715, %v6758_v2  ;;  %v6766_v19 = vmul.f32 %v6734_v6, %v10858_v53  ;;  %v6636_v1 = vmul.f32 %v6601_v27, %v6563_v60  ;;  %v6565_v61 = vpop.f32.mrb[221].mxu1  ;;  %v7208_v2 = vunpack.c.l.s8.bf16 %v7084_v63  ;;  %v7087_v60 = vld [vmem:[%s8684_s5 + $0x1f8] sm:$0xff] }
 0xb22   : > { %v6791_v46 = vmul.f32 0.044715, %v6759_v13  ;;  %v6767_v54 = vmul.f32 %v6735_v56, %v10866_v47  ;;  %v6637_v31 = vmul.f32 %v6605_v16, %v6565_v61  ;;  %v6567_v52 = vpop.f32.mrb[222].mxu1  ;;  %v7213_v61 = vunpack.c.l.s8.bf16 %v7087_v60 }
 0xb23   : > { %v6822_v44 = vadd.f32 %v6790_v55, %v10850_v5  ;;  %v6798_v17 = vmul.f32 0.044715, %v6766_v19  ;;  %v10883_v7 = vadd.f32 %v6675_v20, %v6636_v1  ;;  %v6644_v15 = vmul.f32 %v6601_v27, %v6567_v52  ;;  %v6569_v29 = vpop.f32.mrb[223].mxu1  ;;  %7394 = vmatpush1.bf16.msra.mxu0 %v7202_v32 }
 0xb24   : > { %v6823_v28 = vadd.f32 %v6791_v46, %v10853_v33  ;;  %v6799_v37 = vmul.f32 0.044715, %v6767_v54  ;;  %v10887_v49 = vadd.f32 %v10847_v43, %v6637_v31  ;;  %v6645_v8 = vmul.f32 %v6605_v16, %v6569_v29  ;;  %7395 = vmatprep.subr.bf16.mxu0 %v7205_v0 }
 0xb25   : > { %v6854_v9 = vmul.f32 0.7978846, %v6822_v44  ;;  %v6830_v11 = vadd.f32 %v6798_v17, %v10858_v53  ;;  %v6742_v18 = vmul.f32 %v10883_v7, %v10883_v7  ;;  %v10892_v25 = vadd.f32 %v6675_v20, %v6644_v15 }
 0xb26   : > { %v6855_v27 = vmul.f32 0.7978846, %v6823_v28  ;;  %v6831_v58 = vadd.f32 %v6799_v37, %v10866_v47  ;;  %v6743_v24 = vmul.f32 %v10887_v49, %v10887_v49  ;;  %v10898_v50 = vadd.f32 %v10847_v43, %v6645_v8 }
 0xb27   : > { %8503 = vtanh.f32 %v6854_v9  ;;  %v6862_v16 = vmul.f32 0.7978846, %v6830_v11  ;;  %v6774_v23 = vmul.f32 %v6742_v18, %v10883_v7  ;;  %v6750_v22 = vmul.f32 %v10892_v25, %v10892_v25  ;;  %7396 = vmatpush1.bf16.msra.mxu0 %v7204_v45 }
 0xb28   : > { %v6863_v34 = vmul.f32 0.7978846, %v6831_v58  ;;  %v6775_v20 = vmul.f32 %v6743_v24, %v10887_v49  ;;  %v6751_v51 = vmul.f32 %v10898_v50, %v10898_v50  ;;  %7397 = vmatprep.subr.bf16.mxu0 %v7207_v62  ;;  %8505 = vtanh.f32 %v6855_v27 }
 0xb29   : > { %8507 = vtanh.f32 %v6862_v16  ;;  %v6806_v43 = vmul.f32 0.044715, %v6774_v23  ;;  %v6782_v10 = vmul.f32 %v6750_v22, %v10892_v25  ;;  %v7211_v0 = vunpack.c.h.s8.bf16 %v10872_v42 }
 0xb2a   : > { %v6807_v57 = vmul.f32 0.044715, %v6775_v20  ;;  %v6783_v38 = vmul.f32 %v6751_v51, %v10898_v50  ;;  %8509 = vtanh.f32 %v6863_v34  ;;  %v7210_v19 = vunpack.c.h.s8.bf16 %v7084_v63 }
 0xb2b   : > { %v6838_v3 = vadd.f32 %v6806_v43, %v10883_v7  ;;  %v6814_v35 = vmul.f32 0.044715, %v6782_v10  ;;  %7398 = vmatpush1.bf16.msra.mxu0 %v7206_v4  ;;  %v7086_v4 = vld [vmem:[%s8684_s5 + $0x1f0] sm:$0xff]  ;;  %v7215_v29 = vunpack.c.h.s8.bf16 %v7087_v60 }
 0xb2c   : > { %v6839_v6 = vadd.f32 %v6807_v57, %v10887_v49  ;;  %v6815_v32 = vmul.f32 0.044715, %v6783_v38  ;;  %7399 = vmatprep.subr.bf16.mxu0 %v7209_v21  ;;  %v7212_v52 = vunpack.c.l.s8.bf16 %v7086_v4  ;;  %v7214_v9 = vunpack.c.h.s8.bf16 %v7086_v4 }
 0xb2d   : > { %v6870_v13 = vmul.f32 0.7978846, %v6838_v3  ;;  %v6846_v56 = vadd.f32 %v6814_v35, %v10892_v25 }
 0xb2e   : > { %v6871_v45 = vmul.f32 0.7978846, %v6839_v6  ;;  %v6847_v62 = vadd.f32 %v6815_v32, %v10898_v50 }
 0xb2f   : > { %v6878_v55 = vmul.f32 0.7978846, %v6846_v56  ;;  %7400 = vmatpush1.bf16.msra.mxu0 %v7208_v2  ;;  %8511 = vtanh.f32 %v6870_v13 }
 0xb30   : > { %v6879_v1 = vmul.f32 0.7978846, %v6847_v62  ;;  %7401 = vmatprep.subr.bf16.mxu0 %v7211_v0  ;;  %8513 = vtanh.f32 %v6871_v45  ;;  %v7428_v0 = vld [vmem:[%s749_s25] sm:$0x3] }
 0xb31   : > { %v8504_v46 = vpop.eup %8503  ;;  %8515 = vtanh.f32 %v6878_v55 }
 0xb32   : > { %v8506_v54 = vpop.eup %8505  ;;  %v6918_v42 = vadd.f32 1.0, %v8504_v46  ;;  %8517 = vtanh.f32 %v6879_v1 }
 0xb33   : > { %v8508_v31 = vpop.eup %8507  ;;  %7402 = vmatpush1.bf16.msra.mxu0 %v7210_v19  ;;  %v6919_v21 = vadd.f32 1.0, %v8506_v54 }
 0xb34   : > { %v8510_v44 = vpop.eup %8509  ;;  %v6950_v17 = vmul.f32 0.5, %v6918_v42  ;;  %v6926_v15 = vadd.f32 1.0, %v8508_v31  ;;  %7403 = vmatprep.subr.bf16.mxu0 %v7213_v61 }
 0xb35   : > { %v6927_v28 = vadd.f32 1.0, %v8510_v44  ;;  %v6951_v37 = vmul.f32 0.5, %v6919_v21 }
 0xb36   : > { %v6958_v8 = vmul.f32 0.5, %v6926_v15  ;;  %v6982_v18 = vmul.f32 %v6950_v17, %v10850_v5 }
 0xb37   : > { %7404 = vmatpush1.bf16.msra.mxu0 %v7212_v52  ;;  %v6959_v11 = vmul.f32 0.5, %v6927_v28  ;;  %v6983_v24 = vmul.f32 %v6951_v37, %v10853_v33 }
 0xb38   : > { %v6990_v27 = vmul.f32 %v6958_v8, %v10858_v53  ;;  %7405 = vmatprep.subr.bf16.mxu0 %v7215_v29 }
 0xb39   : > { %v8512_v58 = vpop.eup %8511  ;;  %v6991_v16 = vmul.f32 %v6959_v11, %v10866_v47 }
 0xb3a   : > { %v8514_v23 = vpop.eup %8513  ;;  %v7014_v22 = vpack.c.bf16 %v6990_v27, %v6982_v18  ;;  %v6934_v34 = vadd.f32 1.0, %v8512_v58 }
 0xb3b   : > { %v8516_v20 = vpop.eup %8515  ;;  %7406 = vmatpush1.bf16.msra.mxu0 %v7214_v9  ;;  %v7015_v51 = vpack.c.bf16 %v6991_v16, %v6983_v24  ;;  %v6935_v63 = vadd.f32 1.0, %v8514_v23 }
 0xb3c   : > { %v8518_v43 = vpop.eup %8517  ;;  %v6942_v10 = vadd.f32 1.0, %v8516_v20  ;;  %v6966_v57 = vmul.f32 0.5, %v6934_v34 }
 0xb3d   : > { %7407 = vmatprep.mubr.bf16.mxu0 %v7015_v51  ;;  %v6943_v5 = vadd.f32 1.0, %v8518_v43  ;;  %v6967_v53 = vmul.f32 0.5, %v6935_v63 }
 0xb3e   : > { %7408 = vmatmul.mubr.bf16.vlgmr.msra.gmra.mrb[168].mxu0 %v7014_v22  ;;  %v6974_v38 = vmul.f32 0.5, %v6942_v10  ;;  %v6998_v47 = vmul.f32 %v6966_v57, %v10883_v7  ;;  %v7448_v7 = vld [vmem:[%s753_s4] sm:$0x3] }
 0xb3f   : > { %v6975_v33 = vmul.f32 0.5, %v6943_v5  ;;  %v6999_v35 = vmul.f32 %v6967_v53, %v10887_v49  ;;  %v7437_v49 = vrot.slane %v7428_v0, %v11086_v14  ;;  %v7457_v56 = vrot.slane %v7448_v7, %v11086_v14 }
 0xb40   : > { %v7006_v3 = vmul.f32 %v6974_v38, %v10892_v25  ;;  %v7433_v25 = vrot.slane %v7428_v0, %v11085_v40 }
 0xb41   : > { %v7007_v2 = vmul.f32 %v6975_v33, %v10898_v50  ;;  %v7453_v50 = vrot.slane %v7448_v7, %v11085_v40 }
 0xb42   : > { %v7022_v6 = vpack.c.bf16 %v7006_v3, %v6998_v47 }
 0xb43   : > { %v7023_v32 = vpack.c.bf16 %v7007_v2, %v6999_v35 }
 0xb45   : > { %7417 = vmatprep.mubr.bf16.mxu0 %v7023_v32 }
 0xb46   : > { %7418 = vmatmul.mubr.bf16.gmra.mrb[172].mxu0 %v7022_v6 }
 0xc11   : > { %v7409_v13 = vpop.f32.mrb[168].mxu0 }
 0xc12   : > { %v7440_v60 = vmul.f32 %v7433_v25, %v7409_v13  ;;  %v7411_v45 = vpop.f32.mrb[169].mxu0 }
 0xc13   : > { %v7441_v62 = vmul.f32 %v7437_v49, %v7411_v45  ;;  %v7413_v55 = vpop.f32.mrb[170].mxu0 }
 0xc14   : > { %v7460_v19 = vadd.f32 %v7453_v50, %v7440_v60  ;;  %v7442_v1 = vmul.f32 %v7433_v25, %v7413_v55  ;;  %v7415_v61 = vpop.f32.mrb[171].mxu0 }
 0xc15   : > { %v7461_v4 = vadd.f32 %v7457_v56, %v7441_v62  ;;  %v7443_v46 = vmul.f32 %v7437_v49, %v7415_v61 }
 0xc16   : > { %v7468_v54 = vadd.f32 %v7460_v19, %v10345_v48  ;;  %v7462_v42 = vadd.f32 %v7453_v50, %v7442_v1 }
 0xc17   : > { %v7469_v31 = vadd.f32 %v7461_v4, %v10350_v39  ;;  %v7463_v52 = vadd.f32 %v7457_v56, %v7443_v46 }
 0xc18   : > { %7476 = vst [vmem:[%s11029_s14] sm:$0xff] %v7468_v54  ;;  %v7470_v40 = vadd.f32 %v7462_v42, %v10355_v26 }
 0xc19   : > { %7477 = vst [vmem:[%s11029_s14 + $0x8] sm:$0xff] %v7469_v31  ;;  %v7471_v14 = vadd.f32 %v7463_v52, %v10360_v30  ;;  %v7419_v21 = vpop.f32.mrb[172].mxu0 }
 0xc1a   : > { %7478 = vst [vmem:[%s11029_s14 + $0x10] sm:$0xff] %v7470_v40  ;;  %v7444_v48 = vmul.f32 %v7433_v25, %v7419_v21  ;;  %v7421_v39 = vpop.f32.mrb[173].mxu0 }
 0xc1b   : > { %7479 = vst [vmem:[%s11029_s14 + $0x18] sm:$0xff] %v7471_v14  ;;  %v7445_v44 = vmul.f32 %v7437_v49, %v7421_v39  ;;  %v7423_v17 = vpop.f32.mrb[174].mxu0 }
 0xc1c   : > { %v7464_v26 = vadd.f32 %v7453_v50, %v7444_v48  ;;  %v7446_v15 = vmul.f32 %v7433_v25, %v7423_v17  ;;  %v7425_v29 = vpop.f32.mrb[175].mxu0 }
 0xc1d   : > { %v7465_v28 = vadd.f32 %v7457_v56, %v7445_v44  ;;  %v7447_v37 = vmul.f32 %v7437_v49, %v7425_v29 }
 0xc1e   : > { %v7472_v30 = vadd.f32 %v7464_v26, %v10369_v12  ;;  %v7466_v8 = vadd.f32 %v7453_v50, %v7446_v15 }
 0xc1f   : > { %v7473_v9 = vadd.f32 %v7465_v28, %v10374_v59  ;;  %v7467_v11 = vadd.f32 %v7457_v56, %v7447_v37 }
 0xc20   : > { %7480 = vst [vmem:[%s11029_s14 + $0x20] sm:$0xff] %v7472_v30  ;;  %v7474_v18 = vadd.f32 %v7466_v8, %v10379_v36 }
 0xc21   : > { %7481 = vst [vmem:[%s11029_s14 + $0x28] sm:$0xff] %v7473_v9  ;;  %v7475_v27 = vadd.f32 %v7467_v11, %v10384_v41 }
 0xc22   : > { %7482 = vst [vmem:[%s11029_s14 + $0x30] sm:$0xff] %v7474_v18 }
 0xc23   : > { %7483 = vst [vmem:[%s11029_s14 + $0x38] sm:$0xff] %v7475_v27 }
 0xc24 PF: > { %s11093_s28 = sld [smem:[#allocation2_spill]] }
 0xc2a   : > { %s26_s21 = sadd.s32 1, %s11093_s28  }
 0xc2b   : > { %p23_p5 = scmp.ge.s32.totalorder %s26_s21, 6  }
 0xc2d   :  { %25 = sbr.rel (!%p23_p5) target bundleno = 13 (0xd), region = 156 }

</bundles_post_ra>
